<compile_context>
chip_gen: v5e
topology: v5e:2x2
jax: 0.10.0
libtpu: 0.0.40
codegen_flags: <defaults>
</compile_context>

<pallas_src>
import math

import jax
import jax.numpy as jnp
from jax.experimental import pallas as pl
from jax.experimental.pallas import tpu as pltpu


def _convlstm_kernel(x_ref, h_ref, w_ref, b_ref, gs_ref, gb_ref, c_ref,
                     hc_ref, lhs_ref):
    # x_ref  : (1, 1, TH+2ph, W+2pw, Cin)   padded input row-tile (NHWC)
    # h_ref  : (1, 1, TH+2ph, W+2pw, Ch)    padded old hidden row-tile
    # w_ref  : (KH*KW*(Ch+Cin), 4*Ch) bf16  K ordered [taps x h-ch | taps x x-ch]
    # b_ref  : (1, 4*Ch)                    bias
    # gs_ref : (1, 4*Ch)                    per-gate activation scale (0.5 / 1.0)
    # gb_ref : (1, 4*Ch)                    per-gate activation shift (0.5 / 0.0)
    # c_ref  : (1, 1, TH, W, Ch)            old cell row-tile
    # hc_ref : (1, 1, TH, W, 2*Ch)          packed [new_h | new_c] output
    # lhs_ref: (TH, W, K) bf16 VMEM scratch -- im2col buffer
    TH, W, Ch = c_ref.shape[2], c_ref.shape[3], c_ref.shape[4]
    THp, Wp, Cin = x_ref.shape[2], x_ref.shape[3], x_ref.shape[4]
    KH, KW = THp - TH + 1, Wp - W + 1
    ntap = KH * KW
    assert w_ref.shape[0] == ntap * (Ch + Cin)

    # Build the im2col lhs: hidden-state patches first (Ch-wide, 32-aligned
    # lane offsets), then the narrow input patches.  All stores are VMEM-local.
    for t in range(ntap):
        kh, kw = divmod(t, KW)
        lhs_ref[:, :, t * Ch:(t + 1) * Ch] = (
            h_ref[0, 0, kh:kh + TH, kw:kw + W, :].astype(jnp.bfloat16))
    xoff = ntap * Ch
    for t in range(ntap):
        kh, kw = divmod(t, KW)
        lhs_ref[:, :, xoff + t * Cin:xoff + (t + 1) * Cin] = (
            x_ref[0, 0, kh:kh + TH, kw:kw + W, :].astype(jnp.bfloat16))

    # Single big-K MXU matmul (bf16 x bf16 -> f32 accumulation).
    acc = jax.lax.dot_general(
        lhs_ref[...], w_ref[...],
        dimension_numbers=(((2,), (0,)), ((), ())),
        preferred_element_type=jnp.float32)                 # (TH, W, 4*Ch)
    acc = acc + b_ref[...][None]

    # Gate order i, f, o, g.  sigmoid(x) = 0.5*tanh(0.5*x) + 0.5, so one
    # full-width tanh covers all four gates (gs/gb select sigmoid vs tanh).
    gs = gs_ref[...][None]
    gb = gb_ref[...][None]
    act = gs * jnp.tanh(gs * acc) + gb

    i_g = act[..., 0 * Ch:1 * Ch]
    f_g = act[..., 1 * Ch:2 * Ch]
    o_g = act[..., 2 * Ch:3 * Ch]
    g_g = act[..., 3 * Ch:4 * Ch]

    c_old = c_ref[0, 0].astype(jnp.float32)
    c_new = f_g * c_old + i_g * g_g
    h_new = o_g * jnp.tanh(c_new)

    # One packed, wider-lane output block; split back into h/c in the wrapper.
    hc_ref[0, 0] = jnp.concatenate([h_new, c_new], axis=-1).astype(hc_ref.dtype)


def _choose_tile_h(H, W, Cin, Ch, KH, KW, budget_bytes=6 * 1024 * 1024):
    """Largest divisor of H whose per-tile working set stays small.

    Keeps double-buffered input/output blocks plus scratch comfortably inside
    the default 32 MiB scoped VMEM on every generation (including v7x's 64 MiB
    physical VMEM), while giving the grid enough steps for pipelining and for
    both TensorCores on megacore parts.
    """
    ph, pw = KH // 2, KW // 2
    Wp = W + 2 * pw
    K = KH * KW * (Cin + Ch)
    best = 1
    for th in range(1, H + 1):
        if H % th:
            continue
        thp = th + 2 * ph
        io_elems = (thp * Wp * (Cin + Ch)      # padded x + h blocks
                    + th * W * Ch              # old cell block
                    + th * W * 2 * Ch)         # packed output block
        scratch = th * W * K * 2 + th * W * 4 * Ch * 4   # bf16 lhs + f32 acc
        if 2 * 4 * io_elems + scratch <= budget_bytes:
            best = th
    return best


def convlstm_cell_nhwc(x, weights_oihw, bias, h, c):
    """NHWC-native ConvLSTM cell forward.

    x: (B, H, W, Cin); h, c: (B, H, W, Ch); weights: (4*Ch, Cin+Ch, KH, KW).
    Returns (new_h, new_c) in NHWC.  Use this entry point inside a recurrent
    loop so the state never leaves NHWC between timesteps.
    """
    B, H, W, Cin = x.shape
    Ch = h.shape[-1]
    KH, KW = weights_oihw.shape[2], weights_oihw.shape[3]
    ph, pw = KH // 2, KW // 2          # "same" padding (odd kernel sizes)
    Wp = W + 2 * pw
    K = KH * KW * (Cin + Ch)

    TH = _choose_tile_h(H, W, Cin, Ch, KH, KW)
    nH = H // TH
    THp = TH + 2 * ph

    # Padded, halo'd row tiles (standard Blocked indexing; when nH == 1 this is
    # just a cheap reshape, no row duplication).
    x_pad = jnp.pad(x, ((0, 0), (ph, ph), (pw, pw), (0, 0)))
    h_pad = jnp.pad(h, ((0, 0), (ph, ph), (pw, pw), (0, 0)))
    if nH == 1:
        x_t = x_pad[:, None]
        h_t = h_pad[:, None]
    else:
        x_t = jnp.stack([x_pad[:, i * TH:i * TH + THp] for i in range(nH)], 1)
        h_t = jnp.stack([h_pad[:, i * TH:i * TH + THp] for i in range(nH)], 1)
    c_t = c.reshape(B, nH, TH, W, Ch)

    # Weights: OIHW -> flat (K, 4*Ch) bf16 matmul operand, K ordered
    # [all taps x hidden channels, then all taps x input channels].
    w_hwio = jnp.transpose(weights_oihw, (2, 3, 1, 0))          # (KH,KW,C,4Ch)
    w_hid = w_hwio[:, :, Cin:, :].reshape(KH * KW * Ch, 4 * Ch)
    w_inp = w_hwio[:, :, :Cin, :].reshape(KH * KW * Cin, 4 * Ch)
    w_flat = jnp.concatenate([w_hid, w_inp], axis=0).astype(jnp.bfloat16)

    b2 = bias.reshape(1, 4 * Ch).astype(jnp.float32)
    gate_scale = jnp.concatenate(
        [jnp.full((1, 3 * Ch), 0.5, jnp.float32),
         jnp.ones((1, Ch), jnp.float32)], axis=1)
    gate_shift = jnp.concatenate(
        [jnp.full((1, 3 * Ch), 0.5, jnp.float32),
         jnp.zeros((1, Ch), jnp.float32)], axis=1)

    grid_spec = pltpu.PrefetchScalarGridSpec(
        num_scalar_prefetch=0,
        grid=(B, nH),
        in_specs=[
            pl.BlockSpec((1, 1, THp, Wp, Cin), lambda b, t: (b, t, 0, 0, 0)),
            pl.BlockSpec((1, 1, THp, Wp, Ch), lambda b, t: (b, t, 0, 0, 0)),
            pl.BlockSpec((K, 4 * Ch), lambda b, t: (0, 0)),
            pl.BlockSpec((1, 4 * Ch), lambda b, t: (0, 0)),
            pl.BlockSpec((1, 4 * Ch), lambda b, t: (0, 0)),
            pl.BlockSpec((1, 4 * Ch), lambda b, t: (0, 0)),
            pl.BlockSpec((1, 1, TH, W, Ch), lambda b, t: (b, t, 0, 0, 0)),
        ],
        out_specs=pl.BlockSpec((1, 1, TH, W, 2 * Ch),
                               lambda b, t: (b, t, 0, 0, 0)),
        scratch_shapes=[pltpu.VMEM((TH, W, K), jnp.bfloat16)],
    )

    hc = pl.pallas_call(
        _convlstm_kernel,
        out_shape=jax.ShapeDtypeStruct((B, nH, TH, W, 2 * Ch), x.dtype),
        grid_spec=grid_spec,
        compiler_params=pltpu.CompilerParams(
            dimension_semantics=("parallel", "parallel")),
    )(x_t, h_t, w_flat, b2, gate_scale, gate_shift, c_t)

    hc = hc.reshape(B, H, W, 2 * Ch)
    return hc[..., :Ch], hc[..., Ch:]


@jax.jit
def convlstm_cell_forward(x_nchw, weights_oihw, bias, h_nchw, c_nchw):
    """PyTorch-layout (NCHW) wrapper around the NHWC-native cell."""
    x = jnp.transpose(x_nchw, (0, 2, 3, 1))
    h = jnp.transpose(h_nchw, (0, 2, 3, 1))
    c = jnp.transpose(c_nchw, (0, 2, 3, 1))
    new_h, new_c = convlstm_cell_nhwc(x, weights_oihw, bias, h, c)
    return (jnp.transpose(new_h, (0, 3, 1, 2)),
            jnp.transpose(new_c, (0, 3, 1, 2)))


def _reference_forward(x_nchw, weights_oihw, bias, h_nchw, c_nchw):
    """Pure-JAX f32 reference (mirrors the C++ ConvLSTM forward)."""
    Ch = h_nchw.shape[1]
    KH, KW = weights_oihw.shape[2], weights_oihw.shape[3]
    combined = jnp.concatenate([x_nchw, h_nchw], axis=1)
    gates = jax.lax.conv_general_dilated(
        combined, weights_oihw,
        window_strides=(1, 1),
        padding=((KH // 2, KH // 2), (KW // 2, KW // 2)),
        dimension_numbers=("NCHW", "OIHW", "NCHW"),
    ) + bias[None, :, None, None]
    i_g = jax.nn.sigmoid(gates[:, 0 * Ch:1 * Ch])
    f_g = jax.nn.sigmoid(gates[:, 1 * Ch:2 * Ch])
    o_g = jax.nn.sigmoid(gates[:, 2 * Ch:3 * Ch])
    g_g = jnp.tanh(gates[:, 3 * Ch:4 * Ch])
    c_new = f_g * c_nchw + i_g * g_g
    h_new = o_g * jnp.tanh(c_new)
    return h_new, c_new


if __name__ == "__main__":
    # Small shapes consistent with ConvLSTMCPPCell.
    B, Cin, H, W = 2, 4, 16, 16
    Ch = 32
    KH, KW = 3, 3

    key = jax.random.PRNGKey(0)
    k_w, k_b, k_x, k_h, k_c = jax.random.split(key, 5)

    # reset_parameters(): uniform(-stdv, +stdv), stdv = 1/sqrt(hidden_dim)
    stdv = 1.0 / math.sqrt(Ch)
    weights = jax.random.uniform(
        k_w, (4 * Ch, Cin + Ch, KH, KW), jnp.float32, -stdv, stdv)
    bias = jax.random.uniform(k_b, (4 * Ch,), jnp.float32, -stdv, stdv)

    x = jax.random.normal(k_x, (B, Cin, H, W), jnp.float32)
    old_h = jax.random.normal(k_h, (B, Ch, H, W), jnp.float32)
    old_c = jax.random.normal(k_c, (B, Ch, H, W), jnp.float32)

    new_h, new_c = convlstm_cell_forward(x, weights, bias, old_h, old_c)
    jax.block_until_ready((new_h, new_c))

    ref_h, ref_c = _reference_forward(x, weights, bias, old_h, old_c)
    assert new_h.shape == (B, Ch, H, W) and new_c.shape == (B, Ch, H, W)
    # bf16 matmul operands (f32 accumulation) -> relaxed tolerance vs f32 ref.
    assert jnp.allclose(new_h, ref_h, rtol=5e-2, atol=5e-2)
    assert jnp.allclose(new_c, ref_c, rtol=5e-2, atol=5e-2)

    print("KERNEL_OK")
</pallas_src>

<mosaic_0001>
module attributes {stable_mosaic.version = 11 : i64} {
  func.func @_convlstm_kernel(%arg0: i32, %arg1: i32, %arg2: memref<1x1x18x18x4xf32, #tpu.memory_space<vmem>>, %arg3: memref<1x1x18x18x32xf32, #tpu.memory_space<vmem>>, %arg4: memref<324x128xbf16, #tpu.memory_space<vmem>>, %arg5: memref<1x128xf32, #tpu.memory_space<vmem>>, %arg6: memref<1x128xf32, #tpu.memory_space<vmem>>, %arg7: memref<1x128xf32, #tpu.memory_space<vmem>>, %arg8: memref<1x1x16x16x32xf32, #tpu.memory_space<vmem>>, %arg9: memref<1x1x16x16x64xf32, #tpu.memory_space<vmem>>, %arg10: memref<16x16x324xbf16, #tpu.memory_space<vmem>>) attributes {dimension_semantics = [#tpu.dimension_semantics<parallel>, #tpu.dimension_semantics<parallel>], iteration_bounds = array<i64: 2, 1>, scalar_prefetch = 0 : i64, scratch_operands = 1 : i64, tpu.core_type = #tpu.core_type<tc>, window_params = [{transform_indices = @transform_0, window_bounds = array<i64: 1, 1, 18, 18, 4>}, {transform_indices = @transform_1, window_bounds = array<i64: 1, 1, 18, 18, 32>}, {pipeline_mode = #tpu.pipeline_mode<synchronous>, transform_indices = @transform_2, window_bounds = array<i64: 324, 128>}, {pipeline_mode = #tpu.pipeline_mode<synchronous>, transform_indices = @transform_3, window_bounds = array<i64: 1, 128>}, {pipeline_mode = #tpu.pipeline_mode<synchronous>, transform_indices = @transform_4, window_bounds = array<i64: 1, 128>}, {pipeline_mode = #tpu.pipeline_mode<synchronous>, transform_indices = @transform_5, window_bounds = array<i64: 1, 128>}, {transform_indices = @transform_6, window_bounds = array<i64: 1, 1, 16, 16, 32>}, {transform_indices = @transform_7, window_bounds = array<i64: 1, 1, 16, 16, 64>}]} {
    %c0 = arith.constant 0 : index
    %c0_0 = arith.constant 0 : index
    %c0_1 = arith.constant 0 : index
    %c0_2 = arith.constant 0 : index
    %c0_3 = arith.constant 0 : index
    %0 = vector.load %arg3[%c0, %c0_0, %c0_1, %c0_2, %c0_3] : memref<1x1x18x18x32xf32, #tpu.memory_space<vmem>>, vector<1x1x16x16x32xf32>
    %1 = vector.shape_cast %0 : vector<1x1x16x16x32xf32> to vector<16x16x32xf32>
    %2 = arith.truncf %1 : vector<16x16x32xf32> to vector<16x16x32xbf16>
    %c0_4 = arith.constant 0 : index
    %c0_5 = arith.constant 0 : index
    %c0_6 = arith.constant 0 : index
    %3 = vector.load %arg10[%c0_4, %c0_5, %c0_6] : memref<16x16x324xbf16, #tpu.memory_space<vmem>>, vector<16x16x32xbf16>
    tpu.vector_store %arg10[%c0_4, %c0_5, %c0_6], %2 {strides = array<i32>} : memref<16x16x324xbf16, #tpu.memory_space<vmem>>, vector<16x16x32xbf16>,
    %c0_7 = arith.constant 0 : index
    %c0_8 = arith.constant 0 : index
    %c0_9 = arith.constant 0 : index
    %c1 = arith.constant 1 : index
    %c0_10 = arith.constant 0 : index
    %4 = vector.load %arg3[%c0_7, %c0_8, %c0_9, %c1, %c0_10] : memref<1x1x18x18x32xf32, #tpu.memory_space<vmem>>, vector<1x1x16x16x32xf32>
    %5 = vector.shape_cast %4 : vector<1x1x16x16x32xf32> to vector<16x16x32xf32>
    %6 = arith.truncf %5 : vector<16x16x32xf32> to vector<16x16x32xbf16>
    %c0_11 = arith.constant 0 : index
    %c0_12 = arith.constant 0 : index
    %c32 = arith.constant 32 : index
    %7 = vector.load %arg10[%c0_11, %c0_12, %c32] : memref<16x16x324xbf16, #tpu.memory_space<vmem>>, vector<16x16x32xbf16>
    tpu.vector_store %arg10[%c0_11, %c0_12, %c32], %6 {strides = array<i32>} : memref<16x16x324xbf16, #tpu.memory_space<vmem>>, vector<16x16x32xbf16>,
    %c0_13 = arith.constant 0 : index
    %c0_14 = arith.constant 0 : index
    %c0_15 = arith.constant 0 : index
    %c2 = arith.constant 2 : index
    %c0_16 = arith.constant 0 : index
    %8 = vector.load %arg3[%c0_13, %c0_14, %c0_15, %c2, %c0_16] : memref<1x1x18x18x32xf32, #tpu.memory_space<vmem>>, vector<1x1x16x16x32xf32>
    %9 = vector.shape_cast %8 : vector<1x1x16x16x32xf32> to vector<16x16x32xf32>
    %10 = arith.truncf %9 : vector<16x16x32xf32> to vector<16x16x32xbf16>
    %c0_17 = arith.constant 0 : index
    %c0_18 = arith.constant 0 : index
    %c64 = arith.constant 64 : index
    %11 = vector.load %arg10[%c0_17, %c0_18, %c64] : memref<16x16x324xbf16, #tpu.memory_space<vmem>>, vector<16x16x32xbf16>
    tpu.vector_store %arg10[%c0_17, %c0_18, %c64], %10 {strides = array<i32>} : memref<16x16x324xbf16, #tpu.memory_space<vmem>>, vector<16x16x32xbf16>,
    %c0_19 = arith.constant 0 : index
    %c0_20 = arith.constant 0 : index
    %c1_21 = arith.constant 1 : index
    %c0_22 = arith.constant 0 : index
    %c0_23 = arith.constant 0 : index
    %12 = vector.load %arg3[%c0_19, %c0_20, %c1_21, %c0_22, %c0_23] : memref<1x1x18x18x32xf32, #tpu.memory_space<vmem>>, vector<1x1x16x16x32xf32>
    %13 = vector.shape_cast %12 : vector<1x1x16x16x32xf32> to vector<16x16x32xf32>
    %14 = arith.truncf %13 : vector<16x16x32xf32> to vector<16x16x32xbf16>
    %c0_24 = arith.constant 0 : index
    %c0_25 = arith.constant 0 : index
    %c96 = arith.constant 96 : index
    %15 = vector.load %arg10[%c0_24, %c0_25, %c96] : memref<16x16x324xbf16, #tpu.memory_space<vmem>>, vector<16x16x32xbf16>
    tpu.vector_store %arg10[%c0_24, %c0_25, %c96], %14 {strides = array<i32>} : memref<16x16x324xbf16, #tpu.memory_space<vmem>>, vector<16x16x32xbf16>,
    %c0_26 = arith.constant 0 : index
    %c0_27 = arith.constant 0 : index
    %c1_28 = arith.constant 1 : index
    %c1_29 = arith.constant 1 : index
    %c0_30 = arith.constant 0 : index
    %16 = vector.load %arg3[%c0_26, %c0_27, %c1_28, %c1_29, %c0_30] : memref<1x1x18x18x32xf32, #tpu.memory_space<vmem>>, vector<1x1x16x16x32xf32>
    %17 = vector.shape_cast %16 : vector<1x1x16x16x32xf32> to vector<16x16x32xf32>
    %18 = arith.truncf %17 : vector<16x16x32xf32> to vector<16x16x32xbf16>
    %c0_31 = arith.constant 0 : index
    %c0_32 = arith.constant 0 : index
    %c128 = arith.constant 128 : index
    %19 = vector.load %arg10[%c0_31, %c0_32, %c128] : memref<16x16x324xbf16, #tpu.memory_space<vmem>>, vector<16x16x32xbf16>
    tpu.vector_store %arg10[%c0_31, %c0_32, %c128], %18 {strides = array<i32>} : memref<16x16x324xbf16, #tpu.memory_space<vmem>>, vector<16x16x32xbf16>,
    %c0_33 = arith.constant 0 : index
    %c0_34 = arith.constant 0 : index
    %c1_35 = arith.constant 1 : index
    %c2_36 = arith.constant 2 : index
    %c0_37 = arith.constant 0 : index
    %20 = vector.load %arg3[%c0_33, %c0_34, %c1_35, %c2_36, %c0_37] : memref<1x1x18x18x32xf32, #tpu.memory_space<vmem>>, vector<1x1x16x16x32xf32>
    %21 = vector.shape_cast %20 : vector<1x1x16x16x32xf32> to vector<16x16x32xf32>
    %22 = arith.truncf %21 : vector<16x16x32xf32> to vector<16x16x32xbf16>
    %c0_38 = arith.constant 0 : index
    %c0_39 = arith.constant 0 : index
    %c160 = arith.constant 160 : index
    %23 = vector.load %arg10[%c0_38, %c0_39, %c160] : memref<16x16x324xbf16, #tpu.memory_space<vmem>>, vector<16x16x32xbf16>
    tpu.vector_store %arg10[%c0_38, %c0_39, %c160], %22 {strides = array<i32>} : memref<16x16x324xbf16, #tpu.memory_space<vmem>>, vector<16x16x32xbf16>,
    %c0_40 = arith.constant 0 : index
    %c0_41 = arith.constant 0 : index
    %c2_42 = arith.constant 2 : index
    %c0_43 = arith.constant 0 : index
    %c0_44 = arith.constant 0 : index
    %24 = vector.load %arg3[%c0_40, %c0_41, %c2_42, %c0_43, %c0_44] : memref<1x1x18x18x32xf32, #tpu.memory_space<vmem>>, vector<1x1x16x16x32xf32>
    %25 = vector.shape_cast %24 : vector<1x1x16x16x32xf32> to vector<16x16x32xf32>
    %26 = arith.truncf %25 : vector<16x16x32xf32> to vector<16x16x32xbf16>
    %c0_45 = arith.constant 0 : index
    %c0_46 = arith.constant 0 : index
    %c192 = arith.constant 192 : index
    %27 = vector.load %arg10[%c0_45, %c0_46, %c192] : memref<16x16x324xbf16, #tpu.memory_space<vmem>>, vector<16x16x32xbf16>
    tpu.vector_store %arg10[%c0_45, %c0_46, %c192], %26 {strides = array<i32>} : memref<16x16x324xbf16, #tpu.memory_space<vmem>>, vector<16x16x32xbf16>,
    %c0_47 = arith.constant 0 : index
    %c0_48 = arith.constant 0 : index
    %c2_49 = arith.constant 2 : index
    %c1_50 = arith.constant 1 : index
    %c0_51 = arith.constant 0 : index
    %28 = vector.load %arg3[%c0_47, %c0_48, %c2_49, %c1_50, %c0_51] : memref<1x1x18x18x32xf32, #tpu.memory_space<vmem>>, vector<1x1x16x16x32xf32>
    %29 = vector.shape_cast %28 : vector<1x1x16x16x32xf32> to vector<16x16x32xf32>
    %30 = arith.truncf %29 : vector<16x16x32xf32> to vector<16x16x32xbf16>
    %c0_52 = arith.constant 0 : index
    %c0_53 = arith.constant 0 : index
    %c224 = arith.constant 224 : index
    %31 = vector.load %arg10[%c0_52, %c0_53, %c224] : memref<16x16x324xbf16, #tpu.memory_space<vmem>>, vector<16x16x32xbf16>
    tpu.vector_store %arg10[%c0_52, %c0_53, %c224], %30 {strides = array<i32>} : memref<16x16x324xbf16, #tpu.memory_space<vmem>>, vector<16x16x32xbf16>,
    %c0_54 = arith.constant 0 : index
    %c0_55 = arith.constant 0 : index
    %c2_56 = arith.constant 2 : index
    %c2_57 = arith.constant 2 : index
    %c0_58 = arith.constant 0 : index
    %32 = vector.load %arg3[%c0_54, %c0_55, %c2_56, %c2_57, %c0_58] : memref<1x1x18x18x32xf32, #tpu.memory_space<vmem>>, vector<1x1x16x16x32xf32>
    %33 = vector.shape_cast %32 : vector<1x1x16x16x32xf32> to vector<16x16x32xf32>
    %34 = arith.truncf %33 : vector<16x16x32xf32> to vector<16x16x32xbf16>
    %c0_59 = arith.constant 0 : index
    %c0_60 = arith.constant 0 : index
    %c256 = arith.constant 256 : index
    %35 = vector.load %arg10[%c0_59, %c0_60, %c256] : memref<16x16x324xbf16, #tpu.memory_space<vmem>>, vector<16x16x32xbf16>
    tpu.vector_store %arg10[%c0_59, %c0_60, %c256], %34 {strides = array<i32>} : memref<16x16x324xbf16, #tpu.memory_space<vmem>>, vector<16x16x32xbf16>,
    %c0_61 = arith.constant 0 : index
    %c0_62 = arith.constant 0 : index
    %c0_63 = arith.constant 0 : index
    %c0_64 = arith.constant 0 : index
    %c0_65 = arith.constant 0 : index
    %36 = vector.load %arg2[%c0_61, %c0_62, %c0_63, %c0_64, %c0_65] : memref<1x1x18x18x4xf32, #tpu.memory_space<vmem>>, vector<1x1x16x16x4xf32>
    %37 = vector.shape_cast %36 : vector<1x1x16x16x4xf32> to vector<16x16x4xf32>
    %38 = arith.truncf %37 : vector<16x16x4xf32> to vector<16x16x4xbf16>
    %c0_66 = arith.constant 0 : index
    %c0_67 = arith.constant 0 : index
    %c288 = arith.constant 288 : index
    %39 = vector.load %arg10[%c0_66, %c0_67, %c288] : memref<16x16x324xbf16, #tpu.memory_space<vmem>>, vector<16x16x4xbf16>
    tpu.vector_store %arg10[%c0_66, %c0_67, %c288], %38 {strides = array<i32>} : memref<16x16x324xbf16, #tpu.memory_space<vmem>>, vector<16x16x4xbf16>,
    %c0_68 = arith.constant 0 : index
    %c0_69 = arith.constant 0 : index
    %c0_70 = arith.constant 0 : index
    %c1_71 = arith.constant 1 : index
    %c0_72 = arith.constant 0 : index
    %40 = vector.load %arg2[%c0_68, %c0_69, %c0_70, %c1_71, %c0_72] : memref<1x1x18x18x4xf32, #tpu.memory_space<vmem>>, vector<1x1x16x16x4xf32>
    %41 = vector.shape_cast %40 : vector<1x1x16x16x4xf32> to vector<16x16x4xf32>
    %42 = arith.truncf %41 : vector<16x16x4xf32> to vector<16x16x4xbf16>
    %c0_73 = arith.constant 0 : index
    %c0_74 = arith.constant 0 : index
    %c292 = arith.constant 292 : index
    %43 = vector.load %arg10[%c0_73, %c0_74, %c292] : memref<16x16x324xbf16, #tpu.memory_space<vmem>>, vector<16x16x4xbf16>
    tpu.vector_store %arg10[%c0_73, %c0_74, %c292], %42 {strides = array<i32>} : memref<16x16x324xbf16, #tpu.memory_space<vmem>>, vector<16x16x4xbf16>,
    %c0_75 = arith.constant 0 : index
    %c0_76 = arith.constant 0 : index
    %c0_77 = arith.constant 0 : index
    %c2_78 = arith.constant 2 : index
    %c0_79 = arith.constant 0 : index
    %44 = vector.load %arg2[%c0_75, %c0_76, %c0_77, %c2_78, %c0_79] : memref<1x1x18x18x4xf32, #tpu.memory_space<vmem>>, vector<1x1x16x16x4xf32>
    %45 = vector.shape_cast %44 : vector<1x1x16x16x4xf32> to vector<16x16x4xf32>
    %46 = arith.truncf %45 : vector<16x16x4xf32> to vector<16x16x4xbf16>
    %c0_80 = arith.constant 0 : index
    %c0_81 = arith.constant 0 : index
    %c296 = arith.constant 296 : index
    %47 = vector.load %arg10[%c0_80, %c0_81, %c296] : memref<16x16x324xbf16, #tpu.memory_space<vmem>>, vector<16x16x4xbf16>
    tpu.vector_store %arg10[%c0_80, %c0_81, %c296], %46 {strides = array<i32>} : memref<16x16x324xbf16, #tpu.memory_space<vmem>>, vector<16x16x4xbf16>,
    %c0_82 = arith.constant 0 : index
    %c0_83 = arith.constant 0 : index
    %c1_84 = arith.constant 1 : index
    %c0_85 = arith.constant 0 : index
    %c0_86 = arith.constant 0 : index
    %48 = vector.load %arg2[%c0_82, %c0_83, %c1_84, %c0_85, %c0_86] : memref<1x1x18x18x4xf32, #tpu.memory_space<vmem>>, vector<1x1x16x16x4xf32>
    %49 = vector.shape_cast %48 : vector<1x1x16x16x4xf32> to vector<16x16x4xf32>
    %50 = arith.truncf %49 : vector<16x16x4xf32> to vector<16x16x4xbf16>
    %c0_87 = arith.constant 0 : index
    %c0_88 = arith.constant 0 : index
    %c300 = arith.constant 300 : index
    %51 = vector.load %arg10[%c0_87, %c0_88, %c300] : memref<16x16x324xbf16, #tpu.memory_space<vmem>>, vector<16x16x4xbf16>
    tpu.vector_store %arg10[%c0_87, %c0_88, %c300], %50 {strides = array<i32>} : memref<16x16x324xbf16, #tpu.memory_space<vmem>>, vector<16x16x4xbf16>,
    %c0_89 = arith.constant 0 : index
    %c0_90 = arith.constant 0 : index
    %c1_91 = arith.constant 1 : index
    %c1_92 = arith.constant 1 : index
    %c0_93 = arith.constant 0 : index
    %52 = vector.load %arg2[%c0_89, %c0_90, %c1_91, %c1_92, %c0_93] : memref<1x1x18x18x4xf32, #tpu.memory_space<vmem>>, vector<1x1x16x16x4xf32>
    %53 = vector.shape_cast %52 : vector<1x1x16x16x4xf32> to vector<16x16x4xf32>
    %54 = arith.truncf %53 : vector<16x16x4xf32> to vector<16x16x4xbf16>
    %c0_94 = arith.constant 0 : index
    %c0_95 = arith.constant 0 : index
    %c304 = arith.constant 304 : index
    %55 = vector.load %arg10[%c0_94, %c0_95, %c304] : memref<16x16x324xbf16, #tpu.memory_space<vmem>>, vector<16x16x4xbf16>
    tpu.vector_store %arg10[%c0_94, %c0_95, %c304], %54 {strides = array<i32>} : memref<16x16x324xbf16, #tpu.memory_space<vmem>>, vector<16x16x4xbf16>,
    %c0_96 = arith.constant 0 : index
    %c0_97 = arith.constant 0 : index
    %c1_98 = arith.constant 1 : index
    %c2_99 = arith.constant 2 : index
    %c0_100 = arith.constant 0 : index
    %56 = vector.load %arg2[%c0_96, %c0_97, %c1_98, %c2_99, %c0_100] : memref<1x1x18x18x4xf32, #tpu.memory_space<vmem>>, vector<1x1x16x16x4xf32>
    %57 = vector.shape_cast %56 : vector<1x1x16x16x4xf32> to vector<16x16x4xf32>
    %58 = arith.truncf %57 : vector<16x16x4xf32> to vector<16x16x4xbf16>
    %c0_101 = arith.constant 0 : index
    %c0_102 = arith.constant 0 : index
    %c308 = arith.constant 308 : index
    %59 = vector.load %arg10[%c0_101, %c0_102, %c308] : memref<16x16x324xbf16, #tpu.memory_space<vmem>>, vector<16x16x4xbf16>
    tpu.vector_store %arg10[%c0_101, %c0_102, %c308], %58 {strides = array<i32>} : memref<16x16x324xbf16, #tpu.memory_space<vmem>>, vector<16x16x4xbf16>,
    %c0_103 = arith.constant 0 : index
    %c0_104 = arith.constant 0 : index
    %c2_105 = arith.constant 2 : index
    %c0_106 = arith.constant 0 : index
    %c0_107 = arith.constant 0 : index
    %60 = vector.load %arg2[%c0_103, %c0_104, %c2_105, %c0_106, %c0_107] : memref<1x1x18x18x4xf32, #tpu.memory_space<vmem>>, vector<1x1x16x16x4xf32>
    %61 = vector.shape_cast %60 : vector<1x1x16x16x4xf32> to vector<16x16x4xf32>
    %62 = arith.truncf %61 : vector<16x16x4xf32> to vector<16x16x4xbf16>
    %c0_108 = arith.constant 0 : index
    %c0_109 = arith.constant 0 : index
    %c312 = arith.constant 312 : index
    %63 = vector.load %arg10[%c0_108, %c0_109, %c312] : memref<16x16x324xbf16, #tpu.memory_space<vmem>>, vector<16x16x4xbf16>
    tpu.vector_store %arg10[%c0_108, %c0_109, %c312], %62 {strides = array<i32>} : memref<16x16x324xbf16, #tpu.memory_space<vmem>>, vector<16x16x4xbf16>,
    %c0_110 = arith.constant 0 : index
    %c0_111 = arith.constant 0 : index
    %c2_112 = arith.constant 2 : index
    %c1_113 = arith.constant 1 : index
    %c0_114 = arith.constant 0 : index
    %64 = vector.load %arg2[%c0_110, %c0_111, %c2_112, %c1_113, %c0_114] : memref<1x1x18x18x4xf32, #tpu.memory_space<vmem>>, vector<1x1x16x16x4xf32>
    %65 = vector.shape_cast %64 : vector<1x1x16x16x4xf32> to vector<16x16x4xf32>
    %66 = arith.truncf %65 : vector<16x16x4xf32> to vector<16x16x4xbf16>
    %c0_115 = arith.constant 0 : index
    %c0_116 = arith.constant 0 : index
    %c316 = arith.constant 316 : index
    %67 = vector.load %arg10[%c0_115, %c0_116, %c316] : memref<16x16x324xbf16, #tpu.memory_space<vmem>>, vector<16x16x4xbf16>
    tpu.vector_store %arg10[%c0_115, %c0_116, %c316], %66 {strides = array<i32>} : memref<16x16x324xbf16, #tpu.memory_space<vmem>>, vector<16x16x4xbf16>,
    %c0_117 = arith.constant 0 : index
    %c0_118 = arith.constant 0 : index
    %c2_119 = arith.constant 2 : index
    %c2_120 = arith.constant 2 : index
    %c0_121 = arith.constant 0 : index
    %68 = vector.load %arg2[%c0_117, %c0_118, %c2_119, %c2_120, %c0_121] : memref<1x1x18x18x4xf32, #tpu.memory_space<vmem>>, vector<1x1x16x16x4xf32>
    %69 = vector.shape_cast %68 : vector<1x1x16x16x4xf32> to vector<16x16x4xf32>
    %70 = arith.truncf %69 : vector<16x16x4xf32> to vector<16x16x4xbf16>
    %c0_122 = arith.constant 0 : index
    %c0_123 = arith.constant 0 : index
    %c320 = arith.constant 320 : index
    %71 = vector.load %arg10[%c0_122, %c0_123, %c320] : memref<16x16x324xbf16, #tpu.memory_space<vmem>>, vector<16x16x4xbf16>
    tpu.vector_store %arg10[%c0_122, %c0_123, %c320], %70 {strides = array<i32>} : memref<16x16x324xbf16, #tpu.memory_space<vmem>>, vector<16x16x4xbf16>,
    %c0_124 = arith.constant 0 : index
    %c0_125 = arith.constant 0 : index
    %c0_126 = arith.constant 0 : index
    %72 = vector.load %arg10[%c0_124, %c0_125, %c0_126] : memref<16x16x324xbf16, #tpu.memory_space<vmem>>, vector<16x16x324xbf16>
    %c0_127 = arith.constant 0 : index
    %c0_128 = arith.constant 0 : index
    %73 = vector.load %arg4[%c0_127, %c0_128] : memref<324x128xbf16, #tpu.memory_space<vmem>>, vector<324x128xbf16>
    %cst = arith.constant dense<0.000000e+00> : vector<16x16x128xf32>
    %74 = tpu.matmul %72, %73, %cst {dimension_numbers = #tpu.dot_dimension_numbers<[2], [0], [0, 1], [1], [0, 0, 0, 1, 1, 1], [], []>} : vector<16x16x324xbf16>, vector<324x128xbf16>, vector<16x16x128xf32> -> vector<16x16x128xf32>
    %c0_129 = arith.constant 0 : index
    %c0_130 = arith.constant 0 : index
    %75 = vector.load %arg5[%c0_129, %c0_130] : memref<1x128xf32, #tpu.memory_space<vmem>>, vector<1x128xf32>
    %76 = vector.shape_cast %75 : vector<1x128xf32> to vector<1x1x128xf32>
    %77 = vector.broadcast %76 : vector<1x1x128xf32> to vector<16x16x128xf32>
    %78 = arith.addf %74, %77 : vector<16x16x128xf32>
    %c0_131 = arith.constant 0 : index
    %c0_132 = arith.constant 0 : index
    %79 = vector.load %arg6[%c0_131, %c0_132] : memref<1x128xf32, #tpu.memory_space<vmem>>, vector<1x128xf32>
    %80 = vector.shape_cast %79 : vector<1x128xf32> to vector<1x1x128xf32>
    %c0_133 = arith.constant 0 : index
    %c0_134 = arith.constant 0 : index
    %81 = vector.load %arg7[%c0_133, %c0_134] : memref<1x128xf32, #tpu.memory_space<vmem>>, vector<1x128xf32>
    %82 = vector.shape_cast %81 : vector<1x128xf32> to vector<1x1x128xf32>
    %83 = vector.broadcast %80 : vector<1x1x128xf32> to vector<16x16x128xf32>
    %84 = arith.mulf %83, %78 : vector<16x16x128xf32>
    %85 = math.tanh %84 : vector<16x16x128xf32>
    %86 = vector.broadcast %80 : vector<1x1x128xf32> to vector<16x16x128xf32>
    %87 = arith.mulf %86, %85 : vector<16x16x128xf32>
    %88 = vector.broadcast %82 : vector<1x1x128xf32> to vector<16x16x128xf32>
    %89 = arith.addf %87, %88 : vector<16x16x128xf32>
    %90 = vector.extract_strided_slice %89 {offsets = [0, 0, 0], sizes = [16, 16, 32], strides = [1, 1, 1]} : vector<16x16x128xf32> to vector<16x16x32xf32>
    %91 = vector.extract_strided_slice %89 {offsets = [0, 0, 32], sizes = [16, 16, 32], strides = [1, 1, 1]} : vector<16x16x128xf32> to vector<16x16x32xf32>
    %92 = vector.extract_strided_slice %89 {offsets = [0, 0, 64], sizes = [16, 16, 32], strides = [1, 1, 1]} : vector<16x16x128xf32> to vector<16x16x32xf32>
    %93 = vector.extract_strided_slice %89 {offsets = [0, 0, 96], sizes = [16, 16, 32], strides = [1, 1, 1]} : vector<16x16x128xf32> to vector<16x16x32xf32>
    %c0_135 = arith.constant 0 : index
    %c0_136 = arith.constant 0 : index
    %c0_137 = arith.constant 0 : index
    %c0_138 = arith.constant 0 : index
    %c0_139 = arith.constant 0 : index
    %94 = vector.load %arg8[%c0_135, %c0_136, %c0_137, %c0_138, %c0_139] : memref<1x1x16x16x32xf32, #tpu.memory_space<vmem>>, vector<1x1x16x16x32xf32>
    %95 = vector.shape_cast %94 : vector<1x1x16x16x32xf32> to vector<16x16x32xf32>
    %96 = arith.mulf %91, %95 : vector<16x16x32xf32>
    %97 = arith.mulf %90, %93 : vector<16x16x32xf32>
    %98 = arith.addf %96, %97 : vector<16x16x32xf32>
    %99 = math.tanh %98 : vector<16x16x32xf32>
    %100 = arith.mulf %92, %99 : vector<16x16x32xf32>
    %101 = tpu.concatenate %100, %98 in 2 : vector<16x16x32xf32>, vector<16x16x32xf32> -> vector<16x16x64xf32>
    %c0_140 = arith.constant 0 : index
    %c0_141 = arith.constant 0 : index
    %c0_142 = arith.constant 0 : index
    %c0_143 = arith.constant 0 : index
    %c0_144 = arith.constant 0 : index
    %102 = vector.load %arg9[%c0_140, %c0_141, %c0_142, %c0_143, %c0_144] : memref<1x1x16x16x64xf32, #tpu.memory_space<vmem>>, vector<1x1x16x16x64xf32>
    %103 = vector.shape_cast %102 : vector<1x1x16x16x64xf32> to vector<16x16x64xf32>
    %104 = vector.shape_cast %101 : vector<16x16x64xf32> to vector<1x1x16x16x64xf32>
    tpu.vector_store %arg9[%c0_140, %c0_141, %c0_142, %c0_143, %c0_144], %104 {strides = array<i32>} : memref<1x1x16x16x64xf32, #tpu.memory_space<vmem>>, vector<1x1x16x16x64xf32>,
    return
  }
  func.func @transform_0(%arg0: i32, %arg1: i32) -> (i32, i32, i32, i32, i32) {
    %c0_i32 = arith.constant 0 : i32
    %c0_i32_0 = arith.constant 0 : i32
    %c0_i32_1 = arith.constant 0 : i32
    %c0_i32_2 = arith.constant 0 : i32
    return %arg0, %arg1, %c0_i32, %c0_i32_0, %c0_i32_1 : i32, i32, i32, i32, i32
  }
  func.func @transform_1(%arg0: i32, %arg1: i32) -> (i32, i32, i32, i32, i32) {
    %c0_i32 = arith.constant 0 : i32
    %c0_i32_0 = arith.constant 0 : i32
    %c0_i32_1 = arith.constant 0 : i32
    %c0_i32_2 = arith.constant 0 : i32
    return %arg0, %arg1, %c0_i32, %c0_i32_0, %c0_i32_1 : i32, i32, i32, i32, i32
  }
  func.func @transform_2(%arg0: i32, %arg1: i32) -> (i32, i32) {
    %c0_i32 = arith.constant 0 : i32
    %c0_i32_0 = arith.constant 0 : i32
    %c0_i32_1 = arith.constant 0 : i32
    return %c0_i32, %c0_i32_0 : i32, i32
  }
  func.func @transform_3(%arg0: i32, %arg1: i32) -> (i32, i32) {
    %c0_i32 = arith.constant 0 : i32
    %c0_i32_0 = arith.constant 0 : i32
    %c0_i32_1 = arith.constant 0 : i32
    return %c0_i32, %c0_i32_0 : i32, i32
  }
  func.func @transform_4(%arg0: i32, %arg1: i32) -> (i32, i32) {
    %c0_i32 = arith.constant 0 : i32
    %c0_i32_0 = arith.constant 0 : i32
    %c0_i32_1 = arith.constant 0 : i32
    return %c0_i32, %c0_i32_0 : i32, i32
  }
  func.func @transform_5(%arg0: i32, %arg1: i32) -> (i32, i32) {
    %c0_i32 = arith.constant 0 : i32
    %c0_i32_0 = arith.constant 0 : i32
    %c0_i32_1 = arith.constant 0 : i32
    return %c0_i32, %c0_i32_0 : i32, i32
  }
  func.func @transform_6(%arg0: i32, %arg1: i32) -> (i32, i32, i32, i32, i32) {
    %c0_i32 = arith.constant 0 : i32
    %c0_i32_0 = arith.constant 0 : i32
    %c0_i32_1 = arith.constant 0 : i32
    %c0_i32_2 = arith.constant 0 : i32
    return %arg0, %arg1, %c0_i32, %c0_i32_0, %c0_i32_1 : i32, i32, i32, i32, i32
  }
  func.func @transform_7(%arg0: i32, %arg1: i32) -> (i32, i32, i32, i32, i32) {
    %c0_i32 = arith.constant 0 : i32
    %c0_i32_0 = arith.constant 0 : i32
    %c0_i32_1 = arith.constant 0 : i32
    %c0_i32_2 = arith.constant 0 : i32
    return %arg0, %arg1, %c0_i32, %c0_i32_0, %c0_i32_1 : i32, i32, i32, i32, i32
  }
}

</mosaic_0001>

<bundles_post_ra>
// kernel: convlstm_cell_forward.1
= control target key start
LH: loop header
LB: loop body
LE: loop exit
PB: predicated region body
PF: predicated region fallthrough
CT: control target
= control target key end

     0   :  { %s7026_s24 = smov 0   ;;  %s7028_s25 = smov 0   ;;  %s10166_s0 = inlined_call_operand.vmem [shape: f32[2,1,18,18,4], index: 0, kind: input, shape index: {}]   ;;  %s10167_s1 = inlined_call_operand.vmem [shape: f32[2,1,18,18,32], index: 1, kind: input, shape index: {}]   ;;  %s10168_s2 = inlined_call_operand.vmem [shape: bf16[324,128], index: 2, kind: input, shape index: {}]   ;;  %s10169_s3 = inlined_call_operand.vmem [shape: f32[1,128], index: 3, kind: input, shape index: {}]   ;;  %s10170_s4 = inlined_call_operand.vmem [shape: f32[1,128], index: 4, kind: input, shape index: {}]   ;;  %s10171_s5 = inlined_call_operand.vmem [shape: f32[1,128], index: 5, kind: input, shape index: {}]   ;;  %s10172_s6 = inlined_call_operand.vmem [shape: f32[2,1,16,16,32], index: 6, kind: input, shape index: {}]   ;;  %s10173_s7 = inlined_call_operand.vmem [shape: f32[2,1,16,16,64], index: 7, kind: output, shape index: {}]  }
   0x1   :  { %s7030_s26 = smov 0  }
   0x2 LB: > { %s29_s27 = sadd.s32 1, %s6970_s25  ;;  %p6013_p0 = scmp.ge.s32.totalorder %s6974_s26, 1  ;;  %s6974_s26 = sphi %s7030_s26, %s17_s26   ;;  %s6970_s25 = sphi %s7028_s25, %s10249_s25   ;;  %s6966_s24 = sphi %s7026_s24, %s10248_s24  }
   0x3   : > { %p31_p1 = scmp.ge.s32.totalorder %s29_s27, 2  ;;  %p289_p2 = scmp.lt.s32.totalorder %s6974_s26, 3 }
   0x5   : > { %s10251_s27 = smov (%p31_p1, %s29_s27), 0  ;;  %p290_p3 = pnand %p6013_p0, %p289_p2 }
   0x7   : > { %293 = sbr.rel (%p290_p3) target bundleno = 2153 (0x869), region = 48 }
   0xc   : > { %p347_p4 = scmp.lt.s32.totalorder %s6966_s24, 1  ;;  %s6976_s9 = smov 32   ;;  %vm448_vm0 = vcmask 257024   ;;  %vm673_vm1 = vcmask 519424   ;;  %vm898_vm2 = vcmask 781824   ;;  %vm1124_vm3 = vcmask 1044224  }
   0xd   : > { %s6977_s10 = smov 64   ;;  %s6978_s11 = smov 96   ;;  %vm2214_vm4 = vcmask 290048   ;;  %vm2439_vm5 = vcmask 322848   ;;  %vm2664_vm6 = vcmask 355648   ;;  %vm2890_vm7 = vcmask 388448  }
   0xe   : > { %s10253_s24 = smov (!%p347_p4, %s6966_s24), 1  ;;  %s6979_s17 = smov 36   ;;  %vm3115_vm8 = vcmask 421248   ;;  %vm3340_vm9 = vcmask 454048   ;;  %vm3566_vm10 = vcmask 486848   ;;  %vm3791_vm11 = vcmask 519648  }
   0xf   : > { %s6785_s28 = smul.u32 432, %s10253_s24  ;;  %s6980_s18 = smov 40   ;;  %vm4570_vm12 = vcmask 1041408   ;;  %vm4016_vm13 = vcmask 552448   ;;  %vm4521_vm14 = vcmask 556032   ;;  %vm5809_vm15 = vcmask 261120  }
  0x10   : > { %s6981_s20 = smov 44   ;;  %s6982_s21 = smov 48  }
  0x11   : > { %s7052_s8 = scalar_lea.vmem %s10167_s1, %s6785_s28  ;;  %s8032_s12 = scalar_lea.vmem %s10166_s0, %s6785_s28 }
  0x12   : > { %v483_v0 = vld [vmem:[%s7052_s8 + $0x19] sm:$0xff]  ;;  %v481_v1 = vld [vmem:[%s7052_s8 + $0x1] sm:$0xff]  ;;  %v485_v4 = vld [vmem:[%s7052_s8 + $0x31] sm:$0xff]  ;;  %s6983_s22 = smov 52   ;;  %s6984_s23 = smov 56  }
  0x13   : > { %v515_v2 = vpack.c.bf16 %v483_v0, %v483_v0  ;;  %v513_v3 = vpack.c.bf16 %v481_v1, %v481_v1  ;;  %v517_v5 = vpack.c.bf16 %v485_v4, %v485_v4  ;;  %v484_v6 = vld [vmem:[%s7052_s8 + $0x21] sm:$0xff]  ;;  %v482_v7 = vld [vmem:[%s7052_s8 + $0x9] sm:$0xff]  ;;  %v486_v8 = vld [vmem:[%s7052_s8 + $0x39] sm:$0xff]  ;;  %s6985_s29 = smov 60  }
  0x14   : > { %v516_v9 = vpack.c.bf16 %v484_v6, %v484_v6  ;;  %v514_v10 = vpack.c.bf16 %v482_v7, %v482_v7  ;;  %v518_v11 = vpack.c.bf16 %v486_v8, %v486_v8  ;;  %v488_v12 = vld [vmem:[%s7052_s8 + $0x51] sm:$0xff]  ;;  %v487_v13 = vld [vmem:[%s7052_s8 + $0x49] sm:$0xff]  ;;  %v489_v14 = vld [vmem:[%s7052_s8 + $0x61] sm:$0xff] }
  0x15   : > { %581 = vrot.lane.b32.xlu1 %v515_v2, %s6976_s9  ;;  %577 = vrot.lane.b32.xlu0 %v513_v3, %s6976_s9  ;;  %v520_v15 = vpack.c.bf16 %v488_v12, %v488_v12  ;;  %v519_v16 = vpack.c.bf16 %v487_v13, %v487_v13  ;;  %v521_v17 = vpack.c.bf16 %v489_v14, %v489_v14  ;;  %v491_v18 = vld [vmem:[%s7052_s8 + $0x79] sm:$0xff]  ;;  %v490_v19 = vld [vmem:[%s7052_s8 + $0x69] sm:$0xff] }
  0x16   : > { %585 = vrot.lane.b32.xlu2 %v517_v5, %s6976_s9  ;;  %v492_v20 = vld [vmem:[%s7052_s8 + $0x81] sm:$0xff]  ;;  %v523_v21 = vpack.c.bf16 %v491_v18, %v491_v18  ;;  %v522_v22 = vpack.c.bf16 %v490_v19, %v490_v19  ;;  %v494_v24 = vld [vmem:[%s7052_s8 + $0x99] sm:$0xff]  ;;  %v493_v25 = vld [vmem:[%s7052_s8 + $0x91] sm:$0xff] }
  0x17   : > { %v524_v23 = vpack.c.bf16 %v492_v20, %v492_v20  ;;  %v495_v26 = vld [vmem:[%s7052_s8 + $0xa9] sm:$0xff]  ;;  %v526_v27 = vpack.c.bf16 %v494_v24, %v494_v24  ;;  %v525_v28 = vpack.c.bf16 %v493_v25, %v493_v25  ;;  %v497_v30 = vld [vmem:[%s7052_s8 + $0xc1] sm:$0xff]  ;;  %v496_v31 = vld [vmem:[%s7052_s8 + $0xb1] sm:$0xff] }
  0x18   : > { %v527_v29 = vpack.c.bf16 %v495_v26, %v495_v26  ;;  %v498_v32 = vld [vmem:[%s7052_s8 + $0xc9] sm:$0xff]  ;;  %v529_v33 = vpack.c.bf16 %v497_v30, %v497_v30  ;;  %v528_v34 = vpack.c.bf16 %v496_v31, %v496_v31  ;;  %v500_v36 = vld [vmem:[%s7052_s8 + $0xe1] sm:$0xff]  ;;  %v499_v37 = vld [vmem:[%s7052_s8 + $0xd9] sm:$0xff] }
  0x19   : > { %v530_v35 = vpack.c.bf16 %v498_v32, %v498_v32  ;;  %v501_v38 = vld [vmem:[%s7052_s8 + $0xf1] sm:$0xff]  ;;  %v532_v39 = vpack.c.bf16 %v500_v36, %v500_v36  ;;  %v531_v40 = vpack.c.bf16 %v499_v37, %v499_v37  ;;  %v503_v42 = vld [vmem:[%s7052_s8 + $0x109] sm:$0xff]  ;;  %v502_v43 = vld [vmem:[%s7052_s8 + $0xf9] sm:$0xff] }
  0x1a   : > { %v533_v41 = vpack.c.bf16 %v501_v38, %v501_v38  ;;  %v504_v44 = vld [vmem:[%s7052_s8 + $0x111] sm:$0xff]  ;;  %v535_v45 = vpack.c.bf16 %v503_v42, %v503_v42  ;;  %v534_v46 = vpack.c.bf16 %v502_v43, %v502_v43  ;;  %v506_v48 = vld [vmem:[%s7052_s8 + $0x129] sm:$0xff]  ;;  %v505_v49 = vld [vmem:[%s7052_s8 + $0x121] sm:$0xff] }
  0x1b   : > { %v536_v47 = vpack.c.bf16 %v504_v44, %v504_v44  ;;  %v507_v50 = vld [vmem:[%s7052_s8 + $0x139] sm:$0xff]  ;;  %v538_v51 = vpack.c.bf16 %v506_v48, %v506_v48  ;;  %v537_v52 = vpack.c.bf16 %v505_v49, %v505_v49  ;;  %v509_v54 = vld [vmem:[%s7052_s8 + $0x151] sm:$0xff]  ;;  %v508_v55 = vld [vmem:[%s7052_s8 + $0x141] sm:$0xff] }
  0x1c   : > { %v539_v53 = vpack.c.bf16 %v507_v50, %v507_v50  ;;  %v510_v56 = vld [vmem:[%s7052_s8 + $0x159] sm:$0xff]  ;;  %v541_v57 = vpack.c.bf16 %v509_v54, %v509_v54  ;;  %v540_v58 = vpack.c.bf16 %v508_v55, %v508_v55  ;;  %v512_v60 = vld [vmem:[%s7052_s8 + $0x171] sm:$0xff]  ;;  %v511_v61 = vld [vmem:[%s7052_s8 + $0x169] sm:$0xff] }
  0x1d   : > { %583 = vrot.lane.b32.xlu1 %v516_v9, %s6976_s9  ;;  %579 = vrot.lane.b32.xlu0 %v514_v10, %s6976_s9  ;;  %v542_v59 = vpack.c.bf16 %v510_v56, %v510_v56  ;;  %v706_v62 = vld [vmem:[%s7052_s8 + $0x2] sm:$0xff]  ;;  %v544_v63 = vpack.c.bf16 %v512_v60, %v512_v60  ;;  %v543_v0 = vpack.c.bf16 %v511_v61, %v511_v61  ;;  %v388_v2 = vld [vmem:[%s7052_s8 + $0x30] sm:$0xff] }
  0x1e   : > { %587 = vrot.lane.b32.xlu2 %v518_v11, %s6976_s9  ;;  %v738_v1 = vpack.c.bf16 %v706_v62, %v706_v62  ;;  %v386_v3 = vld [vmem:[%s7052_s8 + $0x18] sm:$0xff]  ;;  %v7121_v4 = vpack.c.bf16 %v388_v2, %v388_v2  ;;  %v707_v7 = vld [vmem:[%s7052_s8 + $0xa] sm:$0xff]  ;;  %v709_v8 = vld [vmem:[%s7052_s8 + $0x22] sm:$0xff] }
  0x1f   : > { %v7123_v5 = vpack.c.bf16 %v386_v3, %v386_v3  ;;  %v708_v6 = vld [vmem:[%s7052_s8 + $0x1a] sm:$0xff]  ;;  %v739_v11 = vpack.c.bf16 %v707_v7, %v707_v7  ;;  %v7136_v13 = vpack.c.bf16 %v709_v8, %v709_v8  ;;  %v710_v19 = vld [vmem:[%s7052_s8 + $0x32] sm:$0xff]  ;;  %v712_v20 = vld [vmem:[%s7052_s8 + $0x4a] sm:$0xff] }
  0x20   : > { %453 = vst.msk [vmem:[#allocation2 + $0x30] sm:$0xf] %vm448_vm0, %v7121_v4  ;;  %v384_v9 = vld [vmem:[%s7052_s8] sm:$0xff]  ;;  %v7134_v10 = vpack.c.bf16 %v708_v6, %v708_v6  ;;  %v389_v14 = vld [vmem:[%s7052_s8 + $0x38] sm:$0xff]  ;;  %v7163_v26 = vpack.c.bf16 %v712_v20, %v712_v20  ;;  %v720_v56 = vld [vmem:[%s7052_s8 + $0xaa] sm:$0xff] }
  0x21   : > { %451 = vst.msk [vmem:[#allocation2 + $0x18] sm:$0xf] %vm448_vm0, %v7123_v5  ;;  %v416_v12 = vpack.c.bf16 %v384_v9, %v384_v9  ;;  %v711_v18 = vld [vmem:[%s7052_s8 + $0x3a] sm:$0xff]  ;;  %v714_v31 = vld [vmem:[%s7052_s8 + $0x62] sm:$0xff]  ;;  %v713_v32 = vld [vmem:[%s7052_s8 + $0x52] sm:$0xff] }
  0x22   : > { %v7188_v36 = vpack.c.bf16 %v713_v32, %v713_v32  ;;  %v717_v44 = vld [vmem:[%s7052_s8 + $0x82] sm:$0xff]  ;;  %v397_v54 = vld [vmem:[%s7052_s8 + $0x98] sm:$0xff]  ;;  %v396_v62 = vld [vmem:[%s7052_s8 + $0x90] sm:$0xff] }
  0x23   : > { %449 = vst.msk [vmem:[#allocation2] sm:$0xf] %vm448_vm0, %v416_v12  ;;  %v7217_v48 = vpack.c.bf16 %v717_v44, %v717_v44  ;;  %v7242_v60 = vpack.c.bf16 %v397_v54, %v397_v54  ;;  %v721_v61 = vld [vmem:[%s7052_s8 + $0xb2] sm:$0xff]  ;;  %v7252_v2 = vpack.c.bf16 %v396_v62, %v396_v62  ;;  %v401_v6 = vld [vmem:[%s7052_s8 + $0xc8] sm:$0xff]  ;;  %v400_v7 = vld [vmem:[%s7052_s8 + $0xc0] sm:$0xff] }
  0x24   : > { %v7255_v3 = vpack.c.bf16 %v721_v61, %v721_v61  ;;  %v7267_v8 = vpack.c.bf16 %v401_v6, %v401_v6  ;;  %v723_v9 = vld [vmem:[%s7052_s8 + $0xca] sm:$0xff]  ;;  %v727_v44 = vld [vmem:[%s7052_s8 + $0xfa] sm:$0xff] }
  0x25   : > { %591 = vrot.lane.b32.xlu1 %v520_v15, %s6976_s9  ;;  %589 = vrot.lane.b32.xlu0 %v519_v16, %s6976_s9  ;;  %v387_v15 = vld [vmem:[%s7052_s8 + $0x20] sm:$0xff]  ;;  %v7144_v16 = vpack.c.bf16 %v389_v14, %v389_v14  ;;  %462 = vst.msk [vmem:[#allocation2 + $0x9c] sm:$0xf] %vm448_vm0, %v7242_v60  ;;  %v7281_v20 = vpack.c.bf16 %v723_v9, %v723_v9  ;;  %v728_v61 = vld [vmem:[%s7052_s8 + $0x10a] sm:$0xff] }
  0x26   : > { %593 = vrot.lane.b32.xlu2 %v521_v17, %s6976_s9  ;;  %v7146_v17 = vpack.c.bf16 %v387_v15, %v387_v15  ;;  %461 = vst.msk [vmem:[#allocation2 + $0x90] sm:$0xf] %vm448_vm0, %v7252_v2  ;;  %v7275_v15 = vpack.c.bf16 %v400_v7, %v400_v7  ;;  %v7321_v54 = vpack.c.bf16 %v727_v44, %v727_v44  ;;  %v730_v7 = vld [vmem:[%s7052_s8 + $0x122] sm:$0xff]  ;;  %v405_v9 = vld [vmem:[%s7052_s8 + $0xf8] sm:$0xff] }
  0x27   : > { %454 = vst.msk [vmem:[#allocation2 + $0x3c] sm:$0xf] %vm448_vm0, %v7144_v16 }
  0x28   : > { %452 = vst.msk [vmem:[#allocation2 + $0x24] sm:$0xf] %vm448_vm0, %v7146_v17 }
  0x29   : > { %466 = vst.msk [vmem:[#allocation2 + $0xcc] sm:$0xf] %vm448_vm0, %v7267_v8 }
  0x2a   : > { %465 = vst.msk [vmem:[#allocation2 + $0xc0] sm:$0xf] %vm448_vm0, %v7275_v15 }
  0x2d   : > { %597 = vrot.lane.b32.xlu1 %v523_v21, %s6976_s9  ;;  %595 = vrot.lane.b32.xlu0 %v522_v22, %s6976_s9  ;;  %v385_v21 = vld [vmem:[%s7052_s8 + $0x8] sm:$0xff]  ;;  %v7158_v22 = vpack.c.bf16 %v711_v18, %v711_v18  ;;  %v724_v18 = vld [vmem:[%s7052_s8 + $0xda] sm:$0xff] }
  0x2e   : > { %599 = vrot.lane.b32.xlu2 %v524_v23, %s6976_s9  ;;  %v7160_v23 = vpack.c.bf16 %v710_v19, %v710_v19  ;;  %v417_v25 = vpack.c.bf16 %v385_v21, %v385_v21  ;;  %v399_v19 = vld [vmem:[%s7052_s8 + $0xb0] sm:$0xff] }
  0x30   : > { %450 = vst.msk [vmem:[#allocation2 + $0xc] sm:$0xf] %vm448_vm0, %v417_v25  ;;  %v7285_v25 = vpack.c.bf16 %v399_v19, %v399_v19  ;;  %v7354_v19 = vpack.c.bf16 %v730_v7, %v730_v7  ;;  %v412_v7 = vld [vmem:[%s7052_s8 + $0x150] sm:$0xff] }
  0x32   : > { %464 = vst.msk [vmem:[#allocation2 + $0xb4] sm:$0xf] %vm448_vm0, %v7285_v25 }
  0x35   : > { %603 = vrot.lane.b32.xlu1 %v526_v27, %s6976_s9  ;;  %601 = vrot.lane.b32.xlu0 %v525_v28, %s6976_s9  ;;  %v392_v27 = vld [vmem:[%s7052_s8 + $0x60] sm:$0xff]  ;;  %v391_v28 = vld [vmem:[%s7052_s8 + $0x50] sm:$0xff] }
  0x36   : > { %605 = vrot.lane.b32.xlu2 %v527_v29, %s6976_s9  ;;  %v7172_v29 = vpack.c.bf16 %v392_v27, %v392_v27  ;;  %v7174_v30 = vpack.c.bf16 %v391_v28, %v391_v28  ;;  %v7288_v27 = vpack.c.bf16 %v724_v18, %v724_v18  ;;  %v404_v28 = vld [vmem:[%s7052_s8 + $0xf0] sm:$0xff]  ;;  %v7351_v18 = vpack.c.bf16 %v405_v9, %v405_v9 }
  0x37   : > { %v7300_v32 = vpack.c.bf16 %v404_v28, %v404_v28  ;;  %v409_v28 = vld [vmem:[%s7052_s8 + $0x128] sm:$0xff] }
  0x38   : > { %457 = vst.msk [vmem:[#allocation2 + $0x60] sm:$0xf] %vm448_vm0, %v7172_v29  ;;  %v7374_v44 = vpack.c.bf16 %v409_v28, %v409_v28 }
  0x39   : > { %456 = vst.msk [vmem:[#allocation2 + $0x54] sm:$0xf] %vm448_vm0, %v7174_v30 }
  0x3a   : > { %469 = vst.msk [vmem:[#allocation2 + $0xf0] sm:$0xf] %vm448_vm0, %v7300_v32 }
  0x3b   : > { %470 = vst.msk [vmem:[#allocation2 + $0xfc] sm:$0xf] %vm448_vm0, %v7351_v18 }
  0x3c   : > { %474 = vst.msk [vmem:[#allocation2 + $0x12c] sm:$0xf] %vm448_vm0, %v7374_v44 }
  0x3d   : > { %609 = vrot.lane.b32.xlu1 %v529_v33, %s6976_s9  ;;  %607 = vrot.lane.b32.xlu0 %v528_v34, %s6976_s9  ;;  %v715_v33 = vld [vmem:[%s7052_s8 + $0x6a] sm:$0xff] }
  0x3e   : > { %611 = vrot.lane.b32.xlu2 %v530_v35, %s6976_s9  ;;  %v390_v34 = vld [vmem:[%s7052_s8 + $0x48] sm:$0xff]  ;;  %v7186_v35 = vpack.c.bf16 %v714_v31, %v714_v31  ;;  %v403_v31 = vld [vmem:[%s7052_s8 + $0xe0] sm:$0xff] }
  0x3f   : > { %v7190_v38 = vpack.c.bf16 %v390_v34, %v390_v34  ;;  %v725_v34 = vld [vmem:[%s7052_s8 + $0xe2] sm:$0xff] }
  0x41   : > { %455 = vst.msk [vmem:[#allocation2 + $0x48] sm:$0xf] %vm448_vm0, %v7190_v38 }
  0x45   : > { %615 = vrot.lane.b32.xlu1 %v532_v39, %s6976_s9  ;;  %613 = vrot.lane.b32.xlu0 %v531_v40, %s6976_s9  ;;  %v7193_v39 = vpack.c.bf16 %v715_v33, %v715_v33  ;;  %v395_v40 = vld [vmem:[%s7052_s8 + $0x80] sm:$0xff]  ;;  %v726_v33 = vld [vmem:[%s7052_s8 + $0xf2] sm:$0xff] }
  0x46   : > { %617 = vrot.lane.b32.xlu2 %v533_v41, %s6976_s9  ;;  %v394_v41 = vld [vmem:[%s7052_s8 + $0x78] sm:$0xff]  ;;  %v7203_v42 = vpack.c.bf16 %v395_v40, %v395_v40 }
  0x47   : > { %v7205_v43 = vpack.c.bf16 %v394_v41, %v394_v41  ;;  %v7308_v41 = vpack.c.bf16 %v403_v31, %v403_v31 }
  0x48   : > { %460 = vst.msk [vmem:[#allocation2 + $0x84] sm:$0xf] %vm448_vm0, %v7203_v42 }
  0x49   : > { %459 = vst.msk [vmem:[#allocation2 + $0x78] sm:$0xf] %vm448_vm0, %v7205_v43 }
  0x4a   : > { %468 = vst.msk [vmem:[#allocation2 + $0xe4] sm:$0xf] %vm448_vm0, %v7308_v41 }
  0x4d   : > { %621 = vrot.lane.b32.xlu1 %v535_v45, %s6976_s9  ;;  %619 = vrot.lane.b32.xlu0 %v534_v46, %s6976_s9  ;;  %v716_v45 = vld [vmem:[%s7052_s8 + $0x7a] sm:$0xff]  ;;  %v718_v46 = vld [vmem:[%s7052_s8 + $0x92] sm:$0xff] }
  0x4e   : > { %623 = vrot.lane.b32.xlu2 %v536_v47, %s6976_s9  ;;  %v393_v47 = vld [vmem:[%s7052_s8 + $0x68] sm:$0xff]  ;;  %v7219_v49 = vpack.c.bf16 %v716_v45, %v716_v45  ;;  %v402_v45 = vld [vmem:[%s7052_s8 + $0xd8] sm:$0xff] }
  0x55   : > { %627 = vrot.lane.b32.xlu1 %v538_v51, %s6976_s9  ;;  %625 = vrot.lane.b32.xlu0 %v537_v52, %s6976_s9  ;;  %v7221_v51 = vpack.c.bf16 %v393_v47, %v393_v47  ;;  %v7224_v52 = vpack.c.bf16 %v718_v46, %v718_v46  ;;  %v7314_v46 = vpack.c.bf16 %v726_v33, %v726_v33  ;;  %v732_v33 = vld [vmem:[%s7052_s8 + $0x13a] sm:$0xff] }
  0x56   : > { %629 = vrot.lane.b32.xlu2 %v539_v53, %s6976_s9  ;;  %v398_v53 = vld [vmem:[%s7052_s8 + $0xa8] sm:$0xff]  ;;  %v7316_v47 = vpack.c.bf16 %v725_v34, %v725_v34 }
  0x57   : > { %458 = vst.msk [vmem:[#allocation2 + $0x6c] sm:$0xf] %vm448_vm0, %v7221_v51  ;;  %v7234_v55 = vpack.c.bf16 %v398_v53, %v398_v53  ;;  %v7318_v53 = vpack.c.bf16 %v402_v45, %v402_v45  ;;  %v731_v34 = vld [vmem:[%s7052_s8 + $0x12a] sm:$0xff]  ;;  %v733_v45 = vld [vmem:[%s7052_s8 + $0x142] sm:$0xff] }
  0x59   : > { %463 = vst.msk [vmem:[#allocation2 + $0xa8] sm:$0xf] %vm448_vm0, %v7234_v55 }
  0x5a   : > { %467 = vst.msk [vmem:[#allocation2 + $0xd8] sm:$0xf] %vm448_vm0, %v7318_v53 }
  0x5d   : > { %633 = vrot.lane.b32.xlu1 %v541_v57, %s6976_s9  ;;  %631 = vrot.lane.b32.xlu0 %v540_v58, %s6976_s9  ;;  %v719_v57 = vld [vmem:[%s7052_s8 + $0x9a] sm:$0xff] }
  0x5e   : > { %635 = vrot.lane.b32.xlu2 %v542_v59, %s6976_s9 }
  0x65   : > { %639 = vrot.lane.b32.xlu1 %v544_v63, %s6976_s9  ;;  %637 = vrot.lane.b32.xlu0 %v543_v0, %s6976_s9  ;;  %v7248_v63 = vpack.c.bf16 %v720_v56, %v720_v56  ;;  %v7250_v0 = vpack.c.bf16 %v719_v57, %v719_v57  ;;  %v407_v56 = vld [vmem:[%s7052_s8 + $0x110] sm:$0xff]  ;;  %v406_v57 = vld [vmem:[%s7052_s8 + $0x108] sm:$0xff] }
  0x66   : > { %802 = vrot.lane.b32.xlu2 %v738_v1, %s6977_s10  ;;  %v7341_v6 = vpack.c.bf16 %v406_v57, %v406_v57  ;;  %v7382_v57 = vpack.c.bf16 %v731_v34, %v731_v34  ;;  %v7407_v34 = vpack.c.bf16 %v412_v7, %v412_v7  ;;  %v415_v7 = vld [vmem:[%s7052_s8 + $0x170] sm:$0xff] }
  0x68   : > { %471 = vst.msk [vmem:[#allocation2 + $0x108] sm:$0xf] %vm448_vm0, %v7341_v6 }
  0x69   : > { %477 = vst.msk [vmem:[#allocation2 + $0x150] sm:$0xf] %vm448_vm0, %v7407_v34 }
  0x6d   : > { %806 = vrot.lane.b32.xlu1 %v7134_v10, %s6977_s10  ;;  %804 = vrot.lane.b32.xlu0 %v739_v11, %s6977_s10  ;;  %v722_v11 = vld [vmem:[%s7052_s8 + $0xc2] sm:$0xff] }
  0x6e   : > { %808 = vrot.lane.b32.xlu2 %v7136_v13, %s6977_s10  ;;  %v7283_v21 = vpack.c.bf16 %v722_v11, %v722_v11 }
  0x70   : > { %v586_v24 = vpop.permute.xlu2 %585 }
  0x71   : > { %678 = vst.msk [vmem:[#allocation2 + $0x30] sm:$0xf] %vm673_vm1, %v586_v24 }
  0x75   : > { %812 = vrot.lane.b32.xlu1 %v7158_v22, %s6977_s10  ;;  %810 = vrot.lane.b32.xlu0 %v7160_v23, %s6977_s10 }
  0x76   : > { %814 = vrot.lane.b32.xlu2 %v7163_v26, %s6977_s10 }
  0x78   : > { %v588_v37 = vpop.permute.xlu2 %587 }
  0x79   : > { %679 = vst.msk [vmem:[#allocation2 + $0x3c] sm:$0xf] %vm673_vm1, %v588_v37 }
  0x7d   : > { %818 = vrot.lane.b32.xlu1 %v7186_v35, %s6977_s10  ;;  %816 = vrot.lane.b32.xlu0 %v7188_v36, %s6977_s10 }
  0x7e   : > { %820 = vrot.lane.b32.xlu2 %v7193_v39, %s6977_s10 }
  0x80   : > { %v594_v50 = vpop.permute.xlu2 %593 }
  0x81   : > { %682 = vst.msk [vmem:[#allocation2 + $0x60] sm:$0xf] %vm673_vm1, %v594_v50 }
  0x85   : > { %824 = vrot.lane.b32.xlu1 %v7217_v48, %s6977_s10  ;;  %822 = vrot.lane.b32.xlu0 %v7219_v49, %s6977_s10 }
  0x86   : > { %826 = vrot.lane.b32.xlu2 %v7224_v52, %s6977_s10 }
  0x87   : > { %v582_v58 = vpop.permute.xlu1 %581  ;;  %v578_v59 = vpop.permute.xlu0 %577 }
  0x88   : > { %676 = vst.msk [vmem:[#allocation2 + $0x18] sm:$0xf] %vm673_vm1, %v582_v58  ;;  %v600_v1 = vpop.permute.xlu2 %599  ;;  %v7333_v58 = vpack.c.bf16 %v407_v56, %v407_v56  ;;  %v7380_v56 = vpack.c.bf16 %v732_v33, %v732_v33 }
  0x89   : > { %674 = vst.msk [vmem:[#allocation2] sm:$0xf] %vm673_vm1, %v578_v59  ;;  %v729_v59 = vld [vmem:[%s7052_s8 + $0x112] sm:$0xff] }
  0x8a   : > { %685 = vst.msk [vmem:[#allocation2 + $0x84] sm:$0xf] %vm673_vm1, %v600_v1  ;;  %v7347_v11 = vpack.c.bf16 %v729_v59, %v729_v59 }
  0x8b   : > { %472 = vst.msk [vmem:[#allocation2 + $0x114] sm:$0xf] %vm448_vm0, %v7333_v58 }
  0x8c   : > { %10186 = vst [vmem:[#allocation3_spill] sm:$0xff] %v7380_v56 }
  0x8d   : > { %830 = vrot.lane.b32.xlu1 %v7248_v63, %s6977_s10  ;;  %828 = vrot.lane.b32.xlu0 %v7250_v0, %s6977_s10 }
  0x8e   : > { %832 = vrot.lane.b32.xlu2 %v7255_v3, %s6977_s10 }
  0x8f   : > { %v584_v12 = vpop.permute.xlu1 %583  ;;  %v580_v14 = vpop.permute.xlu0 %579 }
  0x90   : > { %677 = vst.msk [vmem:[#allocation2 + $0x24] sm:$0xf] %vm673_vm1, %v584_v12  ;;  %v606_v24 = vpop.permute.xlu2 %605  ;;  %v7349_v12 = vpack.c.bf16 %v728_v61, %v728_v61 }
  0x91   : > { %675 = vst.msk [vmem:[#allocation2 + $0xc] sm:$0xf] %vm673_vm1, %v580_v14 }
  0x92   : > { %688 = vst.msk [vmem:[#allocation2 + $0xa8] sm:$0xf] %vm673_vm1, %v606_v24  ;;  %v410_v24 = vld [vmem:[%s7052_s8 + $0x138] sm:$0xff] }
  0x93   : > { %v7366_v31 = vpack.c.bf16 %v410_v24, %v410_v24  ;;  %v734_v24 = vld [vmem:[%s7052_s8 + $0x152] sm:$0xff] }
  0x95   : > { %836 = vrot.lane.b32.xlu1 %v7281_v20, %s6977_s10  ;;  %834 = vrot.lane.b32.xlu0 %v7283_v21, %s6977_s10  ;;  %475 = vst.msk [vmem:[#allocation2 + $0x138] sm:$0xf] %vm448_vm0, %v7366_v31 }
  0x96   : > { %838 = vrot.lane.b32.xlu2 %v7288_v27, %s6977_s10 }
  0x97   : > { %v592_v37 = vpop.permute.xlu1 %591  ;;  %v590_v40 = vpop.permute.xlu0 %589 }
  0x98   : > { %681 = vst.msk [vmem:[#allocation2 + $0x54] sm:$0xf] %vm673_vm1, %v592_v37  ;;  %v612_v50 = vpop.permute.xlu2 %611 }
  0x99   : > { %680 = vst.msk [vmem:[#allocation2 + $0x48] sm:$0xf] %vm673_vm1, %v590_v40 }
  0x9a   : > { %691 = vst.msk [vmem:[#allocation2 + $0xcc] sm:$0xf] %vm673_vm1, %v612_v50  ;;  %v408_v50 = vld [vmem:[%s7052_s8 + $0x120] sm:$0xff] }
  0x9b   : > { %v7384_v61 = vpack.c.bf16 %v408_v50, %v408_v50  ;;  %v7415_v50 = vpack.c.bf16 %v734_v24, %v734_v24  ;;  %v737_v24 = vld [vmem:[%s7052_s8 + $0x172] sm:$0xff] }
  0x9d   : > { %842 = vrot.lane.b32.xlu1 %v7314_v46, %s6977_s10  ;;  %840 = vrot.lane.b32.xlu0 %v7316_v47, %s6977_s10  ;;  %473 = vst.msk [vmem:[#allocation2 + $0x120] sm:$0xf] %vm448_vm0, %v7384_v61 }
  0x9e   : > { %844 = vrot.lane.b32.xlu2 %v7321_v54, %s6977_s10 }
  0x9f   : > { %v598_v62 = vpop.permute.xlu1 %597  ;;  %v596_v1 = vpop.permute.xlu0 %595 }
  0xa0   : > { %684 = vst.msk [vmem:[#allocation2 + $0x78] sm:$0xf] %vm673_vm1, %v598_v62  ;;  %v618_v14 = vpop.permute.xlu2 %617  ;;  %v7387_v62 = vpack.c.bf16 %v733_v45, %v733_v45 }
  0xa1   : > { %683 = vst.msk [vmem:[#allocation2 + $0x6c] sm:$0xf] %vm673_vm1, %v596_v1  ;;  %v413_v1 = vld [vmem:[%s7052_s8 + $0x158] sm:$0xff] }
  0xa2   : > { %694 = vst.msk [vmem:[#allocation2 + $0xf0] sm:$0xf] %vm673_vm1, %v618_v14  ;;  %v7399_v9 = vpack.c.bf16 %v413_v1, %v413_v1  ;;  %v735_v14 = vld [vmem:[%s7052_s8 + $0x15a] sm:$0xff] }
  0xa3   : > { %v7413_v45 = vpack.c.bf16 %v735_v14, %v735_v14  ;;  %v7431_v14 = vpack.c.bf16 %v415_v7, %v415_v7 }
  0xa4   : > { %478 = vst.msk [vmem:[#allocation2 + $0x15c] sm:$0xf] %vm448_vm0, %v7399_v9 }
  0xa5   : > { %848 = vrot.lane.b32.xlu1 %v7347_v11, %s6977_s10  ;;  %846 = vrot.lane.b32.xlu0 %v7349_v12, %s6977_s10  ;;  %10187 = vst [vmem:[#allocation4_spill] sm:$0xff] %v7413_v45 }
  0xa6   : > { %850 = vrot.lane.b32.xlu2 %v7354_v19, %s6977_s10  ;;  %480 = vst.msk [vmem:[#allocation2 + $0x174] sm:$0xf] %vm448_vm0, %v7431_v14 }
  0xa7   : > { %v604_v37 = vpop.permute.xlu1 %603  ;;  %v602_v40 = vpop.permute.xlu0 %601 }
  0xa8   : > { %687 = vst.msk [vmem:[#allocation2 + $0x9c] sm:$0xf] %vm673_vm1, %v604_v37  ;;  %v624_v59 = vpop.permute.xlu2 %623  ;;  %v736_v37 = vld [vmem:[%s7052_s8 + $0x16a] sm:$0xff] }
  0xa9   : > { %686 = vst.msk [vmem:[#allocation2 + $0x90] sm:$0xf] %vm673_vm1, %v602_v40  ;;  %v411_v40 = vld [vmem:[%s7052_s8 + $0x140] sm:$0xff] }
  0xaa   : > { %697 = vst.msk [vmem:[#allocation2 + $0x114] sm:$0xf] %vm673_vm1, %v624_v59  ;;  %v7417_v1 = vpack.c.bf16 %v411_v40, %v411_v40  ;;  %v7441_v40 = vpack.c.bf16 %v737_v24, %v737_v24 }
  0xac   : > { %476 = vst.msk [vmem:[#allocation2 + $0x144] sm:$0xf] %vm448_vm0, %v7417_v1 }
  0xad   : > { %854 = vrot.lane.b32.xlu1 %v7380_v56, %s6977_s10  ;;  %852 = vrot.lane.b32.xlu0 %v7382_v57, %s6977_s10  ;;  %v7420_v56 = vpack.c.bf16 %v736_v37, %v736_v37  ;;  %v414_v37 = vld [vmem:[%s7052_s8 + $0x168] sm:$0xff] }
  0xae   : > { %856 = vrot.lane.b32.xlu2 %v7387_v62, %s6977_s10 }
  0xaf   : > { %v610_v28 = vpop.permute.xlu1 %609  ;;  %v608_v33 = vpop.permute.xlu0 %607 }
  0xb0   : > { %690 = vst.msk [vmem:[#allocation2 + $0xc0] sm:$0xf] %vm673_vm1, %v610_v28  ;;  %v630_v59 = vpop.permute.xlu2 %629 }
  0xb1   : > { %689 = vst.msk [vmem:[#allocation2 + $0xb4] sm:$0xf] %vm673_vm1, %v608_v33 }
  0xb2   : > { %700 = vst.msk [vmem:[#allocation2 + $0x138] sm:$0xf] %vm673_vm1, %v630_v59 }
  0xb5   : > { %860 = vrot.lane.b32.xlu1 %v7413_v45, %s6977_s10  ;;  %858 = vrot.lane.b32.xlu0 %v7415_v50, %s6977_s10  ;;  %v7443_v45 = vpack.c.bf16 %v414_v37, %v414_v37 }
  0xb6   : > { %862 = vrot.lane.b32.xlu2 %v7420_v56, %s6977_s10 }
  0xb7   : > { %v616_v28 = vpop.permute.xlu1 %615  ;;  %v614_v33 = vpop.permute.xlu0 %613  ;;  %479 = vst.msk [vmem:[#allocation2 + $0x168] sm:$0xf] %vm448_vm0, %v7443_v45 }
  0xb8   : > { %693 = vst.msk [vmem:[#allocation2 + $0xe4] sm:$0xf] %vm673_vm1, %v616_v28  ;;  %v636_v59 = vpop.permute.xlu2 %635 }
  0xb9   : > { %692 = vst.msk [vmem:[#allocation2 + $0xd8] sm:$0xf] %vm673_vm1, %v614_v33 }
  0xba   : > { %703 = vst.msk [vmem:[#allocation2 + $0x15c] sm:$0xf] %vm673_vm1, %v636_v59  ;;  %v6751_v59 = vld [vmem:[%s10168_s2 + $0x38] sm:$0xff] }
  0xbb   : > { %4574 = vmatpush.bf16.msra.mxu0 %v6751_v59  ;;  %6764 = vmatpush.bf16.msra.mxu3 %v6751_v59  ;;  %v6114_v59 = vld [vmem:[%s7052_s8 + $0x182] sm:$0xff] }
  0xbd   : > { %1028 = vrot.lane.b32.xlu1 %v7123_v5, %s6978_s11  ;;  %864 = vrot.lane.b32.xlu0 %v7441_v40, %s6977_s10 }
  0xbe   : > { %1030 = vrot.lane.b32.xlu2 %v7146_v17, %s6978_s11 }
  0xbf   : > { %v622_v7 = vpop.permute.xlu1 %621  ;;  %v620_v28 = vpop.permute.xlu0 %619 }
  0xc0   : > { %696 = vst.msk [vmem:[#allocation2 + $0x108] sm:$0xf] %vm673_vm1, %v622_v7  ;;  %v803_v24 = vpop.permute.xlu2 %802  ;;  %v6050_v7 = vld [vmem:[%s7052_s8 + $0x180] sm:$0xff] }
  0xc1   : > { %695 = vst.msk [vmem:[#allocation2 + $0xfc] sm:$0xf] %vm673_vm1, %v620_v28 }
  0xc2   : > { %899 = vst.msk [vmem:[#allocation2] sm:$0xf] %vm898_vm2, %v803_v24 }
  0xc5   : > { %1034 = vrot.lane.b32.xlu1 %v7144_v16, %s6978_s11  ;;  %1032 = vrot.lane.b32.xlu0 %v7121_v4, %s6978_s11 }
  0xc6   : > { %1036 = vrot.lane.b32.xlu2 %v7190_v38, %s6978_s11 }
  0xc7   : > { %v628_v5 = vpop.permute.xlu1 %627  ;;  %v626_v33 = vpop.permute.xlu0 %625 }
  0xc8   : > { %699 = vst.msk [vmem:[#allocation2 + $0x12c] sm:$0xf] %vm673_vm1, %v628_v5  ;;  %v809_v17 = vpop.permute.xlu2 %808  ;;  %v6051_v5 = vld [vmem:[%s7052_s8 + $0x188] sm:$0xff] }
  0xc9   : > { %698 = vst.msk [vmem:[#allocation2 + $0x120] sm:$0xf] %vm673_vm1, %v626_v33  ;;  %v6747_v33 = vld [vmem:[%s10168_s2 + $0x18] sm:$0xff] }
  0xca   : > { %902 = vst.msk [vmem:[#allocation2 + $0x24] sm:$0xf] %vm898_vm2, %v809_v17  ;;  %v7557_v17 = vpack.c.bf16 %v6051_v5, %v6051_v5  ;;  %v6117_v5 = vld [vmem:[%s7052_s8 + $0x38] sm:$0xff] }
  0xcd   : > { %1040 = vrot.lane.b32.xlu1 %v7172_v29, %s6978_s11  ;;  %1038 = vrot.lane.b32.xlu0 %v7174_v30, %s6978_s11 }
  0xce   : > { %1042 = vrot.lane.b32.xlu2 %v7221_v51, %s6978_s11 }
  0xcf   : > { %v634_v16 = vpop.permute.xlu1 %633  ;;  %v632_v4 = vpop.permute.xlu0 %631 }
  0xd0   : > { %702 = vst.msk [vmem:[#allocation2 + $0x150] sm:$0xf] %vm673_vm1, %v634_v16  ;;  %v815_v38 = vpop.permute.xlu2 %814 }
  0xd1   : > { %701 = vst.msk [vmem:[#allocation2 + $0x144] sm:$0xf] %vm673_vm1, %v632_v4 }
  0xd2   : > { %905 = vst.msk [vmem:[#allocation2 + $0x48] sm:$0xf] %vm898_vm2, %v815_v38 }
  0xd5   : > { %1046 = vrot.lane.b32.xlu1 %v7203_v42, %s6978_s11  ;;  %1044 = vrot.lane.b32.xlu0 %v7205_v43, %s6978_s11 }
  0xd6   : > { %1048 = vrot.lane.b32.xlu2 %v7252_v2, %s6978_s11 }
  0xd7   : > { %v640_v29 = vpop.permute.xlu1 %639  ;;  %v638_v30 = vpop.permute.xlu0 %637 }
  0xd8   : > { %705 = vst.msk [vmem:[#allocation2 + $0x174] sm:$0xf] %vm673_vm1, %v640_v29  ;;  %v821_v51 = vpop.permute.xlu2 %820  ;;  %v6744_v29 = vld [vmem:[%s10168_s2] sm:$0xff] }
  0xd9   : > { %704 = vst.msk [vmem:[#allocation2 + $0x168] sm:$0xf] %vm673_vm1, %v638_v30 }
  0xda   : > { %908 = vst.msk [vmem:[#allocation2 + $0x6c] sm:$0xf] %vm898_vm2, %v821_v51 }
  0xdd   : > { %1052 = vrot.lane.b32.xlu1 %v7234_v55, %s6978_s11  ;;  %1050 = vrot.lane.b32.xlu0 %v7242_v60, %s6978_s11 }
  0xde   : > { %1054 = vrot.lane.b32.xlu2 %v7285_v25, %s6978_s11 }
  0xdf   : > { %v807_v42 = vpop.permute.xlu1 %806  ;;  %v805_v43 = vpop.permute.xlu0 %804 }
  0xe0   : > { %901 = vst.msk [vmem:[#allocation2 + $0x18] sm:$0xf] %vm898_vm2, %v807_v42  ;;  %v827_v2 = vpop.permute.xlu2 %826 }
  0xe1   : > { %900 = vst.msk [vmem:[#allocation2 + $0xc] sm:$0xf] %vm898_vm2, %v805_v43 }
  0xe2   : > { %911 = vst.msk [vmem:[#allocation2 + $0x90] sm:$0xf] %vm898_vm2, %v827_v2 }
  0xe5   : > { %1058 = vrot.lane.b32.xlu1 %v7267_v8, %s6978_s11  ;;  %1056 = vrot.lane.b32.xlu0 %v7275_v15, %s6978_s11 }
  0xe6   : > { %1060 = vrot.lane.b32.xlu2 %v7318_v53, %s6978_s11 }
  0xe7   : > { %v813_v55 = vpop.permute.xlu1 %812  ;;  %v811_v60 = vpop.permute.xlu0 %810 }
  0xe8   : > { %904 = vst.msk [vmem:[#allocation2 + $0x3c] sm:$0xf] %vm898_vm2, %v813_v55  ;;  %v833_v37 = vpop.permute.xlu2 %832 }
  0xe9   : > { %903 = vst.msk [vmem:[#allocation2 + $0x30] sm:$0xf] %vm898_vm2, %v811_v60 }
  0xea   : > { %914 = vst.msk [vmem:[#allocation2 + $0xb4] sm:$0xf] %vm898_vm2, %v833_v37 }
  0xed   : > { %1064 = vrot.lane.b32.xlu1 %v7300_v32, %s6978_s11  ;;  %1062 = vrot.lane.b32.xlu0 %v7308_v41, %s6978_s11 }
  0xee   : > { %1066 = vrot.lane.b32.xlu2 %v7351_v18, %s6978_s11 }
  0xef   : > { %v819_v8 = vpop.permute.xlu1 %818  ;;  %v817_v15 = vpop.permute.xlu0 %816 }
  0xf0   : > { %907 = vst.msk [vmem:[#allocation2 + $0x60] sm:$0xf] %vm898_vm2, %v819_v8  ;;  %v839_v53 = vpop.permute.xlu2 %838 }
  0xf1   : > { %906 = vst.msk [vmem:[#allocation2 + $0x54] sm:$0xf] %vm898_vm2, %v817_v15 }
  0xf2   : > { %917 = vst.msk [vmem:[#allocation2 + $0xd8] sm:$0xf] %vm898_vm2, %v839_v53 }
  0xf5   : > { %1070 = vrot.lane.b32.xlu1 %v7333_v58, %s6978_s11  ;;  %1068 = vrot.lane.b32.xlu0 %v7341_v6, %s6978_s11  ;;  %v6750_v58 = vld [vmem:[%s10168_s2 + $0x30] sm:$0xff] }
  0xf6   : > { %1072 = vrot.lane.b32.xlu2 %v7384_v61, %s6978_s11  ;;  %4575 = vmatpush.bf16.msra.mxu0 %v6750_v58 }
  0xf7   : > { %v825_v32 = vpop.permute.xlu1 %824  ;;  %v823_v41 = vpop.permute.xlu0 %822  ;;  %6765 = vmatpush.bf16.msra.mxu3 %v6750_v58 }
  0xf8   : > { %910 = vst.msk [vmem:[#allocation2 + $0x84] sm:$0xf] %vm898_vm2, %v825_v32  ;;  %v845_v18 = vpop.permute.xlu2 %844 }
  0xf9   : > { %909 = vst.msk [vmem:[#allocation2 + $0x78] sm:$0xf] %vm898_vm2, %v823_v41 }
  0xfa   : > { %920 = vst.msk [vmem:[#allocation2 + $0xfc] sm:$0xf] %vm898_vm2, %v845_v18  ;;  %v6115_v18 = vld [vmem:[%s7052_s8 + $0x18a] sm:$0xff] }
  0xfd   : > { %1076 = vrot.lane.b32.xlu1 %v7366_v31, %s6978_s11  ;;  %1074 = vrot.lane.b32.xlu0 %v7374_v44, %s6978_s11  ;;  %v6749_v44 = vld [vmem:[%s10168_s2 + $0x28] sm:$0xff] }
  0xfe   : > { %1078 = vrot.lane.b32.xlu2 %v7417_v1, %s6978_s11  ;;  %4576 = vmatpush.bf16.msra.mxu0 %v6749_v44  ;;  %v6748_v1 = vld [vmem:[%s10168_s2 + $0x20] sm:$0xff] }
  0xff   : > { %v831_v6 = vpop.permute.xlu1 %830  ;;  %v829_v61 = vpop.permute.xlu0 %828  ;;  %6766 = vmatpush.bf16.msra.mxu3 %v6749_v44 }
 0x100   : > { %913 = vst.msk [vmem:[#allocation2 + $0xa8] sm:$0xf] %vm898_vm2, %v831_v6  ;;  %v851_v31 = vpop.permute.xlu2 %850  ;;  %v6116_v6 = vld [vmem:[%s7052_s8 + $0x30] sm:$0xff] }
 0x101   : > { %912 = vst.msk [vmem:[#allocation2 + $0x9c] sm:$0xf] %vm898_vm2, %v829_v61  ;;  %v1315_v61 = vpack.c.bf16 %v6114_v59, %v6114_v59  ;;  %v1510_v44 = vpack.c.bf16 %v6116_v6, %v6116_v6  ;;  %v6126_v6 = vld [vmem:[%s7052_s8 + $0xa8] sm:$0xff] }
 0x102   : > { %923 = vst.msk [vmem:[#allocation2 + $0x120] sm:$0xf] %vm898_vm2, %v851_v31  ;;  %4577 = vmatpush.bf16.msra.mxu0 %v6748_v1 }
 0x103   : > { %6767 = vmatpush.bf16.msra.mxu3 %v6748_v1 }
 0x105   : > { %1082 = vrot.lane.b32.xlu1 %v7399_v9, %s6978_s11  ;;  %1080 = vrot.lane.b32.xlu0 %v7407_v34, %s6978_s11  ;;  %v7551_v9 = vpack.c.bf16 %v6050_v7, %v6050_v7  ;;  %v6054_v7 = vld [vmem:[%s7052_s8 + $0x31] sm:$0xff] }
 0x106   : > { %1084 = vrot.lane.b32.xlu2 %v7443_v45, %s6978_s11  ;;  %4578 = vmatpush.bf16.msra.mxu0 %v6747_v33  ;;  %v6746_v45 = vld [vmem:[%s10168_s2 + $0x10] sm:$0xff] }
 0x107   : > { %v837_v28 = vpop.permute.xlu1 %836  ;;  %v835_v24 = vpop.permute.xlu0 %834  ;;  %6768 = vmatpush.bf16.msra.mxu3 %v6747_v33 }
 0x108   : > { %916 = vst.msk [vmem:[#allocation2 + $0xcc] sm:$0xf] %vm898_vm2, %v837_v28  ;;  %v857_v34 = vpop.permute.xlu2 %856  ;;  %v6053_v28 = vld [vmem:[%s7052_s8 + $0x21] sm:$0xff] }
 0x109   : > { %915 = vst.msk [vmem:[#allocation2 + $0xc0] sm:$0xf] %vm898_vm2, %v835_v24  ;;  %v6118_v24 = vld [vmem:[%s7052_s8 + $0x48] sm:$0xff] }
 0x10a   : > { %926 = vst.msk [vmem:[#allocation2 + $0x144] sm:$0xf] %vm898_vm2, %v857_v34  ;;  %4579 = vmatpush.bf16.msra.mxu0 %v6746_v45 }
 0x10b   : > { %6769 = vmatpush.bf16.msra.mxu3 %v6746_v45  ;;  %v7677_v45 = vpack.c.bf16 %v6054_v7, %v6054_v7  ;;  %v1520_v7 = vpack.c.bf16 %v6126_v6, %v6126_v6 }
 0x10d   : > { %1088 = vrot.lane.b32.xlu1 %v7551_v9, %s6978_s11  ;;  %1086 = vrot.lane.b32.xlu0 %v7431_v14, %s6978_s11  ;;  %v6745_v14 = vld [vmem:[%s10168_s2 + $0x8] sm:$0xff]  ;;  %1223 = vst.msk [vmem:[#allocation2 + $0x1c] sm:$0xf] %vm448_vm0, %v7677_v45 }
 0x10e   : > { %1090 = vrot.lane.b32.xlu2 %v7557_v17, %s6978_s11  ;;  %4580 = vmatpush.bf16.msra.mxu0 %v6745_v14 }
 0x10f   : > { %v843_v16 = vpop.permute.xlu1 %842  ;;  %v841_v4 = vpop.permute.xlu0 %840  ;;  %6770 = vmatpush.bf16.msra.mxu3 %v6745_v14  ;;  %v6052_v14 = vld [vmem:[%s7052_s8 + $0x19] sm:$0xff] }
 0x110   : > { %919 = vst.msk [vmem:[#allocation2 + $0xf0] sm:$0xf] %vm898_vm2, %v843_v16  ;;  %v863_v38 = vpop.permute.xlu2 %862 }
 0x111   : > { %918 = vst.msk [vmem:[#allocation2 + $0xe4] sm:$0xf] %vm898_vm2, %v841_v4  ;;  %v6119_v4 = vld [vmem:[%s7052_s8 + $0x50] sm:$0xff] }
 0x112   : > { %929 = vst.msk [vmem:[#allocation2 + $0x168] sm:$0xf] %vm898_vm2, %v863_v38  ;;  %4581 = vmatpush.bf16.msra.mxu0 %v6744_v29  ;;  %v1190_v38 = vpack.c.bf16 %v6053_v28, %v6053_v28 }
 0x113   : > { %6771 = vmatpush.bf16.msra.mxu3 %v6744_v29  ;;  %v1512_v29 = vpack.c.bf16 %v6118_v24, %v6118_v24 }
 0x114   : > { %1222 = vst.msk [vmem:[#allocation2 + $0x10] sm:$0xf] %vm448_vm0, %v1190_v38  ;;  %v6065_v38 = vld [vmem:[%s7052_s8 + $0xb1] sm:$0xff] }
 0x115   : > { %1351 = vrot.lane.b32.xlu1 %v7136_v13, %s6976_s9  ;;  %1349 = vrot.lane.b32.xlu0 %v7134_v10, %s6976_s9 }
 0x116   : > { %1353 = vrot.lane.b32.xlu2 %v7160_v23, %s6976_s9 }
 0x117   : > { %v849_v30 = vpop.permute.xlu1 %848  ;;  %v847_v51 = vpop.permute.xlu0 %846 }
 0x118   : > { %922 = vst.msk [vmem:[#allocation2 + $0x114] sm:$0xf] %vm898_vm2, %v849_v30  ;;  %v1031_v13 = vpop.permute.xlu2 %1030  ;;  %v1511_v30 = vpack.c.bf16 %v6117_v5, %v6117_v5 }
 0x119   : > { %921 = vst.msk [vmem:[#allocation2 + $0x108] sm:$0xf] %vm898_vm2, %v847_v51 }
 0x11a   : > { %1126 = vst.msk [vmem:[#allocation2 + $0xc] sm:$0xf] %vm1124_vm3, %v1031_v13  ;;  %v1189_v13 = vpack.c.bf16 %v6052_v14, %v6052_v14  ;;  %v6130_v14 = vld [vmem:[%s7052_s8 + $0xd8] sm:$0xff] }
 0x11c   : > { %1221 = vst.msk [vmem:[#allocation2 + $0x4] sm:$0xf] %vm448_vm0, %v1189_v13 }
 0x11d   : > { %1357 = vrot.lane.b32.xlu1 %v7163_v26, %s6976_s9  ;;  %1355 = vrot.lane.b32.xlu0 %v7158_v22, %s6976_s9 }
 0x11e   : > { %1359 = vrot.lane.b32.xlu2 %v7188_v36, %s6976_s9 }
 0x11f   : > { %v855_v10 = vpop.permute.xlu1 %854  ;;  %v853_v42 = vpop.permute.xlu0 %852 }
 0x120   : > { %925 = vst.msk [vmem:[#allocation2 + $0x138] sm:$0xf] %vm898_vm2, %v855_v10  ;;  %v1037_v23 = vpop.permute.xlu2 %1036  ;;  %v1513_v10 = vpack.c.bf16 %v6119_v4, %v6119_v4  ;;  %v6066_v4 = vld [vmem:[%s7052_s8 + $0xc1] sm:$0xff] }
 0x121   : > { %924 = vst.msk [vmem:[#allocation2 + $0x12c] sm:$0xf] %vm898_vm2, %v853_v42  ;;  %v6057_v42 = vld [vmem:[%s7052_s8 + $0x51] sm:$0xff] }
 0x122   : > { %1129 = vst.msk [vmem:[#allocation2 + $0x30] sm:$0xf] %vm1124_vm3, %v1037_v23  ;;  %v6056_v23 = vld [vmem:[%s7052_s8 + $0x49] sm:$0xff] }
 0x125   : > { %1363 = vrot.lane.b32.xlu1 %v7193_v39, %s6976_s9  ;;  %1361 = vrot.lane.b32.xlu0 %v7186_v35, %s6976_s9 }
 0x126   : > { %1365 = vrot.lane.b32.xlu2 %v7219_v49, %s6976_s9 }
 0x127   : > { %v861_v26 = vpop.permute.xlu1 %860  ;;  %v859_v22 = vpop.permute.xlu0 %858 }
 0x128   : > { %928 = vst.msk [vmem:[#allocation2 + $0x15c] sm:$0xf] %vm898_vm2, %v861_v26  ;;  %v1043_v36 = vpop.permute.xlu2 %1042  ;;  %v6121_v26 = vld [vmem:[%s7052_s8 + $0x68] sm:$0xff] }
 0x129   : > { %927 = vst.msk [vmem:[#allocation2 + $0x150] sm:$0xf] %vm898_vm2, %v859_v22  ;;  %v6430_v32 = vld [vmem:[#allocation2 + $0x30] sm:$0xf]  ;;  %v6120_v22 = vld [vmem:[%s7052_s8 + $0x60] sm:$0xff] }
 0x12a   : > { %1132 = vst.msk [vmem:[#allocation2 + $0x54] sm:$0xf] %vm1124_vm3, %v1043_v36 }
 0x12d   : > { %1369 = vrot.lane.b32.xlu1 %v7224_v52, %s6976_s9  ;;  %1367 = vrot.lane.b32.xlu0 %v7217_v48, %s6976_s9  ;;  %v6697_v52 = vld [vmem:[#allocation2 + $0x8] sm:$0xf0] }
 0x12e   : > { %1371 = vrot.lane.b32.xlu2 %v7250_v0, %s6976_s9 }
 0x12f   : > { %v1029_v39 = vpop.permute.xlu1 %1028  ;;  %v865_v35 = vpop.permute.xlu0 %864 }
 0x130   : > { %1125 = vst.msk [vmem:[#allocation2] sm:$0xf] %vm1124_vm3, %v1029_v39  ;;  %v1049_v49 = vpop.permute.xlu2 %1048 }
 0x131   : > { %930 = vst.msk [vmem:[#allocation2 + $0x174] sm:$0xf] %vm898_vm2, %v865_v35  ;;  %v6706_v1 = vld [vmem:[#allocation2 + $0x50] sm:$0xf0]  ;;  %v7695_v35 = vpack.c.bf16 %v6057_v42, %v6057_v42 }
 0x132   : > { %1135 = vst.msk [vmem:[#allocation2 + $0x78] sm:$0xf] %vm1124_vm3, %v1049_v49  ;;  %v6122_v49 = vld [vmem:[%s7052_s8 + $0x78] sm:$0xff] }
 0x133   : > { %1226 = vst.msk [vmem:[#allocation2 + $0x40] sm:$0xf] %vm448_vm0, %v7695_v35 }
 0x135   : > { %1375 = vrot.lane.b32.xlu1 %v7255_v3, %s6976_s9  ;;  %1373 = vrot.lane.b32.xlu0 %v7248_v63, %s6976_s9 }
 0x136   : > { %1377 = vrot.lane.b32.xlu2 %v7283_v21, %s6976_s9 }
 0x137   : > { %v1035_v48 = vpop.permute.xlu1 %1034  ;;  %v1033_v43 = vpop.permute.xlu0 %1032  ;;  %v6406_v2 = vld [vmem:[#allocation2] sm:$0xf] }
 0x138   : > { %1128 = vst.msk [vmem:[#allocation2 + $0x24] sm:$0xf] %vm1124_vm3, %v1035_v48  ;;  %v6407_v0 = vor.u32 %v6697_v52, %v6406_v2  ;;  %v1055_v55 = vpop.permute.xlu2 %1054  ;;  %v7699_v52 = vpack.c.bf16 %v6056_v23, %v6056_v23  ;;  %v6055_v48 = vld [vmem:[%s7052_s8 + $0x39] sm:$0xff]  ;;  %v1514_v2 = vpack.c.bf16 %v6120_v22, %v6120_v22  ;;  %v6064_v22 = vld [vmem:[%s7052_s8 + $0xa9] sm:$0xff] }
 0x139   : > { %1127 = vst.msk [vmem:[#allocation2 + $0x18] sm:$0xf] %vm1124_vm3, %v1033_v43  ;;  %v1515_v43 = vpack.c.bf16 %v6121_v26, %v6121_v26  ;;  %v6466_v13 = vld [vmem:[#allocation2 + $0x78] sm:$0xf]  ;;  %v6131_v23 = vld [vmem:[%s7052_s8 + $0xe0] sm:$0xff]  ;;  %v7771_v26 = vpack.c.bf16 %v6065_v38, %v6065_v38 }
 0x13a   : > { %4582 = vmatmul.bf16.vlgmr.msra.gmra.mxu0 %v6407_v0  ;;  %1138 = vst.msk [vmem:[#allocation2 + $0x9c] sm:$0xf] %vm1124_vm3, %v1055_v55  ;;  %v7703_v55 = vpack.c.bf16 %v6055_v48, %v6055_v48  ;;  %v7775_v48 = vpack.c.bf16 %v6064_v22, %v6064_v22 }
 0x13b   : > { %1225 = vst.msk [vmem:[#allocation2 + $0x34] sm:$0xf] %vm448_vm0, %v7699_v52 }
 0x13c   : > { %1224 = vst.msk [vmem:[#allocation2 + $0x28] sm:$0xf] %vm448_vm0, %v7703_v55 }
 0x13d   : > { %1381 = vrot.lane.b32.xlu1 %v7288_v27, %s6976_s9  ;;  %1379 = vrot.lane.b32.xlu0 %v7281_v20, %s6976_s9  ;;  %1234 = vst.msk [vmem:[#allocation2 + $0xa0] sm:$0xf] %vm448_vm0, %v7771_v26 }
 0x13e   : > { %1383 = vrot.lane.b32.xlu2 %v7316_v47, %s6976_s9  ;;  %1233 = vst.msk [vmem:[#allocation2 + $0x94] sm:$0xf] %vm448_vm0, %v7775_v48 }
 0x13f   : > { %v1041_v63 = vpop.permute.xlu1 %1040  ;;  %v1039_v3 = vpop.permute.xlu0 %1038  ;;  %v6700_v20 = vld [vmem:[#allocation2 + $0x20] sm:$0xf0] }
 0x140   : > { %1131 = vst.msk [vmem:[#allocation2 + $0x48] sm:$0xf] %vm1124_vm3, %v1041_v63  ;;  %v1061_v21 = vpop.permute.xlu2 %1060  ;;  %v6418_v27 = vld [vmem:[#allocation2 + $0x18] sm:$0xf]  ;;  %v1516_v63 = vpack.c.bf16 %v6122_v49, %v6122_v49 }
 0x141   : > { %1130 = vst.msk [vmem:[#allocation2 + $0x3c] sm:$0xf] %vm1124_vm3, %v1039_v3  ;;  %v6419_v47 = vor.u32 %v6700_v20, %v6418_v27  ;;  %v6060_v20 = vld [vmem:[%s7052_s8 + $0x79] sm:$0xff] }
 0x142   : > { %1141 = vst.msk [vmem:[#allocation2 + $0xc0] sm:$0xf] %vm1124_vm3, %v1061_v21 }
 0x145   : > { %1387 = vrot.lane.b32.xlu1 %v7321_v54, %s6976_s9  ;;  %1385 = vrot.lane.b32.xlu0 %v7314_v46, %s6976_s9 }
 0x146   : > { %1389 = vrot.lane.b32.xlu2 %v7349_v12, %s6976_s9 }
 0x147   : > { %v1047_v60 = vpop.permute.xlu1 %1046  ;;  %v1045_v37 = vpop.permute.xlu0 %1044 }
 0x148   : > { %1134 = vst.msk [vmem:[#allocation2 + $0x6c] sm:$0xf] %vm1124_vm3, %v1047_v60  ;;  %v1067_v8 = vpop.permute.xlu2 %1066  ;;  %v6059_v60 = vld [vmem:[%s7052_s8 + $0x69] sm:$0xff] }
 0x149   : > { %1133 = vst.msk [vmem:[#allocation2 + $0x60] sm:$0xf] %vm1124_vm3, %v1045_v37  ;;  %v6124_v37 = vld [vmem:[%s7052_s8 + $0x90] sm:$0xff] }
 0x14a   : > { %4587 = vmatmul.bf16.gmra.mxu0 %v6419_v47  ;;  %1144 = vst.msk [vmem:[#allocation2 + $0xe4] sm:$0xf] %vm1124_vm3, %v1067_v8  ;;  %v6123_v47 = vld [vmem:[%s7052_s8 + $0x80] sm:$0xff] }
 0x14d   : > { %1393 = vrot.lane.b32.xlu1 %v7354_v19, %s6976_s9  ;;  %1391 = vrot.lane.b32.xlu0 %v7347_v11, %s6976_s9  ;;  %v10188_v19 = vld [vmem:[#allocation3_spill] sm:$0xff]  ;;  %v6703_v11 = vld [vmem:[#allocation2 + $0x38] sm:$0xf0] }
 0x14e   : > { %1395 = vrot.lane.b32.xlu2 %v7382_v57, %s6976_s9  ;;  %v6431_v57 = vor.u32 %v6703_v11, %v6430_v32  ;;  %v6058_v32 = vld [vmem:[%s7052_s8 + $0x61] sm:$0xff] }
 0x14f   : > { %v1053_v46 = vpop.permute.xlu1 %1052  ;;  %v1051_v54 = vpop.permute.xlu0 %1050  ;;  %v6709_v21 = vld [vmem:[#allocation2 + $0x68] sm:$0xf0] }
 0x150   : > { %1137 = vst.msk [vmem:[#allocation2 + $0x90] sm:$0xf] %vm1124_vm3, %v1053_v46  ;;  %v1073_v12 = vpop.permute.xlu2 %1072  ;;  %v6454_v3 = vld [vmem:[#allocation2 + $0x60] sm:$0xf] }
 0x151   : > { %1136 = vst.msk [vmem:[#allocation2 + $0x84] sm:$0xf] %vm1124_vm3, %v1051_v54 }
 0x152   : > { %1147 = vst.msk [vmem:[#allocation2 + $0x108] sm:$0xf] %vm1124_vm3, %v1073_v12  ;;  %v7719_v12 = vpack.c.bf16 %v6060_v20, %v6060_v20 }
 0x154   : > { %1229 = vst.msk [vmem:[#allocation2 + $0x64] sm:$0xf] %vm448_vm0, %v7719_v12 }
 0x155   : > { %1399 = vrot.lane.b32.xlu1 %v7387_v62, %s6976_s9  ;;  %1397 = vrot.lane.b32.xlu0 %v10188_v19, %s6976_s9  ;;  %v10189_v62 = vld [vmem:[#allocation4_spill] sm:$0xff]  ;;  %v6455_v19 = vor.u32 %v6709_v21, %v6454_v3  ;;  %v6132_v3 = vld [vmem:[%s7052_s8 + $0xf0] sm:$0xff] }
 0x156   : > { %1401 = vrot.lane.b32.xlu2 %v7415_v50, %s6976_s9 }
 0x157   : > { %v1059_v15 = vpop.permute.xlu1 %1058  ;;  %v1057_v53 = vpop.permute.xlu0 %1056 }
 0x158   : > { %1140 = vst.msk [vmem:[#allocation2 + $0xb4] sm:$0xf] %vm1124_vm3, %v1059_v15  ;;  %v1079_v41 = vpop.permute.xlu2 %1078  ;;  %v6125_v15 = vld [vmem:[%s7052_s8 + $0x98] sm:$0xff] }
 0x159   : > { %1139 = vst.msk [vmem:[#allocation2 + $0xa8] sm:$0xf] %vm1124_vm3, %v1057_v53  ;;  %v7723_v53 = vpack.c.bf16 %v6059_v60, %v6059_v60  ;;  %v1519_v59 = vpack.c.bf16 %v6125_v15, %v6125_v15  ;;  %v6134_v60 = vld [vmem:[%s7052_s8 + $0x108] sm:$0xff]  ;;  %v6478_v15 = vld [vmem:[#allocation2 + $0x90] sm:$0xf] }
 0x15a   : > { %4592 = vmatmul.bf16.gmra.mxu0 %v6431_v57  ;;  %1150 = vst.msk [vmem:[#allocation2 + $0x12c] sm:$0xf] %vm1124_vm3, %v1079_v41  ;;  %v1518_v57 = vpack.c.bf16 %v6124_v37, %v6124_v37  ;;  %v1517_v41 = vpack.c.bf16 %v6123_v47, %v6123_v47  ;;  %v6067_v47 = vld [vmem:[%s7052_s8 + $0xc9] sm:$0xff] }
 0x15b   : > { %1228 = vst.msk [vmem:[#allocation2 + $0x58] sm:$0xf] %vm448_vm0, %v7723_v53 }
 0x15d   : > { %1405 = vrot.lane.b32.xlu1 %v7420_v56, %s6976_s9  ;;  %1403 = vrot.lane.b32.xlu0 %v10189_v62, %s6976_s9  ;;  %v1316_v56 = vpack.c.bf16 %v6115_v18, %v6115_v18  ;;  %v7727_v18 = vpack.c.bf16 %v6058_v32, %v6058_v32  ;;  %v6715_v32 = vld [vmem:[#allocation2 + $0x98] sm:$0xf0] }
 0x15e   : > { %1407 = vrot.lane.b32.xlu2 %v7441_v40, %s6976_s9  ;;  %v6442_v40 = vld [vmem:[#allocation2 + $0x48] sm:$0xf] }
 0x15f   : > { %v1065_v58 = vpop.permute.xlu1 %1064  ;;  %v1063_v50 = vpop.permute.xlu0 %1062  ;;  %v6443_v16 = vor.u32 %v6706_v1, %v6442_v40  ;;  %1227 = vst.msk [vmem:[#allocation2 + $0x4c] sm:$0xf] %vm448_vm0, %v7727_v18  ;;  %v6061_v40 = vld [vmem:[%s7052_s8 + $0x81] sm:$0xff] }
 0x160   : > { %1143 = vst.msk [vmem:[#allocation2 + $0xd8] sm:$0xf] %vm1124_vm3, %v1065_v58  ;;  %v1085_v31 = vpop.permute.xlu2 %1084  ;;  %v6063_v58 = vld [vmem:[%s7052_s8 + $0x99] sm:$0xff]  ;;  %v7750_v24 = vpack.c.bf16 %v6061_v40, %v6061_v40 }
 0x161   : > { %1142 = vst.msk [vmem:[#allocation2 + $0xcc] sm:$0xf] %vm1124_vm3, %v1063_v50  ;;  %v6733_v27 = vld [vmem:[#allocation2 + $0x128] sm:$0xf0]  ;;  %v6062_v50 = vld [vmem:[%s7052_s8 + $0x91] sm:$0xff] }
 0x162   : > { %1153 = vst.msk [vmem:[#allocation2 + $0x150] sm:$0xf] %vm1124_vm3, %v1085_v31  ;;  %v7742_v31 = vpack.c.bf16 %v6063_v58, %v6063_v58  ;;  %v7746_v1 = vpack.c.bf16 %v6062_v50, %v6062_v50  ;;  %v6135_v58 = vld [vmem:[%s7052_s8 + $0x110] sm:$0xff] }
 0x163   : > { %1230 = vst.msk [vmem:[#allocation2 + $0x70] sm:$0xf] %vm448_vm0, %v7750_v24 }
 0x164   : > { %1232 = vst.msk [vmem:[#allocation2 + $0x88] sm:$0xf] %vm448_vm0, %v7742_v31 }
 0x165   : > { %1411 = vrot.lane.b32.xlu1 %v1316_v56, %s6976_s9  ;;  %1409 = vrot.lane.b32.xlu0 %v1315_v61, %s6976_s9  ;;  %1231 = vst.msk [vmem:[#allocation2 + $0x7c] sm:$0xf] %vm448_vm0, %v7746_v1 }
 0x166   : > { %1574 = vrot.lane.b32.xlu2 %v1510_v44, %s6977_s10  ;;  %v6128_v44 = vld [vmem:[%s7052_s8 + $0xc0] sm:$0xff] }
 0x167   : > { %v1071_v34 = vpop.permute.xlu1 %1070  ;;  %v1069_v33 = vpop.permute.xlu0 %1068  ;;  %v1522_v5 = vpack.c.bf16 %v6128_v44, %v6128_v44  ;;  %v6479_v44 = vor.u32 %v6715_v32, %v6478_v15 }
 0x168   : > { %1146 = vst.msk [vmem:[#allocation2 + $0xfc] sm:$0xf] %vm1124_vm3, %v1071_v34  ;;  %v1091_v51 = vpop.permute.xlu2 %1090  ;;  %v6712_v34 = vld [vmem:[#allocation2 + $0x80] sm:$0xf0] }
 0x169   : > { %1145 = vst.msk [vmem:[#allocation2 + $0xf0] sm:$0xf] %vm1124_vm3, %v1069_v33 }
 0x16a   : > { %4597 = vmatmul.bf16.gmra.mxu0 %v6443_v16  ;;  %1156 = vst.msk [vmem:[#allocation2 + $0x174] sm:$0xf] %vm1124_vm3, %v1091_v51 }
 0x16d   : > { %1578 = vrot.lane.b32.xlu1 %v1512_v29, %s6977_s10  ;;  %1576 = vrot.lane.b32.xlu0 %v1511_v30, %s6977_s10  ;;  %v6129_v29 = vld [vmem:[%s7052_s8 + $0xc8] sm:$0xff] }
 0x16e   : > { %1580 = vrot.lane.b32.xlu2 %v1513_v10, %s6977_s10  ;;  %v7767_v10 = vpack.c.bf16 %v6066_v4, %v6066_v4 }
 0x16f   : > { %v1077_v36 = vpop.permute.xlu1 %1076  ;;  %v1075_v39 = vpop.permute.xlu0 %1074 }
 0x170   : > { %1149 = vst.msk [vmem:[#allocation2 + $0x120] sm:$0xf] %vm1124_vm3, %v1077_v36  ;;  %v1354_v0 = vpop.permute.xlu2 %1353  ;;  %v1524_v36 = vpack.c.bf16 %v6130_v14, %v6130_v14  ;;  %v6075_v14 = vld [vmem:[%s7052_s8 + $0x129] sm:$0xff] }
 0x171   : > { %1148 = vst.msk [vmem:[#allocation2 + $0x114] sm:$0xf] %vm1124_vm3, %v1075_v39  ;;  %v1523_v39 = vpack.c.bf16 %v6129_v29, %v6129_v29  ;;  %v6074_v29 = vld [vmem:[%s7052_s8 + $0x121] sm:$0xff] }
 0x172   : > { %1447 = vst.msk [vmem:[#allocation2 + $0x1c] sm:$0xf] %vm673_vm1, %v1354_v0  ;;  %v6068_v0 = vld [vmem:[%s7052_s8 + $0xd9] sm:$0xff]  ;;  %v7843_v22 = vpack.c.bf16 %v6074_v29, %v6074_v29 }
 0x173   : > { %1235 = vst.msk [vmem:[#allocation2 + $0xac] sm:$0xf] %vm448_vm0, %v7767_v10  ;;  %v7795_v37 = vpack.c.bf16 %v6068_v0, %v6068_v0  ;;  %v6718_v0 = vld [vmem:[#allocation2 + $0xb0] sm:$0xf0] }
 0x174   : > { %1243 = vst.msk [vmem:[#allocation2 + $0x10c] sm:$0xf] %vm448_vm0, %v7843_v22 }
 0x175   : > { %1584 = vrot.lane.b32.xlu1 %v1515_v43, %s6977_s10  ;;  %1582 = vrot.lane.b32.xlu0 %v1514_v2, %s6977_s10  ;;  %v1525_v43 = vpack.c.bf16 %v6131_v23, %v6131_v23  ;;  %v6069_v2 = vld [vmem:[%s7052_s8 + $0xe1] sm:$0xff]  ;;  %1237 = vst.msk [vmem:[#allocation2 + $0xc4] sm:$0xf] %vm448_vm0, %v7795_v37  ;;  %v6140_v23 = vld [vmem:[%s7052_s8 + $0x150] sm:$0xff] }
 0x176   : > { %1586 = vrot.lane.b32.xlu2 %v1516_v63, %s6977_s10  ;;  %v6133_v63 = vld [vmem:[%s7052_s8 + $0xf8] sm:$0xff]  ;;  %v7791_v20 = vpack.c.bf16 %v6069_v2, %v6069_v2 }
 0x177   : > { %v1083_v8 = vpop.permute.xlu1 %1082  ;;  %v1081_v46 = vpop.permute.xlu0 %1080  ;;  %v6550_v54 = vld [vmem:[#allocation2 + $0x120] sm:$0xf] }
 0x178   : > { %1152 = vst.msk [vmem:[#allocation2 + $0x144] sm:$0xf] %vm1124_vm3, %v1083_v8  ;;  %v6551_v11 = vor.u32 %v6733_v27, %v6550_v54  ;;  %v1360_v62 = vpop.permute.xlu2 %1359  ;;  %v1527_v8 = vpack.c.bf16 %v6133_v63, %v6133_v63  ;;  %v1534_v63 = vpack.c.bf16 %v6140_v23, %v6140_v23  ;;  %v6147_v23 = vld [vmem:[%s7052_s8 + $0x1a0] sm:$0xff] }
 0x179   : > { %1151 = vst.msk [vmem:[#allocation2 + $0x138] sm:$0xf] %vm1124_vm3, %v1081_v46  ;;  %v1526_v46 = vpack.c.bf16 %v6132_v3, %v6132_v3  ;;  %v6490_v3 = vld [vmem:[#allocation2 + $0xa8] sm:$0xf] }
 0x17a   : > { %4602 = vmatmul.bf16.gmra.mxu0 %v6455_v19  ;;  %4642 = vmatmul.bf16.vlgmr.msra.gmra.mxu3 %v6551_v11  ;;  %1450 = vst.msk [vmem:[#allocation2 + $0x40] sm:$0xf] %vm673_vm1, %v1360_v62  ;;  %v7799_v19 = vpack.c.bf16 %v6067_v47, %v6067_v47  ;;  %v1528_v11 = vpack.c.bf16 %v6134_v60, %v6134_v60  ;;  %v6071_v62 = vld [vmem:[%s7052_s8 + $0xf9] sm:$0xff]  ;;  %v6078_v60 = vld [vmem:[%s7052_s8 + $0x151] sm:$0xff]  ;;  %v6077_v47 = vld [vmem:[%s7052_s8 + $0x141] sm:$0xff] }
 0x17b   : > { %1238 = vst.msk [vmem:[#allocation2 + $0xd0] sm:$0xf] %vm448_vm0, %v7791_v20  ;;  %v7863_v15 = vpack.c.bf16 %v6078_v60, %v6078_v60  ;;  %v6491_v32 = vor.u32 %v6718_v0, %v6490_v3 }
 0x17c   : > { %1236 = vst.msk [vmem:[#allocation2 + $0xb8] sm:$0xf] %vm448_vm0, %v7799_v19 }
 0x17d   : > { %1590 = vrot.lane.b32.xlu1 %v1518_v57, %s6977_s10  ;;  %1588 = vrot.lane.b32.xlu0 %v1517_v41, %s6977_s10  ;;  %v6072_v41 = vld [vmem:[%s7052_s8 + $0x109] sm:$0xff]  ;;  %1247 = vst.msk [vmem:[#allocation2 + $0x13c] sm:$0xf] %vm448_vm0, %v7863_v15 }
 0x17e   : > { %1592 = vrot.lane.b32.xlu2 %v1519_v59, %s6977_s10  ;;  %v6136_v59 = vld [vmem:[%s7052_s8 + $0x120] sm:$0xff] }
 0x17f   : > { %v1089_v56 = vpop.permute.xlu1 %1088  ;;  %v1087_v61 = vpop.permute.xlu0 %1086  ;;  %v6736_v33 = vld [vmem:[#allocation2 + $0x140] sm:$0xf0] }
 0x180   : > { %1155 = vst.msk [vmem:[#allocation2 + $0x168] sm:$0xf] %vm1124_vm3, %v1089_v56  ;;  %v1366_v28 = vpop.permute.xlu2 %1365  ;;  %v6562_v16 = vld [vmem:[#allocation2 + $0x138] sm:$0xf]  ;;  %v6574_v56 = vld [vmem:[#allocation2 + $0x150] sm:$0xf] }
 0x181   : > { %1154 = vst.msk [vmem:[#allocation2 + $0x15c] sm:$0xf] %vm1124_vm3, %v1087_v61  ;;  %v6563_v42 = vor.u32 %v6736_v33, %v6562_v16  ;;  %v7815_v61 = vpack.c.bf16 %v6072_v41, %v6072_v41  ;;  %v1529_v33 = vpack.c.bf16 %v6135_v58, %v6135_v58  ;;  %v6143_v41 = vld [vmem:[%s7052_s8 + $0x170] sm:$0xff] }
 0x182   : > { %1453 = vst.msk [vmem:[#allocation2 + $0x64] sm:$0xf] %vm673_vm1, %v1366_v28  ;;  %v7819_v28 = vpack.c.bf16 %v6071_v62, %v6071_v62  ;;  %v7867_v62 = vpack.c.bf16 %v6077_v47, %v6077_v47  ;;  %v6724_v47 = vld [vmem:[#allocation2 + $0xe0] sm:$0xf0] }
 0x183   : > { %1241 = vst.msk [vmem:[#allocation2 + $0xf4] sm:$0xf] %vm448_vm0, %v7815_v61 }
 0x184   : > { %1240 = vst.msk [vmem:[#allocation2 + $0xe8] sm:$0xf] %vm448_vm0, %v7819_v28 }
 0x185   : > { %1596 = vrot.lane.b32.xlu1 %v7285_v25, %s6977_s10  ;;  %1594 = vrot.lane.b32.xlu0 %v1520_v7, %s6977_s10  ;;  %v6467_v25 = vor.u32 %v6712_v34, %v6466_v13  ;;  %v6137_v7 = vld [vmem:[%s7052_s8 + $0x128] sm:$0xff]  ;;  %v1530_v34 = vpack.c.bf16 %v6136_v59, %v6136_v59  ;;  %v6076_v59 = vld [vmem:[%s7052_s8 + $0x139] sm:$0xff]  ;;  %1246 = vst.msk [vmem:[#allocation2 + $0x130] sm:$0xf] %vm448_vm0, %v7867_v62 }
 0x186   : > { %1598 = vrot.lane.b32.xlu2 %v1522_v5, %s6977_s10  ;;  %v6070_v5 = vld [vmem:[%s7052_s8 + $0xf1] sm:$0xff]  ;;  %v1531_v38 = vpack.c.bf16 %v6137_v7, %v6137_v7  ;;  %v6080_v7 = vld [vmem:[%s7052_s8 + $0x169] sm:$0xff] }
 0x187   : > { %v1352_v30 = vpop.permute.xlu1 %1351  ;;  %v1350_v51 = vpop.permute.xlu0 %1349  ;;  %v7823_v4 = vpack.c.bf16 %v6070_v5, %v6070_v5 }
 0x188   : > { %1446 = vst.msk [vmem:[#allocation2 + $0x10] sm:$0xf] %vm673_vm1, %v1352_v30  ;;  %v1372_v49 = vpop.permute.xlu2 %1371  ;;  %v6739_v57 = vld [vmem:[#allocation2 + $0x158] sm:$0xf0]  ;;  %v6139_v30 = vld [vmem:[%s7052_s8 + $0x140] sm:$0xff] }
 0x189   : > { %1445 = vst.msk [vmem:[#allocation2 + $0x4] sm:$0xf] %vm673_vm1, %v1350_v51  ;;  %v6575_v40 = vor.u32 %v6739_v57, %v6574_v56  ;;  %v6138_v51 = vld [vmem:[%s7052_s8 + $0x138] sm:$0xff]  ;;  %v7871_v56 = vpack.c.bf16 %v6076_v59, %v6076_v59  ;;  %v6538_v59 = vld [vmem:[#allocation2 + $0x108] sm:$0xf] }
 0x18a   : > { %4607 = vmatmul.bf16.gmra.mxu0 %v6467_v25  ;;  %4647 = vmatmul.bf16.gmra.mxu3 %v6563_v42  ;;  %1456 = vst.msk [vmem:[#allocation2 + $0x88] sm:$0xf] %vm673_vm1, %v1372_v49  ;;  %v7839_v42 = vpack.c.bf16 %v6075_v14, %v6075_v14  ;;  %v1532_v49 = vpack.c.bf16 %v6138_v51, %v6138_v51  ;;  %v6079_v14 = vld [vmem:[%s7052_s8 + $0x159] sm:$0xff] }
 0x18b   : > { %1239 = vst.msk [vmem:[#allocation2 + $0xdc] sm:$0xf] %vm448_vm0, %v7823_v4 }
 0x18c   : > { %1244 = vst.msk [vmem:[#allocation2 + $0x118] sm:$0xf] %vm448_vm0, %v7839_v42 }
 0x18d   : > { %1602 = vrot.lane.b32.xlu1 %v1524_v36, %s6977_s10  ;;  %1600 = vrot.lane.b32.xlu0 %v1523_v39, %s6977_s10  ;;  %v6073_v36 = vld [vmem:[%s7052_s8 + $0x111] sm:$0xff]  ;;  %v1533_v39 = vpack.c.bf16 %v6139_v30, %v6139_v30  ;;  %1245 = vst.msk [vmem:[#allocation2 + $0x124] sm:$0xf] %vm448_vm0, %v7871_v56  ;;  %v7893_v30 = vpack.c.bf16 %v6079_v14, %v6079_v14  ;;  %v2023_v14 = vld [vmem:[%s8032_s12 + $0x8] sm:$0xff] }
 0x18e   : > { %1604 = vrot.lane.b32.xlu2 %v1525_v43, %s6977_s10  ;;  %v7847_v2 = vpack.c.bf16 %v6073_v36, %v6073_v36 }
 0x18f   : > { %v1358_v21 = vpop.permute.xlu1 %1357  ;;  %v1356_v27 = vpop.permute.xlu0 %1355  ;;  %1248 = vst.msk [vmem:[#allocation2 + $0x148] sm:$0xf] %vm448_vm0, %v7893_v30 }
 0x190   : > { %1449 = vst.msk [vmem:[#allocation2 + $0x34] sm:$0xf] %vm673_vm1, %v1358_v21  ;;  %v1378_v54 = vpop.permute.xlu2 %1377  ;;  %v6742_v21 = vld [vmem:[#allocation2 + $0x170] sm:$0xf0] }
 0x191   : > { %1448 = vst.msk [vmem:[#allocation2 + $0x28] sm:$0xf] %vm673_vm1, %v1356_v27  ;;  %v6586_v27 = vld [vmem:[#allocation2 + $0x168] sm:$0xf] }
 0x192   : > { %1459 = vst.msk [vmem:[#allocation2 + $0xac] sm:$0xf] %vm673_vm1, %v1378_v54  ;;  %v6587_v57 = vor.u32 %v6742_v21, %v6586_v27 }
 0x193   : > { %1242 = vst.msk [vmem:[#allocation2 + $0x100] sm:$0xf] %vm448_vm0, %v7847_v2 }
 0x195   : > { %1608 = vrot.lane.b32.xlu1 %v1527_v8, %s6977_s10  ;;  %1606 = vrot.lane.b32.xlu0 %v1526_v46, %s6977_s10  ;;  %v6142_v8 = vld [vmem:[%s7052_s8 + $0x168] sm:$0xff]  ;;  %v6141_v46 = vld [vmem:[%s7052_s8 + $0x158] sm:$0xff] }
 0x196   : > { %1610 = vrot.lane.b32.xlu2 %v1528_v11, %s6977_s10  ;;  %v1536_v58 = vpack.c.bf16 %v6142_v8, %v6142_v8 }
 0x197   : > { %v1364_v50 = vpop.permute.xlu1 %1363  ;;  %v1362_v6 = vpop.permute.xlu0 %1361 }
 0x198   : > { %1452 = vst.msk [vmem:[#allocation2 + $0x58] sm:$0xf] %vm673_vm1, %v1364_v50  ;;  %v1384_v16 = vpop.permute.xlu2 %1383  ;;  %v1535_v50 = vpack.c.bf16 %v6141_v46, %v6141_v46 }
 0x199   : > { %1451 = vst.msk [vmem:[#allocation2 + $0x4c] sm:$0xf] %vm673_vm1, %v1362_v6 }
 0x19a   : > { %4612 = vmatmul.bf16.gmra.mxu0 %v6479_v44  ;;  %4652 = vmatmul.bf16.gmra.mxu3 %v6575_v40  ;;  %1462 = vst.msk [vmem:[#allocation2 + $0xd0] sm:$0xf] %vm673_vm1, %v1384_v16  ;;  %v1537_v44 = vpack.c.bf16 %v6143_v41, %v6143_v41  ;;  %v6081_v40 = vld [vmem:[%s7052_s8 + $0x171] sm:$0xff] }
 0x19b   : > { %v6146_v16 = vld [vmem:[%s7052_s8 + $0x198] sm:$0xff] }
 0x19c   : > { %v1540_v51 = vpack.c.bf16 %v6146_v16, %v6146_v16  ;;  %v6755_v16 = vld [vmem:[%s10168_s2 + $0x58] sm:$0xff] }
 0x19d   : > { %1614 = vrot.lane.b32.xlu1 %v1530_v34, %s6977_s10  ;;  %1612 = vrot.lane.b32.xlu0 %v1529_v33, %s6977_s10  ;;  %v7885_v33 = vpack.c.bf16 %v6081_v40, %v6081_v40 }
 0x19e   : > { %1616 = vrot.lane.b32.xlu2 %v1531_v38, %s6977_s10  ;;  %v7889_v38 = vpack.c.bf16 %v6080_v7, %v6080_v7 }
 0x19f   : > { %v1370_v13 = vpop.permute.xlu1 %1369  ;;  %v1368_v25 = vpop.permute.xlu0 %1367  ;;  %1250 = vst.msk [vmem:[#allocation2 + $0x160] sm:$0xf] %vm448_vm0, %v7885_v33 }
 0x1a0   : > { %1455 = vst.msk [vmem:[#allocation2 + $0x7c] sm:$0xf] %vm673_vm1, %v1370_v13  ;;  %v1390_v43 = vpop.permute.xlu2 %1389  ;;  %v6721_v13 = vld [vmem:[#allocation2 + $0xc8] sm:$0xf0] }
 0x1a1   : > { %1454 = vst.msk [vmem:[#allocation2 + $0x70] sm:$0xf] %vm673_vm1, %v1368_v25  ;;  %v6083_v25 = vld [vmem:[%s7052_s8 + $0x189] sm:$0xff] }
 0x1a2   : > { %1465 = vst.msk [vmem:[#allocation2 + $0xf4] sm:$0xf] %vm673_vm1, %v1390_v43  ;;  %v7909_v43 = vpack.c.bf16 %v6083_v25, %v6083_v25  ;;  %v2024_v25 = vld [vmem:[%s8032_s12 + $0x18] sm:$0xff] }
 0x1a3   : > { %1249 = vst.msk [vmem:[#allocation2 + $0x154] sm:$0xf] %vm448_vm0, %v7889_v38 }
 0x1a4   : > { %1252 = vst.msk [vmem:[#allocation2 + $0x178] sm:$0xf] %vm448_vm0, %v7909_v43 }
 0x1a5   : > { %1620 = vrot.lane.b32.xlu1 %v1533_v39, %s6977_s10  ;;  %1618 = vrot.lane.b32.xlu0 %v1532_v49, %s6977_s10  ;;  %v6502_v49 = vld [vmem:[#allocation2 + $0xc0] sm:$0xf] }
 0x1a6   : > { %1622 = vrot.lane.b32.xlu2 %v1534_v63, %s6977_s10  ;;  %v6503_v0 = vor.u32 %v6721_v13, %v6502_v49  ;;  %v6753_v49 = vld [vmem:[%s10168_s2 + $0x48] sm:$0xff] }
 0x1a7   : > { %v1376_v54 = vpop.permute.xlu1 %1375  ;;  %v1374_v11 = vpop.permute.xlu0 %1373 }
 0x1a8   : > { %1458 = vst.msk [vmem:[#allocation2 + $0xa0] sm:$0xf] %vm673_vm1, %v1376_v54  ;;  %v1396_v6 = vpop.permute.xlu2 %1395 }
 0x1a9   : > { %1457 = vst.msk [vmem:[#allocation2 + $0x94] sm:$0xf] %vm673_vm1, %v1374_v11 }
 0x1aa   : > { %4617 = vmatmul.bf16.gmra.mxu0 %v6491_v32  ;;  %4657 = vmatmul.bf16.gmra.mxu3 %v6587_v57  ;;  %1468 = vst.msk [vmem:[#allocation2 + $0x118] sm:$0xf] %vm673_vm1, %v1396_v6 }
 0x1ad   : > { %1626 = vrot.lane.b32.xlu1 %v1536_v58, %s6977_s10  ;;  %1624 = vrot.lane.b32.xlu0 %v1535_v50, %s6977_s10  ;;  %v6759_v50 = vld [vmem:[%s10168_s2 + $0x78] sm:$0xff] }
 0x1ae   : > { %1628 = vrot.lane.b32.xlu2 %v1537_v44, %s6977_s10  ;;  %4663 = vmatpush.bf16.msra.mxu1 %v6759_v50  ;;  %v6756_v44 = vld [vmem:[%s10168_s2 + $0x60] sm:$0xff] }
 0x1af   : > { %v1382_v5 = vpop.permute.xlu1 %1381  ;;  %v1380_v34 = vpop.permute.xlu0 %1379  ;;  %6772 = vmatpush.bf16.msrb.mxu3 %v6759_v50  ;;  %v2038_v50 = vld [vmem:[%s8032_s12 + $0xc0] sm:$0xff] }
 0x1b0   : > { %1461 = vst.msk [vmem:[#allocation2 + $0xc4] sm:$0xf] %vm673_vm1, %v1382_v5  ;;  %v1402_v29 = vpop.permute.xlu2 %1401  ;;  %v6179_v5 = vld [vmem:[%s7052_s8 + $0x1a1] sm:$0xff] }
 0x1b1   : > { %1460 = vst.msk [vmem:[#allocation2 + $0xb8] sm:$0xf] %vm673_vm1, %v1380_v34 }
 0x1b2   : > { %1471 = vst.msk [vmem:[#allocation2 + $0x13c] sm:$0xf] %vm673_vm1, %v1402_v29  ;;  %v2022_v29 = vld [vmem:[%s8032_s12] sm:$0xff] }
 0x1b5   : > { %1632 = vrot.lane.b32.xlu1 %v7557_v17, %s6977_s10  ;;  %1630 = vrot.lane.b32.xlu0 %v7551_v9, %s6977_s10  ;;  %v6082_v17 = vld [vmem:[%s7052_s8 + $0x181] sm:$0xff]  ;;  %v1541_v9 = vpack.c.bf16 %v6147_v23, %v6147_v23  ;;  %v2055_v23 = vpack.c.bf16 %v2023_v14, %v2023_v14  ;;  %v2042_v14 = vld [vmem:[%s8032_s12 + $0xf0] sm:$0xff] }
 0x1b6   : > { %1634 = vrot.lane.b32.xlu2 %v1540_v51, %s6977_s10  ;;  %v7914_v3 = vpack.c.bf16 %v6082_v17, %v6082_v17  ;;  %v2025_v17 = vld [vmem:[%s8032_s12 + $0x20] sm:$0xff] }
 0x1b7   : > { %v1388_v36 = vpop.permute.xlu1 %1387  ;;  %v1386_v39 = vpop.permute.xlu0 %1385 }
 0x1b8   : > { %1464 = vst.msk [vmem:[#allocation2 + $0xe8] sm:$0xf] %vm673_vm1, %v1388_v36  ;;  %v1408_v63 = vpop.permute.xlu2 %1407  ;;  %v2054_v36 = vpack.c.bf16 %v2022_v29, %v2022_v29 }
 0x1b9   : > { %1463 = vst.msk [vmem:[#allocation2 + $0xdc] sm:$0xf] %vm673_vm1, %v1386_v39 }
 0x1ba   : > { %4622 = vmatmul.bf16.gmra.mxu0 %v6503_v0  ;;  %1474 = vst.msk [vmem:[#allocation2 + $0x160] sm:$0xf] %vm673_vm1, %v1408_v63  ;;  %v2026_v0 = vld [vmem:[%s8032_s12 + $0x30] sm:$0xff] }
 0x1bb   : > { %1251 = vst.msk [vmem:[#allocation2 + $0x16c] sm:$0xf] %vm448_vm0, %v7914_v3 }
 0x1bd   : > { %1798 = vrot.lane.b32.xlu1 %v7677_v45, %s6978_s11  ;;  %1636 = vrot.lane.b32.xlu0 %v1541_v9, %s6977_s10  ;;  %v6514_v45 = vld [vmem:[#allocation2 + $0xd8] sm:$0xf]  ;;  %v6752_v9 = vld [vmem:[%s10168_s2 + $0x40] sm:$0xff] }
 0x1be   : > { %1800 = vrot.lane.b32.xlu2 %v7703_v55, %s6978_s11  ;;  %v6515_v55 = vor.u32 %v6724_v47, %v6514_v45 }
 0x1bf   : > { %v1394_v21 = vpop.permute.xlu1 %1393  ;;  %v1392_v27 = vpop.permute.xlu0 %1391 }
 0x1c0   : > { %1467 = vst.msk [vmem:[#allocation2 + $0x10c] sm:$0xf] %vm673_vm1, %v1394_v21  ;;  %v1575_v60 = vpop.permute.xlu2 %1574  ;;  %v2027_v21 = vld [vmem:[%s8032_s12 + $0x38] sm:$0xff] }
 0x1c1   : > { %1466 = vst.msk [vmem:[#allocation2 + $0x100] sm:$0xf] %vm673_vm1, %v1392_v27  ;;  %v2058_v27 = vpack.c.bf16 %v2026_v0, %v2026_v0  ;;  %v2059_v47 = vpack.c.bf16 %v2027_v21, %v2027_v21 }
 0x1c2   : > { %1670 = vst.msk [vmem:[#allocation2 + $0x4] sm:$0xf] %vm898_vm2, %v1575_v60  ;;  %v2057_v60 = vpack.c.bf16 %v2025_v17, %v2025_v17  ;;  %v2045_v17 = vld [vmem:[%s8032_s12 + $0x110] sm:$0xff] }
 0x1c3   : > { %v2077_v21 = vpack.c.bf16 %v2045_v17, %v2045_v17 }
 0x1c5   : > { %1804 = vrot.lane.b32.xlu1 %v7695_v35, %s6978_s11  ;;  %1802 = vrot.lane.b32.xlu0 %v7699_v52, %s6978_s11 }
 0x1c6   : > { %1806 = vrot.lane.b32.xlu2 %v7727_v18, %s6978_s11 }
 0x1c7   : > { %v1400_v8 = vpop.permute.xlu1 %1399  ;;  %v1398_v46 = vpop.permute.xlu0 %1397 }
 0x1c8   : > { %1470 = vst.msk [vmem:[#allocation2 + $0x130] sm:$0xf] %vm673_vm1, %v1400_v8  ;;  %v1581_v54 = vpop.permute.xlu2 %1580  ;;  %v2029_v8 = vld [vmem:[%s8032_s12 + $0x50] sm:$0xff] }
 0x1c9   : > { %1469 = vst.msk [vmem:[#allocation2 + $0x124] sm:$0xf] %vm673_vm1, %v1398_v46  ;;  %v2028_v46 = vld [vmem:[%s8032_s12 + $0x48] sm:$0xff] }
 0x1ca   : > { %4627 = vmatmul.bf16.gmra.mxu0 %v6515_v55  ;;  %1673 = vst.msk [vmem:[#allocation2 + $0x28] sm:$0xf] %vm898_vm2, %v1581_v54 }
 0x1cd   : > { %1810 = vrot.lane.b32.xlu1 %v7719_v12, %s6978_s11  ;;  %1808 = vrot.lane.b32.xlu0 %v7723_v53, %s6978_s11  ;;  %v6526_v12 = vld [vmem:[#allocation2 + $0xf0] sm:$0xf]  ;;  %v6727_v53 = vld [vmem:[#allocation2 + $0xf8] sm:$0xf0] }
 0x1ce   : > { %1812 = vrot.lane.b32.xlu2 %v7750_v24, %s6978_s11  ;;  %v6527_v24 = vor.u32 %v6727_v53, %v6526_v12 }
 0x1cf   : > { %v1406_v35 = vpop.permute.xlu1 %1405  ;;  %v1404_v52 = vpop.permute.xlu0 %1403 }
 0x1d0   : > { %1473 = vst.msk [vmem:[#allocation2 + $0x154] sm:$0xf] %vm673_vm1, %v1406_v35  ;;  %v1587_v18 = vpop.permute.xlu2 %1586  ;;  %v2030_v35 = vld [vmem:[%s8032_s12 + $0x60] sm:$0xff] }
 0x1d1   : > { %1472 = vst.msk [vmem:[#allocation2 + $0x148] sm:$0xf] %vm673_vm1, %v1404_v52  ;;  %v2061_v52 = vpack.c.bf16 %v2029_v8, %v2029_v8  ;;  %v2062_v53 = vpack.c.bf16 %v2030_v35, %v2030_v35  ;;  %v2048_v8 = vld [vmem:[%s8032_s12 + $0x138] sm:$0xff] }
 0x1d2   : > { %1676 = vst.msk [vmem:[#allocation2 + $0x4c] sm:$0xf] %vm898_vm2, %v1587_v18  ;;  %v2060_v18 = vpack.c.bf16 %v2028_v46, %v2028_v46  ;;  %v2080_v35 = vpack.c.bf16 %v2048_v8, %v2048_v8  ;;  %v2255_v8 = vld [vmem:[%s8032_s12 + $0x61] sm:$0xff] }
 0x1d5   : > { %1816 = vrot.lane.b32.xlu1 %v7742_v31, %s6978_s11  ;;  %1814 = vrot.lane.b32.xlu0 %v7746_v1, %s6978_s11 }
 0x1d6   : > { %1818 = vrot.lane.b32.xlu2 %v7775_v48, %s6978_s11 }
 0x1d7   : > { %v1412_v11 = vpop.permute.xlu1 %1411  ;;  %v1410_v32 = vpop.permute.xlu0 %1409 }
 0x1d8   : > { %1476 = vst.msk [vmem:[#allocation2 + $0x178] sm:$0xf] %vm673_vm1, %v1412_v11  ;;  %v1593_v57 = vpop.permute.xlu2 %1592  ;;  %v2032_v11 = vld [vmem:[%s8032_s12 + $0x78] sm:$0xff] }
 0x1d9   : > { %1475 = vst.msk [vmem:[#allocation2 + $0x16c] sm:$0xf] %vm673_vm1, %v1410_v32  ;;  %v2031_v32 = vld [vmem:[%s8032_s12 + $0x68] sm:$0xff] }
 0x1da   : > { %4632 = vmatmul.bf16.gmra.mxu0 %v6527_v24  ;;  %1679 = vst.msk [vmem:[#allocation2 + $0x70] sm:$0xf] %vm898_vm2, %v1593_v57 }
 0x1dd   : > { %1822 = vrot.lane.b32.xlu1 %v7767_v10, %s6978_s11  ;;  %1820 = vrot.lane.b32.xlu0 %v7771_v26, %s6978_s11  ;;  %v6730_v10 = vld [vmem:[#allocation2 + $0x110] sm:$0xf0] }
 0x1de   : > { %1824 = vrot.lane.b32.xlu2 %v7799_v19, %s6978_s11  ;;  %v6539_v19 = vor.u32 %v6730_v10, %v6538_v59  ;;  %v2034_v59 = vld [vmem:[%s8032_s12 + $0x90] sm:$0xff] }
 0x1df   : > { %v1579_v31 = vpop.permute.xlu1 %1578  ;;  %v1577_v1 = vpop.permute.xlu0 %1576 }
 0x1e0   : > { %1672 = vst.msk [vmem:[#allocation2 + $0x1c] sm:$0xf] %vm898_vm2, %v1579_v31  ;;  %v1599_v48 = vpop.permute.xlu2 %1598  ;;  %v2033_v31 = vld [vmem:[%s8032_s12 + $0x80] sm:$0xff] }
 0x1e1   : > { %1671 = vst.msk [vmem:[#allocation2 + $0x10] sm:$0xf] %vm898_vm2, %v1577_v1  ;;  %v2064_v1 = vpack.c.bf16 %v2032_v11, %v2032_v11 }
 0x1e2   : > { %1682 = vst.msk [vmem:[#allocation2 + $0x94] sm:$0xf] %vm898_vm2, %v1599_v48  ;;  %v2063_v48 = vpack.c.bf16 %v2031_v32, %v2031_v32 }
 0x1e5   : > { %1828 = vrot.lane.b32.xlu1 %v7791_v20, %s6978_s11  ;;  %1826 = vrot.lane.b32.xlu0 %v7795_v37, %s6978_s11 }
 0x1e6   : > { %1830 = vrot.lane.b32.xlu2 %v7823_v4, %s6978_s11 }
 0x1e7   : > { %v1585_v26 = vpop.permute.xlu1 %1584  ;;  %v1583_v41 = vpop.permute.xlu0 %1582 }
 0x1e8   : > { %1675 = vst.msk [vmem:[#allocation2 + $0x40] sm:$0xf] %vm898_vm2, %v1585_v26  ;;  %v1605_v58 = vpop.permute.xlu2 %1604  ;;  %v2065_v26 = vpack.c.bf16 %v2033_v31, %v2033_v31 }
 0x1e9   : > { %1674 = vst.msk [vmem:[#allocation2 + $0x34] sm:$0xf] %vm898_vm2, %v1583_v41  ;;  %v2035_v41 = vld [vmem:[%s8032_s12 + $0x98] sm:$0xff] }
 0x1ea   : > { %4637 = vmatmul.bf16.gmra.mxu0 %v6539_v19  ;;  %1685 = vst.msk [vmem:[#allocation2 + $0xb8] sm:$0xf] %vm898_vm2, %v1605_v58 }
 0x1ed   : > { %1834 = vrot.lane.b32.xlu1 %v7815_v61, %s6978_s11  ;;  %1832 = vrot.lane.b32.xlu0 %v7819_v28, %s6978_s11 }
 0x1ee   : > { %1836 = vrot.lane.b32.xlu2 %v7847_v2, %s6978_s11 }
 0x1ef   : > { %v1591_v20 = vpop.permute.xlu1 %1590  ;;  %v1589_v37 = vpop.permute.xlu0 %1588 }
 0x1f0   : > { %1678 = vst.msk [vmem:[#allocation2 + $0x64] sm:$0xf] %vm898_vm2, %v1591_v20  ;;  %v1611_v4 = vpop.permute.xlu2 %1610  ;;  %v2036_v20 = vld [vmem:[%s8032_s12 + $0xa8] sm:$0xff] }
 0x1f1   : > { %1677 = vst.msk [vmem:[#allocation2 + $0x58] sm:$0xf] %vm898_vm2, %v1589_v37  ;;  %v2067_v37 = vpack.c.bf16 %v2035_v41, %v2035_v41  ;;  %v2052_v41 = vld [vmem:[%s8032_s12 + $0x168] sm:$0xff] }
 0x1f2   : > { %1688 = vst.msk [vmem:[#allocation2 + $0xdc] sm:$0xf] %vm898_vm2, %v1611_v4  ;;  %v2066_v4 = vpack.c.bf16 %v2034_v59, %v2034_v59 }
 0x1f5   : > { %1840 = vrot.lane.b32.xlu1 %v7839_v42, %s6978_s11  ;;  %1838 = vrot.lane.b32.xlu0 %v7843_v22, %s6978_s11  ;;  %v6758_v42 = vld [vmem:[%s10168_s2 + $0x70] sm:$0xff] }
 0x1f6   : > { %1842 = vrot.lane.b32.xlu2 %v7871_v56, %s6978_s11  ;;  %4664 = vmatpush.bf16.msra.mxu1 %v6758_v42  ;;  %v6178_v56 = vld [vmem:[%s7052_s8 + $0x199] sm:$0xff] }
 0x1f7   : > { %v1597_v61 = vpop.permute.xlu1 %1596  ;;  %v1595_v28 = vpop.permute.xlu0 %1594  ;;  %6773 = vmatpush.bf16.msrb.mxu3 %v6758_v42  ;;  %v1764_v34 = vpack.c.bf16 %v6178_v56, %v6178_v56  ;;  %v2037_v42 = vld [vmem:[%s8032_s12 + $0xb0] sm:$0xff]  ;;  %v2039_v56 = vld [vmem:[%s8032_s12 + $0xc8] sm:$0xff] }
 0x1f8   : > { %1681 = vst.msk [vmem:[#allocation2 + $0x88] sm:$0xf] %vm898_vm2, %v1597_v61  ;;  %v1617_v2 = vpop.permute.xlu2 %1616 }
 0x1f9   : > { %1680 = vst.msk [vmem:[#allocation2 + $0x7c] sm:$0xf] %vm898_vm2, %v1595_v28  ;;  %v2068_v28 = vpack.c.bf16 %v2036_v20, %v2036_v20 }
 0x1fa   : > { %1691 = vst.msk [vmem:[#allocation2 + $0x100] sm:$0xf] %vm898_vm2, %v1617_v2 }
 0x1fd   : > { %1846 = vrot.lane.b32.xlu1 %v7863_v15, %s6978_s11  ;;  %1844 = vrot.lane.b32.xlu0 %v7867_v62, %s6978_s11  ;;  %v6757_v62 = vld [vmem:[%s10168_s2 + $0x68] sm:$0xff] }
 0x1fe   : > { %1848 = vrot.lane.b32.xlu2 %v7893_v30, %s6978_s11  ;;  %4665 = vmatpush.bf16.msra.mxu1 %v6757_v62  ;;  %v6754_v30 = vld [vmem:[%s10168_s2 + $0x50] sm:$0xff] }
 0x1ff   : > { %v1603_v22 = vpop.permute.xlu1 %1602  ;;  %v1601_v6 = vpop.permute.xlu0 %1600  ;;  %6774 = vmatpush.bf16.msrb.mxu3 %v6757_v62 }
 0x200   : > { %1684 = vst.msk [vmem:[#allocation2 + $0xac] sm:$0xf] %vm898_vm2, %v1603_v22  ;;  %v1623_v15 = vpop.permute.xlu2 %1622 }
 0x201   : > { %1683 = vst.msk [vmem:[#allocation2 + $0xa0] sm:$0xf] %vm898_vm2, %v1601_v6 }
 0x202   : > { %1694 = vst.msk [vmem:[#allocation2 + $0x124] sm:$0xf] %vm898_vm2, %v1623_v15  ;;  %4666 = vmatpush.bf16.msra.mxu1 %v6756_v44 }
 0x203   : > { %6775 = vmatpush.bf16.msrb.mxu3 %v6756_v44  ;;  %v2070_v44 = vpack.c.bf16 %v2038_v50, %v2038_v50  ;;  %v6182_v50 = vld [vmem:[%s7052_s8 + $0x4a] sm:$0xff] }
 0x205   : > { %1852 = vrot.lane.b32.xlu1 %v7885_v33, %s6978_s11  ;;  %1850 = vrot.lane.b32.xlu0 %v7889_v38, %s6978_s11  ;;  %v1765_v38 = vpack.c.bf16 %v6179_v5, %v6179_v5  ;;  %v2071_v5 = vpack.c.bf16 %v2039_v56, %v2039_v56  ;;  %v1960_v56 = vpack.c.bf16 %v6182_v50, %v6182_v50 }
 0x206   : > { %1854 = vrot.lane.b32.xlu2 %v7914_v3, %s6978_s11  ;;  %4667 = vmatpush.bf16.msra.mxu1 %v6755_v16 }
 0x207   : > { %v1609_v40 = vpop.permute.xlu1 %1608  ;;  %v1607_v7 = vpop.permute.xlu0 %1606  ;;  %6776 = vmatpush.bf16.msrb.mxu3 %v6755_v16  ;;  %1992 = vst.msk [vmem:[#allocation2 + $0x20] sm:$0xf] %vm448_vm0, %v1960_v56  ;;  %v6194_v56 = vld [vmem:[%s7052_s8 + $0xda] sm:$0xff] }
 0x208   : > { %1687 = vst.msk [vmem:[#allocation2 + $0xd0] sm:$0xf] %vm898_vm2, %v1609_v40  ;;  %v1629_v33 = vpop.permute.xlu2 %1628  ;;  %v2069_v40 = vpack.c.bf16 %v2037_v42, %v2037_v42  ;;  %v6181_v42 = vld [vmem:[%s7052_s8 + $0x3a] sm:$0xff] }
 0x209   : > { %1686 = vst.msk [vmem:[#allocation2 + $0xc4] sm:$0xf] %vm898_vm2, %v1607_v7 }
 0x20a   : > { %1697 = vst.msk [vmem:[#allocation2 + $0x148] sm:$0xf] %vm898_vm2, %v1629_v33  ;;  %4668 = vmatpush.bf16.msra.mxu1 %v6754_v30  ;;  %v2040_v33 = vld [vmem:[%s8032_s12 + $0xd8] sm:$0xff] }
 0x20b   : > { %6777 = vmatpush.bf16.msrb.mxu3 %v6754_v30  ;;  %v2072_v30 = vpack.c.bf16 %v2040_v33, %v2040_v33 }
 0x20d   : > { %1858 = vrot.lane.b32.xlu1 %v1764_v34, %s6978_s11  ;;  %1856 = vrot.lane.b32.xlu0 %v7909_v43, %s6978_s11  ;;  %v2056_v43 = vpack.c.bf16 %v2024_v25, %v2024_v25  ;;  %v2041_v34 = vld [vmem:[%s8032_s12 + $0xe0] sm:$0xff] }
 0x20e   : > { %1860 = vrot.lane.b32.xlu2 %v1765_v38, %s6978_s11  ;;  %4669 = vmatpush.bf16.msra.mxu1 %v6753_v49  ;;  %v2073_v29 = vpack.c.bf16 %v2041_v34, %v2041_v34 }
 0x20f   : > { %v1615_v51 = vpop.permute.xlu1 %1614  ;;  %v1613_v13 = vpop.permute.xlu0 %1612  ;;  %6778 = vmatpush.bf16.msrb.mxu3 %v6753_v49 }
 0x210   : > { %1690 = vst.msk [vmem:[#allocation2 + $0xf4] sm:$0xf] %vm898_vm2, %v1615_v51  ;;  %v1635_v39 = vpop.permute.xlu2 %1634 }
 0x211   : > { %1689 = vst.msk [vmem:[#allocation2 + $0xe8] sm:$0xf] %vm898_vm2, %v1613_v13  ;;  %v2074_v13 = vpack.c.bf16 %v2042_v14, %v2042_v14 }
 0x212   : > { %1700 = vst.msk [vmem:[#allocation2 + $0x16c] sm:$0xf] %vm898_vm2, %v1635_v39  ;;  %4670 = vmatpush.bf16.msra.mxu1 %v6752_v9  ;;  %v2043_v39 = vld [vmem:[%s8032_s12 + $0xf8] sm:$0xff] }
 0x213   : > { %6779 = vmatpush.bf16.msrb.mxu3 %v6752_v9 }
 0x215   : > { %2120 = vrot.lane.b32.xlu1 %v2055_v23, %s6976_s9  ;;  %2118 = vrot.lane.b32.xlu0 %v2054_v36, %s6976_s9  ;;  %v2044_v36 = vld [vmem:[%s8032_s12 + $0x108] sm:$0xff] }
 0x216   : > { %2122 = vrot.lane.b32.xlu2 %v2056_v43, %s6976_s9  ;;  %v2076_v9 = vpack.c.bf16 %v2044_v36, %v2044_v36 }
 0x217   : > { %v1621_v63 = vpop.permute.xlu1 %1620  ;;  %v1619_v3 = vpop.permute.xlu0 %1618 }
 0x218   : > { %1693 = vst.msk [vmem:[#allocation2 + $0x118] sm:$0xf] %vm898_vm2, %v1621_v63  ;;  %v1801_v45 = vpop.permute.xlu2 %1800  ;;  %v2075_v63 = vpack.c.bf16 %v2043_v39, %v2043_v39  ;;  %v2253_v39 = vld [vmem:[%s8032_s12 + $0x49] sm:$0xff] }
 0x219   : > { %1692 = vst.msk [vmem:[#allocation2 + $0x10c] sm:$0xf] %vm898_vm2, %v1619_v3 }
 0x21a   : > { %1895 = vst.msk [vmem:[#allocation2 + $0x10] sm:$0xf] %vm1124_vm3, %v1801_v45 }
 0x21d   : > { %2126 = vrot.lane.b32.xlu1 %v2058_v27, %s6976_s9  ;;  %2124 = vrot.lane.b32.xlu0 %v2057_v60, %s6976_s9  ;;  %v2047_v27 = vld [vmem:[%s8032_s12 + $0x128] sm:$0xff]  ;;  %v2046_v60 = vld [vmem:[%s8032_s12 + $0x120] sm:$0xff] }
 0x21e   : > { %2128 = vrot.lane.b32.xlu2 %v2059_v47, %s6976_s9  ;;  %v2079_v46 = vpack.c.bf16 %v2047_v27, %v2047_v27 }
 0x21f   : > { %v1627_v55 = vpop.permute.xlu1 %1626  ;;  %v1625_v54 = vpop.permute.xlu0 %1624 }
 0x220   : > { %1696 = vst.msk [vmem:[#allocation2 + $0x13c] sm:$0xf] %vm898_vm2, %v1627_v55  ;;  %v1807_v12 = vpop.permute.xlu2 %1806  ;;  %v2078_v55 = vpack.c.bf16 %v2046_v60, %v2046_v60 }
 0x221   : > { %1695 = vst.msk [vmem:[#allocation2 + $0x130] sm:$0xf] %vm898_vm2, %v1625_v54  ;;  %v6408_v2 = vld [vmem:[#allocation2 + $0xc] sm:$0xf0] }
 0x222   : > { %1898 = vst.msk [vmem:[#allocation2 + $0x34] sm:$0xf] %vm1124_vm3, %v1807_v12  ;;  %v2049_v12 = vld [vmem:[%s8032_s12 + $0x140] sm:$0xff] }
 0x225   : > { %2132 = vrot.lane.b32.xlu1 %v2061_v52, %s6976_s9  ;;  %2130 = vrot.lane.b32.xlu0 %v2060_v18, %s6976_s9  ;;  %v2050_v18 = vld [vmem:[%s8032_s12 + $0x150] sm:$0xff] }
 0x226   : > { %2134 = vrot.lane.b32.xlu2 %v2062_v53, %s6976_s9  ;;  %v2082_v31 = vpack.c.bf16 %v2050_v18, %v2050_v18 }
 0x227   : > { %v1633_v24 = vpop.permute.xlu1 %1632  ;;  %v1631_v57 = vpop.permute.xlu0 %1630 }
 0x228   : > { %1699 = vst.msk [vmem:[#allocation2 + $0x160] sm:$0xf] %vm898_vm2, %v1633_v24  ;;  %v1813_v10 = vpop.permute.xlu2 %1812 }
 0x229   : > { %1698 = vst.msk [vmem:[#allocation2 + $0x154] sm:$0xf] %vm898_vm2, %v1631_v57  ;;  %v6702_v32 = vld [vmem:[#allocation2 + $0x34] sm:$0xf]  ;;  %v2051_v57 = vld [vmem:[%s8032_s12 + $0x158] sm:$0xff] }
 0x22a   : > { %1901 = vst.msk [vmem:[#allocation2 + $0x58] sm:$0xf] %vm1124_vm3, %v1813_v10  ;;  %v2083_v10 = vpack.c.bf16 %v2051_v57, %v2051_v57 }
 0x22d   : > { %2138 = vrot.lane.b32.xlu1 %v2064_v1, %s6976_s9  ;;  %2136 = vrot.lane.b32.xlu0 %v2063_v48, %s6976_s9  ;;  %v2081_v1 = vpack.c.bf16 %v2049_v12, %v2049_v12 }
 0x22e   : > { %2140 = vrot.lane.b32.xlu2 %v2065_v26, %s6976_s9  ;;  %v2053_v26 = vld [vmem:[%s8032_s12 + $0x170] sm:$0xff] }
 0x22f   : > { %v1799_v19 = vpop.permute.xlu1 %1798  ;;  %v1637_v58 = vpop.permute.xlu0 %1636  ;;  %v2085_v20 = vpack.c.bf16 %v2053_v26, %v2053_v26  ;;  %v6190_v26 = vld [vmem:[%s7052_s8 + $0xaa] sm:$0xff] }
 0x230   : > { %1894 = vst.msk [vmem:[#allocation2 + $0x4] sm:$0xf] %vm1124_vm3, %v1799_v19  ;;  %v1819_v61 = vpop.permute.xlu2 %1818 }
 0x231   : > { %1701 = vst.msk [vmem:[#allocation2 + $0x178] sm:$0xf] %vm898_vm2, %v1637_v58  ;;  %v2247_v58 = vld [vmem:[%s8032_s12 + $0x1] sm:$0xff] }
 0x232   : > { %1904 = vst.msk [vmem:[#allocation2 + $0x7c] sm:$0xf] %vm1124_vm3, %v1819_v61  ;;  %v2279_v61 = vpack.c.bf16 %v2247_v58, %v2247_v58 }
 0x235   : > { %2144 = vrot.lane.b32.xlu1 %v2067_v37, %s6976_s9  ;;  %2142 = vrot.lane.b32.xlu0 %v2066_v4, %s6976_s9  ;;  %v2084_v37 = vpack.c.bf16 %v2052_v41, %v2052_v41  ;;  %v2258_v41 = vld [vmem:[%s8032_s12 + $0x81] sm:$0xff] }
 0x236   : > { %2146 = vrot.lane.b32.xlu2 %v2068_v28, %s6976_s9  ;;  %v6444_v28 = vld [vmem:[#allocation2 + $0x54] sm:$0xf0] }
 0x237   : > { %v1805_v22 = vpop.permute.xlu1 %1804  ;;  %v1803_v6 = vpop.permute.xlu0 %1802  ;;  %v6696_v15 = vld [vmem:[#allocation2 + $0x4] sm:$0xf] }
 0x238   : > { %1897 = vst.msk [vmem:[#allocation2 + $0x28] sm:$0xf] %vm1124_vm3, %v1805_v22  ;;  %v6411_v62 = vor.u32 %v6696_v15, %v6408_v2  ;;  %v1825_v7 = vpop.permute.xlu2 %1824  ;;  %v2249_v22 = vld [vmem:[%s8032_s12 + $0x19] sm:$0xff] }
 0x239   : > { %1896 = vst.msk [vmem:[#allocation2 + $0x1c] sm:$0xf] %vm1124_vm3, %v1803_v6  ;;  %v2248_v6 = vld [vmem:[%s8032_s12 + $0x9] sm:$0xff]  ;;  %v2281_v34 = vpack.c.bf16 %v2249_v22, %v2249_v22 }
 0x23a   : > { %4671 = vmatmul.bf16.vlgmr.msra.gmra.mxu1 %v6411_v62  ;;  %1907 = vst.msk [vmem:[#allocation2 + $0xa0] sm:$0xf] %vm1124_vm3, %v1825_v7  ;;  %v1959_v7 = vpack.c.bf16 %v6181_v42, %v6181_v42  ;;  %v2280_v33 = vpack.c.bf16 %v2248_v6, %v2248_v6 }
 0x23c   : > { %1991 = vst.msk [vmem:[#allocation2 + $0x14] sm:$0xf] %vm448_vm0, %v1959_v7  ;;  %v2260_v7 = vld [vmem:[%s8032_s12 + $0x99] sm:$0xff] }
 0x23d   : > { %2150 = vrot.lane.b32.xlu1 %v2070_v44, %s6976_s9  ;;  %2148 = vrot.lane.b32.xlu0 %v2069_v40, %s6976_s9  ;;  %v2250_v40 = vld [vmem:[%s8032_s12 + $0x21] sm:$0xff] }
 0x23e   : > { %2152 = vrot.lane.b32.xlu2 %v2071_v5, %s6976_s9  ;;  %v6180_v5 = vld [vmem:[%s7052_s8 + $0x32] sm:$0xff]  ;;  %v2282_v14 = vpack.c.bf16 %v2250_v40, %v2250_v40  ;;  %v2261_v40 = vld [vmem:[%s8032_s12 + $0xa9] sm:$0xff] }
 0x23f   : > { %v1811_v16 = vpop.permute.xlu1 %1810  ;;  %v1809_v38 = vpop.permute.xlu0 %1808  ;;  %v6420_v23 = vld [vmem:[#allocation2 + $0x24] sm:$0xf0] }
 0x240   : > { %1900 = vst.msk [vmem:[#allocation2 + $0x4c] sm:$0xf] %vm1124_vm3, %v1811_v16  ;;  %v1831_v51 = vpop.permute.xlu2 %1830  ;;  %v6699_v25 = vld [vmem:[#allocation2 + $0x1c] sm:$0xf] }
 0x241   : > { %1899 = vst.msk [vmem:[#allocation2 + $0x40] sm:$0xf] %vm1124_vm3, %v1809_v38  ;;  %v6423_v0 = vor.u32 %v6699_v25, %v6420_v23  ;;  %v1958_v38 = vpack.c.bf16 %v6180_v5, %v6180_v5 }
 0x242   : > { %1910 = vst.msk [vmem:[#allocation2 + $0xc4] sm:$0xf] %vm1124_vm3, %v1831_v51  ;;  %v2252_v51 = vld [vmem:[%s8032_s12 + $0x39] sm:$0xff] }
 0x243   : > { %1990 = vst.msk [vmem:[#allocation2 + $0x8] sm:$0xf] %vm448_vm0, %v1958_v38 }
 0x245   : > { %2156 = vrot.lane.b32.xlu1 %v2073_v29, %s6976_s9  ;;  %2154 = vrot.lane.b32.xlu0 %v2072_v30, %s6976_s9  ;;  %v6185_v29 = vld [vmem:[%s7052_s8 + $0x6a] sm:$0xff]  ;;  %v6184_v30 = vld [vmem:[%s7052_s8 + $0x62] sm:$0xff] }
 0x246   : > { %2158 = vrot.lane.b32.xlu2 %v2074_v13, %s6976_s9  ;;  %v2251_v13 = vld [vmem:[%s8032_s12 + $0x31] sm:$0xff]  ;;  %v1963_v36 = vpack.c.bf16 %v6185_v29, %v6185_v29 }
 0x247   : > { %v1817_v49 = vpop.permute.xlu1 %1816  ;;  %v1815_v43 = vpop.permute.xlu0 %1814  ;;  %v6705_v2 = vld [vmem:[#allocation2 + $0x4c] sm:$0xf]  ;;  %v2283_v17 = vpack.c.bf16 %v2251_v13, %v2251_v13  ;;  %v2262_v29 = vld [vmem:[%s8032_s12 + $0xb1] sm:$0xff]  ;;  %v2293_v13 = vpack.c.bf16 %v2261_v40, %v2261_v40 }
 0x248   : > { %1903 = vst.msk [vmem:[#allocation2 + $0x70] sm:$0xf] %vm1124_vm3, %v1817_v49  ;;  %v1837_v3 = vpop.permute.xlu2 %1836  ;;  %v6432_v52 = vld [vmem:[#allocation2 + $0x3c] sm:$0xf0]  ;;  %v6447_v44 = vor.u32 %v6705_v2, %v6444_v28  ;;  %v1962_v49 = vpack.c.bf16 %v6184_v30, %v6184_v30  ;;  %v2290_v28 = vpack.c.bf16 %v2258_v41, %v2258_v41  ;;  %v6198_v41 = vld [vmem:[%s7052_s8 + $0x10a] sm:$0xff] }
 0x249   : > { %1902 = vst.msk [vmem:[#allocation2 + $0x64] sm:$0xf] %vm1124_vm3, %v1815_v43  ;;  %v6435_v24 = vor.u32 %v6702_v32, %v6432_v52  ;;  %v6183_v43 = vld [vmem:[%s7052_s8 + $0x52] sm:$0xff]  ;;  %v6186_v32 = vld [vmem:[%s7052_s8 + $0x7a] sm:$0xff] }
 0x24a   : > { %4676 = vmatmul.bf16.gmra.mxu1 %v6423_v0  ;;  %1913 = vst.msk [vmem:[#allocation2 + $0xe8] sm:$0xf] %vm1124_vm3, %v1837_v3  ;;  %v2284_v0 = vpack.c.bf16 %v2252_v51, %v2252_v51  ;;  %v2285_v3 = vpack.c.bf16 %v2253_v39, %v2253_v39  ;;  %v6192_v51 = vld [vmem:[%s7052_s8 + $0xc2] sm:$0xff]  ;;  %v2294_v39 = vpack.c.bf16 %v2262_v29, %v2262_v29  ;;  %v6205_v29 = vld [vmem:[%s7052_s8 + $0x15a] sm:$0xff] }
 0x24b   : > { %1995 = vst.msk [vmem:[#allocation2 + $0x44] sm:$0xf] %vm448_vm0, %v1963_v36  ;;  %v1970_v36 = vpack.c.bf16 %v6192_v51, %v6192_v51  ;;  %v2272_v51 = vld [vmem:[%s8032_s12 + $0x129] sm:$0xff] }
 0x24c   : > { %1994 = vst.msk [vmem:[#allocation2 + $0x38] sm:$0xf] %vm448_vm0, %v1962_v49  ;;  %v6197_v49 = vld [vmem:[%s7052_s8 + $0xfa] sm:$0xff] }
 0x24d   : > { %2162 = vrot.lane.b32.xlu1 %v2076_v9, %s6976_s9  ;;  %2160 = vrot.lane.b32.xlu0 %v2075_v63, %s6976_s9  ;;  %v1961_v63 = vpack.c.bf16 %v6183_v43, %v6183_v43  ;;  %2002 = vst.msk [vmem:[#allocation2 + $0x98] sm:$0xf] %vm448_vm0, %v1970_v36  ;;  %v6196_v43 = vld [vmem:[%s7052_s8 + $0xf2] sm:$0xff] }
 0x24e   : > { %2164 = vrot.lane.b32.xlu2 %v2077_v21, %s6976_s9 }
 0x24f   : > { %v1823_v45 = vpop.permute.xlu1 %1822  ;;  %v1821_v47 = vpop.permute.xlu0 %1820  ;;  %v6456_v27 = vld [vmem:[#allocation2 + $0x6c] sm:$0xf0]  ;;  %1993 = vst.msk [vmem:[#allocation2 + $0x2c] sm:$0xf] %vm448_vm0, %v1961_v63 }
 0x250   : > { %1906 = vst.msk [vmem:[#allocation2 + $0x94] sm:$0xf] %vm1124_vm3, %v1823_v45  ;;  %v1843_v54 = vpop.permute.xlu2 %1842  ;;  %v6708_v21 = vld [vmem:[#allocation2 + $0x64] sm:$0xf]  ;;  %v6188_v45 = vld [vmem:[%s7052_s8 + $0x92] sm:$0xff] }
 0x251   : > { %1905 = vst.msk [vmem:[#allocation2 + $0x88] sm:$0xf] %vm1124_vm3, %v1821_v47  ;;  %v6187_v47 = vld [vmem:[%s7052_s8 + $0x82] sm:$0xff]  ;;  %v1966_v52 = vpack.c.bf16 %v6188_v45, %v6188_v45  ;;  %v6459_v18 = vor.u32 %v6708_v21, %v6456_v27  ;;  %v2265_v21 = vld [vmem:[%s8032_s12 + $0xd9] sm:$0xff]  ;;  %v1974_v27 = vpack.c.bf16 %v6196_v43, %v6196_v43  ;;  %v1983_v43 = vpack.c.bf16 %v6205_v29, %v6205_v29 }
 0x252   : > { %1916 = vst.msk [vmem:[#allocation2 + $0x10c] sm:$0xf] %vm1124_vm3, %v1843_v54 }
 0x253   : > { %1998 = vst.msk [vmem:[#allocation2 + $0x68] sm:$0xf] %vm448_vm0, %v1966_v52 }
 0x254   : > { %2006 = vst.msk [vmem:[#allocation2 + $0xc8] sm:$0xf] %vm448_vm0, %v1974_v27  ;;  %v6209_v27 = vld [vmem:[%s7052_s8 + $0x18a] sm:$0xff] }
 0x255   : > { %2168 = vrot.lane.b32.xlu1 %v2079_v46, %s6976_s9  ;;  %2166 = vrot.lane.b32.xlu0 %v2078_v55, %s6976_s9  ;;  %v2254_v46 = vld [vmem:[%s8032_s12 + $0x51] sm:$0xff]  ;;  %2015 = vst.msk [vmem:[#allocation2 + $0x134] sm:$0xf] %vm448_vm0, %v1983_v43  ;;  %v2480_v43 = vld [vmem:[%s8032_s12 + $0x62] sm:$0xff] }
 0x256   : > { %2170 = vrot.lane.b32.xlu2 %v2080_v35, %s6976_s9  ;;  %v2286_v57 = vpack.c.bf16 %v2254_v46, %v2254_v46 }
 0x257   : > { %v1829_v53 = vpop.permute.xlu1 %1828  ;;  %v1827_v11 = vpop.permute.xlu0 %1826 }
 0x258   : > { %1909 = vst.msk [vmem:[#allocation2 + $0xb8] sm:$0xf] %vm1124_vm3, %v1829_v53  ;;  %v1849_v48 = vpop.permute.xlu2 %1848  ;;  %v2256_v53 = vld [vmem:[%s8032_s12 + $0x69] sm:$0xff] }
 0x259   : > { %1908 = vst.msk [vmem:[#allocation2 + $0xac] sm:$0xf] %vm1124_vm3, %v1827_v11  ;;  %v1965_v11 = vpack.c.bf16 %v6187_v47, %v6187_v47  ;;  %v6468_v6 = vld [vmem:[#allocation2 + $0x84] sm:$0xf0] }
 0x25a   : > { %4681 = vmatmul.bf16.gmra.mxu1 %v6435_v24  ;;  %1919 = vst.msk [vmem:[#allocation2 + $0x130] sm:$0xf] %vm1124_vm3, %v1849_v48  ;;  %v2287_v24 = vpack.c.bf16 %v2255_v8, %v2255_v8  ;;  %v2288_v48 = vpack.c.bf16 %v2256_v53, %v2256_v53  ;;  %v2267_v53 = vld [vmem:[%s8032_s12 + $0xf1] sm:$0xff] }
 0x25b   : > { %1997 = vst.msk [vmem:[#allocation2 + $0x5c] sm:$0xf] %vm448_vm0, %v1965_v11  ;;  %v2266_v11 = vld [vmem:[%s8032_s12 + $0xe1] sm:$0xff] }
 0x25d   : > { %2174 = vrot.lane.b32.xlu1 %v2082_v31, %s6976_s9  ;;  %2172 = vrot.lane.b32.xlu0 %v2081_v1, %s6976_s9  ;;  %v1964_v1 = vpack.c.bf16 %v6186_v32, %v6186_v32 }
 0x25e   : > { %2176 = vrot.lane.b32.xlu2 %v2083_v10, %s6976_s9  ;;  %v6191_v10 = vld [vmem:[%s7052_s8 + $0xb2] sm:$0xff] }
 0x25f   : > { %v1835_v59 = vpop.permute.xlu1 %1834  ;;  %v1833_v19 = vpop.permute.xlu0 %1832  ;;  %1996 = vst.msk [vmem:[#allocation2 + $0x50] sm:$0xf] %vm448_vm0, %v1964_v1 }
 0x260   : > { %1912 = vst.msk [vmem:[#allocation2 + $0xdc] sm:$0xf] %vm1124_vm3, %v1835_v59  ;;  %v1855_v4 = vpop.permute.xlu2 %1854  ;;  %v2257_v59 = vld [vmem:[%s8032_s12 + $0x79] sm:$0xff] }
 0x261   : > { %1911 = vst.msk [vmem:[#allocation2 + $0xd0] sm:$0xf] %vm1124_vm3, %v1833_v19  ;;  %v6552_v60 = vld [vmem:[#allocation2 + $0x12c] sm:$0xf0]  ;;  %v2289_v2 = vpack.c.bf16 %v2257_v59, %v2257_v59  ;;  %v2299_v59 = vpack.c.bf16 %v2267_v53, %v2267_v53 }
 0x262   : > { %1922 = vst.msk [vmem:[#allocation2 + $0x154] sm:$0xf] %vm1124_vm3, %v1855_v4  ;;  %v1968_v4 = vpack.c.bf16 %v6190_v26, %v6190_v26 }
 0x264   : > { %2000 = vst.msk [vmem:[#allocation2 + $0x80] sm:$0xf] %vm448_vm0, %v1968_v4  ;;  %v6203_v4 = vld [vmem:[%s7052_s8 + $0x142] sm:$0xff] }
 0x265   : > { %2180 = vrot.lane.b32.xlu1 %v2085_v20, %s6976_s9  ;;  %2178 = vrot.lane.b32.xlu0 %v2084_v37, %s6976_s9  ;;  %v1969_v20 = vpack.c.bf16 %v6191_v10, %v6191_v10  ;;  %v2259_v37 = vld [vmem:[%s8032_s12 + $0x91] sm:$0xff]  ;;  %v2268_v10 = vld [vmem:[%s8032_s12 + $0xf9] sm:$0xff] }
 0x266   : > { %2343 = vrot.lane.b32.xlu2 %v2279_v61, %s6979_s17  ;;  %v6189_v61 = vld [vmem:[%s7052_s8 + $0x9a] sm:$0xff]  ;;  %v2291_v22 = vpack.c.bf16 %v2259_v37, %v2259_v37  ;;  %v2300_v37 = vpack.c.bf16 %v2268_v10, %v2268_v10 }
 0x267   : > { %v1841_v15 = vpop.permute.xlu1 %1840  ;;  %v1839_v62 = vpop.permute.xlu0 %1838  ;;  %v1967_v42 = vpack.c.bf16 %v6189_v61, %v6189_v61  ;;  %2001 = vst.msk [vmem:[#allocation2 + $0x8c] sm:$0xf] %vm448_vm0, %v1969_v20  ;;  %v1976_v20 = vpack.c.bf16 %v6198_v41, %v6198_v41  ;;  %v6202_v61 = vld [vmem:[%s7052_s8 + $0x13a] sm:$0xff] }
 0x268   : > { %1915 = vst.msk [vmem:[#allocation2 + $0x100] sm:$0xf] %vm1124_vm3, %v1841_v15  ;;  %v1861_v16 = vpop.permute.xlu2 %1860 }
 0x269   : > { %1914 = vst.msk [vmem:[#allocation2 + $0xf4] sm:$0xf] %vm1124_vm3, %v1839_v62 }
 0x26a   : > { %4686 = vmatmul.bf16.gmra.mxu1 %v6447_v44  ;;  %1925 = vst.msk [vmem:[#allocation2 + $0x178] sm:$0xf] %vm1124_vm3, %v1861_v16  ;;  %v6193_v44 = vld [vmem:[%s7052_s8 + $0xca] sm:$0xff]  ;;  %v1972_v16 = vpack.c.bf16 %v6194_v56, %v6194_v56 }
 0x26b   : > { %1999 = vst.msk [vmem:[#allocation2 + $0x74] sm:$0xf] %vm448_vm0, %v1967_v42  ;;  %v1971_v30 = vpack.c.bf16 %v6193_v44, %v6193_v44 }
 0x26c   : > { %2004 = vst.msk [vmem:[#allocation2 + $0xb0] sm:$0xf] %vm448_vm0, %v1972_v16 }
 0x26d   : > { %2347 = vrot.lane.b32.xlu1 %v2281_v34, %s6979_s17  ;;  %2345 = vrot.lane.b32.xlu0 %v2280_v33, %s6979_s17  ;;  %v6711_v33 = vld [vmem:[#allocation2 + $0x7c] sm:$0xf]  ;;  %2003 = vst.msk [vmem:[#allocation2 + $0xa4] sm:$0xf] %vm448_vm0, %v1971_v30 }
 0x26e   : > { %2349 = vrot.lane.b32.xlu2 %v2282_v14, %s6979_s17  ;;  %v6471_v38 = vor.u32 %v6711_v33, %v6468_v6  ;;  %2008 = vst.msk [vmem:[#allocation2 + $0xe0] sm:$0xf] %vm448_vm0, %v1976_v20  ;;  %v2271_v6 = vld [vmem:[%s8032_s12 + $0x121] sm:$0xff]  ;;  %v6717_v33 = vld [vmem:[#allocation2 + $0xac] sm:$0xf]  ;;  %v2273_v30 = vld [vmem:[%s8032_s12 + $0x139] sm:$0xff] }
 0x26f   : > { %v1847_v25 = vpop.permute.xlu1 %1846  ;;  %v1845_v23 = vpop.permute.xlu0 %1844  ;;  %v6210_v20 = vld [vmem:[%s7052_s8 + $0x19a] sm:$0xff] }
 0x270   : > { %1918 = vst.msk [vmem:[#allocation2 + $0x124] sm:$0xf] %vm1124_vm3, %v1847_v25  ;;  %v2123_v9 = vpop.permute.xlu2 %2122  ;;  %v2292_v25 = vpack.c.bf16 %v2260_v7, %v2260_v7 }
 0x271   : > { %1917 = vst.msk [vmem:[#allocation2 + $0x118] sm:$0xf] %vm1124_vm3, %v1845_v23  ;;  %v6588_v16 = vld [vmem:[#allocation2 + $0x174] sm:$0xf0] }
 0x272   : > { %2217 = vst.msk [vmem:[#allocation2 + $0x20] sm:$0xf] %vm2214_vm4, %v2123_v9 }
 0x275   : > { %2353 = vrot.lane.b32.xlu1 %v2284_v0, %s6979_s17  ;;  %2351 = vrot.lane.b32.xlu0 %v2283_v17, %s6979_s17  ;;  %v2264_v0 = vld [vmem:[%s8032_s12 + $0xc9] sm:$0xff]  ;;  %v2263_v17 = vld [vmem:[%s8032_s12 + $0xc1] sm:$0xff] }
 0x276   : > { %2355 = vrot.lane.b32.xlu2 %v2285_v3, %s6979_s17  ;;  %v1975_v3 = vpack.c.bf16 %v6197_v49, %v6197_v49  ;;  %v2296_v45 = vpack.c.bf16 %v2264_v0, %v2264_v0  ;;  %v2295_v47 = vpack.c.bf16 %v2263_v17, %v2263_v17  ;;  %v2274_v49 = vld [vmem:[%s8032_s12 + $0x141] sm:$0xff]  ;;  %v6204_v0 = vld [vmem:[%s7052_s8 + $0x152] sm:$0xff]  ;;  %v2305_v17 = vpack.c.bf16 %v2273_v30, %v2273_v30 }
 0x277   : > { %v1853_v55 = vpop.permute.xlu1 %1852  ;;  %v1851_v54 = vpop.permute.xlu0 %1850  ;;  %v6732_v35 = vld [vmem:[#allocation2 + $0x124] sm:$0xf] }
 0x278   : > { %1921 = vst.msk [vmem:[#allocation2 + $0x148] sm:$0xf] %vm1124_vm3, %v1853_v55  ;;  %v6555_v12 = vor.u32 %v6732_v35, %v6552_v60  ;;  %v2129_v31 = vpop.permute.xlu2 %2128  ;;  %v6195_v60 = vld [vmem:[%s7052_s8 + $0xe2] sm:$0xff]  ;;  %v2297_v55 = vpack.c.bf16 %v2265_v21, %v2265_v21  ;;  %v2306_v21 = vpack.c.bf16 %v2274_v49, %v2274_v49  ;;  %v2481_v49 = vld [vmem:[%s8032_s12 + $0x6a] sm:$0xff] }
 0x279   : > { %1920 = vst.msk [vmem:[#allocation2 + $0x13c] sm:$0xf] %vm1124_vm3, %v1851_v54  ;;  %v1973_v46 = vpack.c.bf16 %v6195_v60, %v6195_v60  ;;  %v6714_v54 = vld [vmem:[#allocation2 + $0x94] sm:$0xf]  ;;  %v6480_v35 = vld [vmem:[#allocation2 + $0x9c] sm:$0xf0] }
 0x27a   : > { %4691 = vmatmul.bf16.gmra.mxu1 %v6459_v18  ;;  %4731 = vmatmul.bf16.vlgmr.msrb.gmra.mxu3 %v6555_v12  ;;  %2220 = vst.msk [vmem:[#allocation2 + $0x44] sm:$0xf] %vm2214_vm4, %v2129_v31  ;;  %v6200_v18 = vld [vmem:[%s7052_s8 + $0x122] sm:$0xff]  ;;  %v6199_v12 = vld [vmem:[%s7052_s8 + $0x112] sm:$0xff]  ;;  %v6483_v1 = vor.u32 %v6714_v54, %v6480_v35  ;;  %v1987_v54 = vpack.c.bf16 %v6209_v27, %v6209_v27 }
 0x27b   : > { %2007 = vst.msk [vmem:[#allocation2 + $0xd4] sm:$0xf] %vm448_vm0, %v1975_v3  ;;  %v1978_v31 = vpack.c.bf16 %v6200_v18, %v6200_v18  ;;  %v1977_v26 = vpack.c.bf16 %v6199_v12, %v6199_v12  ;;  %v1982_v3 = vpack.c.bf16 %v6204_v0, %v6204_v0  ;;  %v6208_v60 = vld [vmem:[%s7052_s8 + $0x182] sm:$0xff]  ;;  %v6207_v18 = vld [vmem:[%s7052_s8 + $0x172] sm:$0xff] }
 0x27c   : > { %2005 = vst.msk [vmem:[#allocation2 + $0xbc] sm:$0xf] %vm448_vm0, %v1973_v46  ;;  %v2277_v35 = vld [vmem:[%s8032_s12 + $0x169] sm:$0xff] }
 0x27d   : > { %2359 = vrot.lane.b32.xlu1 %v2287_v24, %s6979_s17  ;;  %2357 = vrot.lane.b32.xlu0 %v2286_v57, %s6979_s17  ;;  %v6738_v57 = vld [vmem:[#allocation2 + $0x154] sm:$0xf]  ;;  %2010 = vst.msk [vmem:[#allocation2 + $0xf8] sm:$0xf] %vm448_vm0, %v1978_v31  ;;  %v6211_v31 = vld [vmem:[%s7052_s8 + $0x1a2] sm:$0xff] }
 0x27e   : > { %2361 = vrot.lane.b32.xlu2 %v2288_v48, %s6979_s17  ;;  %2009 = vst.msk [vmem:[#allocation2 + $0xec] sm:$0xf] %vm448_vm0, %v1977_v26  ;;  %v6720_v26 = vld [vmem:[#allocation2 + $0xc4] sm:$0xf]  ;;  %v1989_v41 = vpack.c.bf16 %v6211_v31, %v6211_v31 }
 0x27f   : > { %v1859_v19 = vpop.permute.xlu1 %1858  ;;  %v1857_v58 = vpop.permute.xlu0 %1856  ;;  %v6564_v15 = vld [vmem:[#allocation2 + $0x144] sm:$0xf0]  ;;  %2014 = vst.msk [vmem:[#allocation2 + $0x128] sm:$0xf] %vm448_vm0, %v1982_v3  ;;  %v2512_v3 = vpack.c.bf16 %v2480_v43, %v2480_v43 }
 0x280   : > { %1924 = vst.msk [vmem:[#allocation2 + $0x16c] sm:$0xf] %vm1124_vm3, %v1859_v19  ;;  %v2135_v50 = vpop.permute.xlu2 %2134  ;;  %v6735_v62 = vld [vmem:[#allocation2 + $0x13c] sm:$0xf]  ;;  %v2298_v19 = vpack.c.bf16 %v2266_v11, %v2266_v11  ;;  %v2497_v43 = vld [vmem:[%s8032_s12 + $0x12a] sm:$0xff] }
 0x281   : > { %1923 = vst.msk [vmem:[#allocation2 + $0x160] sm:$0xf] %vm1124_vm3, %v1857_v58  ;;  %v6567_v14 = vor.u32 %v6735_v62, %v6564_v15  ;;  %v1980_v15 = vpack.c.bf16 %v6202_v61, %v6202_v61  ;;  %v6201_v62 = vld [vmem:[%s7052_s8 + $0x12a] sm:$0xff] }
 0x282   : > { %2223 = vst.msk [vmem:[#allocation2 + $0x68] sm:$0xf] %vm2214_vm4, %v2135_v50  ;;  %v1979_v7 = vpack.c.bf16 %v6201_v62, %v6201_v62  ;;  %v2476_v62 = vld [vmem:[%s8032_s12 + $0x32] sm:$0xff] }
 0x283   : > { %2012 = vst.msk [vmem:[#allocation2 + $0x110] sm:$0xf] %vm448_vm0, %v1980_v15 }
 0x284   : > { %2011 = vst.msk [vmem:[#allocation2 + $0x104] sm:$0xf] %vm448_vm0, %v1979_v7 }
 0x285   : > { %2365 = vrot.lane.b32.xlu1 %v2290_v28, %s6979_s17  ;;  %2363 = vrot.lane.b32.xlu0 %v2289_v2, %s6979_s17  ;;  %v2270_v28 = vld [vmem:[%s8032_s12 + $0x111] sm:$0xff]  ;;  %v2269_v2 = vld [vmem:[%s8032_s12 + $0x109] sm:$0xff]  ;;  %2019 = vst.msk [vmem:[#allocation2 + $0x164] sm:$0xf] %vm448_vm0, %v1987_v54 }
 0x286   : > { %2367 = vrot.lane.b32.xlu2 %v2291_v22, %s6979_s17  ;;  %v1981_v22 = vpack.c.bf16 %v6203_v4, %v6203_v4  ;;  %v2302_v56 = vpack.c.bf16 %v2270_v28, %v2270_v28  ;;  %v2301_v44 = vpack.c.bf16 %v2269_v2, %v2269_v2  ;;  %v1988_v2 = vpack.c.bf16 %v6210_v20, %v6210_v20  ;;  %v2490_v20 = vld [vmem:[%s8032_s12 + $0xda] sm:$0xff] }
 0x287   : > { %v2121_v5 = vpop.permute.xlu1 %2120  ;;  %v2119_v34 = vpop.permute.xlu0 %2118  ;;  %2021 = vst.msk [vmem:[#allocation2 + $0x17c] sm:$0xf] %vm448_vm0, %v1989_v41 }
 0x288   : > { %2216 = vst.msk [vmem:[#allocation2 + $0x14] sm:$0xf] %vm2214_vm4, %v2121_v5  ;;  %v2141_v23 = vpop.permute.xlu2 %2140  ;;  %v6576_v52 = vld [vmem:[#allocation2 + $0x15c] sm:$0xf0]  ;;  %v6492_v5 = vld [vmem:[#allocation2 + $0xb4] sm:$0xf0] }
 0x289   : > { %2215 = vst.msk [vmem:[#allocation2 + $0x8] sm:$0xf] %vm2214_vm4, %v2119_v34  ;;  %v6579_v48 = vor.u32 %v6738_v57, %v6576_v52  ;;  %v2303_v34 = vpack.c.bf16 %v2271_v6, %v2271_v6  ;;  %v6495_v36 = vor.u32 %v6717_v33, %v6492_v5  ;;  %v1986_v52 = vpack.c.bf16 %v6208_v60, %v6208_v60  ;;  %v6504_v57 = vld [vmem:[#allocation2 + $0xcc] sm:$0xf0]  ;;  %v6516_v33 = vld [vmem:[#allocation2 + $0xe4] sm:$0xf0] }
 0x28a   : > { %4696 = vmatmul.bf16.gmra.mxu1 %v6471_v38  ;;  %4736 = vmatmul.bf16.gmra.mxu3 %v6567_v14  ;;  %2226 = vst.msk [vmem:[#allocation2 + $0x8c] sm:$0xf] %vm2214_vm4, %v2141_v23  ;;  %v6741_v38 = vld [vmem:[#allocation2 + $0x16c] sm:$0xf]  ;;  %v8321_v5 = vpack.c.bf16 %v2476_v62, %v2476_v62  ;;  %v6726_v60 = vld [vmem:[#allocation2 + $0xf4] sm:$0xf] }
 0x28b   : > { %2013 = vst.msk [vmem:[#allocation2 + $0x11c] sm:$0xf] %vm448_vm0, %v1981_v22  ;;  %v6206_v14 = vld [vmem:[%s7052_s8 + $0x16a] sm:$0xff]  ;;  %v2474_v22 = vld [vmem:[%s8032_s12 + $0x1a] sm:$0xff] }
 0x28c   : > { %v1984_v23 = vpack.c.bf16 %v6206_v14, %v6206_v14  ;;  %2018 = vst.msk [vmem:[#allocation2 + $0x158] sm:$0xf] %vm448_vm0, %v1986_v52 }
 0x28d   : > { %2371 = vrot.lane.b32.xlu1 %v2293_v13, %s6979_s17  ;;  %2369 = vrot.lane.b32.xlu0 %v2292_v25, %s6979_s17  ;;  %2020 = vst.msk [vmem:[#allocation2 + $0x170] sm:$0xf] %vm448_vm0, %v1988_v2 }
 0x28e   : > { %2373 = vrot.lane.b32.xlu2 %v2294_v39, %s6979_s17  ;;  %v6591_v39 = vor.u32 %v6741_v38, %v6588_v16  ;;  %2016 = vst.msk [vmem:[#allocation2 + $0x140] sm:$0xf] %vm448_vm0, %v1984_v23  ;;  %v2478_v16 = vld [vmem:[%s8032_s12 + $0x4a] sm:$0xff]  ;;  %v2477_v38 = vld [vmem:[%s8032_s12 + $0x3a] sm:$0xff] }
 0x28f   : > { %v2127_v9 = vpop.permute.xlu1 %2126  ;;  %v2125_v63 = vpop.permute.xlu0 %2124 }
 0x290   : > { %2219 = vst.msk [vmem:[#allocation2 + $0x38] sm:$0xf] %vm2214_vm4, %v2127_v9  ;;  %v2147_v8 = vpop.permute.xlu2 %2146  ;;  %v2304_v9 = vpack.c.bf16 %v2272_v51, %v2272_v51  ;;  %v2479_v51 = vld [vmem:[%s8032_s12 + $0x52] sm:$0xff] }
 0x291   : > { %2218 = vst.msk [vmem:[#allocation2 + $0x2c] sm:$0xf] %vm2214_vm4, %v2125_v63 }
 0x292   : > { %2229 = vst.msk [vmem:[#allocation2 + $0xb0] sm:$0xf] %vm2214_vm4, %v2147_v8  ;;  %v2275_v8 = vld [vmem:[%s8032_s12 + $0x151] sm:$0xff] }
 0x293   : > { %v2307_v53 = vpack.c.bf16 %v2275_v8, %v2275_v8  ;;  %v2484_v8 = vld [vmem:[%s8032_s12 + $0x92] sm:$0xff] }
 0x295   : > { %2377 = vrot.lane.b32.xlu1 %v2296_v45, %s6979_s17  ;;  %2375 = vrot.lane.b32.xlu0 %v2295_v47, %s6979_s17  ;;  %v8282_v45 = vpop.f32.mrf.mxu3  ;;  %v2276_v47 = vld [vmem:[%s8032_s12 + $0x159] sm:$0xff] }
 0x296   : > { %2379 = vrot.lane.b32.xlu2 %v2297_v55, %s6979_s17  ;;  %v2308_v12 = vpack.c.bf16 %v2276_v47, %v2276_v47  ;;  %v6528_v47 = vld [vmem:[#allocation2 + $0xfc] sm:$0xf0] }
 0x297   : > { %v2133_v32 = vpop.permute.xlu1 %2132  ;;  %v2131_v24 = vpop.permute.xlu0 %2130  ;;  %v6531_v52 = vor.u32 %v6726_v60, %v6528_v47 }
 0x298   : > { %2222 = vst.msk [vmem:[#allocation2 + $0x5c] sm:$0xf] %vm2214_vm4, %v2133_v32  ;;  %v2153_v58 = vpop.permute.xlu2 %2152  ;;  %v1985_v32 = vpack.c.bf16 %v6207_v18, %v6207_v18  ;;  %v2485_v18 = vld [vmem:[%s8032_s12 + $0x9a] sm:$0xff] }
 0x299   : > { %2221 = vst.msk [vmem:[#allocation2 + $0x50] sm:$0xf] %vm2214_vm4, %v2131_v24  ;;  %v2309_v24 = vpack.c.bf16 %v2277_v35, %v2277_v35 }
 0x29a   : > { %4701 = vmatmul.bf16.gmra.mxu1 %v6483_v1  ;;  %4741 = vmatmul.bf16.gmra.mxu3 %v6579_v48  ;;  %2232 = vst.msk [vmem:[#allocation2 + $0xd4] sm:$0xf] %vm2214_vm4, %v2153_v58  ;;  %v2472_v1 = vld [vmem:[%s8032_s12 + $0x2] sm:$0xff]  ;;  %v2278_v48 = vld [vmem:[%s8032_s12 + $0x171] sm:$0xff] }
 0x29b   : > { %2017 = vst.msk [vmem:[#allocation2 + $0x14c] sm:$0xf] %vm448_vm0, %v1985_v32  ;;  %v2473_v58 = vld [vmem:[%s8032_s12 + $0xa] sm:$0xff]  ;;  %v2504_v4 = vpack.c.bf16 %v2472_v1, %v2472_v1  ;;  %v2310_v61 = vpack.c.bf16 %v2278_v48, %v2278_v48  ;;  %v8361_v32 = vpack.c.bf16 %v2485_v18, %v2485_v18  ;;  %v2488_v48 = vld [vmem:[%s8032_s12 + $0xc2] sm:$0xff]  ;;  %vm5842_vm0 = vcmask 523264  }
 0x29d   : > { %2383 = vrot.lane.b32.xlu1 %v2299_v59, %s6979_s17  ;;  %2381 = vrot.lane.b32.xlu0 %v2298_v19, %s6979_s17  ;;  %v6507_v19 = vor.u32 %v6720_v26, %v6504_v57  ;;  %v2486_v57 = vld [vmem:[%s8032_s12 + $0xaa] sm:$0xff] }
 0x29e   : > { %2385 = vrot.lane.b32.xlu2 %v2300_v37, %s6979_s17  ;;  %v8304_v37 = vpop.f32.mrf.mxu3  ;;  %v2518_v41 = vpack.c.bf16 %v2486_v57, %v2486_v57 }
 0x29f   : > { %v2139_v50 = vpop.permute.xlu1 %2138  ;;  %v2137_v42 = vpop.permute.xlu0 %2136 }
 0x2a0   : > { %2225 = vst.msk [vmem:[#allocation2 + $0x80] sm:$0xf] %vm2214_vm4, %v2139_v50  ;;  %v2159_v40 = vpop.permute.xlu2 %2158  ;;  %v2505_v50 = vpack.c.bf16 %v2473_v58, %v2473_v58  ;;  %v6540_v58 = vld [vmem:[#allocation2 + $0x114] sm:$0xf0] }
 0x2a1   : > { %2224 = vst.msk [vmem:[#allocation2 + $0x74] sm:$0xf] %vm2214_vm4, %v2137_v42  ;;  %v2475_v42 = vld [vmem:[%s8032_s12 + $0x22] sm:$0xff] }
 0x2a2   : > { %2235 = vst.msk [vmem:[#allocation2 + $0xf8] sm:$0xf] %vm2214_vm4, %v2159_v40 }
 0x2a5   : > { %2389 = vrot.lane.b32.xlu1 %v2302_v56, %s6979_s17  ;;  %2387 = vrot.lane.b32.xlu0 %v2301_v44, %s6979_s17  ;;  %v2507_v56 = vpack.c.bf16 %v2475_v42, %v2475_v42  ;;  %v2506_v44 = vpack.c.bf16 %v2474_v22, %v2474_v22  ;;  %v2491_v42 = vld [vmem:[%s8032_s12 + $0xe2] sm:$0xff]  ;;  %v2522_v22 = vpack.c.bf16 %v2490_v20, %v2490_v20 }
 0x2a6   : > { %2391 = vrot.lane.b32.xlu2 %v2303_v34, %s6979_s17  ;;  %v8319_v7 = vpop.f32.mrf.mxu3  ;;  %v6723_v34 = vld [vmem:[#allocation2 + $0xdc] sm:$0xf] }
 0x2a7   : > { %v2145_v13 = vpop.permute.xlu1 %2144  ;;  %v2143_v25 = vpop.permute.xlu0 %2142  ;;  %v6519_v30 = vor.u32 %v6723_v34, %v6516_v33 }
 0x2a8   : > { %2228 = vst.msk [vmem:[#allocation2 + $0xa4] sm:$0xf] %vm2214_vm4, %v2145_v13  ;;  %v2165_v63 = vpop.permute.xlu2 %2164  ;;  %v2510_v13 = vpack.c.bf16 %v2478_v16, %v2478_v16  ;;  %v2494_v16 = vld [vmem:[%s8032_s12 + $0x10a] sm:$0xff] }
 0x2a9   : > { %2227 = vst.msk [vmem:[#allocation2 + $0x98] sm:$0xf] %vm2214_vm4, %v2143_v25  ;;  %v2509_v25 = vpack.c.bf16 %v2477_v38, %v2477_v38 }
 0x2aa   : > { %4706 = vmatmul.bf16.gmra.mxu1 %v6495_v36  ;;  %4746 = vmatmul.bf16.gmra.mxu3 %v6591_v39  ;;  %2238 = vst.msk [vmem:[#allocation2 + $0x11c] sm:$0xf] %vm2214_vm4, %v2165_v63  ;;  %v8333_v36 = vpack.c.bf16 %v2479_v51, %v2479_v51  ;;  %v2513_v63 = vpack.c.bf16 %v2481_v49, %v2481_v49 }
 0x2ad   : > { %2395 = vrot.lane.b32.xlu1 %v2305_v17, %s6979_s17  ;;  %2393 = vrot.lane.b32.xlu0 %v2304_v9, %s6979_s17  ;;  %v2482_v9 = vld [vmem:[%s8032_s12 + $0x7a] sm:$0xff] }
 0x2ae   : > { %2397 = vrot.lane.b32.xlu2 %v2306_v21, %s6979_s17  ;;  %v8335_v39 = vpop.f32.mrf.mxu3  ;;  %v8347_v27 = vpack.c.bf16 %v2482_v9, %v2482_v9 }
 0x2af   : > { %v2151_v46 = vpop.permute.xlu1 %2150  ;;  %v2149_v55 = vpop.permute.xlu0 %2148  ;;  %10190 = vst [vmem:[#allocation3_spill] sm:$0xff] %v8335_v39 }
 0x2b0   : > { %2231 = vst.msk [vmem:[#allocation2 + $0xc8] sm:$0xf] %vm2214_vm4, %v2151_v46  ;;  %v2171_v11 = vpop.permute.xlu2 %2170  ;;  %v2483_v46 = vld [vmem:[%s8032_s12 + $0x82] sm:$0xff] }
 0x2b1   : > { %2230 = vst.msk [vmem:[#allocation2 + $0xbc] sm:$0xf] %vm2214_vm4, %v2149_v55 }
 0x2b2   : > { %2241 = vst.msk [vmem:[#allocation2 + $0x140] sm:$0xf] %vm2214_vm4, %v2171_v11 }
 0x2b5   : > { %2401 = vrot.lane.b32.xlu1 %v2308_v12, %s6979_s17  ;;  %2399 = vrot.lane.b32.xlu0 %v2307_v53, %s6979_s17  ;;  %v2516_v12 = vpack.c.bf16 %v2484_v8, %v2484_v8  ;;  %v2515_v53 = vpack.c.bf16 %v2483_v46, %v2483_v46  ;;  %v2499_v8 = vld [vmem:[%s8032_s12 + $0x142] sm:$0xff]  ;;  %v2498_v46 = vld [vmem:[%s8032_s12 + $0x13a] sm:$0xff] }
 0x2b6   : > { %2403 = vrot.lane.b32.xlu2 %v2309_v24, %s6979_s17  ;;  %v8353_v55 = vpop.f32.mrf.mxu3  ;;  %v2487_v24 = vld [vmem:[%s8032_s12 + $0xb2] sm:$0xff]  ;;  %v8435_v18 = vpack.c.bf16 %v2498_v46, %v2498_v46  ;;  %v6221_v46 = vld [vmem:[%s8032_s12 + $0x80] sm:$0xff] }
 0x2b7   : > { %v2157_v10 = vpop.permute.xlu1 %2156  ;;  %v2155_v59 = vpop.permute.xlu0 %2154  ;;  %10191 = vst [vmem:[#allocation4_spill] sm:$0xff] %v8353_v55  ;;  %v2519_v26 = vpack.c.bf16 %v2487_v24, %v2487_v24  ;;  %v6276_v55 = vld [vmem:[%s8032_s12 + $0x1a] sm:$0xff] }
 0x2b8   : > { %2234 = vst.msk [vmem:[#allocation2 + $0xec] sm:$0xf] %vm2214_vm4, %v2157_v10  ;;  %v2177_v28 = vpop.permute.xlu2 %2176 }
 0x2b9   : > { %2233 = vst.msk [vmem:[#allocation2 + $0xe0] sm:$0xf] %vm2214_vm4, %v2155_v59 }
 0x2ba   : > { %4711 = vmatmul.bf16.gmra.mxu1 %v6507_v19  ;;  %2244 = vst.msk [vmem:[#allocation2 + $0x164] sm:$0xf] %vm2214_vm4, %v2177_v28  ;;  %v8375_v19 = vpack.c.bf16 %v2488_v48, %v2488_v48  ;;  %v6729_v28 = vld [vmem:[#allocation2 + $0x10c] sm:$0xf] }
 0x2bd   : > { %2568 = vrot.lane.b32.xlu1 %v2504_v4, %s6980_s18  ;;  %2405 = vrot.lane.b32.xlu0 %v2310_v61, %s6979_s17  ;;  %v2489_v4 = vld [vmem:[%s8032_s12 + $0xca] sm:$0xff] }
 0x2be   : > { %2570 = vrot.lane.b32.xlu2 %v2505_v50, %s6980_s18  ;;  %v8371_v10 = vpop.f32.mrf.mxu3  ;;  %v6543_v50 = vor.u32 %v6729_v28, %v6540_v58 }
 0x2bf   : > { %v2163_v6 = vpop.permute.xlu1 %2162  ;;  %v2161_v15 = vpop.permute.xlu0 %2160  ;;  %10192 = vst [vmem:[#allocation5_spill] sm:$0xff] %v8371_v10 }
 0x2c0   : > { %2237 = vst.msk [vmem:[#allocation2 + $0x110] sm:$0xf] %vm2214_vm4, %v2163_v6  ;;  %v2344_v40 = vpop.permute.xlu2 %2343  ;;  %v2521_v6 = vpack.c.bf16 %v2489_v4, %v2489_v4  ;;  %v6213_v4 = vld [vmem:[%s8032_s12 + $0x20] sm:$0xff] }
 0x2c1   : > { %2236 = vst.msk [vmem:[#allocation2 + $0x104] sm:$0xf] %vm2214_vm4, %v2161_v15 }
 0x2c2   : > { %2440 = vst.msk [vmem:[#allocation2 + $0x8] sm:$0xf] %vm2439_vm5, %v2344_v40  ;;  %v2492_v40 = vld [vmem:[%s8032_s12 + $0xf2] sm:$0xff] }
 0x2c5   : > { %2574 = vrot.lane.b32.xlu1 %v2507_v56, %s6980_s18  ;;  %2572 = vrot.lane.b32.xlu0 %v2506_v44, %s6980_s18  ;;  %v8389_v56 = vpack.c.bf16 %v2491_v42, %v2491_v42  ;;  %v2493_v44 = vld [vmem:[%s8032_s12 + $0xfa] sm:$0xff]  ;;  %v2731_v42 = vpack.c.bf16 %v6213_v4, %v6213_v4 }
 0x2c6   : > { %2576 = vrot.lane.b32.xlu2 %v8321_v5, %s6980_s18  ;;  %v8387_v62 = vpop.f32.mrf.mxu3  ;;  %v2525_v38 = vpack.c.bf16 %v2493_v44, %v2493_v44  ;;  %v6216_v44 = vld [vmem:[%s8032_s12 + $0x48] sm:$0xff] }
 0x2c7   : > { %v2169_v14 = vpop.permute.xlu1 %2168  ;;  %v2167_v29 = vpop.permute.xlu0 %2166  ;;  %10193 = vst [vmem:[#allocation6_spill] sm:$0xff] %v8387_v62 }
 0x2c8   : > { %2240 = vst.msk [vmem:[#allocation2 + $0x134] sm:$0xf] %vm2214_vm4, %v2169_v14  ;;  %v2350_v23 = vpop.permute.xlu2 %2349  ;;  %v2524_v14 = vpack.c.bf16 %v2492_v40, %v2492_v40  ;;  %v6215_v40 = vld [vmem:[%s8032_s12 + $0x38] sm:$0xff] }
 0x2c9   : > { %2239 = vst.msk [vmem:[#allocation2 + $0x128] sm:$0xf] %vm2214_vm4, %v2167_v29 }
 0x2ca   : > { %4716 = vmatmul.bf16.gmra.mxu1 %v6519_v30  ;;  %2443 = vst.msk [vmem:[#allocation2 + $0x2c] sm:$0xf] %vm2439_vm5, %v2350_v23  ;;  %v8401_v30 = vpack.c.bf16 %v2494_v16, %v2494_v16  ;;  %v6217_v16 = vld [vmem:[%s8032_s12 + $0x50] sm:$0xff] }
 0x2cd   : > { %2580 = vrot.lane.b32.xlu1 %v2510_v13, %s6980_s18  ;;  %2578 = vrot.lane.b32.xlu0 %v2509_v25, %s6980_s18  ;;  %v2496_v13 = vld [vmem:[%s8032_s12 + $0x122] sm:$0xff]  ;;  %v2495_v25 = vld [vmem:[%s8032_s12 + $0x112] sm:$0xff] }
 0x2ce   : > { %2582 = vrot.lane.b32.xlu2 %v8333_v36, %s6980_s18  ;;  %v8403_v51 = vpop.f32.mrf.mxu3 }
 0x2cf   : > { %v2175_v0 = vpop.permute.xlu1 %2174  ;;  %v2173_v17 = vpop.permute.xlu0 %2172  ;;  %10194 = vst [vmem:[#allocation7_spill] sm:$0xff] %v8403_v51 }
 0x2d0   : > { %2243 = vst.msk [vmem:[#allocation2 + $0x158] sm:$0xf] %vm2214_vm4, %v2175_v0  ;;  %v2356_v21 = vpop.permute.xlu2 %2355  ;;  %v2528_v0 = vpack.c.bf16 %v2496_v13, %v2496_v13  ;;  %v8483_v13 = vpack.c.bf16 %v6217_v16, %v6217_v16  ;;  %v6230_v16 = vld [vmem:[%s8032_s12 + $0xf0] sm:$0xff] }
 0x2d1   : > { %2242 = vst.msk [vmem:[#allocation2 + $0x14c] sm:$0xf] %vm2214_vm4, %v2173_v17  ;;  %v8414_v17 = vpack.c.bf16 %v2495_v25, %v2495_v25  ;;  %v6219_v25 = vld [vmem:[%s8032_s12 + $0x68] sm:$0xff] }
 0x2d2   : > { %2446 = vst.msk [vmem:[#allocation2 + $0x50] sm:$0xf] %vm2439_vm5, %v2356_v21 }
 0x2d5   : > { %2586 = vrot.lane.b32.xlu1 %v2513_v63, %s6980_s18  ;;  %2584 = vrot.lane.b32.xlu0 %v2512_v3, %s6980_s18  ;;  %v6820_v63 = vld [vmem:[%s10169_s3] ss:$0 sm:$0xff]  ;;  %v8420_v3 = vpack.c.bf16 %v2497_v43, %v2497_v43 }
 0x2d6   : > { %2588 = vrot.lane.b32.xlu2 %v8347_v27, %s6980_s18  ;;  %v4644_v21 = vadd.f32 %v6820_v63, %v8282_v45  ;;  %v2500_v45 = vld [vmem:[%s8032_s12 + $0x152] sm:$0xff] }
 0x2d7   : > { %v2181_v54 = vpop.permute.xlu1 %2180  ;;  %v2179_v35 = vpop.permute.xlu0 %2178 }
 0x2d8   : > { %2246 = vst.msk [vmem:[#allocation2 + $0x17c] sm:$0xf] %vm2214_vm4, %v2181_v54  ;;  %v2362_v11 = vpop.permute.xlu2 %2361 }
 0x2d9   : > { %2245 = vst.msk [vmem:[#allocation2 + $0x170] sm:$0xf] %vm2214_vm4, %v2179_v35 }
 0x2da   : > { %4721 = vmatmul.bf16.gmra.mxu1 %v6531_v52  ;;  %2449 = vst.msk [vmem:[#allocation2 + $0x74] sm:$0xf] %vm2439_vm5, %v2362_v11  ;;  %v2531_v52 = vpack.c.bf16 %v2499_v8, %v2499_v8  ;;  %v4646_v11 = vadd.f32 %v6820_v63, %v8304_v37  ;;  %v2503_v37 = vld [vmem:[%s8032_s12 + $0x172] sm:$0xff] }
 0x2db   : > { %v8456_v20 = vpack.c.bf16 %v2503_v37, %v2503_v37  ;;  %v6222_v8 = vld [vmem:[%s8032_s12 + $0x90] sm:$0xff]  ;;  %v6226_v37 = vld [vmem:[%s8032_s12 + $0xc0] sm:$0xff] }
 0x2dd   : > { %2592 = vrot.lane.b32.xlu1 %v2516_v12, %s6980_s18  ;;  %2590 = vrot.lane.b32.xlu0 %v2515_v53, %s6980_s18  ;;  %v8438_v53 = vpack.c.bf16 %v2500_v45, %v2500_v45  ;;  %v6223_v45 = vld [vmem:[%s8032_s12 + $0x98] sm:$0xff] }
 0x2de   : > { %2594 = vrot.lane.b32.xlu2 %v8361_v32, %s6980_s18 }
 0x2df   : > { %v2348_v31 = vpop.permute.xlu1 %2347  ;;  %v2346_v1 = vpop.permute.xlu0 %2345 }
 0x2e0   : > { %2442 = vst.msk [vmem:[#allocation2 + $0x20] sm:$0xf] %vm2439_vm5, %v2348_v31  ;;  %v2368_v59 = vpop.permute.xlu2 %2367  ;;  %v2502_v31 = vld [vmem:[%s8032_s12 + $0x16a] sm:$0xff] }
 0x2e1   : > { %2441 = vst.msk [vmem:[#allocation2 + $0x14] sm:$0xf] %vm2439_vm5, %v2346_v1  ;;  %v2501_v1 = vld [vmem:[%s8032_s12 + $0x15a] sm:$0xff] }
 0x2e2   : > { %2452 = vst.msk [vmem:[#allocation2 + $0x98] sm:$0xf] %vm2439_vm5, %v2368_v59  ;;  %v8453_v59 = vpack.c.bf16 %v2501_v1, %v2501_v1  ;;  %v6224_v1 = vld [vmem:[%s8032_s12 + $0xa8] sm:$0xff] }
 0x2e5   : > { %2598 = vrot.lane.b32.xlu1 %v2519_v26, %s6980_s18  ;;  %2596 = vrot.lane.b32.xlu0 %v2518_v41, %s6980_s18  ;;  %v2534_v41 = vpack.c.bf16 %v2502_v31, %v2502_v31  ;;  %v6225_v31 = vld [vmem:[%s8032_s12 + $0xb0] sm:$0xff] }
 0x2e6   : > { %2600 = vrot.lane.b32.xlu2 %v8375_v19, %s6980_s18 }
 0x2e7   : > { %v2354_v61 = vpop.permute.xlu1 %2353  ;;  %v2352_v2 = vpop.permute.xlu0 %2351 }
 0x2e8   : > { %2445 = vst.msk [vmem:[#allocation2 + $0x44] sm:$0xf] %vm2439_vm5, %v2354_v61  ;;  %v2374_v15 = vpop.permute.xlu2 %2373  ;;  %v6212_v61 = vld [vmem:[%s8032_s12 + $0x18] sm:$0xff] }
 0x2e9   : > { %2444 = vst.msk [vmem:[#allocation2 + $0x38] sm:$0xf] %vm2439_vm5, %v2352_v2 }
 0x2ea   : > { %4726 = vmatmul.bf16.gmra.mxu1 %v6543_v50  ;;  %2455 = vst.msk [vmem:[#allocation2 + $0xbc] sm:$0xf] %vm2439_vm5, %v2374_v15  ;;  %v6214_v50 = vld [vmem:[%s8032_s12 + $0x30] sm:$0xff] }
 0x2eb   : > { %v8469_v15 = vpack.c.bf16 %v6214_v50, %v6214_v50 }
 0x2ed   : > { %2604 = vrot.lane.b32.xlu1 %v2522_v22, %s6980_s18  ;;  %2602 = vrot.lane.b32.xlu0 %v2521_v6, %s6980_s18  ;;  %v2730_v22 = vpack.c.bf16 %v6212_v61, %v6212_v61  ;;  %v8528_v61 = vpack.c.bf16 %v6226_v37, %v6226_v37  ;;  %v6238_v37 = vld [vmem:[%s8032_s12 + $0x150] sm:$0xff] }
 0x2ee   : > { %2606 = vrot.lane.b32.xlu2 %v8389_v56, %s6980_s18 }
 0x2ef   : > { %v2360_v34 = vpop.permute.xlu1 %2359  ;;  %v2358_v33 = vpop.permute.xlu0 %2357 }
 0x2f0   : > { %2448 = vst.msk [vmem:[#allocation2 + $0x68] sm:$0xf] %vm2439_vm5, %v2360_v34  ;;  %v2380_v29 = vpop.permute.xlu2 %2379 }
 0x2f1   : > { %2447 = vst.msk [vmem:[#allocation2 + $0x5c] sm:$0xf] %vm2439_vm5, %v2358_v33 }
 0x2f2   : > { %2458 = vst.msk [vmem:[#allocation2 + $0xe0] sm:$0xf] %vm2439_vm5, %v2380_v29 }
 0x2f5   : > { %2610 = vrot.lane.b32.xlu1 %v2525_v38, %s6980_s18  ;;  %2608 = vrot.lane.b32.xlu0 %v2524_v14, %s6980_s18  ;;  %v2734_v38 = vpack.c.bf16 %v6216_v44, %v6216_v44  ;;  %v8480_v14 = vpack.c.bf16 %v6215_v40, %v6215_v40 }
 0x2f6   : > { %2612 = vrot.lane.b32.xlu2 %v8401_v30, %s6980_s18 }
 0x2f7   : > { %v2366_v23 = vpop.permute.xlu1 %2365  ;;  %v2364_v49 = vpop.permute.xlu0 %2363 }
 0x2f8   : > { %2451 = vst.msk [vmem:[#allocation2 + $0x8c] sm:$0xf] %vm2439_vm5, %v2366_v23  ;;  %v2386_v9 = vpop.permute.xlu2 %2385  ;;  %v6218_v23 = vld [vmem:[%s8032_s12 + $0x60] sm:$0xff] }
 0x2f9   : > { %2450 = vst.msk [vmem:[#allocation2 + $0x80] sm:$0xf] %vm2439_vm5, %v2364_v49  ;;  %v8495_v63 = vpack.c.bf16 %v6218_v23, %v6218_v23 }
 0x2fa   : > { %2461 = vst.msk [vmem:[#allocation2 + $0x104] sm:$0xf] %vm2439_vm5, %v2386_v9  ;;  %v2737_v9 = vpack.c.bf16 %v6219_v25, %v6219_v25  ;;  %v6232_v25 = vld [vmem:[%s8032_s12 + $0x108] sm:$0xff] }
 0x2fd   : > { %v4732_v60 = vpop.f32.mrf.mxu3  ;;  %2616 = vrot.lane.b32.xlu1 %v2528_v0, %s6980_s18  ;;  %2614 = vrot.lane.b32.xlu0 %v8414_v17, %s6980_s18  ;;  %v6220_v0 = vld [vmem:[%s8032_s12 + $0x78] sm:$0xff] }
 0x2fe   : > { %v8426_v47 = vadd.f32 %v4732_v60, %v4644_v21  ;;  %2618 = vrot.lane.b32.xlu2 %v8420_v3, %s6980_s18  ;;  %v8498_v60 = vpack.c.bf16 %v6220_v0, %v6220_v0  ;;  %v8558_v0 = vpack.c.bf16 %v6232_v25, %v6232_v25  ;;  %v6243_v25 = vld [vmem:[%s8032_s12 + $0x188] sm:$0xff] }
 0x2ff   : > { %v2372_v54 = vpop.permute.xlu1 %2371  ;;  %v2370_v35 = vpop.permute.xlu0 %2369 }
 0x300   : > { %10195 = vst [vmem:[#allocation8_spill] sm:$0xff] %v8426_v47  ;;  %v2392_v12 = vpop.permute.xlu2 %2391 }
 0x301   : > { %2454 = vst.msk [vmem:[#allocation2 + $0xb0] sm:$0xf] %vm2439_vm5, %v2372_v54 }
 0x302   : > { %2453 = vst.msk [vmem:[#allocation2 + $0xa4] sm:$0xf] %vm2439_vm5, %v2370_v35 }
 0x303   : > { %2464 = vst.msk [vmem:[#allocation2 + $0x128] sm:$0xf] %vm2439_vm5, %v2392_v12  ;;  %v8510_v12 = vpack.c.bf16 %v6221_v46, %v6221_v46 }
 0x305   : > { %v4734_v24 = vpop.f32.mrf.mxu3  ;;  %2622 = vrot.lane.b32.xlu1 %v2531_v52, %s6980_s18  ;;  %2620 = vrot.lane.b32.xlu0 %v8435_v18, %s6980_s18  ;;  %v2740_v52 = vpack.c.bf16 %v6222_v8, %v6222_v8 }
 0x306   : > { %v8444_v57 = vadd.f32 %v4734_v24, %v4646_v11  ;;  %2624 = vrot.lane.b32.xlu2 %v8438_v53, %s6980_s18  ;;  %v8513_v24 = vpack.c.bf16 %v6223_v45, %v6223_v45 }
 0x307   : > { %v2378_v48 = vpop.permute.xlu1 %2377  ;;  %v2376_v26 = vpop.permute.xlu0 %2375 }
 0x308   : > { %10196 = vst [vmem:[#allocation9_spill] sm:$0xff] %v8444_v57  ;;  %v2398_v58 = vpop.permute.xlu2 %2397  ;;  %v6272_v57 = vld [vmem:[%s8032_s12 + $0x169] sm:$0xff] }
 0x309   : > { %2457 = vst.msk [vmem:[#allocation2 + $0xd4] sm:$0xf] %vm2439_vm5, %v2378_v48 }
 0x30a   : > { %2456 = vst.msk [vmem:[#allocation2 + $0xc8] sm:$0xf] %vm2439_vm5, %v2376_v26 }
 0x30b   : > { %2467 = vst.msk [vmem:[#allocation2 + $0x14c] sm:$0xf] %vm2439_vm5, %v2398_v58  ;;  %v8525_v58 = vpack.c.bf16 %v6224_v1, %v6224_v1  ;;  %v6236_v1 = vld [vmem:[%s8032_s12 + $0x138] sm:$0xff] }
 0x30d   : > { %2628 = vrot.lane.b32.xlu1 %v2534_v41, %s6980_s18  ;;  %2626 = vrot.lane.b32.xlu0 %v8453_v59, %s6980_s18  ;;  %v2743_v41 = vpack.c.bf16 %v6225_v31, %v6225_v31  ;;  %v6237_v31 = vld [vmem:[%s8032_s12 + $0x140] sm:$0xff] }
 0x30e   : > { %2630 = vrot.lane.b32.xlu2 %v8456_v20, %s6980_s18 }
 0x30f   : > { %v2384_v28 = vpop.permute.xlu1 %2383  ;;  %v2382_v2 = vpop.permute.xlu0 %2381 }
 0x310   : > { %2460 = vst.msk [vmem:[#allocation2 + $0xf8] sm:$0xf] %vm2439_vm5, %v2384_v28  ;;  %v2404_v6 = vpop.permute.xlu2 %2403  ;;  %v6228_v28 = vld [vmem:[%s8032_s12 + $0xd8] sm:$0xff] }
 0x311   : > { %2459 = vst.msk [vmem:[#allocation2 + $0xec] sm:$0xf] %vm2439_vm5, %v2382_v2  ;;  %v6227_v2 = vld [vmem:[%s8032_s12 + $0xc8] sm:$0xff] }
 0x312   : > { %2470 = vst.msk [vmem:[#allocation2 + $0x170] sm:$0xf] %vm2439_vm5, %v2404_v6  ;;  %v2746_v6 = vpack.c.bf16 %v6228_v28, %v6228_v28  ;;  %v8540_v44 = vpack.c.bf16 %v6227_v2, %v6227_v2  ;;  %v8588_v2 = vpack.c.bf16 %v6238_v37, %v6238_v37 }
 0x315   : > { %2796 = vrot.lane.b32.xlu1 %v2731_v42, %s6981_s20  ;;  %2794 = vrot.lane.b32.xlu0 %v2730_v22, %s6981_s20  ;;  %v6229_v22 = vld [vmem:[%s8032_s12 + $0xe0] sm:$0xff] }
 0x316   : > { %2798 = vrot.lane.b32.xlu2 %v8469_v15, %s6981_s20 }
 0x317   : > { %v2390_v34 = vpop.permute.xlu1 %2389  ;;  %v2388_v33 = vpop.permute.xlu0 %2387 }
 0x318   : > { %2463 = vst.msk [vmem:[#allocation2 + $0x11c] sm:$0xf] %vm2439_vm5, %v2390_v34  ;;  %v2571_v29 = vpop.permute.xlu2 %2570  ;;  %v8543_v34 = vpack.c.bf16 %v6229_v22, %v6229_v22 }
 0x319   : > { %2462 = vst.msk [vmem:[#allocation2 + $0x110] sm:$0xf] %vm2439_vm5, %v2388_v33  ;;  %v6231_v33 = vld [vmem:[%s8032_s12 + $0xf8] sm:$0xff] }
 0x31a   : > { %2666 = vst.msk [vmem:[#allocation2 + $0x14] sm:$0xf] %vm2664_vm6, %v2571_v29  ;;  %v2749_v23 = vpack.c.bf16 %v6231_v33, %v6231_v33 }
 0x31d   : > { %2802 = vrot.lane.b32.xlu1 %v2734_v38, %s6981_s20  ;;  %2800 = vrot.lane.b32.xlu0 %v8480_v14, %s6981_s20 }
 0x31e   : > { %2804 = vrot.lane.b32.xlu2 %v8483_v13, %s6981_s20 }
 0x31f   : > { %v2396_v49 = vpop.permute.xlu1 %2395  ;;  %v2394_v43 = vpop.permute.xlu0 %2393 }
 0x320   : > { %2466 = vst.msk [vmem:[#allocation2 + $0x140] sm:$0xf] %vm2439_vm5, %v2396_v49  ;;  %v2577_v21 = vpop.permute.xlu2 %2576  ;;  %v8555_v49 = vpack.c.bf16 %v6230_v16, %v6230_v16 }
 0x321   : > { %2465 = vst.msk [vmem:[#allocation2 + $0x134] sm:$0xf] %vm2439_vm5, %v2394_v43 }
 0x322   : > { %2669 = vst.msk [vmem:[#allocation2 + $0x38] sm:$0xf] %vm2664_vm6, %v2577_v21  ;;  %v6233_v21 = vld [vmem:[%s8032_s12 + $0x110] sm:$0xff] }
 0x323   : > { %v8570_v45 = vpack.c.bf16 %v6233_v21, %v6233_v21  ;;  %v6244_v21 = vld [vmem:[%s8032_s12 + $0x19] sm:$0xff] }
 0x325   : > { %2808 = vrot.lane.b32.xlu1 %v2737_v9, %s6981_s20  ;;  %2806 = vrot.lane.b32.xlu0 %v8495_v63, %s6981_s20  ;;  %v6234_v9 = vld [vmem:[%s8032_s12 + $0x120] sm:$0xff] }
 0x326   : > { %2810 = vrot.lane.b32.xlu2 %v8498_v60, %s6981_s20 }
 0x327   : > { %v2402_v54 = vpop.permute.xlu1 %2401  ;;  %v2400_v35 = vpop.permute.xlu0 %2399 }
 0x328   : > { %2469 = vst.msk [vmem:[#allocation2 + $0x164] sm:$0xf] %vm2439_vm5, %v2402_v54  ;;  %v2583_v11 = vpop.permute.xlu2 %2582  ;;  %v6235_v54 = vld [vmem:[%s8032_s12 + $0x128] sm:$0xff] }
 0x329   : > { %2468 = vst.msk [vmem:[#allocation2 + $0x158] sm:$0xf] %vm2439_vm5, %v2400_v35  ;;  %v2752_v35 = vpack.c.bf16 %v6234_v9, %v6234_v9 }
 0x32a   : > { %2672 = vst.msk [vmem:[#allocation2 + $0x5c] sm:$0xf] %vm2664_vm6, %v2583_v11  ;;  %v8573_v11 = vpack.c.bf16 %v6235_v54, %v6235_v54 }
 0x32d   : > { %2814 = vrot.lane.b32.xlu1 %v2740_v52, %s6981_s20  ;;  %2812 = vrot.lane.b32.xlu0 %v8510_v12, %s6981_s20 }
 0x32e   : > { %2816 = vrot.lane.b32.xlu2 %v8513_v24, %s6981_s20 }
 0x32f   : > { %v2569_v48 = vpop.permute.xlu1 %2568  ;;  %v2406_v26 = vpop.permute.xlu0 %2405 }
 0x330   : > { %2665 = vst.msk [vmem:[#allocation2 + $0x8] sm:$0xf] %vm2664_vm6, %v2569_v48  ;;  %v2589_v4 = vpop.permute.xlu2 %2588 }
 0x331   : > { %2471 = vst.msk [vmem:[#allocation2 + $0x17c] sm:$0xf] %vm2439_vm5, %v2406_v26 }
 0x332   : > { %2675 = vst.msk [vmem:[#allocation2 + $0x80] sm:$0xf] %vm2664_vm6, %v2589_v4  ;;  %v8585_v4 = vpack.c.bf16 %v6236_v1, %v6236_v1 }
 0x335   : > { %2820 = vrot.lane.b32.xlu1 %v2743_v41, %s6981_s20  ;;  %2818 = vrot.lane.b32.xlu0 %v8525_v58, %s6981_s20  ;;  %v2755_v41 = vpack.c.bf16 %v6237_v31, %v6237_v31  ;;  %v6245_v31 = vld [vmem:[%s8032_s12 + $0x21] sm:$0xff] }
 0x336   : > { %2822 = vrot.lane.b32.xlu2 %v8528_v61, %s6981_s20 }
 0x337   : > { %v2575_v50 = vpop.permute.xlu1 %2574  ;;  %v2573_v42 = vpop.permute.xlu0 %2572 }
 0x338   : > { %2668 = vst.msk [vmem:[#allocation2 + $0x2c] sm:$0xf] %vm2664_vm6, %v2575_v50  ;;  %v2595_v40 = vpop.permute.xlu2 %2594  ;;  %v6240_v50 = vld [vmem:[%s8032_s12 + $0x168] sm:$0xff] }
 0x339   : > { %2667 = vst.msk [vmem:[#allocation2 + $0x20] sm:$0xf] %vm2664_vm6, %v2573_v42  ;;  %v6239_v42 = vld [vmem:[%s8032_s12 + $0x158] sm:$0xff]  ;;  %v2758_v33 = vpack.c.bf16 %v6240_v50, %v6240_v50 }
 0x33a   : > { %2678 = vst.msk [vmem:[#allocation2 + $0xa4] sm:$0xf] %vm2664_vm6, %v2595_v40  ;;  %v6241_v40 = vld [vmem:[%s8032_s12 + $0x170] sm:$0xff]  ;;  %v8600_v16 = vpack.c.bf16 %v6239_v42, %v6239_v42 }
 0x33b   : > { %v6249_v42 = vld [vmem:[%s8032_s12 + $0x51] sm:$0xff] }
 0x33d   : > { %2826 = vrot.lane.b32.xlu1 %v2746_v6, %s6981_s20  ;;  %2824 = vrot.lane.b32.xlu0 %v8540_v44, %s6981_s20 }
 0x33e   : > { %2828 = vrot.lane.b32.xlu2 %v8543_v34, %s6981_s20 }
 0x33f   : > { %v2581_v38 = vpop.permute.xlu1 %2580  ;;  %v2579_v29 = vpop.permute.xlu0 %2578 }
 0x340   : > { %2671 = vst.msk [vmem:[#allocation2 + $0x50] sm:$0xf] %vm2664_vm6, %v2581_v38  ;;  %v2601_v43 = vpop.permute.xlu2 %2600 }
 0x341   : > { %2670 = vst.msk [vmem:[#allocation2 + $0x44] sm:$0xf] %vm2664_vm6, %v2579_v29  ;;  %v8603_v29 = vpack.c.bf16 %v6241_v40, %v6241_v40 }
 0x342   : > { %2681 = vst.msk [vmem:[#allocation2 + $0xc8] sm:$0xf] %vm2664_vm6, %v2601_v43 }
 0x345   : > { %2832 = vrot.lane.b32.xlu1 %v2749_v23, %s6981_s20  ;;  %2830 = vrot.lane.b32.xlu0 %v8555_v49, %s6981_s20  ;;  %v6242_v23 = vld [vmem:[%s8032_s12 + $0x180] sm:$0xff] }
 0x346   : > { %2834 = vrot.lane.b32.xlu2 %v8558_v0, %s6981_s20 }
 0x347   : > { %v2587_v8 = vpop.permute.xlu1 %2586  ;;  %v2585_v46 = vpop.permute.xlu0 %2584 }
 0x348   : > { %2674 = vst.msk [vmem:[#allocation2 + $0x74] sm:$0xf] %vm2664_vm6, %v2587_v8  ;;  %v2607_v52 = vpop.permute.xlu2 %2606  ;;  %v2761_v8 = vpack.c.bf16 %v6243_v25, %v6243_v25 }
 0x349   : > { %2673 = vst.msk [vmem:[#allocation2 + $0x68] sm:$0xf] %vm2664_vm6, %v2585_v46  ;;  %v8615_v46 = vpack.c.bf16 %v6242_v23, %v6242_v23 }
 0x34a   : > { %2684 = vst.msk [vmem:[#allocation2 + $0xec] sm:$0xf] %vm2664_vm6, %v2607_v52  ;;  %v6246_v52 = vld [vmem:[%s8032_s12 + $0x31] sm:$0xff] }
 0x34b   : > { %v2957_v37 = vpack.c.bf16 %v6246_v52, %v6246_v52 }
 0x34d   : > { %2838 = vrot.lane.b32.xlu1 %v2752_v35, %s6981_s20  ;;  %2836 = vrot.lane.b32.xlu0 %v8570_v45, %s6981_s20  ;;  %v2955_v35 = vpack.c.bf16 %v6244_v21, %v6244_v21  ;;  %v6251_v21 = vld [vmem:[%s8032_s12 + $0x69] sm:$0xff] }
 0x34e   : > { %2840 = vrot.lane.b32.xlu2 %v8573_v11, %s6981_s20 }
 0x34f   : > { %v2593_v48 = vpop.permute.xlu1 %2592  ;;  %v2591_v26 = vpop.permute.xlu0 %2590 }
 0x350   : > { %2677 = vst.msk [vmem:[#allocation2 + $0x98] sm:$0xf] %vm2664_vm6, %v2593_v48  ;;  %v2613_v28 = vpop.permute.xlu2 %2612 }
 0x351   : > { %2676 = vst.msk [vmem:[#allocation2 + $0x8c] sm:$0xf] %vm2664_vm6, %v2591_v26  ;;  %v6247_v26 = vld [vmem:[%s8032_s12 + $0x39] sm:$0xff] }
 0x352   : > { %2687 = vst.msk [vmem:[#allocation2 + $0x110] sm:$0xf] %vm2664_vm6, %v2613_v28  ;;  %v8628_v50 = vpack.c.bf16 %v6247_v26, %v6247_v26  ;;  %v6255_v26 = vld [vmem:[%s8032_s12 + $0x99] sm:$0xff] }
 0x355   : > { %2844 = vrot.lane.b32.xlu1 %v2755_v41, %s6981_s20  ;;  %2842 = vrot.lane.b32.xlu0 %v8585_v4, %s6981_s20  ;;  %v2956_v41 = vpack.c.bf16 %v6245_v31, %v6245_v31  ;;  %v8654_v31 = vpack.c.bf16 %v6251_v21, %v6251_v21 }
 0x356   : > { %2846 = vrot.lane.b32.xlu2 %v8588_v2, %s6981_s20 }
 0x357   : > { %v2599_v22 = vpop.permute.xlu1 %2598  ;;  %v2597_v6 = vpop.permute.xlu0 %2596 }
 0x358   : > { %2680 = vst.msk [vmem:[#allocation2 + $0xbc] sm:$0xf] %vm2664_vm6, %v2599_v22  ;;  %v2619_v38 = vpop.permute.xlu2 %2618  ;;  %v6248_v22 = vld [vmem:[%s8032_s12 + $0x49] sm:$0xff] }
 0x359   : > { %2679 = vst.msk [vmem:[#allocation2 + $0xb0] sm:$0xf] %vm2664_vm6, %v2597_v6  ;;  %v8639_v25 = vpack.c.bf16 %v6248_v22, %v6248_v22  ;;  %v2966_v22 = vpack.c.bf16 %v6255_v26, %v6255_v26  ;;  %v6261_v26 = vld [vmem:[%s8032_s12 + $0xe1] sm:$0xff] }
 0x35a   : > { %2690 = vst.msk [vmem:[#allocation2 + $0x134] sm:$0xf] %vm2664_vm6, %v2619_v38  ;;  %v2960_v38 = vpack.c.bf16 %v6249_v42, %v6249_v42  ;;  %v6256_v42 = vld [vmem:[%s8032_s12 + $0xa9] sm:$0xff] }
 0x35d   : > { %2850 = vrot.lane.b32.xlu1 %v2758_v33, %s6981_s20  ;;  %2848 = vrot.lane.b32.xlu0 %v8600_v16, %s6981_s20  ;;  %v6250_v33 = vld [vmem:[%s8032_s12 + $0x61] sm:$0xff] }
 0x35e   : > { %2852 = vrot.lane.b32.xlu2 %v8603_v29, %s6981_s20 }
 0x35f   : > { %v2605_v43 = vpop.permute.xlu1 %2604  ;;  %v2603_v9 = vpop.permute.xlu0 %2602 }
 0x360   : > { %2683 = vst.msk [vmem:[#allocation2 + $0xe0] sm:$0xf] %vm2664_vm6, %v2605_v43  ;;  %v2625_v54 = vpop.permute.xlu2 %2624  ;;  %v8642_v43 = vpack.c.bf16 %v6250_v33, %v6250_v33  ;;  %v8672_v33 = vpack.c.bf16 %v6256_v42, %v6256_v42  ;;  %v6262_v42 = vld [vmem:[%s8032_s12 + $0xf1] sm:$0xff] }
 0x361   : > { %2682 = vst.msk [vmem:[#allocation2 + $0xd4] sm:$0xf] %vm2664_vm6, %v2603_v9  ;;  %v6252_v9 = vld [vmem:[%s8032_s12 + $0x79] sm:$0xff] }
 0x362   : > { %2693 = vst.msk [vmem:[#allocation2 + $0x158] sm:$0xf] %vm2664_vm6, %v2625_v54  ;;  %v2963_v52 = vpack.c.bf16 %v6252_v9, %v6252_v9 }
 0x365   : > { %2856 = vrot.lane.b32.xlu1 %v2761_v8, %s6981_s20  ;;  %2854 = vrot.lane.b32.xlu0 %v8615_v46, %s6981_s20 }
 0x366   : > { %3019 = vrot.lane.b32.xlu2 %v2955_v35, %s6982_s21  ;;  %v6253_v35 = vld [vmem:[%s8032_s12 + $0x81] sm:$0xff] }
 0x367   : > { %v2611_v1 = vpop.permute.xlu1 %2610  ;;  %v2609_v48 = vpop.permute.xlu0 %2608 }
 0x368   : > { %2686 = vst.msk [vmem:[#allocation2 + $0x104] sm:$0xf] %vm2664_vm6, %v2611_v1  ;;  %v2631_v28 = vpop.permute.xlu2 %2630 }
 0x369   : > { %2685 = vst.msk [vmem:[#allocation2 + $0xf8] sm:$0xf] %vm2664_vm6, %v2609_v48  ;;  %v8657_v48 = vpack.c.bf16 %v6253_v35, %v6253_v35 }
 0x36a   : > { %2696 = vst.msk [vmem:[#allocation2 + $0x17c] sm:$0xf] %vm2664_vm6, %v2631_v28 }
 0x36d   : > { %3023 = vrot.lane.b32.xlu1 %v2957_v37, %s6982_s21  ;;  %3021 = vrot.lane.b32.xlu0 %v2956_v41, %s6982_s21  ;;  %v6254_v37 = vld [vmem:[%s8032_s12 + $0x91] sm:$0xff] }
 0x36e   : > { %3025 = vrot.lane.b32.xlu2 %v8628_v50, %s6982_s21 }
 0x36f   : > { %v2617_v6 = vpop.permute.xlu1 %2616  ;;  %v2615_v40 = vpop.permute.xlu0 %2614 }
 0x370   : > { %2689 = vst.msk [vmem:[#allocation2 + $0x128] sm:$0xf] %vm2664_vm6, %v2617_v6  ;;  %v2799_v23 = vpop.permute.xlu2 %2798  ;;  %v8669_v6 = vpack.c.bf16 %v6254_v37, %v6254_v37  ;;  %v6260_v37 = vld [vmem:[%s8032_s12 + $0xd9] sm:$0xff] }
 0x371   : > { %2688 = vst.msk [vmem:[#allocation2 + $0x11c] sm:$0xf] %vm2664_vm6, %v2615_v40 }
 0x372   : > { %2893 = vst.msk [vmem:[#allocation2 + $0x20] sm:$0xf] %vm2890_vm7, %v2799_v23  ;;  %v6257_v23 = vld [vmem:[%s8032_s12 + $0xb1] sm:$0xff] }
 0x373   : > { %v8684_v35 = vpack.c.bf16 %v6257_v23, %v6257_v23  ;;  %v8702_v23 = vpack.c.bf16 %v6262_v42, %v6262_v42  ;;  %v6267_v42 = vld [vmem:[%s8032_s12 + $0x129] sm:$0xff] }
 0x375   : > { %3029 = vrot.lane.b32.xlu1 %v2960_v38, %s6982_s21  ;;  %3027 = vrot.lane.b32.xlu0 %v8639_v25, %s6982_s21  ;;  %v6258_v38 = vld [vmem:[%s8032_s12 + $0xc1] sm:$0xff] }
 0x376   : > { %3031 = vrot.lane.b32.xlu2 %v8642_v43, %s6982_s21 }
 0x377   : > { %v2623_v8 = vpop.permute.xlu1 %2622  ;;  %v2621_v54 = vpop.permute.xlu0 %2620 }
 0x378   : > { %2692 = vst.msk [vmem:[#allocation2 + $0x14c] sm:$0xf] %vm2664_vm6, %v2623_v8  ;;  %v2805_v1 = vpop.permute.xlu2 %2804  ;;  %v6259_v8 = vld [vmem:[%s8032_s12 + $0xc9] sm:$0xff] }
 0x379   : > { %2691 = vst.msk [vmem:[#allocation2 + $0x140] sm:$0xf] %vm2664_vm6, %v2621_v54  ;;  %v2969_v54 = vpack.c.bf16 %v6258_v38, %v6258_v38 }
 0x37a   : > { %2896 = vst.msk [vmem:[#allocation2 + $0x44] sm:$0xf] %vm2890_vm7, %v2805_v1  ;;  %v8687_v1 = vpack.c.bf16 %v6259_v8, %v6259_v8 }
 0x37d   : > { %3035 = vrot.lane.b32.xlu1 %v2963_v52, %s6982_s21  ;;  %3033 = vrot.lane.b32.xlu0 %v8654_v31, %s6982_s21 }
 0x37e   : > { %3037 = vrot.lane.b32.xlu2 %v8657_v48, %s6982_s21 }
 0x37f   : > { %v2629_v41 = vpop.permute.xlu1 %2628  ;;  %v2627_v28 = vpop.permute.xlu0 %2626 }
 0x380   : > { %2695 = vst.msk [vmem:[#allocation2 + $0x170] sm:$0xf] %vm2664_vm6, %v2629_v41  ;;  %v2811_v40 = vpop.permute.xlu2 %2810 }
 0x381   : > { %2694 = vst.msk [vmem:[#allocation2 + $0x164] sm:$0xf] %vm2664_vm6, %v2627_v28 }
 0x382   : > { %2899 = vst.msk [vmem:[#allocation2 + $0x68] sm:$0xf] %vm2890_vm7, %v2811_v40  ;;  %v8699_v40 = vpack.c.bf16 %v6260_v37, %v6260_v37 }
 0x385   : > { %3041 = vrot.lane.b32.xlu1 %v2966_v22, %s6982_s21  ;;  %3039 = vrot.lane.b32.xlu0 %v8669_v6, %s6982_s21  ;;  %v2972_v22 = vpack.c.bf16 %v6261_v26, %v6261_v26 }
 0x386   : > { %3043 = vrot.lane.b32.xlu2 %v8672_v33, %s6982_s21 }
 0x387   : > { %v2797_v9 = vpop.permute.xlu1 %2796  ;;  %v2795_v21 = vpop.permute.xlu0 %2794 }
 0x388   : > { %2892 = vst.msk [vmem:[#allocation2 + $0x14] sm:$0xf] %vm2890_vm7, %v2797_v9  ;;  %v2817_v52 = vpop.permute.xlu2 %2816  ;;  %v6264_v9 = vld [vmem:[%s8032_s12 + $0x109] sm:$0xff] }
 0x389   : > { %2891 = vst.msk [vmem:[#allocation2 + $0x8] sm:$0xf] %vm2890_vm7, %v2795_v21  ;;  %v6263_v21 = vld [vmem:[%s8032_s12 + $0xf9] sm:$0xff]  ;;  %v2975_v26 = vpack.c.bf16 %v6264_v9, %v6264_v9 }
 0x38a   : > { %2902 = vst.msk [vmem:[#allocation2 + $0x8c] sm:$0xf] %vm2890_vm7, %v2817_v52  ;;  %v6265_v52 = vld [vmem:[%s8032_s12 + $0x111] sm:$0xff]  ;;  %v8714_v37 = vpack.c.bf16 %v6263_v21, %v6263_v21  ;;  %v6268_v21 = vld [vmem:[%s8032_s12 + $0x139] sm:$0xff] }
 0x38d   : > { %3047 = vrot.lane.b32.xlu1 %v2969_v54, %s6982_s21  ;;  %3045 = vrot.lane.b32.xlu0 %v8684_v35, %s6982_s21 }
 0x38e   : > { %3049 = vrot.lane.b32.xlu2 %v8687_v1, %s6982_s21 }
 0x38f   : > { %v2803_v41 = vpop.permute.xlu1 %2802  ;;  %v2801_v28 = vpop.permute.xlu0 %2800 }
 0x390   : > { %2895 = vst.msk [vmem:[#allocation2 + $0x38] sm:$0xf] %vm2890_vm7, %v2803_v41  ;;  %v2823_v38 = vpop.permute.xlu2 %2822 }
 0x391   : > { %2894 = vst.msk [vmem:[#allocation2 + $0x2c] sm:$0xf] %vm2890_vm7, %v2801_v28  ;;  %v8717_v28 = vpack.c.bf16 %v6265_v52, %v6265_v52 }
 0x392   : > { %2905 = vst.msk [vmem:[#allocation2 + $0xb0] sm:$0xf] %vm2890_vm7, %v2823_v38 }
 0x395   : > { %3053 = vrot.lane.b32.xlu1 %v2972_v22, %s6982_s21  ;;  %3051 = vrot.lane.b32.xlu0 %v8699_v40, %s6982_s21  ;;  %v6266_v22 = vld [vmem:[%s8032_s12 + $0x121] sm:$0xff] }
 0x396   : > { %3055 = vrot.lane.b32.xlu2 %v8702_v23, %s6982_s21 }
 0x397   : > { %v2809_v8 = vpop.permute.xlu1 %2808  ;;  %v2807_v54 = vpop.permute.xlu0 %2806 }
 0x398   : > { %2898 = vst.msk [vmem:[#allocation2 + $0x5c] sm:$0xf] %vm2890_vm7, %v2809_v8  ;;  %v2829_v41 = vpop.permute.xlu2 %2828  ;;  %v2978_v8 = vpack.c.bf16 %v6267_v42, %v6267_v42 }
 0x399   : > { %2897 = vst.msk [vmem:[#allocation2 + $0x50] sm:$0xf] %vm2890_vm7, %v2807_v54  ;;  %v8729_v54 = vpack.c.bf16 %v6266_v22, %v6266_v22  ;;  %v6271_v22 = vld [vmem:[%s8032_s12 + $0x159] sm:$0xff] }
 0x39a   : > { %2908 = vst.msk [vmem:[#allocation2 + $0xd4] sm:$0xf] %vm2890_vm7, %v2829_v41  ;;  %v6270_v41 = vld [vmem:[%s8032_s12 + $0x151] sm:$0xff] }
 0x39d   : > { %3059 = vrot.lane.b32.xlu1 %v2975_v26, %s6982_s21  ;;  %3057 = vrot.lane.b32.xlu0 %v8714_v37, %s6982_s21  ;;  %v8732_v26 = vpack.c.bf16 %v6268_v21, %v6268_v21 }
 0x39e   : > { %3061 = vrot.lane.b32.xlu2 %v8717_v28, %s6982_s21 }
 0x39f   : > { %v2815_v38 = vpop.permute.xlu1 %2814  ;;  %v2813_v9 = vpop.permute.xlu0 %2812 }
 0x3a0   : > { %2901 = vst.msk [vmem:[#allocation2 + $0x80] sm:$0xf] %vm2890_vm7, %v2815_v38  ;;  %v2835_v52 = vpop.permute.xlu2 %2834  ;;  %v6269_v38 = vld [vmem:[%s8032_s12 + $0x141] sm:$0xff] }
 0x3a1   : > { %2900 = vst.msk [vmem:[#allocation2 + $0x74] sm:$0xf] %vm2890_vm7, %v2813_v9  ;;  %v2981_v9 = vpack.c.bf16 %v6270_v41, %v6270_v41  ;;  %v8744_v21 = vpack.c.bf16 %v6269_v38, %v6269_v38  ;;  %v6274_v38 = vld [vmem:[%s8032_s12 + $0x181] sm:$0xff] }
 0x3a2   : > { %2911 = vst.msk [vmem:[#allocation2 + $0xf8] sm:$0xf] %vm2890_vm7, %v2835_v52  ;;  %v8747_v52 = vpack.c.bf16 %v6271_v22, %v6271_v22  ;;  %v8759_v22 = vpack.c.bf16 %v6272_v57, %v6272_v57 }
 0x3a5   : > { %3065 = vrot.lane.b32.xlu1 %v2978_v8, %s6982_s21  ;;  %3063 = vrot.lane.b32.xlu0 %v8729_v54, %s6982_s21 }
 0x3a6   : > { %3067 = vrot.lane.b32.xlu2 %v8732_v26, %s6982_s21 }
 0x3a7   : > { %v2821_v51 = vpop.permute.xlu1 %2820  ;;  %v2819_v42 = vpop.permute.xlu0 %2818 }
 0x3a8   : > { %2904 = vst.msk [vmem:[#allocation2 + $0xa4] sm:$0xf] %vm2890_vm7, %v2821_v51  ;;  %v2841_v8 = vpop.permute.xlu2 %2840  ;;  %v6273_v51 = vld [vmem:[%s8032_s12 + $0x171] sm:$0xff] }
 0x3a9   : > { %2903 = vst.msk [vmem:[#allocation2 + $0x98] sm:$0xf] %vm2890_vm7, %v2819_v42  ;;  %v2984_v42 = vpack.c.bf16 %v6273_v51, %v6273_v51  ;;  %v6277_v51 = vld [vmem:[%s8032_s12 + $0x22] sm:$0xff] }
 0x3aa   : > { %2914 = vst.msk [vmem:[#allocation2 + $0x11c] sm:$0xf] %vm2890_vm7, %v2841_v8  ;;  %v8762_v8 = vpack.c.bf16 %v6274_v38, %v6274_v38 }
 0x3ad   : > { %3071 = vrot.lane.b32.xlu1 %v2981_v9, %s6982_s21  ;;  %3069 = vrot.lane.b32.xlu0 %v8744_v21, %s6982_s21 }
 0x3ae   : > { %3073 = vrot.lane.b32.xlu2 %v8747_v52, %s6982_s21 }
 0x3af   : > { %v2827_v62 = vpop.permute.xlu1 %2826  ;;  %v2825_v41 = vpop.permute.xlu0 %2824 }
 0x3b0   : > { %2907 = vst.msk [vmem:[#allocation2 + $0xc8] sm:$0xf] %vm2890_vm7, %v2827_v62  ;;  %v2847_v9 = vpop.permute.xlu2 %2846  ;;  %v6275_v62 = vld [vmem:[%s8032_s12 + $0x189] sm:$0xff] }
 0x3b1   : > { %2906 = vst.msk [vmem:[#allocation2 + $0xbc] sm:$0xf] %vm2890_vm7, %v2825_v41  ;;  %v3180_v41 = vpack.c.bf16 %v6276_v55, %v6276_v55  ;;  %v8774_v38 = vpack.c.bf16 %v6275_v62, %v6275_v62  ;;  %v6280_v62 = vld [vmem:[%s8032_s12 + $0x4a] sm:$0xff] }
 0x3b2   : > { %2917 = vst.msk [vmem:[#allocation2 + $0x140] sm:$0xf] %vm2890_vm7, %v2847_v9  ;;  %v3181_v9 = vpack.c.bf16 %v6277_v51, %v6277_v51 }
 0x3b5   : > { %3077 = vrot.lane.b32.xlu1 %v2984_v42, %s6982_s21  ;;  %3075 = vrot.lane.b32.xlu0 %v8759_v22, %s6982_s21 }
 0x3b6   : > { %3079 = vrot.lane.b32.xlu2 %v8762_v8, %s6982_s21 }
 0x3b7   : > { %v2833_v47 = vpop.permute.xlu1 %2832  ;;  %v2831_v57 = vpop.permute.xlu0 %2830 }
 0x3b8   : > { %2910 = vst.msk [vmem:[#allocation2 + $0xec] sm:$0xf] %vm2890_vm7, %v2833_v47  ;;  %v2853_v42 = vpop.permute.xlu2 %2852  ;;  %v6279_v47 = vld [vmem:[%s8032_s12 + $0x3a] sm:$0xff] }
 0x3b9   : > { %2909 = vst.msk [vmem:[#allocation2 + $0xe0] sm:$0xf] %vm2890_vm7, %v2831_v57  ;;  %v8785_v57 = vpack.c.bf16 %v6279_v47, %v6279_v47  ;;  %v6283_v47 = vld [vmem:[%s8032_s12 + $0x6a] sm:$0xff] }
 0x3ba   : > { %2920 = vst.msk [vmem:[#allocation2 + $0x164] sm:$0xf] %vm2890_vm7, %v2853_v42  ;;  %v6282_v42 = vld [vmem:[%s8032_s12 + $0x62] sm:$0xff] }
 0x3bd   : > { %3244 = vrot.lane.b32.xlu1 %v3180_v41, %s6983_s22  ;;  %3081 = vrot.lane.b32.xlu0 %v8774_v38, %s6982_s21  ;;  %v8788_v41 = vpack.c.bf16 %v6280_v62, %v6280_v62 }
 0x3be   : > { %3246 = vrot.lane.b32.xlu2 %v3181_v9, %s6983_s22 }
 0x3bf   : > { %v2839_v10 = vpop.permute.xlu1 %2838  ;;  %v2837_v55 = vpop.permute.xlu0 %2836 }
 0x3c0   : > { %2913 = vst.msk [vmem:[#allocation2 + $0x110] sm:$0xf] %vm2890_vm7, %v2839_v10  ;;  %v3020_v51 = vpop.permute.xlu2 %3019 }
 0x3c1   : > { %2912 = vst.msk [vmem:[#allocation2 + $0x104] sm:$0xf] %vm2890_vm7, %v2837_v55  ;;  %v3186_v55 = vpack.c.bf16 %v6282_v42, %v6282_v42 }
 0x3c2   : > { %3116 = vst.msk [vmem:[#allocation2 + $0x8] sm:$0xf] %vm3115_vm8, %v3020_v51  ;;  %v8801_v51 = vpack.c.bf16 %v6283_v47, %v6283_v47 }
 0x3c5   : > { %3250 = vrot.lane.b32.xlu1 %v8785_v57, %s6983_s22  ;;  %3248 = vrot.lane.b32.xlu0 %v8321_v5, %s6983_s22  ;;  %v6285_v5 = vld [vmem:[%s8032_s12 + $0x82] sm:$0xff] }
 0x3c6   : > { %3252 = vrot.lane.b32.xlu2 %v8788_v41, %s6983_s22 }
 0x3c7   : > { %v2845_v10 = vpop.permute.xlu1 %2844  ;;  %v2843_v9 = vpop.permute.xlu0 %2842 }
 0x3c8   : > { %2916 = vst.msk [vmem:[#allocation2 + $0x134] sm:$0xf] %vm2890_vm7, %v2845_v10  ;;  %v3026_v62 = vpop.permute.xlu2 %3025  ;;  %v6286_v10 = vld [vmem:[%s8032_s12 + $0x92] sm:$0xff] }
 0x3c9   : > { %2915 = vst.msk [vmem:[#allocation2 + $0x128] sm:$0xf] %vm2890_vm7, %v2843_v9  ;;  %v3189_v9 = vpack.c.bf16 %v6285_v5, %v6285_v5  ;;  %v6289_v5 = vld [vmem:[%s8032_s12 + $0xb2] sm:$0xff] }
 0x3ca   : > { %3119 = vst.msk [vmem:[#allocation2 + $0x2c] sm:$0xf] %vm3115_vm8, %v3026_v62 }
 0x3cd   : > { %3256 = vrot.lane.b32.xlu1 %v3186_v55, %s6983_s22  ;;  %3254 = vrot.lane.b32.xlu0 %v8333_v36, %s6983_s22  ;;  %v8813_v55 = vpack.c.bf16 %v6286_v10, %v6286_v10  ;;  %v6288_v36 = vld [vmem:[%s8032_s12 + $0xaa] sm:$0xff] }
 0x3ce   : > { %3258 = vrot.lane.b32.xlu2 %v8801_v51, %s6983_s22 }
 0x3cf   : > { %v2851_v39 = vpop.permute.xlu1 %2850  ;;  %v2849_v42 = vpop.permute.xlu0 %2848 }
 0x3d0   : > { %2919 = vst.msk [vmem:[#allocation2 + $0x158] sm:$0xf] %vm2890_vm7, %v2851_v39  ;;  %v3032_v47 = vpop.permute.xlu2 %3031 }
 0x3d1   : > { %2918 = vst.msk [vmem:[#allocation2 + $0x14c] sm:$0xf] %vm2890_vm7, %v2849_v42  ;;  %v3192_v42 = vpack.c.bf16 %v6288_v36, %v6288_v36 }
 0x3d2   : > { %3122 = vst.msk [vmem:[#allocation2 + $0x50] sm:$0xf] %vm3115_vm8, %v3032_v47 }
 0x3d5   : > { %3262 = vrot.lane.b32.xlu1 %v3189_v9, %s6983_s22  ;;  %3260 = vrot.lane.b32.xlu0 %v8347_v27, %s6983_s22  ;;  %v8825_v9 = vpack.c.bf16 %v6289_v5, %v6289_v5  ;;  %v6291_v27 = vld [vmem:[%s8032_s12 + $0xca] sm:$0xff] }
 0x3d6   : > { %3264 = vrot.lane.b32.xlu2 %v8813_v55, %s6983_s22 }
 0x3d7   : > { %v2857_v62 = vpop.permute.xlu1 %2856  ;;  %v2855_v39 = vpop.permute.xlu0 %2854 }
 0x3d8   : > { %2922 = vst.msk [vmem:[#allocation2 + $0x17c] sm:$0xf] %vm2890_vm7, %v2857_v62  ;;  %v3038_v10 = vpop.permute.xlu2 %3037  ;;  %v6292_v62 = vld [vmem:[%s8032_s12 + $0xda] sm:$0xff] }
 0x3d9   : > { %2921 = vst.msk [vmem:[#allocation2 + $0x170] sm:$0xf] %vm2890_vm7, %v2855_v39  ;;  %v3195_v39 = vpack.c.bf16 %v6291_v27, %v6291_v27  ;;  %v6295_v27 = vld [vmem:[%s8032_s12 + $0xfa] sm:$0xff] }
 0x3da   : > { %3125 = vst.msk [vmem:[#allocation2 + $0x74] sm:$0xf] %vm3115_vm8, %v3038_v10 }
 0x3dd   : > { %3268 = vrot.lane.b32.xlu1 %v3192_v42, %s6983_s22  ;;  %3266 = vrot.lane.b32.xlu0 %v8361_v32, %s6983_s22  ;;  %v8837_v42 = vpack.c.bf16 %v6292_v62, %v6292_v62  ;;  %v6294_v32 = vld [vmem:[%s8032_s12 + $0xf2] sm:$0xff] }
 0x3de   : > { %3270 = vrot.lane.b32.xlu2 %v8825_v9, %s6983_s22 }
 0x3df   : > { %v3024_v47 = vpop.permute.xlu1 %3023  ;;  %v3022_v36 = vpop.permute.xlu0 %3021 }
 0x3e0   : > { %3118 = vst.msk [vmem:[#allocation2 + $0x20] sm:$0xf] %vm3115_vm8, %v3024_v47  ;;  %v3044_v5 = vpop.permute.xlu2 %3043 }
 0x3e1   : > { %3117 = vst.msk [vmem:[#allocation2 + $0x14] sm:$0xf] %vm3115_vm8, %v3022_v36  ;;  %v3198_v36 = vpack.c.bf16 %v6294_v32, %v6294_v32 }
 0x3e2   : > { %3128 = vst.msk [vmem:[#allocation2 + $0x98] sm:$0xf] %vm3115_vm8, %v3044_v5 }
 0x3e5   : > { %3274 = vrot.lane.b32.xlu1 %v3195_v39, %s6983_s22  ;;  %3272 = vrot.lane.b32.xlu0 %v8375_v19, %s6983_s22  ;;  %v8849_v39 = vpack.c.bf16 %v6295_v27, %v6295_v27 }
 0x3e6   : > { %3276 = vrot.lane.b32.xlu2 %v8837_v42, %s6983_s22 }
 0x3e7   : > { %v3030_v10 = vpop.permute.xlu1 %3029  ;;  %v3028_v47 = vpop.permute.xlu0 %3027 }
 0x3e8   : > { %3121 = vst.msk [vmem:[#allocation2 + $0x44] sm:$0xf] %vm3115_vm8, %v3030_v10  ;;  %v3050_v62 = vpop.permute.xlu2 %3049  ;;  %v6298_v10 = vld [vmem:[%s8032_s12 + $0x122] sm:$0xff] }
 0x3e9   : > { %3120 = vst.msk [vmem:[#allocation2 + $0x38] sm:$0xf] %vm3115_vm8, %v3028_v47  ;;  %v8860_v47 = vpack.c.bf16 %v6298_v10, %v6298_v10 }
 0x3ea   : > { %3131 = vst.msk [vmem:[#allocation2 + $0xbc] sm:$0xf] %vm3115_vm8, %v3050_v62 }
 0x3ed   : > { %3280 = vrot.lane.b32.xlu1 %v3198_v36, %s6983_s22  ;;  %3278 = vrot.lane.b32.xlu0 %v8389_v56, %s6983_s22  ;;  %v6301_v36 = vld [vmem:[%s8032_s12 + $0x142] sm:$0xff] }
 0x3ee   : > { %3282 = vrot.lane.b32.xlu2 %v8849_v39, %s6983_s22 }
 0x3ef   : > { %v3036_v19 = vpop.permute.xlu1 %3035  ;;  %v3034_v5 = vpop.permute.xlu0 %3033 }
 0x3f0   : > { %3124 = vst.msk [vmem:[#allocation2 + $0x68] sm:$0xf] %vm3115_vm8, %v3036_v19  ;;  %v3056_v32 = vpop.permute.xlu2 %3055  ;;  %v8872_v19 = vpack.c.bf16 %v6301_v36, %v6301_v36 }
 0x3f1   : > { %3123 = vst.msk [vmem:[#allocation2 + $0x5c] sm:$0xf] %vm3115_vm8, %v3034_v5  ;;  %v6304_v5 = vld [vmem:[%s8032_s12 + $0x16a] sm:$0xff] }
 0x3f2   : > { %3134 = vst.msk [vmem:[#allocation2 + $0xe0] sm:$0xf] %vm3115_vm8, %v3056_v32  ;;  %v8884_v32 = vpack.c.bf16 %v6304_v5, %v6304_v5 }
 0x3f5   : > { %3286 = vrot.lane.b32.xlu1 %v8414_v17, %s6983_s22  ;;  %3284 = vrot.lane.b32.xlu0 %v8401_v30, %s6983_s22 }
 0x3f6   : > { %3288 = vrot.lane.b32.xlu2 %v8860_v47, %s6983_s22 }
 0x3f7   : > { %v3042_v56 = vpop.permute.xlu1 %3041  ;;  %v3040_v27 = vpop.permute.xlu0 %3039 }
 0x3f8   : > { %3127 = vst.msk [vmem:[#allocation2 + $0x8c] sm:$0xf] %vm3115_vm8, %v3042_v56  ;;  %v3062_v62 = vpop.permute.xlu2 %3061 }
 0x3f9   : > { %3126 = vst.msk [vmem:[#allocation2 + $0x80] sm:$0xf] %vm3115_vm8, %v3040_v27  ;;  %v6307_v27 = vld [vmem:[%s8032_s12 + $0x18a] sm:$0xff] }
 0x3fa   : > { %3137 = vst.msk [vmem:[#allocation2 + $0x104] sm:$0xf] %vm3115_vm8, %v3062_v62 }
 0x3fd   : > { %3292 = vrot.lane.b32.xlu1 %v8435_v18, %s6983_s22  ;;  %3290 = vrot.lane.b32.xlu0 %v8420_v3, %s6983_s22  ;;  %v6306_v3 = vld [vmem:[%s8032_s12 + $0x182] sm:$0xff] }
 0x3fe   : > { %3294 = vrot.lane.b32.xlu2 %v8872_v19, %s6983_s22  ;;  %v3210_v36 = vpack.c.bf16 %v6306_v3, %v6306_v3 }
 0x3ff   : > { %v3048_v30 = vpop.permute.xlu1 %3047  ;;  %v3046_v17 = vpop.permute.xlu0 %3045 }
 0x400   : > { %3130 = vst.msk [vmem:[#allocation2 + $0xb0] sm:$0xf] %vm3115_vm8, %v3048_v30  ;;  %v3068_v10 = vpop.permute.xlu2 %3067 }
 0x401   : > { %3129 = vst.msk [vmem:[#allocation2 + $0xa4] sm:$0xf] %vm3115_vm8, %v3046_v17  ;;  %v6310_v17 = vld [vmem:[%s8032_s12 + $0x48] sm:$0xff] }
 0x402   : > { %3140 = vst.msk [vmem:[#allocation2 + $0x128] sm:$0xf] %vm3115_vm8, %v3068_v10  ;;  %v3408_v10 = vpack.c.bf16 %v6310_v17, %v6310_v17 }
 0x405   : > { %3298 = vrot.lane.b32.xlu1 %v8453_v59, %s6983_s22  ;;  %3296 = vrot.lane.b32.xlu0 %v8438_v53, %s6983_s22  ;;  %v8897_v59 = vpack.c.bf16 %v6307_v27, %v6307_v27 }
 0x406   : > { %3300 = vrot.lane.b32.xlu2 %v8884_v32, %s6983_s22 }
 0x407   : > { %v3054_v18 = vpop.permute.xlu1 %3053  ;;  %v3052_v56 = vpop.permute.xlu0 %3051 }
 0x408   : > { %3133 = vst.msk [vmem:[#allocation2 + $0xd4] sm:$0xf] %vm3115_vm8, %v3054_v18  ;;  %v3074_v62 = vpop.permute.xlu2 %3073  ;;  %v6313_v18 = vld [vmem:[%s8032_s12 + $0x68] sm:$0xff] }
 0x409   : > { %3132 = vst.msk [vmem:[#allocation2 + $0xc8] sm:$0xf] %vm3115_vm8, %v3052_v56  ;;  %v3411_v27 = vpack.c.bf16 %v6313_v18, %v6313_v18  ;;  %v6325_v18 = vld [vmem:[%s8032_s12 + $0xf8] sm:$0xff] }
 0x40a   : > { %3143 = vst.msk [vmem:[#allocation2 + $0x14c] sm:$0xf] %vm3115_vm8, %v3074_v62 }
 0x40d   : > { %3304 = vrot.lane.b32.xlu1 %v3210_v36, %s6983_s22  ;;  %3302 = vrot.lane.b32.xlu0 %v8456_v20, %s6983_s22  ;;  %v6316_v36 = vld [vmem:[%s8032_s12 + $0x90] sm:$0xff] }
 0x40e   : > { %3306 = vrot.lane.b32.xlu2 %v8897_v59, %s6983_s22 }
 0x40f   : > { %v3060_v53 = vpop.permute.xlu1 %3059  ;;  %v3058_v30 = vpop.permute.xlu0 %3057 }
 0x410   : > { %3136 = vst.msk [vmem:[#allocation2 + $0xf8] sm:$0xf] %vm3115_vm8, %v3060_v53  ;;  %v3080_v5 = vpop.permute.xlu2 %3079  ;;  %v3414_v53 = vpack.c.bf16 %v6316_v36, %v6316_v36 }
 0x411   : > { %3135 = vst.msk [vmem:[#allocation2 + $0xec] sm:$0xf] %vm3115_vm8, %v3058_v30  ;;  %v6319_v30 = vld [vmem:[%s8032_s12 + $0xb0] sm:$0xff] }
 0x412   : > { %3146 = vst.msk [vmem:[#allocation2 + $0x170] sm:$0xf] %vm3115_vm8, %v3080_v5  ;;  %v3417_v5 = vpack.c.bf16 %v6319_v30, %v6319_v30 }
 0x415   : > { %3472 = vrot.lane.b32.xlu1 %v8480_v14, %s6984_s23  ;;  %3470 = vrot.lane.b32.xlu0 %v8469_v15, %s6984_s23 }
 0x416   : > { %3474 = vrot.lane.b32.xlu2 %v3408_v10, %s6984_s23  ;;  %v6322_v10 = vld [vmem:[%s8032_s12 + $0xd8] sm:$0xff] }
 0x417   : > { %v3066_v20 = vpop.permute.xlu1 %3065  ;;  %v3064_v3 = vpop.permute.xlu0 %3063 }
 0x418   : > { %3139 = vst.msk [vmem:[#allocation2 + $0x11c] sm:$0xf] %vm3115_vm8, %v3066_v20  ;;  %v3247_v56 = vpop.permute.xlu2 %3246 }
 0x419   : > { %3138 = vst.msk [vmem:[#allocation2 + $0x110] sm:$0xf] %vm3115_vm8, %v3064_v3  ;;  %v3420_v3 = vpack.c.bf16 %v6322_v10, %v6322_v10 }
 0x41a   : > { %3342 = vst.msk [vmem:[#allocation2 + $0x14] sm:$0xf] %vm3340_vm9, %v3247_v56 }
 0x41d   : > { %3478 = vrot.lane.b32.xlu1 %v8495_v63, %s6984_s23  ;;  %3476 = vrot.lane.b32.xlu0 %v8483_v13, %s6984_s23 }
 0x41e   : > { %3480 = vrot.lane.b32.xlu2 %v3411_v27, %s6984_s23  ;;  %v3423_v27 = vpack.c.bf16 %v6325_v18, %v6325_v18 }
 0x41f   : > { %v3072_v15 = vpop.permute.xlu1 %3071  ;;  %v3070_v14 = vpop.permute.xlu0 %3069 }
 0x420   : > { %3142 = vst.msk [vmem:[#allocation2 + $0x140] sm:$0xf] %vm3115_vm8, %v3072_v15  ;;  %v3253_v62 = vpop.permute.xlu2 %3252  ;;  %v6328_v15 = vld [vmem:[%s8032_s12 + $0x120] sm:$0xff] }
 0x421   : > { %3141 = vst.msk [vmem:[#allocation2 + $0x134] sm:$0xf] %vm3115_vm8, %v3070_v14  ;;  %v3426_v36 = vpack.c.bf16 %v6328_v15, %v6328_v15 }
 0x422   : > { %3345 = vst.msk [vmem:[#allocation2 + $0x38] sm:$0xf] %vm3340_vm9, %v3253_v62  ;;  %v6331_v62 = vld [vmem:[%s8032_s12 + $0x140] sm:$0xff] }
 0x425   : > { %3484 = vrot.lane.b32.xlu1 %v8510_v12, %s6984_s23  ;;  %3482 = vrot.lane.b32.xlu0 %v8498_v60, %s6984_s23 }
 0x426   : > { %3486 = vrot.lane.b32.xlu2 %v3414_v53, %s6984_s23 }
 0x427   : > { %v3078_v13 = vpop.permute.xlu1 %3077  ;;  %v3076_v63 = vpop.permute.xlu0 %3075 }
 0x428   : > { %3145 = vst.msk [vmem:[#allocation2 + $0x164] sm:$0xf] %vm3115_vm8, %v3078_v13  ;;  %v3259_v17 = vpop.permute.xlu2 %3258  ;;  %v3429_v13 = vpack.c.bf16 %v6331_v62, %v6331_v62  ;;  %v6349_v62 = vld [vmem:[%s8032_s12 + $0x99] sm:$0xff] }
 0x429   : > { %3144 = vst.msk [vmem:[#allocation2 + $0x158] sm:$0xf] %vm3115_vm8, %v3076_v63  ;;  %v6334_v63 = vld [vmem:[%s8032_s12 + $0x168] sm:$0xff] }
 0x42a   : > { %3348 = vst.msk [vmem:[#allocation2 + $0x5c] sm:$0xf] %vm3340_vm9, %v3259_v17  ;;  %v3432_v17 = vpack.c.bf16 %v6334_v63, %v6334_v63 }
 0x42d   : > { %3490 = vrot.lane.b32.xlu1 %v8525_v58, %s6984_s23  ;;  %3488 = vrot.lane.b32.xlu0 %v8513_v24, %s6984_s23 }
 0x42e   : > { %3492 = vrot.lane.b32.xlu2 %v3417_v5, %s6984_s23  ;;  %v6337_v5 = vld [vmem:[%s8032_s12 + $0x188] sm:$0xff] }
 0x42f   : > { %v3245_v60 = vpop.permute.xlu1 %3244  ;;  %v3082_v12 = vpop.permute.xlu0 %3081 }
 0x430   : > { %3341 = vst.msk [vmem:[#allocation2 + $0x8] sm:$0xf] %vm3340_vm9, %v3245_v60  ;;  %v3265_v20 = vpop.permute.xlu2 %3264 }
 0x431   : > { %3147 = vst.msk [vmem:[#allocation2 + $0x17c] sm:$0xf] %vm3115_vm8, %v3082_v12  ;;  %v3435_v12 = vpack.c.bf16 %v6337_v5, %v6337_v5 }
 0x432   : > { %3351 = vst.msk [vmem:[#allocation2 + $0x80] sm:$0xf] %vm3340_vm9, %v3265_v20 }
 0x435   : > { %3496 = vrot.lane.b32.xlu1 %v8540_v44, %s6984_s23  ;;  %3494 = vrot.lane.b32.xlu0 %v8528_v61, %s6984_s23 }
 0x436   : > { %3498 = vrot.lane.b32.xlu2 %v3420_v3, %s6984_s23  ;;  %v6340_v3 = vld [vmem:[%s8032_s12 + $0x31] sm:$0xff] }
 0x437   : > { %v3251_v24 = vpop.permute.xlu1 %3250  ;;  %v3249_v58 = vpop.permute.xlu0 %3248 }
 0x438   : > { %3344 = vst.msk [vmem:[#allocation2 + $0x2c] sm:$0xf] %vm3340_vm9, %v3251_v24  ;;  %v3271_v56 = vpop.permute.xlu2 %3270 }
 0x439   : > { %3343 = vst.msk [vmem:[#allocation2 + $0x20] sm:$0xf] %vm3340_vm9, %v3249_v58 }
 0x43a   : > { %3354 = vst.msk [vmem:[#allocation2 + $0xa4] sm:$0xf] %vm3340_vm9, %v3271_v56 }
 0x43d   : > { %3502 = vrot.lane.b32.xlu1 %v8555_v49, %s6984_s23  ;;  %3500 = vrot.lane.b32.xlu0 %v8543_v34, %s6984_s23 }
 0x43e   : > { %3504 = vrot.lane.b32.xlu2 %v3423_v27, %s6984_s23  ;;  %v6343_v27 = vld [vmem:[%s8032_s12 + $0x51] sm:$0xff] }
 0x43f   : > { %v3257_v61 = vpop.permute.xlu1 %3256  ;;  %v3255_v44 = vpop.permute.xlu0 %3254 }
 0x440   : > { %3347 = vst.msk [vmem:[#allocation2 + $0x50] sm:$0xf] %vm3340_vm9, %v3257_v61  ;;  %v3277_v14 = vpop.permute.xlu2 %3276 }
 0x441   : > { %3346 = vst.msk [vmem:[#allocation2 + $0x44] sm:$0xf] %vm3340_vm9, %v3255_v44  ;;  %v3634_v44 = vpack.c.bf16 %v6343_v27, %v6343_v27 }
 0x442   : > { %3357 = vst.msk [vmem:[#allocation2 + $0xc8] sm:$0xf] %vm3340_vm9, %v3277_v14 }
 0x445   : > { %3508 = vrot.lane.b32.xlu1 %v8570_v45, %s6984_s23  ;;  %3506 = vrot.lane.b32.xlu0 %v8558_v0, %s6984_s23 }
 0x446   : > { %3510 = vrot.lane.b32.xlu2 %v3426_v36, %s6984_s23  ;;  %v6346_v36 = vld [vmem:[%s8032_s12 + $0x79] sm:$0xff] }
 0x447   : > { %v3263_v34 = vpop.permute.xlu1 %3262  ;;  %v3261_v49 = vpop.permute.xlu0 %3260 }
 0x448   : > { %3350 = vst.msk [vmem:[#allocation2 + $0x74] sm:$0xf] %vm3340_vm9, %v3263_v34  ;;  %v3283_v53 = vpop.permute.xlu2 %3282 }
 0x449   : > { %3349 = vst.msk [vmem:[#allocation2 + $0x68] sm:$0xf] %vm3340_vm9, %v3261_v49  ;;  %v3637_v49 = vpack.c.bf16 %v6346_v36, %v6346_v36 }
 0x44a   : > { %3360 = vst.msk [vmem:[#allocation2 + $0xec] sm:$0xf] %vm3340_vm9, %v3283_v53 }
 0x44d   : > { %3514 = vrot.lane.b32.xlu1 %v8585_v4, %s6984_s23  ;;  %3512 = vrot.lane.b32.xlu0 %v8573_v11, %s6984_s23 }
 0x44e   : > { %3516 = vrot.lane.b32.xlu2 %v3429_v13, %s6984_s23  ;;  %v3640_v13 = vpack.c.bf16 %v6349_v62, %v6349_v62 }
 0x44f   : > { %v3269_v0 = vpop.permute.xlu1 %3268  ;;  %v3267_v45 = vpop.permute.xlu0 %3266 }
 0x450   : > { %3353 = vst.msk [vmem:[#allocation2 + $0x98] sm:$0xf] %vm3340_vm9, %v3269_v0  ;;  %v3289_v30 = vpop.permute.xlu2 %3288  ;;  %v6352_v0 = vld [vmem:[%s8032_s12 + $0xc1] sm:$0xff] }
 0x451   : > { %3352 = vst.msk [vmem:[#allocation2 + $0x8c] sm:$0xf] %vm3340_vm9, %v3267_v45  ;;  %v3643_v63 = vpack.c.bf16 %v6352_v0, %v6352_v0 }
 0x452   : > { %3363 = vst.msk [vmem:[#allocation2 + $0x110] sm:$0xf] %vm3340_vm9, %v3289_v30  ;;  %v6355_v30 = vld [vmem:[%s8032_s12 + $0xe1] sm:$0xff] }
 0x455   : > { %3520 = vrot.lane.b32.xlu1 %v8600_v16, %s6984_s23  ;;  %3518 = vrot.lane.b32.xlu0 %v8588_v2, %s6984_s23  ;;  %v6339_v2 = vld [vmem:[%s8032_s12 + $0x1a0] sm:$0xff]  ;;  %v6338_v16 = vld [vmem:[%s8032_s12 + $0x198] sm:$0xff] }
 0x456   : > { %3522 = vrot.lane.b32.xlu2 %v3432_v17, %s6984_s23  ;;  %v3437_v24 = vpack.c.bf16 %v6339_v2, %v6339_v2  ;;  %v3436_v58 = vpack.c.bf16 %v6338_v16, %v6338_v16 }
 0x457   : > { %v3275_v11 = vpop.permute.xlu1 %3274  ;;  %v3273_v4 = vpop.permute.xlu0 %3272 }
 0x458   : > { %3356 = vst.msk [vmem:[#allocation2 + $0xbc] sm:$0xf] %vm3340_vm9, %v3275_v11  ;;  %v3295_v60 = vpop.permute.xlu2 %3294  ;;  %v3646_v11 = vpack.c.bf16 %v6355_v30, %v6355_v30 }
 0x459   : > { %3355 = vst.msk [vmem:[#allocation2 + $0xb0] sm:$0xf] %vm3340_vm9, %v3273_v4  ;;  %v6358_v4 = vld [vmem:[%s8032_s12 + $0x109] sm:$0xff] }
 0x45a   : > { %3366 = vst.msk [vmem:[#allocation2 + $0x134] sm:$0xf] %vm3340_vm9, %v3295_v60  ;;  %v3649_v60 = vpack.c.bf16 %v6358_v4, %v6358_v4 }
 0x45d   : > { %3526 = vrot.lane.b32.xlu1 %v8615_v46, %s6984_s23  ;;  %3524 = vrot.lane.b32.xlu0 %v8603_v29, %s6984_s23  ;;  %v3631_v46 = vpack.c.bf16 %v6340_v3, %v6340_v3 }
 0x45e   : > { %3528 = vrot.lane.b32.xlu2 %v3435_v12, %s6984_s23  ;;  %v6361_v12 = vld [vmem:[%s8032_s12 + $0x129] sm:$0xff] }
 0x45f   : > { %v3281_v10 = vpop.permute.xlu1 %3280  ;;  %v3279_v20 = vpop.permute.xlu0 %3278  ;;  %v3652_v16 = vpack.c.bf16 %v6361_v12, %v6361_v12  ;;  %v6385_v12 = vld [vmem:[%s8032_s12 + $0xca] sm:$0xff] }
 0x460   : > { %3359 = vst.msk [vmem:[#allocation2 + $0xe0] sm:$0xf] %vm3340_vm9, %v3281_v10  ;;  %v3301_v18 = vpop.permute.xlu2 %3300  ;;  %v6364_v10 = vld [vmem:[%s8032_s12 + $0x151] sm:$0xff] }
 0x461   : > { %3358 = vst.msk [vmem:[#allocation2 + $0xd4] sm:$0xf] %vm3340_vm9, %v3279_v20  ;;  %v3655_v3 = vpack.c.bf16 %v6364_v10, %v6364_v10 }
 0x462   : > { %3369 = vst.msk [vmem:[#allocation2 + $0x158] sm:$0xf] %vm3340_vm9, %v3301_v18 }
 0x465   : > { %3532 = vrot.lane.b32.xlu1 %v3437_v24, %s6984_s23  ;;  %3530 = vrot.lane.b32.xlu0 %v3436_v58, %s6984_s23  ;;  %v6367_v24 = vld [vmem:[%s8032_s12 + $0x171] sm:$0xff] }
 0x466   : > { %3695 = vrot.lane.b32.xlu2 %v3631_v46, %s6985_s29  ;;  %v3658_v18 = vpack.c.bf16 %v6367_v24, %v6367_v24  ;;  %v6370_v46 = vld [vmem:[%s8032_s12 + $0x199] sm:$0xff] }
 0x467   : > { %v3287_v29 = vpop.permute.xlu1 %3286  ;;  %v3285_v56 = vpop.permute.xlu0 %3284 }
 0x468   : > { %3362 = vst.msk [vmem:[#allocation2 + $0x104] sm:$0xf] %vm3340_vm9, %v3287_v29  ;;  %v3307_v61 = vpop.permute.xlu2 %3306 }
 0x469   : > { %3361 = vst.msk [vmem:[#allocation2 + $0xf8] sm:$0xf] %vm3340_vm9, %v3285_v56  ;;  %v3661_v56 = vpack.c.bf16 %v6370_v46, %v6370_v46 }
 0x46a   : > { %3372 = vst.msk [vmem:[#allocation2 + $0x17c] sm:$0xf] %vm3340_vm9, %v3307_v61 }
 0x46d   : > { %3699 = vrot.lane.b32.xlu1 %v8639_v25, %s6985_s29  ;;  %3697 = vrot.lane.b32.xlu0 %v8628_v50, %s6985_s29 }
 0x46e   : > { %3701 = vrot.lane.b32.xlu2 %v3634_v44, %s6985_s29 }
 0x46f   : > { %v3293_v15 = vpop.permute.xlu1 %3292  ;;  %v3291_v14 = vpop.permute.xlu0 %3290 }
 0x470   : > { %3365 = vst.msk [vmem:[#allocation2 + $0x128] sm:$0xf] %vm3340_vm9, %v3293_v15  ;;  %v3475_v34 = vpop.permute.xlu2 %3474 }
 0x471   : > { %3364 = vst.msk [vmem:[#allocation2 + $0x11c] sm:$0xf] %vm3340_vm9, %v3291_v14 }
 0x472   : > { %3569 = vst.msk [vmem:[#allocation2 + $0x20] sm:$0xf] %vm3566_vm10, %v3475_v34 }
 0x475   : > { %3705 = vrot.lane.b32.xlu1 %v8654_v31, %s6985_s29  ;;  %3703 = vrot.lane.b32.xlu0 %v8642_v43, %s6985_s29 }
 0x476   : > { %3707 = vrot.lane.b32.xlu2 %v3637_v49, %s6985_s29 }
 0x477   : > { %v3299_v50 = vpop.permute.xlu1 %3298  ;;  %v3297_v25 = vpop.permute.xlu0 %3296 }
 0x478   : > { %3368 = vst.msk [vmem:[#allocation2 + $0x14c] sm:$0xf] %vm3340_vm9, %v3299_v50  ;;  %v3481_v53 = vpop.permute.xlu2 %3480  ;;  %v6378_v50 = vld [vmem:[%s8032_s12 + $0x7a] sm:$0xff] }
 0x479   : > { %3367 = vst.msk [vmem:[#allocation2 + $0x140] sm:$0xf] %vm3340_vm9, %v3297_v25  ;;  %v3862_v62 = vpack.c.bf16 %v6378_v50, %v6378_v50 }
 0x47a   : > { %3572 = vst.msk [vmem:[#allocation2 + $0x44] sm:$0xf] %vm3566_vm10, %v3481_v53 }
 0x47d   : > { %3711 = vrot.lane.b32.xlu1 %v8669_v6, %s6985_s29  ;;  %3709 = vrot.lane.b32.xlu0 %v8657_v48, %s6985_s29 }
 0x47e   : > { %3713 = vrot.lane.b32.xlu2 %v3640_v13, %s6985_s29  ;;  %v6376_v13 = vld [vmem:[%s8032_s12 + $0x62] sm:$0xff] }
 0x47f   : > { %v3305_v43 = vpop.permute.xlu1 %3304  ;;  %v3303_v31 = vpop.permute.xlu0 %3302 }
 0x480   : > { %3371 = vst.msk [vmem:[#allocation2 + $0x170] sm:$0xf] %vm3340_vm9, %v3305_v43  ;;  %v3487_v45 = vpop.permute.xlu2 %3486  ;;  %v3860_v43 = vpack.c.bf16 %v6376_v13, %v6376_v13  ;;  %v6400_v13 = vld [vmem:[%s8032_s12 + $0x182] sm:$0xff] }
 0x481   : > { %3370 = vst.msk [vmem:[#allocation2 + $0x164] sm:$0xf] %vm3340_vm9, %v3303_v31 }
 0x482   : > { %3575 = vst.msk [vmem:[#allocation2 + $0x68] sm:$0xf] %vm3566_vm10, %v3487_v45 }
 0x485   : > { %3717 = vrot.lane.b32.xlu1 %v8684_v35, %s6985_s29  ;;  %3715 = vrot.lane.b32.xlu0 %v8672_v33, %s6985_s29 }
 0x486   : > { %3719 = vrot.lane.b32.xlu2 %v3643_v63, %s6985_s29 }
 0x487   : > { %v3473_v48 = vpop.permute.xlu1 %3472  ;;  %v3471_v6 = vpop.permute.xlu0 %3470 }
 0x488   : > { %3568 = vst.msk [vmem:[#allocation2 + $0x14] sm:$0xf] %vm3566_vm10, %v3473_v48  ;;  %v3493_v17 = vpop.permute.xlu2 %3492  ;;  %v6379_v48 = vld [vmem:[%s8032_s12 + $0x82] sm:$0xff] }
 0x489   : > { %3567 = vst.msk [vmem:[#allocation2 + $0x8] sm:$0xf] %vm3566_vm10, %v3471_v6  ;;  %v3863_v6 = vpack.c.bf16 %v6379_v48, %v6379_v48 }
 0x48a   : > { %3578 = vst.msk [vmem:[#allocation2 + $0x8c] sm:$0xf] %vm3566_vm10, %v3493_v17 }
 0x48d   : > { %3723 = vrot.lane.b32.xlu1 %v8699_v40, %s6985_s29  ;;  %3721 = vrot.lane.b32.xlu0 %v8687_v1, %s6985_s29 }
 0x48e   : > { %3725 = vrot.lane.b32.xlu2 %v3646_v11, %s6985_s29 }
 0x48f   : > { %v3479_v33 = vpop.permute.xlu1 %3478  ;;  %v3477_v35 = vpop.permute.xlu0 %3476 }
 0x490   : > { %3571 = vst.msk [vmem:[#allocation2 + $0x38] sm:$0xf] %vm3566_vm10, %v3479_v33  ;;  %v3499_v5 = vpop.permute.xlu2 %3498 }
 0x491   : > { %3570 = vst.msk [vmem:[#allocation2 + $0x2c] sm:$0xf] %vm3566_vm10, %v3477_v35  ;;  %v6382_v35 = vld [vmem:[%s8032_s12 + $0xaa] sm:$0xff] }
 0x492   : > { %3581 = vst.msk [vmem:[#allocation2 + $0xb0] sm:$0xf] %vm3566_vm10, %v3499_v5  ;;  %v3866_v4 = vpack.c.bf16 %v6382_v35, %v6382_v35 }
 0x495   : > { %3729 = vrot.lane.b32.xlu1 %v8714_v37, %s6985_s29  ;;  %3727 = vrot.lane.b32.xlu0 %v8702_v23, %s6985_s29 }
 0x496   : > { %3731 = vrot.lane.b32.xlu2 %v3649_v60, %s6985_s29 }
 0x497   : > { %v3485_v1 = vpop.permute.xlu1 %3484  ;;  %v3483_v40 = vpop.permute.xlu0 %3482 }
 0x498   : > { %3574 = vst.msk [vmem:[#allocation2 + $0x5c] sm:$0xf] %vm3566_vm10, %v3485_v1  ;;  %v3505_v2 = vpop.permute.xlu2 %3504 }
 0x499   : > { %3573 = vst.msk [vmem:[#allocation2 + $0x50] sm:$0xf] %vm3566_vm10, %v3483_v40 }
 0x49a   : > { %3584 = vst.msk [vmem:[#allocation2 + $0xd4] sm:$0xf] %vm3566_vm10, %v3505_v2  ;;  %v3869_v2 = vpack.c.bf16 %v6385_v12, %v6385_v12 }
 0x49d   : > { %3735 = vrot.lane.b32.xlu1 %v8729_v54, %s6985_s29  ;;  %3733 = vrot.lane.b32.xlu0 %v8717_v28, %s6985_s29 }
 0x49e   : > { %3737 = vrot.lane.b32.xlu2 %v3652_v16, %s6985_s29 }
 0x49f   : > { %v3491_v23 = vpop.permute.xlu1 %3490  ;;  %v3489_v37 = vpop.permute.xlu0 %3488 }
 0x4a0   : > { %3577 = vst.msk [vmem:[#allocation2 + $0x80] sm:$0xf] %vm3566_vm10, %v3491_v23  ;;  %v3511_v20 = vpop.permute.xlu2 %3510 }
 0x4a1   : > { %3576 = vst.msk [vmem:[#allocation2 + $0x74] sm:$0xf] %vm3566_vm10, %v3489_v37 }
 0x4a2   : > { %3587 = vst.msk [vmem:[#allocation2 + $0xf8] sm:$0xf] %vm3566_vm10, %v3511_v20  ;;  %v6388_v20 = vld [vmem:[%s8032_s12 + $0xf2] sm:$0xff] }
 0x4a5   : > { %3741 = vrot.lane.b32.xlu1 %v8744_v21, %s6985_s29  ;;  %3739 = vrot.lane.b32.xlu0 %v8732_v26, %s6985_s29 }
 0x4a6   : > { %3743 = vrot.lane.b32.xlu2 %v3655_v3, %s6985_s29  ;;  %v3872_v3 = vpack.c.bf16 %v6388_v20, %v6388_v20 }
 0x4a7   : > { %v3497_v28 = vpop.permute.xlu1 %3496  ;;  %v3495_v54 = vpop.permute.xlu0 %3494 }
 0x4a8   : > { %3580 = vst.msk [vmem:[#allocation2 + $0xa4] sm:$0xf] %vm3566_vm10, %v3497_v28  ;;  %v3517_v58 = vpop.permute.xlu2 %3516 }
 0x4a9   : > { %3579 = vst.msk [vmem:[#allocation2 + $0x98] sm:$0xf] %vm3566_vm10, %v3495_v54 }
 0x4aa   : > { %3590 = vst.msk [vmem:[#allocation2 + $0x11c] sm:$0xf] %vm3566_vm10, %v3517_v58 }
 0x4ad   : > { %3747 = vrot.lane.b32.xlu1 %v8759_v22, %s6985_s29  ;;  %3745 = vrot.lane.b32.xlu0 %v8747_v52, %s6985_s29  ;;  %v6372_v52 = vld [vmem:[%s8032_s12 + $0x32] sm:$0xff]  ;;  %v6371_v22 = vld [vmem:[%s8032_s12 + $0x1a1] sm:$0xff] }
 0x4ae   : > { %3749 = vrot.lane.b32.xlu2 %v3658_v18, %s6985_s29  ;;  %v3856_v44 = vpack.c.bf16 %v6372_v52, %v6372_v52  ;;  %v3662_v15 = vpack.c.bf16 %v6371_v22, %v6371_v22  ;;  %v6391_v18 = vld [vmem:[%s8032_s12 + $0x112] sm:$0xff]  ;;  %v6394_v52 = vld [vmem:[%s8032_s12 + $0x13a] sm:$0xff] }
 0x4af   : > { %v3503_v26 = vpop.permute.xlu1 %3502  ;;  %v3501_v21 = vpop.permute.xlu0 %3500  ;;  %v3878_v22 = vpack.c.bf16 %v6394_v52, %v6394_v52 }
 0x4b0   : > { %3583 = vst.msk [vmem:[#allocation2 + $0xc8] sm:$0xf] %vm3566_vm10, %v3503_v26  ;;  %v3523_v29 = vpop.permute.xlu2 %3522  ;;  %v3875_v26 = vpack.c.bf16 %v6391_v18, %v6391_v18 }
 0x4b1   : > { %3582 = vst.msk [vmem:[#allocation2 + $0xbc] sm:$0xf] %vm3566_vm10, %v3501_v21 }
 0x4b2   : > { %3593 = vst.msk [vmem:[#allocation2 + $0x140] sm:$0xf] %vm3566_vm10, %v3523_v29 }
 0x4b5   : > { %3753 = vrot.lane.b32.xlu1 %v8774_v38, %s6985_s29  ;;  %3751 = vrot.lane.b32.xlu0 %v8762_v8, %s6985_s29  ;;  %v6375_v8 = vld [vmem:[%s8032_s12 + $0x52] sm:$0xff] }
 0x4b6   : > { %3755 = vrot.lane.b32.xlu2 %v3661_v56, %s6985_s29  ;;  %v3859_v34 = vpack.c.bf16 %v6375_v8, %v6375_v8  ;;  %v4153_v8 = vld [vmem:[%s10168_s2 + $0xa0] sm:$0x3] }
 0x4b7   : > { %v3509_v27 = vpop.permute.xlu1 %3508  ;;  %v3507_v61 = vpop.permute.xlu0 %3506 }
 0x4b8   : > { %3586 = vst.msk [vmem:[#allocation2 + $0xec] sm:$0xf] %vm3566_vm10, %v3509_v27  ;;  %v3529_v14 = vpop.permute.xlu2 %3528 }
 0x4b9   : > { %3585 = vst.msk [vmem:[#allocation2 + $0xe0] sm:$0xf] %vm3566_vm10, %v3507_v61 }
 0x4ba   : > { %3596 = vst.msk [vmem:[#allocation2 + $0x164] sm:$0xf] %vm3566_vm10, %v3529_v14  ;;  %v6397_v14 = vld [vmem:[%s8032_s12 + $0x15a] sm:$0xff] }
 0x4bd   : > { %3920 = vrot.lane.b32.xlu1 %v3856_v44, %s6977_s10  ;;  %3757 = vrot.lane.b32.xlu0 %v3662_v15, %s6985_s29 }
 0x4be   : > { %3922 = vrot.lane.b32.xlu2 %v8785_v57, %s6977_s10 }
 0x4bf   : > { %v3515_v38 = vpop.permute.xlu1 %3514  ;;  %v3513_v36 = vpop.permute.xlu0 %3512 }
 0x4c0   : > { %3589 = vst.msk [vmem:[#allocation2 + $0x110] sm:$0xf] %vm3566_vm10, %v3515_v38  ;;  %v3696_v49 = vpop.permute.xlu2 %3695  ;;  %v3881_v38 = vpack.c.bf16 %v6397_v14, %v6397_v14 }
 0x4c1   : > { %3588 = vst.msk [vmem:[#allocation2 + $0x104] sm:$0xf] %vm3566_vm10, %v3513_v36  ;;  %v4479_v36 = vunpack.c.l.b16 %v4153_v8 }
 0x4c2   : > { %3792 = vst.msk [vmem:[#allocation2 + $0x8] sm:$0xf] %vm3791_vm11, %v3696_v49 }
 0x4c5   : > { %3926 = vrot.lane.b32.xlu1 %v3859_v34, %s6977_s10  ;;  %3924 = vrot.lane.b32.xlu0 %v8788_v41, %s6977_s10  ;;  %v6381_v41 = vld [vmem:[%s8032_s12 + $0x9a] sm:$0xff] }
 0x4c6   : > { %3928 = vrot.lane.b32.xlu2 %v3860_v43, %s6977_s10  ;;  %v3865_v45 = vpack.c.bf16 %v6381_v41, %v6381_v41  ;;  %v6402_v34 = vld [vmem:[%s8032_s12 + $0x19a] sm:$0xff]  ;;  %v6762_v43 = vld [vmem:[%s10168_s2 + $0x90] sm:$0xff] }
 0x4c7   : > { %v3521_v25 = vpop.permute.xlu1 %3520  ;;  %v3519_v57 = vpop.permute.xlu0 %3518 }
 0x4c8   : > { %3592 = vst.msk [vmem:[#allocation2 + $0x134] sm:$0xf] %vm3566_vm10, %v3521_v25  ;;  %v3702_v53 = vpop.permute.xlu2 %3701 }
 0x4c9   : > { %3591 = vst.msk [vmem:[#allocation2 + $0x128] sm:$0xf] %vm3566_vm10, %v3519_v57 }
 0x4ca   : > { %3795 = vst.msk [vmem:[#allocation2 + $0x2c] sm:$0xf] %vm3791_vm11, %v3702_v53  ;;  %v6763_v53 = vld [vmem:[%s10168_s2 + $0x98] sm:$0xff] }
 0x4cd   : > { %3932 = vrot.lane.b32.xlu1 %v3862_v62, %s6977_s10  ;;  %3930 = vrot.lane.b32.xlu0 %v8801_v51, %s6977_s10  ;;  %v6384_v51 = vld [vmem:[%s8032_s12 + $0xc2] sm:$0xff]  ;;  %v3886_v62 = vpack.c.bf16 %v6402_v34, %v6402_v34 }
 0x4ce   : > { %3934 = vrot.lane.b32.xlu2 %v3863_v6, %s6977_s10  ;;  %v3868_v11 = vpack.c.bf16 %v6384_v51, %v6384_v51  ;;  %v6403_v51 = vld [vmem:[%s8032_s12 + $0x1a2] sm:$0xff] }
 0x4cf   : > { %v3527_v31 = vpop.permute.xlu1 %3526  ;;  %v3525_v0 = vpop.permute.xlu0 %3524 }
 0x4d0   : > { %3595 = vst.msk [vmem:[#allocation2 + $0x158] sm:$0xf] %vm3566_vm10, %v3527_v31  ;;  %v3708_v63 = vpop.permute.xlu2 %3707 }
 0x4d1   : > { %3594 = vst.msk [vmem:[#allocation2 + $0x14c] sm:$0xf] %vm3566_vm10, %v3525_v0 }
 0x4d2   : > { %3798 = vst.msk [vmem:[#allocation2 + $0x50] sm:$0xf] %vm3791_vm11, %v3708_v63 }
 0x4d5   : > { %3938 = vrot.lane.b32.xlu1 %v3865_v45, %s6977_s10  ;;  %3936 = vrot.lane.b32.xlu0 %v8813_v55, %s6977_s10  ;;  %v6387_v55 = vld [vmem:[%s8032_s12 + $0xe2] sm:$0xff] }
 0x4d6   : > { %3940 = vrot.lane.b32.xlu2 %v3866_v4, %s6977_s10  ;;  %v3871_v1 = vpack.c.bf16 %v6387_v55, %v6387_v55  ;;  %v6761_v45 = vld [vmem:[%s10168_s2 + $0x88] sm:$0xff] }
 0x4d7   : > { %v3533_v30 = vpop.permute.xlu1 %3532  ;;  %v3531_v17 = vpop.permute.xlu0 %3530 }
 0x4d8   : > { %3598 = vst.msk [vmem:[#allocation2 + $0x17c] sm:$0xf] %vm3566_vm10, %v3533_v30  ;;  %v3714_v33 = vpop.permute.xlu2 %3713  ;;  %v3887_v30 = vpack.c.bf16 %v6403_v51, %v6403_v51 }
 0x4d9   : > { %3597 = vst.msk [vmem:[#allocation2 + $0x170] sm:$0xf] %vm3566_vm10, %v3531_v17 }
 0x4da   : > { %3801 = vst.msk [vmem:[#allocation2 + $0x74] sm:$0xf] %vm3791_vm11, %v3714_v33 }
 0x4dd   : > { %3944 = vrot.lane.b32.xlu1 %v3868_v11, %s6977_s10  ;;  %3942 = vrot.lane.b32.xlu0 %v8825_v9, %s6977_s10  ;;  %v6390_v9 = vld [vmem:[%s8032_s12 + $0x10a] sm:$0xff] }
 0x4de   : > { %3946 = vrot.lane.b32.xlu2 %v3869_v2, %s6977_s10  ;;  %v3874_v37 = vpack.c.bf16 %v6390_v9, %v6390_v9 }
 0x4df   : > { %v3700_v5 = vpop.permute.xlu1 %3699  ;;  %v3698_v60 = vpop.permute.xlu0 %3697 }
 0x4e0   : > { %3794 = vst.msk [vmem:[#allocation2 + $0x20] sm:$0xf] %vm3791_vm11, %v3700_v5  ;;  %v3720_v40 = vpop.permute.xlu2 %3719 }
 0x4e1   : > { %3793 = vst.msk [vmem:[#allocation2 + $0x14] sm:$0xf] %vm3791_vm11, %v3698_v60 }
 0x4e2   : > { %3804 = vst.msk [vmem:[#allocation2 + $0x98] sm:$0xf] %vm3791_vm11, %v3720_v40 }
 0x4e5   : > { %3950 = vrot.lane.b32.xlu1 %v3871_v1, %s6977_s10  ;;  %3948 = vrot.lane.b32.xlu0 %v8837_v42, %s6977_s10  ;;  %v6393_v42 = vld [vmem:[%s8032_s12 + $0x12a] sm:$0xff] }
 0x4e6   : > { %3952 = vrot.lane.b32.xlu2 %v3872_v3, %s6977_s10  ;;  %v3877_v24 = vpack.c.bf16 %v6393_v42, %v6393_v42 }
 0x4e7   : > { %v3706_v16 = vpop.permute.xlu1 %3705  ;;  %v3704_v23 = vpop.permute.xlu0 %3703 }
 0x4e8   : > { %3797 = vst.msk [vmem:[#allocation2 + $0x44] sm:$0xf] %vm3791_vm11, %v3706_v16  ;;  %v3726_v10 = vpop.permute.xlu2 %3725 }
 0x4e9   : > { %3796 = vst.msk [vmem:[#allocation2 + $0x38] sm:$0xf] %vm3791_vm11, %v3704_v23 }
 0x4ea   : > { %3807 = vst.msk [vmem:[#allocation2 + $0xbc] sm:$0xf] %vm3791_vm11, %v3726_v10 }
 0x4ed   : > { %3956 = vrot.lane.b32.xlu1 %v3874_v37, %s6977_s10  ;;  %3954 = vrot.lane.b32.xlu0 %v8849_v39, %s6977_s10  ;;  %v6396_v39 = vld [vmem:[%s8032_s12 + $0x152] sm:$0xff] }
 0x4ee   : > { %3958 = vrot.lane.b32.xlu2 %v3875_v26, %s6977_s10  ;;  %v3880_v29 = vpack.c.bf16 %v6396_v39, %v6396_v39 }
 0x4ef   : > { %v3712_v28 = vpop.permute.xlu1 %3711  ;;  %v3710_v54 = vpop.permute.xlu0 %3709 }
 0x4f0   : > { %3800 = vst.msk [vmem:[#allocation2 + $0x68] sm:$0xf] %vm3791_vm11, %v3712_v28  ;;  %v3732_v58 = vpop.permute.xlu2 %3731 }
 0x4f1   : > { %3799 = vst.msk [vmem:[#allocation2 + $0x5c] sm:$0xf] %vm3791_vm11, %v3710_v54 }
 0x4f2   : > { %3810 = vst.msk [vmem:[#allocation2 + $0xe0] sm:$0xf] %vm3791_vm11, %v3732_v58 }
 0x4f5   : > { %3962 = vrot.lane.b32.xlu1 %v3877_v24, %s6977_s10  ;;  %3960 = vrot.lane.b32.xlu0 %v8860_v47, %s6977_s10  ;;  %v6399_v47 = vld [vmem:[%s8032_s12 + $0x172] sm:$0xff]  ;;  %s6694_s12 = sshll.u32 %s10253_s24, 8 }
 0x4f6   : > { %3964 = vrot.lane.b32.xlu2 %v3878_v22, %s6977_s10  ;;  %v3883_v44 = vpack.c.bf16 %v6399_v47, %v6399_v47  ;;  %s9227_s21 = scalar_lea.vmem %s10172_s6, %s6694_s12  ;;  %s10021_s15 = scalar_lea.vmem %s10173_s7, %s6694_s12 }
 0x4f7   : > { %v3718_v21 = vpop.permute.xlu1 %3717  ;;  %v3716_v46 = vpop.permute.xlu0 %3715  ;;  %v4977_v23 = vld [vmem:[%s9227_s21] sm:$0xff]  ;;  %v4978_v3 = vld [vmem:[%s9227_s21 + $0x8] sm:$0xff]  ;;  %v4980_v26 = vld [vmem:[%s9227_s21 + $0x18] sm:$0xff] }
 0x4f8   : > { %3803 = vst.msk [vmem:[#allocation2 + $0x8c] sm:$0xf] %vm3791_vm11, %v3718_v21  ;;  %v3738_v56 = vpop.permute.xlu2 %3737  ;;  %v4984_v14 = vld [vmem:[%s9227_s21 + $0x38] sm:$0xff]  ;;  %v4986_v8 = vld [vmem:[%s9227_s21 + $0x48] sm:$0xff] }
 0x4f9   : > { %3802 = vst.msk [vmem:[#allocation2 + $0x80] sm:$0xf] %vm3791_vm11, %v3716_v46 }
 0x4fa   : > { %3813 = vst.msk [vmem:[#allocation2 + $0x104] sm:$0xf] %vm3791_vm11, %v3738_v56  ;;  %v4983_v56 = vld [vmem:[%s9227_s21 + $0x30] sm:$0xff] }
 0x4fd   : > { %3968 = vrot.lane.b32.xlu1 %v3880_v29, %s6977_s10  ;;  %3966 = vrot.lane.b32.xlu0 %v8872_v19, %s6977_s10  ;;  %v4500_v19 = vpack.c.b16 %v4479_v36, %v4479_v36  ;;  %v4981_v29 = vld [vmem:[%s9227_s21 + $0x20] sm:$0xff] }
 0x4fe   : > { %3970 = vrot.lane.b32.xlu2 %v3881_v38, %s6977_s10 }
 0x4ff   : > { %v3724_v27 = vpop.permute.xlu1 %3723  ;;  %v3722_v61 = vpop.permute.xlu0 %3721  ;;  %v4572_v49 = vsel %vm4570_vm12, %v4500_v19, 0  ;;  %v4982_v19 = vld [vmem:[%s9227_s21 + $0x28] sm:$0xff] }
 0x500   : > { %3806 = vst.msk [vmem:[#allocation2 + $0xb0] sm:$0xf] %vm3791_vm11, %v3724_v27  ;;  %v3744_v15 = vpop.permute.xlu2 %3743  ;;  %4755 = vmatpush.bf16.msra.mxu2 %v4572_v49  ;;  %6780 = vmatpush.bf16.msra.mxu3 %v4572_v49  ;;  %v4987_v49 = vld [vmem:[%s9227_s21 + $0x50] sm:$0xff] }
 0x501   : > { %3805 = vst.msk [vmem:[#allocation2 + $0xa4] sm:$0xf] %vm3791_vm11, %v3722_v61 }
 0x502   : > { %3816 = vst.msk [vmem:[#allocation2 + $0x128] sm:$0xf] %vm3791_vm11, %v3744_v15  ;;  %v4979_v15 = vld [vmem:[%s9227_s21 + $0x10] sm:$0xff] }
 0x504   : > { %4756 = vmatpush.bf16.msra.mxu2 %v6763_v53  ;;  %6781 = vmatpush.bf16.msra.mxu3 %v6763_v53 }
 0x505   : > { %3974 = vrot.lane.b32.xlu1 %v3883_v44, %s6977_s10  ;;  %3972 = vrot.lane.b32.xlu0 %v8884_v32, %s6977_s10  ;;  %v3884_v32 = vpack.c.bf16 %v6400_v13, %v6400_v13 }
 0x507   : > { %v3730_v50 = vpop.permute.xlu1 %3729  ;;  %v3728_v25 = vpop.permute.xlu0 %3727  ;;  %3976 = vrot.lane.b32.xlu2 %v3884_v32, %s6977_s10  ;;  %v4985_v32 = vld [vmem:[%s9227_s21 + $0x40] sm:$0xff] }
 0x508   : > { %3809 = vst.msk [vmem:[#allocation2 + $0xd4] sm:$0xf] %vm3791_vm11, %v3730_v50  ;;  %v3750_v57 = vpop.permute.xlu2 %3749  ;;  %4757 = vmatpush.bf16.msra.mxu2 %v6762_v43  ;;  %6782 = vmatpush.bf16.msra.mxu3 %v6762_v43  ;;  %v4989_v50 = vld [vmem:[%s9227_s21 + $0x60] sm:$0xff] }
 0x509   : > { %3808 = vst.msk [vmem:[#allocation2 + $0xc8] sm:$0xf] %vm3791_vm11, %v3728_v25 }
 0x50a   : > { %3819 = vst.msk [vmem:[#allocation2 + $0x14c] sm:$0xf] %vm3791_vm11, %v3750_v57 }
 0x50c   : > { %4758 = vmatpush.bf16.msra.mxu2 %v6761_v45  ;;  %6783 = vmatpush.bf16.msra.mxu3 %v6761_v45  ;;  %v4988_v45 = vld [vmem:[%s9227_s21 + $0x58] sm:$0xff] }
 0x50d   : > { %3978 = vrot.lane.b32.xlu0 %v8897_v59, %s6977_s10  ;;  %3980 = vrot.lane.b32.xlu1 %v3886_v62, %s6977_s10  ;;  %v6760_v59 = vld [vmem:[%s10168_s2 + $0x80] sm:$0xff] }
 0x50f   : > { %v3736_v41 = vpop.permute.xlu1 %3735  ;;  %v3734_v31 = vpop.permute.xlu0 %3733  ;;  %3982 = vrot.lane.b32.xlu2 %v3887_v30, %s6977_s10 }
 0x510   : > { %3812 = vst.msk [vmem:[#allocation2 + $0xf8] sm:$0xf] %vm3791_vm11, %v3736_v41  ;;  %v3756_v0 = vpop.permute.xlu2 %3755  ;;  %4759 = vmatpush.bf16.msra.mxu2 %v6760_v59  ;;  %6784 = vmatpush.bf16.msra.mxu3 %v6760_v59  ;;  %v4990_v41 = vld [vmem:[%s9227_s21 + $0x68] sm:$0xff] }
 0x511   : > { %3811 = vst.msk [vmem:[#allocation2 + $0xec] sm:$0xf] %vm3791_vm11, %v3734_v31  ;;  %v4992_v31 = vld [vmem:[%s9227_s21 + $0x78] sm:$0xff] }
 0x512   : > { %3822 = vst.msk [vmem:[#allocation2 + $0x170] sm:$0xf] %vm3791_vm11, %v3756_v0 }
 0x515   : > { %5041 = vrot.lane.b32.xlu0 %v4977_v23, %s6976_s9  ;;  %5043 = vrot.lane.b32.xlu1 %v4978_v3, %s6976_s9  ;;  %v4583_v3 = vpop.f32.mrf.mxu0 }
 0x517   : > { %v3742_v63 = vpop.permute.xlu1 %3741  ;;  %v3740_v48 = vpop.permute.xlu0 %3739  ;;  %5045 = vrot.lane.b32.xlu2 %v4979_v15, %s6976_s9 }
 0x518   : > { %3815 = vst.msk [vmem:[#allocation2 + $0x11c] sm:$0xf] %vm3791_vm11, %v3742_v63  ;;  %v3923_v6 = vpop.permute.xlu2 %3922  ;;  %v4993_v63 = vld [vmem:[%s9227_s21 + $0x80] sm:$0xff] }
 0x519   : > { %3814 = vst.msk [vmem:[#allocation2 + $0x110] sm:$0xf] %vm3791_vm11, %v3740_v48  ;;  %v4995_v48 = vld [vmem:[%s9227_s21 + $0x90] sm:$0xff] }
 0x51a   : > { %4018 = vst.msk [vmem:[#allocation2 + $0x14] sm:$0xf] %vm4016_vm13, %v3923_v6 }
 0x51d   : > { %5047 = vrot.lane.b32.xlu0 %v4980_v26, %s6976_s9  ;;  %5049 = vrot.lane.b32.xlu1 %v4981_v29, %s6976_s9  ;;  %v5000_v26 = vld [vmem:[%s9227_s21 + $0xb8] sm:$0xff] }
 0x51f   : > { %v3748_v17 = vpop.permute.xlu1 %3747  ;;  %v3746_v11 = vpop.permute.xlu0 %3745  ;;  %5051 = vrot.lane.b32.xlu2 %v4982_v19, %s6976_s9 }
 0x520   : > { %3818 = vst.msk [vmem:[#allocation2 + $0x140] sm:$0xf] %vm3791_vm11, %v3748_v17  ;;  %v3929_v33 = vpop.permute.xlu2 %3928 }
 0x521   : > { %3817 = vst.msk [vmem:[#allocation2 + $0x134] sm:$0xf] %vm3791_vm11, %v3746_v11  ;;  %v6698_v1 = vld [vmem:[#allocation2 + $0x10] sm:$0xf0] }
 0x522   : > { %4021 = vst.msk [vmem:[#allocation2 + $0x38] sm:$0xf] %vm4016_vm13, %v3929_v33  ;;  %v4991_v33 = vld [vmem:[%s9227_s21 + $0x70] sm:$0xff] }
 0x525   : > { %5053 = vrot.lane.b32.xlu0 %v4983_v56, %s6976_s9  ;;  %5055 = vrot.lane.b32.xlu1 %v4984_v14, %s6976_s9  ;;  %v5007_v14 = vld [vmem:[%s9227_s21 + $0xf0] sm:$0xff] }
 0x527   : > { %v3754_v35 = vpop.permute.xlu1 %3753  ;;  %v3752_v4 = vpop.permute.xlu0 %3751  ;;  %5057 = vrot.lane.b32.xlu2 %v4985_v32, %s6976_s9  ;;  %v9335_v32 = vld [vmem:[%s10169_s3] ss:$0 sm:$0xff] }
 0x528   : > { %3821 = vst.msk [vmem:[#allocation2 + $0x164] sm:$0xf] %vm3791_vm11, %v3754_v35  ;;  %v3935_v55 = vpop.permute.xlu2 %3934 }
 0x529   : > { %3820 = vst.msk [vmem:[#allocation2 + $0x158] sm:$0xf] %vm3791_vm11, %v3752_v4  ;;  %v6438_v52 = vld [vmem:[#allocation2 + $0x38] sm:$0xf] }
 0x52a   : > { %4024 = vst.msk [vmem:[#allocation2 + $0x5c] sm:$0xf] %vm4016_vm13, %v3935_v55  ;;  %v4996_v4 = vld [vmem:[%s9227_s21 + $0x98] sm:$0xff]  ;;  %v4998_v55 = vld [vmem:[%s9227_s21 + $0xa8] sm:$0xff] }
 0x52d   : > { %5059 = vrot.lane.b32.xlu0 %v4986_v8, %s6976_s9  ;;  %5061 = vrot.lane.b32.xlu1 %v4987_v49, %s6976_s9 }
 0x52f   : > { %v3921_v5 = vpop.permute.xlu1 %3920  ;;  %v3758_v60 = vpop.permute.xlu0 %3757  ;;  %5063 = vrot.lane.b32.xlu2 %v4988_v45, %s6976_s9 }
 0x530   : > { %4017 = vst.msk [vmem:[#allocation2 + $0x8] sm:$0xf] %vm4016_vm13, %v3921_v5  ;;  %v3941_v40 = vpop.permute.xlu2 %3940 }
 0x531   : > { %3823 = vst.msk [vmem:[#allocation2 + $0x17c] sm:$0xf] %vm3791_vm11, %v3758_v60  ;;  %v6707_v57 = vld [vmem:[#allocation2 + $0x58] sm:$0xf0] }
 0x532   : > { %4027 = vst.msk [vmem:[#allocation2 + $0x80] sm:$0xf] %vm4016_vm13, %v3941_v40 }
 0x535   : > { %5065 = vrot.lane.b32.xlu0 %v4989_v50, %s6976_s9  ;;  %5067 = vrot.lane.b32.xlu1 %v4990_v41, %s6976_s9  ;;  %v5008_v50 = vld [vmem:[%s9227_s21 + $0xf8] sm:$0xff] }
 0x537   : > { %v3927_v12 = vpop.permute.xlu1 %3926  ;;  %v6414_v2 = vld [vmem:[#allocation2 + $0x8] sm:$0xf]  ;;  %v3925_v9 = vpop.permute.xlu0 %3924  ;;  %5069 = vrot.lane.b32.xlu2 %v4991_v33, %s6976_s9 }
 0x538   : > { %4020 = vst.msk [vmem:[#allocation2 + $0x2c] sm:$0xf] %vm4016_vm13, %v3927_v12  ;;  %v6415_v16 = vor.u32 %v6698_v1, %v6414_v2  ;;  %v3947_v37 = vpop.permute.xlu2 %3946  ;;  %v4994_v1 = vld [vmem:[%s9227_s21 + $0x88] sm:$0xff]  ;;  %v4999_v2 = vld [vmem:[%s9227_s21 + $0xb0] sm:$0xff] }
 0x539   : > { %4019 = vst.msk [vmem:[#allocation2 + $0x20] sm:$0xf] %vm4016_vm13, %v3925_v9  ;;  %v6474_v23 = vld [vmem:[#allocation2 + $0x80] sm:$0xf] }
 0x53a   : > { %6676 = vmatmul.msk.bf16.vlgmr.msra.gmra.mxu2 %vm4521_vm14, %v6415_v16  ;;  %4030 = vst.msk [vmem:[#allocation2 + $0xa4] sm:$0xf] %vm4016_vm13, %v3947_v37  ;;  %v5001_v16 = vld [vmem:[%s9227_s21 + $0xc0] sm:$0xff] }
 0x53d   : > { %5071 = vrot.lane.b32.xlu0 %v4992_v31, %s6976_s9  ;;  %5073 = vrot.lane.b32.xlu1 %v4993_v63, %s6976_s9 }
 0x53f   : > { %v3933_v10 = vpop.permute.xlu1 %3932  ;;  %v3931_v20 = vpop.permute.xlu0 %3930  ;;  %v6701_v28 = vld [vmem:[#allocation2 + $0x28] sm:$0xf0]  ;;  %5075 = vrot.lane.b32.xlu2 %v4994_v1, %s6976_s9 }
 0x540   : > { %4023 = vst.msk [vmem:[#allocation2 + $0x50] sm:$0xf] %vm4016_vm13, %v3933_v10  ;;  %v6426_v42 = vld [vmem:[#allocation2 + $0x20] sm:$0xf]  ;;  %v3953_v24 = vpop.permute.xlu2 %3952 }
 0x541   : > { %4022 = vst.msk [vmem:[#allocation2 + $0x44] sm:$0xf] %vm4016_vm13, %v3931_v20  ;;  %v6427_v54 = vor.u32 %v6701_v28, %v6426_v42  ;;  %v4997_v20 = vld [vmem:[%s9227_s21 + $0xa0] sm:$0xff]  ;;  %v5002_v42 = vld [vmem:[%s9227_s21 + $0xc8] sm:$0xff]  ;;  %v5004_v28 = vld [vmem:[%s9227_s21 + $0xd8] sm:$0xff] }
 0x542   : > { %4033 = vst.msk [vmem:[#allocation2 + $0xc8] sm:$0xf] %vm4016_vm13, %v3953_v24  ;;  %v6716_v29 = vld [vmem:[#allocation2 + $0xa0] sm:$0xf0] }
 0x545   : > { %5077 = vrot.lane.b32.xlu0 %v4995_v48, %s6976_s9  ;;  %5079 = vrot.lane.b32.xlu1 %v4996_v4, %s6976_s9 }
 0x547   : > { %v3939_v58 = vpop.permute.xlu1 %3938  ;;  %v3937_v18 = vpop.permute.xlu0 %3936  ;;  %v6450_v25 = vld [vmem:[#allocation2 + $0x50] sm:$0xf]  ;;  %5081 = vrot.lane.b32.xlu2 %v4997_v20, %s6976_s9 }
 0x548   : > { %4026 = vst.msk [vmem:[#allocation2 + $0x74] sm:$0xf] %vm4016_vm13, %v3939_v58  ;;  %v3959_v39 = vpop.permute.xlu2 %3958  ;;  %v6704_v22 = vld [vmem:[#allocation2 + $0x40] sm:$0xf0]  ;;  %v6451_v62 = vor.u32 %v6707_v57, %v6450_v25 }
 0x549   : > { %4025 = vst.msk [vmem:[#allocation2 + $0x68] sm:$0xf] %vm4016_vm13, %v3937_v18  ;;  %v6439_v47 = vor.u32 %v6704_v22, %v6438_v52  ;;  %v5003_v22 = vld [vmem:[%s9227_s21 + $0xd0] sm:$0xff] }
 0x54a   : > { %6677 = vmatmul.msk.bf16.gmra.mxu2 %vm4521_vm14, %v6427_v54  ;;  %4036 = vst.msk [vmem:[#allocation2 + $0xec] sm:$0xf] %vm4016_vm13, %v3959_v39  ;;  %v4672_v54 = vpop.f32.mrf.mxu1  ;;  %v5005_v39 = vld [vmem:[%s9227_s21 + $0xe0] sm:$0xff] }
 0x54d   : > { %5083 = vrot.lane.b32.xlu0 %v4998_v55, %s6976_s9  ;;  %5085 = vrot.lane.b32.xlu1 %v4999_v2, %s6976_s9 }
 0x54f   : > { %v3945_v21 = vpop.permute.xlu1 %3944  ;;  %v3943_v46 = vpop.permute.xlu0 %3942  ;;  %v6710_v51 = vld [vmem:[#allocation2 + $0x70] sm:$0xf0]  ;;  %5087 = vrot.lane.b32.xlu2 %v5000_v26, %s6976_s9 }
 0x550   : > { %4029 = vst.msk [vmem:[#allocation2 + $0x98] sm:$0xf] %vm4016_vm13, %v3945_v21  ;;  %v3965_v27 = vpop.permute.xlu2 %3964  ;;  %v6462_v6 = vld [vmem:[#allocation2 + $0x68] sm:$0xf]  ;;  %v4585_v21 = vpop.f32.mrf.mxu0 }
 0x551   : > { %4028 = vst.msk [vmem:[#allocation2 + $0x8c] sm:$0xf] %vm4016_vm13, %v3943_v46  ;;  %v6463_v30 = vor.u32 %v6710_v51, %v6462_v6  ;;  %v4586_v6 = vadd.f32 %v9335_v32, %v4585_v21 }
 0x552   : > { %4039 = vst.msk [vmem:[#allocation2 + $0x110] sm:$0xf] %vm4016_vm13, %v3965_v27  ;;  %v4674_v56 = vpop.f32.mrf.mxu1 }
 0x555   : > { %5089 = vrot.lane.b32.xlu0 %v5001_v16, %s6976_s9  ;;  %5091 = vrot.lane.b32.xlu1 %v5002_v42, %s6976_s9 }
 0x557   : > { %v3951_v61 = vpop.permute.xlu1 %3950  ;;  %v3949_v44 = vpop.permute.xlu0 %3948  ;;  %v6486_v46 = vld [vmem:[#allocation2 + $0x98] sm:$0xf]  ;;  %5093 = vrot.lane.b32.xlu2 %v5003_v22, %s6976_s9 }
 0x558   : > { %4032 = vst.msk [vmem:[#allocation2 + $0xbc] sm:$0xf] %vm4016_vm13, %v3951_v61  ;;  %v3971_v38 = vpop.permute.xlu2 %3970  ;;  %v6713_v37 = vld [vmem:[#allocation2 + $0x88] sm:$0xf0]  ;;  %v6487_v52 = vor.u32 %v6716_v29, %v6486_v46 }
 0x559   : > { %4031 = vst.msk [vmem:[#allocation2 + $0xb0] sm:$0xf] %vm4016_vm13, %v3949_v44  ;;  %v6475_v10 = vor.u32 %v6713_v37, %v6474_v23 }
 0x55a   : > { %6678 = vmatmul.msk.bf16.gmra.mxu2 %vm4521_vm14, %v6439_v47  ;;  %4042 = vst.msk [vmem:[#allocation2 + $0x134] sm:$0xf] %vm4016_vm13, %v3971_v38  ;;  %v4588_v47 = vpop.f32.mrf.mxu0  ;;  %v4677_v44 = vpop.f32.mrf.mxu1 }
 0x55d   : > { %5095 = vrot.lane.b32.xlu0 %v5004_v28, %s6976_s9  ;;  %5097 = vrot.lane.b32.xlu1 %v5005_v39, %s6976_s9 }
 0x55f   : > { %v3957_v36 = vpop.permute.xlu1 %3956  ;;  %v3955_v34 = vpop.permute.xlu0 %3954  ;;  %v6719_v38 = vld [vmem:[#allocation2 + $0xb8] sm:$0xf0] }
 0x560   : > { %4035 = vst.msk [vmem:[#allocation2 + $0xe0] sm:$0xf] %vm4016_vm13, %v3957_v36  ;;  %v6498_v8 = vld [vmem:[#allocation2 + $0xb0] sm:$0xf]  ;;  %v5006_v36 = vld [vmem:[%s9227_s21 + $0xe8] sm:$0xff] }
 0x561   : > { %4034 = vst.msk [vmem:[#allocation2 + $0xd4] sm:$0xf] %vm4016_vm13, %v3955_v34  ;;  %v3977_v53 = vpop.permute.xlu2 %3976  ;;  %v6499_v34 = vor.u32 %v6719_v38, %v6498_v8  ;;  %5099 = vrot.lane.b32.xlu2 %v5006_v36, %s6976_s9 }
 0x562   : > { %4045 = vst.msk [vmem:[#allocation2 + $0x158] sm:$0xf] %vm4016_vm13, %v3977_v53  ;;  %v4590_v19 = vpop.f32.mrf.mxu0  ;;  %v4679_v49 = vpop.f32.mrf.mxu1 }
 0x563   : > { %v4591_v28 = vadd.f32 %v9335_v32, %v4590_v19 }
 0x565   : > { %5101 = vrot.lane.b32.xlu0 %v5007_v14, %s6976_s9  ;;  %5103 = vrot.lane.b32.xlu1 %v5008_v50, %s6976_s9 }
 0x567   : > { %v3963_v13 = vpop.permute.xlu1 %3962  ;;  %v3961_v43 = vpop.permute.xlu0 %3960  ;;  %v6522_v51 = vld [vmem:[#allocation2 + $0xe0] sm:$0xf] }
 0x568   : > { %4038 = vst.msk [vmem:[#allocation2 + $0x104] sm:$0xf] %vm4016_vm13, %v3963_v13  ;;  %v6722_v53 = vld [vmem:[#allocation2 + $0xd0] sm:$0xf0] }
 0x569   : > { %4037 = vst.msk [vmem:[#allocation2 + $0xf8] sm:$0xf] %vm4016_vm13, %v3961_v43  ;;  %v3983_v11 = vpop.permute.xlu2 %3982  ;;  %v6582_v24 = vld [vmem:[#allocation2 + $0x158] sm:$0xf]  ;;  %v4584_v43 = vadd.f32 %v9335_v32, %v4583_v3 }
 0x56a   : > { %6679 = vmatmul.msk.bf16.gmra.mxu2 %vm4521_vm14, %v6451_v62  ;;  %4048 = vst.msk [vmem:[#allocation2 + $0x17c] sm:$0xf] %vm4016_vm13, %v3983_v11  ;;  %v4593_v25 = vpop.f32.mrf.mxu0  ;;  %v4682_v57 = vpop.f32.mrf.mxu1  ;;  %v6510_v62 = vld [vmem:[#allocation2 + $0xc8] sm:$0xf]  ;;  %v4675_v11 = vadd.f32 %v4674_v56, %v4586_v6 }
 0x56b   : > { %v6511_v13 = vor.u32 %v6722_v53, %v6510_v62  ;;  %v4673_v31 = vadd.f32 %v4672_v54, %v4584_v43  ;;  %v4594_v22 = vadd.f32 %v9335_v32, %v4593_v25 }
 0x56f   : > { %v3969_v0 = vpop.permute.xlu1 %3968  ;;  %v3967_v59 = vpop.permute.xlu0 %3966 }
 0x570   : > { %4041 = vst.msk [vmem:[#allocation2 + $0x128] sm:$0xf] %vm4016_vm13, %v3969_v0  ;;  %v9342_v0 = vld [vmem:[%s10170_s4] ss:$0 sm:$0xff] }
 0x571   : > { %4040 = vst.msk [vmem:[#allocation2 + $0x11c] sm:$0xf] %vm4016_vm13, %v3967_v59  ;;  %v6743_v61 = vld [vmem:[#allocation2 + $0x178] sm:$0xf0] }
 0x572   : > { %v4595_v41 = vpop.f32.mrf.mxu0  ;;  %v4684_v45 = vpop.f32.mrf.mxu1 }
 0x573   : > { %v4596_v36 = vadd.f32 %v9335_v32, %v4595_v41 }
 0x577   : > { %v3975_v17 = vpop.permute.xlu1 %3974  ;;  %v3973_v35 = vpop.permute.xlu0 %3972 }
 0x578   : > { %4044 = vst.msk [vmem:[#allocation2 + $0x14c] sm:$0xf] %vm4016_vm13, %v3975_v17  ;;  %v6731_v62 = vld [vmem:[#allocation2 + $0x118] sm:$0xf0] }
 0x579   : > { %4043 = vst.msk [vmem:[#allocation2 + $0x140] sm:$0xf] %vm4016_vm13, %v3973_v35 }
 0x57a   : > { %6680 = vmatmul.msk.bf16.gmra.mxu2 %vm4521_vm14, %v6463_v30  ;;  %v6725_v30 = vld [vmem:[#allocation2 + $0xe8] sm:$0xf0]  ;;  %v9346_v17 = vpop.f32.mrf.mxu0  ;;  %v9348_v55 = vpop.f32.mrf.mxu1 }
 0x57b   : > { %v6523_v4 = vor.u32 %v6725_v30, %v6522_v51 }
 0x57f   : > { %v6737_v5 = vld [vmem:[#allocation2 + $0x148] sm:$0xf0]  ;;  %v3981_v60 = vpop.permute.xlu1 %3980  ;;  %v3979_v12 = vpop.permute.xlu0 %3978 }
 0x580   : > { %v6570_v40 = vld [vmem:[#allocation2 + $0x140] sm:$0xf]  ;;  %4047 = vst.msk [vmem:[#allocation2 + $0x170] sm:$0xf] %vm4016_vm13, %v3981_v60 }
 0x581   : > { %v6571_v9 = vor.u32 %v6737_v5, %v6570_v40  ;;  %4046 = vst.msk [vmem:[#allocation2 + $0x164] sm:$0xf] %vm4016_vm13, %v3979_v12  ;;  %v9353_v5 = vld [vmem:[%s10171_s5] ss:$0 sm:$0xff]  ;;  %v4589_v12 = vadd.f32 %v9335_v32, %v4588_v47 }
 0x582   : > { %v4600_v23 = vpop.f32.mrf.mxu0  ;;  %v4689_v3 = vpop.f32.mrf.mxu1 }
 0x583   : > { %6689 = vmatmul.msk.bf16.vlgmr.msra.gmra.mxu3 %vm4521_vm14, %v6571_v9  ;;  %v4678_v9 = vadd.f32 %v4677_v44, %v4589_v12 }
 0x587   : > { %v6594_v27 = vld [vmem:[#allocation2 + $0x170] sm:$0xf] }
 0x588   : > { %v6740_v58 = vld [vmem:[#allocation2 + $0x160] sm:$0xf0]  ;;  %v6595_v15 = vor.u32 %v6743_v61, %v6594_v27  ;;  %v4683_v61 = vadd.f32 %v4682_v57, %v4594_v22  ;;  %v6546_v57 = vld [vmem:[#allocation2 + $0x110] sm:$0xf] }
 0x589   : > { %v6583_v18 = vor.u32 %v6740_v58, %v6582_v24  ;;  %v6534_v24 = vld [vmem:[#allocation2 + $0xf8] sm:$0xf]  ;;  %v6728_v58 = vld [vmem:[#allocation2 + $0x100] sm:$0xf0] }
 0x58a   : > { %6681 = vmatmul.msk.bf16.gmra.mxu2 %vm4521_vm14, %v6475_v10  ;;  %v6535_v21 = vor.u32 %v6728_v58, %v6534_v24  ;;  %v4603_v29 = vpop.f32.mrf.mxu0  ;;  %v4692_v47 = vpop.f32.mrf.mxu1 }
 0x592   : > { %v4605_v19 = vpop.f32.mrf.mxu0  ;;  %v4694_v50 = vpop.f32.mrf.mxu1 }
 0x593   : > { %6690 = vmatmul.msk.bf16.gmra.mxu3 %vm4521_vm14, %v6583_v18  ;;  %v4680_v18 = vadd.f32 %v4679_v49, %v4591_v28  ;;  %v4685_v49 = vadd.f32 %v4684_v45, %v4596_v36 }
 0x59a   : > { %6682 = vmatmul.msk.bf16.gmra.mxu2 %vm4521_vm14, %v6487_v52  ;;  %v4697_v30 = vpop.f32.mrf.mxu1 }
 0x5a3   : > { %6691 = vmatmul.msk.bf16.gmra.mxu3 %vm4521_vm14, %v6595_v15 }
 0x5aa   : > { %6683 = vmatmul.msk.bf16.gmra.mxu2 %vm4521_vm14, %v6499_v34 }
 0x5ba   : > { %6684 = vmatmul.msk.bf16.gmra.mxu2 %vm4521_vm14, %v6511_v13 }
 0x5bd   : > { %v4761_v59 = vpop.f32.mrf.mxu2 }
 0x5be   : > { %v4762_v63 = vadd.f32 %v4761_v59, %v4673_v31  ;;  %v6547_v31 = vor.u32 %v6731_v62, %v6546_v57  ;;  %v4599_v59 = vadd.f32 %v9335_v32, %v9346_v17 }
 0x5c0   : > { %v4846_v48 = vmul.f32 %v9342_v0, %v4762_v63  ;;  %v4608_v63 = vpop.f32.mrf.mxu0 }
 0x5c2   : > { %6823 = vtanh.f32 %v4846_v48  ;;  %v4688_v48 = vadd.f32 %v9348_v55, %v4599_v59  ;;  %v6558_v55 = vld [vmem:[#allocation2 + $0x128] sm:$0xf] }
 0x5c5   : > { %v4763_v33 = vpop.f32.mrf.mxu2 }
 0x5c6   : > { %v4764_v35 = vadd.f32 %v4763_v33, %v4675_v11 }
 0x5c8   : > { %v6824_v60 = vpop.eup %6823  ;;  %v4847_v1 = vmul.f32 %v9342_v0, %v4764_v35  ;;  %v4601_v35 = vadd.f32 %v9335_v32, %v4600_v23  ;;  %v4610_v12 = vpop.f32.mrf.mxu0 }
 0x5c9   : > { %v4910_v40 = vmul.f32 %v6824_v60, %v9342_v0 }
 0x5ca   : > { %6825 = vtanh.f32 %v4847_v1  ;;  %6685 = vmatmul.msk.bf16.gmra.mxu2 %vm4521_vm14, %v6523_v4  ;;  %v4690_v60 = vadd.f32 %v4689_v3, %v4601_v35 }
 0x5cb   : > { %v9360_v2 = vadd.f32 %v9353_v5, %v4910_v40  ;;  %v6734_v40 = vld [vmem:[#allocation2 + $0x130] sm:$0xf0] }
 0x5cd   : > { %5201 = vrot.lane.b32.xlu2 %v9360_v2, %s6976_s9  ;;  %v4766_v16 = vpop.f32.mrf.mxu2 }
 0x5ce   : > { %v4767_v37 = vadd.f32 %v4766_v16, %v4678_v9 }
 0x5d0   : > { %v6826_v10 = vpop.eup %6825  ;;  %v4848_v20 = vmul.f32 %v9342_v0, %v4767_v37 }
 0x5d1   : > { %v4911_v42 = vmul.f32 %v6826_v10, %v9342_v0  ;;  %v6559_v10 = vor.u32 %v6734_v40, %v6558_v55 }
 0x5d2   : > { %6827 = vtanh.f32 %v4848_v20  ;;  %v4699_v20 = vpop.f32.mrf.mxu1 }
 0x5d3   : > { %v9368_v54 = vadd.f32 %v9353_v5, %v4911_v42  ;;  %v4604_v42 = vadd.f32 %v9335_v32, %v4603_v29 }
 0x5d5   : > { %5203 = vrot.lane.b32.xlu0 %v9368_v54, %s6976_s9  ;;  %v4768_v26 = vpop.f32.mrf.mxu2  ;;  %v4693_v28 = vadd.f32 %v4692_v47, %v4604_v42 }
 0x5d6   : > { %v4769_v39 = vadd.f32 %v4768_v26, %v4680_v18  ;;  %v4613_v26 = vpop.f32.mrf.mxu0 }
 0x5d8   : > { %v6828_v46 = vpop.eup %6827  ;;  %v4849_v56 = vmul.f32 %v9342_v0, %v4769_v39 }
 0x5d9   : > { %v4912_v52 = vmul.f32 %v6828_v46, %v9342_v0  ;;  %v4606_v46 = vadd.f32 %v9335_v32, %v4605_v19 }
 0x5da   : > { %6829 = vtanh.f32 %v4849_v56  ;;  %6686 = vmatmul.msk.bf16.gmra.mxu2 %vm4521_vm14, %v6535_v21  ;;  %v4702_v29 = vpop.f32.mrf.mxu1 }
 0x5db   : > { %v9377_v27 = vadd.f32 %v9353_v5, %v4912_v52  ;;  %v4695_v52 = vadd.f32 %v4694_v50, %v4606_v46 }
 0x5dd   : > { %5205 = vrot.lane.b32.xlu1 %v9377_v27, %s6976_s9  ;;  %v4771_v44 = vpop.f32.mrf.mxu2 }
 0x5de   : > { %v4772_v15 = vadd.f32 %v4771_v44, %v4683_v61 }
 0x5e0   : > { %v6830_v14 = vpop.eup %6829  ;;  %v4850_v8 = vmul.f32 %v9342_v0, %v4772_v15 }
 0x5e1   : > { %v4913_v38 = vmul.f32 %v6830_v14, %v9342_v0  ;;  %v4609_v14 = vadd.f32 %v9335_v32, %v4608_v63 }
 0x5e2   : > { %6831 = vtanh.f32 %v4850_v8  ;;  %v4615_v8 = vpop.f32.mrf.mxu0  ;;  %v4704_v19 = vpop.f32.mrf.mxu1 }
 0x5e3   : > { %v9385_v34 = vadd.f32 %v9353_v5, %v4913_v38  ;;  %v4698_v36 = vadd.f32 %v4697_v30, %v4609_v14  ;;  %v4614_v30 = vadd.f32 %v9335_v32, %v4613_v26 }
 0x5e5   : > { %5207 = vrot.lane.b32.xlu2 %v9385_v34, %s6976_s9  ;;  %v4773_v25 = vpop.f32.mrf.mxu2 }
 0x5e6   : > { %v4774_v53 = vadd.f32 %v4773_v25, %v4685_v49 }
 0x5e8   : > { %v6832_v13 = vpop.eup %6831  ;;  %v4851_v43 = vmul.f32 %v9342_v0, %v4774_v53  ;;  %v4611_v53 = vadd.f32 %v9335_v32, %v4610_v12 }
 0x5e9   : > { %v4914_v41 = vmul.f32 %v6832_v13, %v9342_v0 }
 0x5ea   : > { %6833 = vtanh.f32 %v4851_v43  ;;  %6687 = vmatmul.msk.bf16.gmra.mxu2 %vm4521_vm14, %v6547_v31  ;;  %v4618_v43 = vpop.f32.mrf.mxu0  ;;  %v4700_v31 = vadd.f32 %v4699_v20, %v4611_v53  ;;  %v4707_v63 = vpop.f32.mrf.mxu1 }
 0x5eb   : > { %v9395_v45 = vadd.f32 %v9353_v5, %v4914_v41  ;;  %v4619_v26 = vadd.f32 %v9335_v32, %v4618_v43 }
 0x5ed   : > { %v4776_v6 = vpop.f32.mrf.mxu2  ;;  %5209 = vrot.lane.b32.xlu0 %v9395_v45, %s6976_s9  ;;  %v4708_v46 = vadd.f32 %v4707_v63, %v4619_v26 }
 0x5ee   : > { %v4777_v51 = vadd.f32 %v4776_v6, %v4688_v48 }
 0x5f0   : > { %v6834_v11 = vpop.eup %6833  ;;  %v4852_v33 = vmul.f32 %v9342_v0, %v4777_v51 }
 0x5f1   : > { %v4915_v17 = vmul.f32 %v6834_v11, %v9342_v0 }
 0x5f2   : > { %6835 = vtanh.f32 %v4852_v33  ;;  %v4703_v33 = vadd.f32 %v4702_v29, %v4614_v30  ;;  %v4620_v35 = vpop.f32.mrf.mxu0  ;;  %v4709_v12 = vpop.f32.mrf.mxu1 }
 0x5f3   : > { %v9404_v4 = vadd.f32 %v9353_v5, %v4915_v17 }
 0x5f5   : > { %v4778_v1 = vpop.f32.mrf.mxu2  ;;  %5211 = vrot.lane.b32.xlu1 %v9404_v4, %s6976_s9 }
 0x5f6   : > { %v4779_v9 = vadd.f32 %v4778_v1, %v4690_v60  ;;  %v9449_v1 = vpop.f32.mrf.mxu3 }
 0x5f8   : > { %v6836_v16 = vpop.eup %6835  ;;  %v4853_v37 = vmul.f32 %v9342_v0, %v4779_v9 }
 0x5f9   : > { %v4916_v23 = vmul.f32 %v6836_v16, %v9342_v0  ;;  %v4616_v16 = vadd.f32 %v9335_v32, %v4615_v8 }
 0x5fa   : > { %6837 = vtanh.f32 %v4853_v37  ;;  %6688 = vmatmul.msk.bf16.gmra.mxu2 %vm4521_vm14, %v6559_v10 }
 0x5fb   : > { %v9413_v3 = vadd.f32 %v9353_v5, %v4916_v23  ;;  %v4705_v10 = vadd.f32 %v4704_v19, %v4616_v16 }
 0x5fd   : > { %5213 = vrot.lane.b32.xlu2 %v9413_v3, %s6976_s9  ;;  %v4781_v24 = vpop.f32.mrf.mxu2 }
 0x5fe   : > { %v4782_v58 = vadd.f32 %v4781_v24, %v4693_v28  ;;  %v4623_v28 = vpop.f32.mrf.mxu0 }
 0x600   : > { %v6838_v18 = vpop.eup %6837  ;;  %v4854_v39 = vmul.f32 %v9342_v0, %v4782_v58  ;;  %v9460_v58 = vpop.f32.mrf.mxu3 }
 0x601   : > { %v4917_v21 = vmul.f32 %v6838_v18, %v9342_v0 }
 0x602   : > { %6839 = vtanh.f32 %v4854_v39  ;;  %v4712_v39 = vpop.f32.mrf.mxu1 }
 0x603   : > { %v9421_v56 = vadd.f32 %v9353_v5, %v4917_v21 }
 0x605   : > { %5215 = vrot.lane.b32.xlu0 %v9421_v56, %s6976_s9  ;;  %v4783_v22 = vpop.f32.mrf.mxu2 }
 0x606   : > { %v4784_v47 = vadd.f32 %v4783_v22, %v4695_v52 }
 0x608   : > { %v6840_v61 = vpop.eup %6839  ;;  %v4855_v44 = vmul.f32 %v9342_v0, %v4784_v47  ;;  %v9472_v14 = vpop.f32.mrf.mxu3 }
 0x609   : > { %v4918_v15 = vmul.f32 %v6840_v61, %v9342_v0 }
 0x60a   : > { %6841 = vtanh.f32 %v4855_v44  ;;  %v4621_v44 = vadd.f32 %v9335_v32, %v4620_v35  ;;  %v4714_v19 = vpop.f32.mrf.mxu1 }
 0x60b   : > { %v9429_v38 = vadd.f32 %v9353_v5, %v4918_v15  ;;  %v4625_v15 = vpop.f32.mrf.mxu0 }
 0x60d   : > { %5217 = vrot.lane.b32.xlu1 %v9429_v38, %s6976_s9  ;;  %v4786_v49 = vpop.f32.mrf.mxu2 }
 0x60e   : > { %v4787_v50 = vadd.f32 %v4786_v49, %v4698_v36  ;;  %v4710_v36 = vadd.f32 %v4709_v12, %v4621_v44  ;;  %v4626_v12 = vadd.f32 %v9335_v32, %v4625_v15 }
 0x610   : > { %v6842_v25 = vpop.eup %6841  ;;  %v4856_v57 = vmul.f32 %v9342_v0, %v4787_v50  ;;  %v4715_v16 = vadd.f32 %v4714_v19, %v4626_v12 }
 0x611   : > { %v4919_v62 = vmul.f32 %v6842_v25, %v9342_v0  ;;  %v9479_v25 = vpop.permute.xlu2 %5045 }
 0x612   : > { %6843 = vtanh.f32 %v4856_v57  ;;  %v4717_v30 = vpop.f32.mrf.mxu1 }
 0x613   : > { %v9437_v13 = vadd.f32 %v9353_v5, %v4919_v62  ;;  %v9481_v62 = vpop.permute.xlu0 %5041 }
 0x615   : > { %5219 = vrot.lane.b32.xlu2 %v9437_v13, %s6976_s9  ;;  %v4788_v41 = vpop.f32.mrf.mxu2 }
 0x616   : > { %v4789_v59 = vadd.f32 %v4788_v41, %v4700_v31  ;;  %v4624_v31 = vadd.f32 %v9335_v32, %v4623_v28 }
 0x618   : > { %v6844_v48 = vpop.eup %6843  ;;  %v4857_v6 = vmul.f32 %v9342_v0, %v4789_v59  ;;  %v4628_v59 = vpop.f32.mrf.mxu0  ;;  %v4713_v63 = vadd.f32 %v4712_v39, %v4624_v31 }
 0x619   : > { %v4920_v51 = vmul.f32 %v6844_v48, %v9342_v0  ;;  %v9489_v48 = vpop.f32.mrf.mxu3 }
 0x61a   : > { %6845 = vtanh.f32 %v4857_v6  ;;  %v4719_v26 = vpop.f32.mrf.mxu1 }
 0x61b   : > { %v9445_v11 = vadd.f32 %v9353_v5, %v4920_v51  ;;  %v9495_v35 = vpop.permute.xlu0 %5047 }
 0x61d   : > { %v4791_v17 = vpop.f32.mrf.mxu2  ;;  %5221 = vrot.lane.b32.xlu0 %v9445_v11, %s6976_s9 }
 0x61e   : > { %v4792_v60 = vadd.f32 %v4791_v17, %v4703_v33  ;;  %v9493_v17 = vpop.permute.xlu1 %5043 }
 0x620   : > { %v6846_v55 = vpop.eup %6845  ;;  %v4858_v40 = vmul.f32 %v9342_v0, %v4792_v60 }
 0x621   : > { %v4921_v9 = vmul.f32 %v6846_v55, %v9342_v0  ;;  %v9498_v55 = vpop.permute.xlu2 %5051 }
 0x622   : > { %6847 = vtanh.f32 %v4858_v40 }
 0x623   : > { %v9455_v37 = vadd.f32 %v9353_v5, %v4921_v9 }
 0x625   : > { %v4793_v20 = vpop.f32.mrf.mxu2  ;;  %5223 = vrot.lane.b32.xlu1 %v9455_v37, %s6976_s9 }
 0x626   : > { %v4794_v23 = vadd.f32 %v4793_v20, %v4705_v10 }
 0x628   : > { %v6848_v42 = vpop.eup %6847  ;;  %v4859_v24 = vmul.f32 %v9342_v0, %v4794_v23  ;;  %v4630_v23 = vpop.f32.mrf.mxu0 }
 0x629   : > { %v4922_v18 = vmul.f32 %v6848_v42, %v9342_v0  ;;  %v9507_v42 = vpop.f32.mrf.mxu3 }
 0x62a   : > { %6849 = vtanh.f32 %v4859_v24  ;;  %v9509_v24 = vpop.permute.xlu1 %5049 }
 0x62b   : > { %v9465_v21 = vadd.f32 %v9353_v5, %v4922_v18 }
 0x62d   : > { %5225 = vrot.lane.b32.xlu2 %v9465_v21, %s6976_s9  ;;  %v4796_v29 = vpop.f32.mrf.mxu2 }
 0x62e   : > { %v4797_v52 = vadd.f32 %v4796_v29, %v4708_v46  ;;  %v4629_v46 = vadd.f32 %v9335_v32, %v4628_v59  ;;  %v9514_v29 = vpop.permute.xlu0 %5053 }
 0x630   : > { %v6850_v22 = vpop.eup %6849  ;;  %v4860_v47 = vmul.f32 %v9342_v0, %v4797_v52  ;;  %v9516_v52 = vpop.permute.xlu2 %5057 }
 0x631   : > { %v4923_v61 = vmul.f32 %v6850_v22, %v9342_v0  ;;  %v4633_v19 = vpop.f32.mrf.mxu0 }
 0x632   : > { %6851 = vtanh.f32 %v4860_v47  ;;  %v4718_v47 = vadd.f32 %v4717_v30, %v4629_v46 }
 0x633   : > { %v9475_v8 = vadd.f32 %v9353_v5, %v4923_v61 }
 0x635   : > { %5227 = vrot.lane.b32.xlu0 %v9475_v8, %s6976_s9  ;;  %v4798_v49 = vpop.f32.mrf.mxu2 }
 0x636   : > { %v4799_v50 = vadd.f32 %v4798_v49, %v4710_v36  ;;  %v9524_v49 = vpop.f32.mrf.mxu3 }
 0x638   : > { %v6852_v57 = vpop.eup %6851  ;;  %v4861_v53 = vmul.f32 %v9342_v0, %v4799_v50 }
 0x639   : > { %v4924_v43 = vmul.f32 %v6852_v57, %v9342_v0  ;;  %v4631_v57 = vadd.f32 %v9335_v32, %v4630_v23 }
 0x63a   : > { %6853 = vtanh.f32 %v4861_v53  ;;  %v9528_v53 = vpop.permute.xlu1 %5055 }
 0x63b   : > { %v9487_v41 = vadd.f32 %v9353_v5, %v4924_v43  ;;  %v4722_v43 = vpop.f32.mrf.mxu1  ;;  %v4720_v59 = vadd.f32 %v4719_v26, %v4631_v57 }
 0x63d   : > { %5229 = vrot.lane.b32.xlu1 %v9487_v41, %s6976_s9  ;;  %v4801_v6 = vpop.f32.mrf.mxu2 }
 0x63e   : > { %v4802_v51 = vadd.f32 %v4801_v6, %v4713_v63  ;;  %v9533_v63 = vpop.permute.xlu0 %5059  ;;  %v9535_v6 = vpop.permute.xlu2 %5063 }
 0x63f   : > { %10197 = vst [vmem:[#allocation10_spill] sm:$0xff] %v9535_v6 }
 0x640   : > { %v6854_v33 = vpop.eup %6853  ;;  %v4862_v60 = vmul.f32 %v9342_v0, %v4802_v51 }
 0x641   : > { %v4925_v40 = vmul.f32 %v6854_v33, %v9342_v0 }
 0x642   : > { %6855 = vtanh.f32 %v4862_v60 }
 0x643   : > { %v9503_v9 = vadd.f32 %v9353_v5, %v4925_v40  ;;  %v4826_v40 = vpop.f32.mrf.mxu3 }
 0x645   : > { %5231 = vrot.lane.b32.xlu2 %v9503_v9, %s6976_s9  ;;  %v4803_v10 = vpop.f32.mrf.mxu2 }
 0x646   : > { %v4804_v20 = vadd.f32 %v4803_v10, %v4715_v16  ;;  %v4634_v16 = vadd.f32 %v9335_v32, %v4633_v19  ;;  %v4635_v10 = vpop.f32.mrf.mxu0 }
 0x648   : > { %v6856_v28 = vpop.eup %6855  ;;  %v4863_v18 = vmul.f32 %v9342_v0, %v4804_v20  ;;  %v4723_v23 = vadd.f32 %v4722_v43, %v4634_v16 }
 0x649   : > { %v4926_v39 = vmul.f32 %v6856_v28, %v9342_v0  ;;  %v9545_v28 = vpop.permute.xlu1 %5061 }
 0x64a   : > { %6857 = vtanh.f32 %v4863_v18  ;;  %v4724_v18 = vpop.f32.mrf.mxu1 }
 0x64b   : > { %v9519_v22 = vadd.f32 %v9353_v5, %v4926_v39  ;;  %v9549_v39 = vpop.permute.xlu0 %5065  ;;  %v4828_v19 = vpop.f32.mrf.mxu3 }
 0x64d   : > { %v4806_v61 = vpop.f32.mrf.mxu2  ;;  %5233 = vrot.lane.b32.xlu0 %v9519_v22, %s6976_s9 }
 0x64e   : > { %v4807_v44 = vadd.f32 %v4806_v61, %v4718_v47  ;;  %v9551_v47 = vpop.permute.xlu2 %5069  ;;  %v4638_v43 = vpop.f32.mrf.mxu0 }
 0x64f   : > { %10198 = vst [vmem:[#allocation11_spill] sm:$0xff] %v9551_v47 }
 0x650   : > { %v6858_v15 = vpop.eup %6857  ;;  %v4864_v36 = vmul.f32 %v9342_v0, %v4807_v44 }
 0x651   : > { %v4927_v50 = vmul.f32 %v6858_v15, %v9342_v0 }
 0x652   : > { %6859 = vtanh.f32 %v4864_v36  ;;  %v4636_v36 = vadd.f32 %v9335_v32, %v4635_v10 }
 0x653   : > { %v9531_v31 = vadd.f32 %v9353_v5, %v4927_v50 }
 0x654   : > { %v4725_v57 = vadd.f32 %v4724_v18, %v4636_v36  ;;  %v4639_v18 = vadd.f32 %v9335_v32, %v4638_v43 }
 0x655   : > { %v4808_v51 = vpop.f32.mrf.mxu2  ;;  %5235 = vrot.lane.b32.xlu1 %v9531_v31, %s6976_s9 }
 0x656   : > { %v4809_v30 = vadd.f32 %v4808_v51, %v4720_v59  ;;  %v9561_v51 = vpop.permute.xlu1 %5067  ;;  %v9566_v10 = vpop.permute.xlu2 %5075 }
 0x657   : > { %10200 = vst [vmem:[#allocation13_spill] sm:$0xff] %v9566_v10  ;;  %v4640_v36 = vpop.f32.mrf.mxu0 }
 0x658   : > { %v6860_v33 = vpop.eup %6859  ;;  %v4865_v60 = vmul.f32 %v9342_v0, %v4809_v30 }
 0x659   : > { %v4928_v12 = vmul.f32 %v6860_v33, %v9342_v0  ;;  %v4727_v33 = vpop.f32.mrf.mxu1 }
 0x65a   : > { %6861 = vtanh.f32 %v4865_v60 }
 0x65b   : > { %v9543_v20 = vadd.f32 %v9353_v5, %v4928_v12  ;;  %v9563_v12 = vpop.permute.xlu0 %5071 }
 0x65c   : > { %10199 = vst [vmem:[#allocation12_spill] sm:$0xff] %v9563_v12 }
 0x65d   : > { %5237 = vrot.lane.b32.xlu2 %v9543_v20, %s6976_s9  ;;  %v4811_v26 = vpop.f32.mrf.mxu2 }
 0x65e   : > { %v4812_v46 = vadd.f32 %v4811_v26, %v4723_v23 }
 0x660   : > { %v6862_v61 = vpop.eup %6861  ;;  %v4866_v44 = vmul.f32 %v9342_v0, %v4812_v46  ;;  %v4728_v46 = vadd.f32 %v4727_v33, %v4639_v18  ;;  %v4641_v33 = vadd.f32 %v9335_v32, %v4640_v36  ;;  %v9584_v18 = vpop.permute.xlu2 %5081 }
 0x661   : > { %v4929_v15 = vmul.f32 %v6862_v61, %v9342_v0  ;;  %v4831_v61 = vpop.f32.mrf.mxu3  ;;  %10202 = vst [vmem:[#allocation15_spill] sm:$0xff] %v9584_v18 }
 0x662   : > { %6863 = vtanh.f32 %v4866_v44 }
 0x663   : > { %v9557_v50 = vadd.f32 %v9353_v5, %v4929_v15 }
 0x665   : > { %5239 = vrot.lane.b32.xlu0 %v9557_v50, %s6976_s9  ;;  %v4813_v59 = vpop.f32.mrf.mxu2 }
 0x666   : > { %v4814_v30 = vadd.f32 %v4813_v59, %v4725_v57  ;;  %v9575_v59 = vpop.permute.xlu1 %5073 }
 0x668   : > { %v6864_v60 = vpop.eup %6863  ;;  %v4867_v16 = vmul.f32 %v9342_v0, %v4814_v30 }
 0x669   : > { %v4930_v23 = vmul.f32 %v6864_v60, %v9342_v0  ;;  %v4729_v60 = vpop.f32.mrf.mxu1 }
 0x66a   : > { %6865 = vtanh.f32 %v4867_v16  ;;  %v4649_v16 = vadd.f32 %v9335_v32, %v8319_v7  ;;  %v4730_v10 = vadd.f32 %v4729_v60, %v4641_v33  ;;  %v4833_v7 = vpop.f32.mrf.mxu3 }
 0x66b   : > { %v9571_v26 = vadd.f32 %v9353_v5, %v4930_v23  ;;  %v9582_v23 = vpop.permute.xlu0 %5077 }
 0x66c   : > { %10201 = vst [vmem:[#allocation14_spill] sm:$0xff] %v9582_v23  ;;  %v10203_v23 = vld [vmem:[#allocation3_spill] sm:$0xff] }
 0x66d   : > { %5241 = vrot.lane.b32.xlu1 %v9571_v26, %s6976_s9  ;;  %v4816_v44 = vpop.f32.mrf.mxu2  ;;  %v4651_v18 = vadd.f32 %v9335_v32, %v10203_v23 }
 0x66e   : > { %v4817_v15 = vadd.f32 %v4816_v44, %v4728_v46  ;;  %v4738_v44 = vadd.f32 %v9449_v1, %v4649_v16  ;;  %v9597_v6 = vpop.permute.xlu1 %5079  ;;  %v10204_v1 = vld [vmem:[#allocation5_spill] sm:$0xff] }
 0x66f   : > { %v4656_v60 = vadd.f32 %v9335_v32, %v10204_v1  ;;  %v10208_v1 = vld [vmem:[#allocation4_spill] sm:$0xff] }
 0x670   : > { %v6866_v57 = vpop.eup %6865  ;;  %v4868_v30 = vmul.f32 %v9342_v0, %v4817_v15 }
 0x671   : > { %v4931_v43 = vmul.f32 %v6866_v57, %v9342_v0  ;;  %v4827_v57 = vadd.f32 %v4826_v40, %v4738_v44  ;;  %v10207_v44 = vld [vmem:[#allocation8_spill] sm:$0xff] }
 0x672   : > { %6867 = vtanh.f32 %v4868_v30 }
 0x673   : > { %v9587_v46 = vadd.f32 %v9353_v5, %v4931_v43  ;;  %v4872_v43 = vmul.f32 %v9342_v0, %v4827_v57  ;;  %v9605_v16 = vpop.permute.xlu0 %5083 }
 0x674   : > { %10205 = vst [vmem:[#allocation3_spill] sm:$0xff] %v9605_v16 }
 0x675   : > { %5243 = vrot.lane.b32.xlu2 %v9587_v46, %s6976_s9  ;;  %v4818_v15 = vpop.f32.mrf.mxu2 }
 0x676   : > { %v4819_v47 = vadd.f32 %v4818_v15, %v4730_v10  ;;  %v4740_v10 = vadd.f32 %v9460_v58, %v4651_v18  ;;  %v4654_v58 = vadd.f32 %v9335_v32, %v10208_v1  ;;  %v4836_v18 = vpop.f32.mrf.mxu3 }
 0x678   : > { %v6868_v12 = vpop.eup %6867  ;;  %v4869_v36 = vmul.f32 %v9342_v0, %v4819_v47  ;;  %v4745_v47 = vadd.f32 %v9489_v48, %v4656_v60  ;;  %v4829_v23 = vadd.f32 %v4828_v19, %v4740_v10  ;;  %v10209_v60 = vld [vmem:[#allocation6_spill] sm:$0xff]  ;;  %v4743_v19 = vadd.f32 %v9472_v14, %v4654_v58  ;;  %v10210_v14 = vld [vmem:[#allocation9_spill] sm:$0xff] }
 0x679   : > { %v4932_v30 = vmul.f32 %v6868_v12, %v9342_v0  ;;  %v9608_v12 = vpop.permute.xlu2 %5087 }
 0x67a   : > { %6869 = vtanh.f32 %v4869_v36  ;;  %10206 = vst [vmem:[#allocation5_spill] sm:$0xff] %v9608_v12  ;;  %v4834_v57 = vadd.f32 %v4833_v7, %v4745_v47  ;;  %v4659_v12 = vadd.f32 %v9335_v32, %v10209_v60  ;;  %v4873_v16 = vmul.f32 %v9342_v0, %v4829_v23 }
 0x67b   : > { %v9602_v40 = vadd.f32 %v9353_v5, %v4932_v30  ;;  %6871 = vtanh.f32 %v4872_v43  ;;  %v9630_v23 = vpop.permute.xlu0 %5089 }
 0x67c   : > { %v4875_v43 = vmul.f32 %v9342_v0, %v4834_v57  ;;  %v4748_v47 = vadd.f32 %v9507_v42, %v4659_v12 }
 0x67d   : > { %v4821_v33 = vpop.f32.mrf.mxu2  ;;  %5245 = vrot.lane.b32.xlu0 %v9602_v40, %s6976_s9 }
 0x67e   : > { %v4822_v15 = vadd.f32 %v4821_v33, %v10207_v44  ;;  %v9626_v33 = vpop.permute.xlu1 %5085  ;;  %v4832_v44 = vadd.f32 %v4831_v61, %v4743_v19  ;;  %v4838_v19 = vpop.f32.mrf.mxu3 }
 0x680   : > { %v6870_v36 = vpop.eup %6869  ;;  %v4870_v30 = vmul.f32 %v9342_v0, %v4822_v15  ;;  %v4874_v61 = vmul.f32 %v9342_v0, %v4832_v44 }
 0x681   : > { %v4933_v48 = vmul.f32 %v6870_v36, %v9342_v0  ;;  %v6872_v10 = vpop.eup %6871  ;;  %v4837_v36 = vadd.f32 %v4836_v18, %v4748_v47  ;;  %v9634_v1 = vpop.permute.xlu2 %5093 }
 0x682   : > { %6873 = vtanh.f32 %v4870_v30  ;;  %v4936_v57 = vmul.f32 %v6872_v10, %v9342_v0  ;;  %10211 = vst [vmem:[#allocation8_spill] sm:$0xff] %v9634_v1 }
 0x683   : > { %v9623_v7 = vadd.f32 %v9353_v5, %v4933_v48  ;;  %6875 = vtanh.f32 %v4873_v16  ;;  %v10212_v48 = vld [vmem:[#allocation7_spill] sm:$0xff]  ;;  %v4876_v60 = vmul.f32 %v9342_v0, %v4837_v36 }
 0x684   : > { %6877 = vtanh.f32 %v4875_v43  ;;  %v4661_v16 = vadd.f32 %v9335_v32, %v10212_v48  ;;  %v9643_v18 = vadd.f32 %v9353_v5, %v4936_v57  ;;  %v9658_v57 = vpop.permute.xlu0 %5095 }
 0x685   : > { %v4823_v15 = vpop.f32.mrf.mxu2  ;;  %5247 = vrot.lane.b32.xlu1 %v9623_v7, %s6976_s9 }
 0x686   : > { %v4824_v30 = vadd.f32 %v4823_v15, %v10210_v14  ;;  %v4750_v47 = vadd.f32 %v9524_v49, %v4661_v16  ;;  %v9653_v32 = vpop.permute.xlu1 %5091 }
 0x688   : > { %v6874_v58 = vpop.eup %6873  ;;  %v4871_v42 = vmul.f32 %v9342_v0, %v4824_v30  ;;  %v4839_v44 = vadd.f32 %v4838_v19, %v4750_v47 }
 0x689   : > { %v4934_v12 = vmul.f32 %v6874_v58, %v9342_v0  ;;  %v6876_v43 = vpop.eup %6875  ;;  %v9656_v14 = vpop.permute.xlu2 %5099 }
 0x68a   : > { %6879 = vtanh.f32 %v4871_v42  ;;  %v6878_v15 = vpop.eup %6877  ;;  %v4937_v36 = vmul.f32 %v6876_v43, %v9342_v0  ;;  %10213 = vst [vmem:[#allocation4_spill] sm:$0xff] %v9656_v14  ;;  %v4877_v42 = vmul.f32 %v9342_v0, %v4839_v44 }
 0x68b   : > { %v9646_v10 = vadd.f32 %v9353_v5, %v4934_v12  ;;  %6881 = vtanh.f32 %v4874_v61  ;;  %v4939_v49 = vmul.f32 %v6878_v15, %v9342_v0 }
 0x68c   : > { %6883 = vtanh.f32 %v4876_v60  ;;  %v9664_v12 = vadd.f32 %v9353_v5, %v4937_v36  ;;  %v9682_v15 = vpop.permute.xlu0 %5101 }
 0x68d   : > { %5249 = vrot.lane.b32.xlu2 %v9646_v10, %s6976_s9  ;;  %5253 = vrot.lane.b32.xlu1 %v9643_v18, %s6976_s9  ;;  %v9670_v60 = vadd.f32 %v9353_v5, %v4939_v49  ;;  %6885 = vtanh.f32 %v4877_v42  ;;  %10214 = vst [vmem:[#allocation6_spill] sm:$0xff] %v9682_v15 }
 0x68e   : > { %v9680_v47 = vpop.permute.xlu1 %5097 }
 0x690   : > { %v6880_v30 = vpop.eup %6879 }
 0x691   : > { %v4935_v58 = vmul.f32 %v6880_v30, %v9342_v0  ;;  %v6882_v61 = vpop.eup %6881  ;;  %v5202_v44 = vpop.permute.xlu2 %5201 }
 0x692   : > { %v6884_v16 = vpop.eup %6883  ;;  %v4938_v19 = vmul.f32 %v6882_v61, %v9342_v0 }
 0x693   : > { %v9667_v48 = vadd.f32 %v9353_v5, %v4935_v58  ;;  %v4940_v43 = vmul.f32 %v6884_v16, %v9342_v0  ;;  %v6886_v49 = vpop.eup %6885  ;;  %v5297_v58 = vmul.f32 %v5202_v44, %v9360_v2 }
 0x694   : > { %v9685_v36 = vadd.f32 %v9353_v5, %v4938_v19  ;;  %v4941_v42 = vmul.f32 %v6886_v49, %v9342_v0  ;;  %v5204_v16 = vpop.permute.xlu0 %5203 }
 0x695   : > { %5251 = vrot.lane.b32.xlu0 %v9667_v48, %s6976_s9  ;;  %5255 = vrot.lane.b32.xlu2 %v9664_v12, %s6976_s9  ;;  %v9688_v30 = vadd.f32 %v9353_v5, %v4940_v43  ;;  %v5298_v14 = vmul.f32 %v5204_v16, %v9368_v54 }
 0x696   : > { %5259 = vrot.lane.b32.xlu1 %v9670_v60, %s6976_s9  ;;  %v9697_v61 = vpop.permute.xlu1 %5103  ;;  %v9700_v43 = vadd.f32 %v9353_v5, %v4941_v42 }
 0x697   : > { %10215 = vst [vmem:[#allocation9_spill] sm:$0xff] %v9697_v61 }
 0x699   : > { %v5208_v19 = vpop.permute.xlu2 %5207 }
 0x69a   : > { %v5300_v44 = vmul.f32 %v5208_v19, %v9385_v34 }
 0x69c   : > { %v5210_v0 = vpop.permute.xlu0 %5209 }
 0x69d   : > { %5261 = vrot.lane.b32.xlu2 %v9688_v30, %s6976_s9  ;;  %5257 = vrot.lane.b32.xlu0 %v9685_v36, %s6976_s9  ;;  %v5301_v61 = vmul.f32 %v5210_v0, %v9395_v45 }
 0x69e   : > { %5361 = vrot.lane.b32.xlu1 %v5297_v58, %s6976_s9  ;;  %v5206_v58 = vpop.permute.xlu1 %5205 }
 0x69f   : > { %v5299_v1 = vmul.f32 %v5206_v58, %v9377_v27 }
 0x6a1   : > { %v5214_v49 = vpop.permute.xlu2 %5213 }
 0x6a2   : > { %v5303_v5 = vmul.f32 %v5214_v49, %v9413_v3 }
 0x6a4   : > { %v5216_v16 = vpop.permute.xlu0 %5215 }
 0x6a5   : > { %5263 = vrot.lane.b32.xlu0 %v9700_v43, %s6976_s9  ;;  %5363 = vrot.lane.b32.xlu2 %v5298_v14, %s6976_s9 }
 0x6a6   : > { %5367 = vrot.lane.b32.xlu1 %v5300_v44, %s6976_s9  ;;  %v5212_v42 = vpop.permute.xlu1 %5211  ;;  %v5304_v44 = vmul.f32 %v5216_v16, %v9421_v56 }
 0x6a7   : > { %v5302_v19 = vmul.f32 %v5212_v42, %v9404_v4 }
 0x6a9   : > { %v5220_v14 = vpop.permute.xlu2 %5219 }
 0x6aa   : > { %v5306_v15 = vmul.f32 %v5220_v14, %v9437_v13 }
 0x6ac   : > { %v5222_v58 = vpop.permute.xlu0 %5221 }
 0x6ad   : > { %5365 = vrot.lane.b32.xlu0 %v5299_v1, %s6976_s9  ;;  %5369 = vrot.lane.b32.xlu2 %v5301_v61, %s6976_s9  ;;  %v5307_v49 = vmul.f32 %v5222_v58, %v9445_v11 }
 0x6ae   : > { %5373 = vrot.lane.b32.xlu1 %v5303_v5, %s6976_s9  ;;  %v5218_v1 = vpop.permute.xlu1 %5217 }
 0x6af   : > { %v5305_v0 = vmul.f32 %v5218_v1, %v9429_v38 }
 0x6b1   : > { %v5226_v61 = vpop.permute.xlu2 %5225 }
 0x6b2   : > { %v5309_v5 = vmul.f32 %v5226_v61, %v9465_v21 }
 0x6b4   : > { %v5228_v16 = vpop.permute.xlu0 %5227 }
 0x6b5   : > { %5371 = vrot.lane.b32.xlu0 %v5302_v19, %s6976_s9  ;;  %5375 = vrot.lane.b32.xlu2 %v5304_v44, %s6976_s9  ;;  %v5310_v19 = vmul.f32 %v5228_v16, %v9475_v8 }
 0x6b6   : > { %5379 = vrot.lane.b32.xlu1 %v5306_v15, %s6976_s9  ;;  %v5224_v42 = vpop.permute.xlu1 %5223 }
 0x6b7   : > { %v5308_v15 = vmul.f32 %v5224_v42, %v9455_v37 }
 0x6b9   : > { %v5232_v14 = vpop.permute.xlu2 %5231 }
 0x6ba   : > { %v5312_v44 = vmul.f32 %v5232_v14, %v9503_v9 }
 0x6bd   : > { %5377 = vrot.lane.b32.xlu0 %v5305_v0, %s6976_s9  ;;  %5381 = vrot.lane.b32.xlu2 %v5307_v49, %s6976_s9 }
 0x6be   : > { %5385 = vrot.lane.b32.xlu1 %v5309_v5, %s6976_s9  ;;  %v5230_v1 = vpop.permute.xlu1 %5229 }
 0x6bf   : > { %v5234_v58 = vpop.permute.xlu0 %5233  ;;  %v5311_v0 = vmul.f32 %v5230_v1, %v9487_v41 }
 0x6c0   : > { %v5313_v49 = vmul.f32 %v5234_v58, %v9519_v22 }
 0x6c1   : > { %v5238_v61 = vpop.permute.xlu2 %5237 }
 0x6c2   : > { %v5315_v5 = vmul.f32 %v5238_v61, %v9543_v20 }
 0x6c5   : > { %5383 = vrot.lane.b32.xlu0 %v5308_v15, %s6976_s9  ;;  %5387 = vrot.lane.b32.xlu2 %v5310_v19, %s6976_s9 }
 0x6c6   : > { %5391 = vrot.lane.b32.xlu1 %v5312_v44, %s6976_s9 }
 0x6c7   : > { %v5236_v42 = vpop.permute.xlu1 %5235 }
 0x6c8   : > { %v5314_v14 = vmul.f32 %v5236_v42, %v9531_v31 }
 0x6cd   : > { %5389 = vrot.lane.b32.xlu0 %v5311_v0, %s6976_s9  ;;  %5393 = vrot.lane.b32.xlu2 %v5313_v49, %s6976_s9 }
 0x6ce   : > { %5397 = vrot.lane.b32.xlu1 %v5315_v5, %s6976_s9 }
 0x6cf   : > { %v5244_v16 = vpop.permute.xlu2 %5243 }
 0x6d0   : > { %v5318_v15 = vmul.f32 %v5244_v16, %v9587_v46 }
 0x6d5   : > { %5395 = vrot.lane.b32.xlu0 %v5314_v14, %s6976_s9 }
 0x6d6   : > { %5403 = vrot.lane.b32.xlu1 %v5318_v15, %s6976_s9 }
 0x6d7   : > { %v5240_v19 = vpop.permute.xlu0 %5239 }
 0x6d8   : > { %v5316_v44 = vmul.f32 %v5240_v19, %v9557_v50 }
 0x6da   : > { %5399 = vrot.lane.b32.xlu2 %v5316_v44, %s6976_s9 }
 0x6df   : > { %v5242_v1 = vpop.permute.xlu1 %5241 }
 0x6e0   : > { %v5317_v58 = vmul.f32 %v5242_v1, %v9571_v26  ;;  %v5138_v1 = vmul.f32 %v9493_v17, %v9368_v54 }
 0x6e2   : > { %5401 = vrot.lane.b32.xlu0 %v5317_v58, %s6976_s9 }
 0x6e7   : > { %v5250_v61 = vpop.permute.xlu2 %5249 }
 0x6e8   : > { %v5321_v0 = vmul.f32 %v5250_v61, %v9646_v10 }
 0x6ea   : > { %5409 = vrot.lane.b32.xlu1 %v5321_v0, %s6976_s9 }
 0x6ef   : > { %v5256_v49 = vpop.permute.xlu2 %5255  ;;  %v5246_v5 = vpop.permute.xlu0 %5245 }
 0x6f0   : > { %v5324_v42 = vmul.f32 %v5256_v49, %v9664_v12  ;;  %v5319_v16 = vmul.f32 %v5246_v5, %v9602_v40  ;;  %v5141_v5 = vmul.f32 %v9509_v24, %v9395_v45  ;;  %v5144_v24 = vmul.f32 %v9528_v53, %v9421_v56 }
 0x6f1   : > { %v5140_v53 = vmul.f32 %v9495_v35, %v9385_v34  ;;  %v5139_v35 = vmul.f32 %v9479_v25, %v9377_v27  ;;  %v5153_v25 = vmul.f32 %v9575_v59, %v9519_v22 }
 0x6f2   : > { %5415 = vrot.lane.b32.xlu1 %v5324_v42, %s6976_s9  ;;  %5405 = vrot.lane.b32.xlu2 %v5319_v16, %s6976_s9 }
 0x6f7   : > { %v5248_v14 = vpop.permute.xlu1 %5247  ;;  %v5262_v15 = vpop.permute.xlu2 %5261 }
 0x6f8   : > { %v5320_v19 = vmul.f32 %v5248_v14, %v9623_v7  ;;  %v5327_v44 = vmul.f32 %v5262_v15, %v9688_v30 }
 0x6fa   : > { %5421 = vrot.lane.b32.xlu1 %v5327_v44, %s6976_s9  ;;  %5407 = vrot.lane.b32.xlu0 %v5320_v19, %s6976_s9 }
 0x6ff   : > { %v5254_v58 = vpop.permute.xlu1 %5253  ;;  %v5364_v61 = vpop.permute.xlu2 %5363 }
 0x700   : > { %v5323_v0 = vmul.f32 %v5254_v58, %v9643_v18  ;;  %v9759_v49 = vadd.f32 %v5364_v61, %v5138_v1  ;;  %v5137_v1 = vmul.f32 %v9481_v62, %v9360_v2  ;;  %v5147_v62 = vmul.f32 %v9545_v28, %v9445_v11 }
 0x701   : > { %v5150_v28 = vmul.f32 %v9561_v51, %v9475_v8  ;;  %v5146_v51 = vmul.f32 %v9533_v63, %v9437_v13  ;;  %v5149_v63 = vmul.f32 %v9549_v39, %v9465_v21 }
 0x702   : > { %6887 = vtanh.f32 %v9759_v49  ;;  %5413 = vrot.lane.b32.xlu0 %v5323_v0, %s6976_s9 }
 0x707   : > { %v5370_v42 = vpop.permute.xlu2 %5369  ;;  %v5252_v16 = vpop.permute.xlu0 %5251 }
 0x708   : > { %v6888_v14 = vpop.eup %6887  ;;  %v5260_v15 = vpop.permute.xlu1 %5259  ;;  %v9765_v19 = vadd.f32 %v5370_v42, %v5141_v5  ;;  %v5322_v17 = vmul.f32 %v5252_v16, %v9667_v48 }
 0x709   : > { %v5326_v44 = vmul.f32 %v5260_v15, %v9670_v60  ;;  %5555 = vrot.lane.b32.xlu1 %v6888_v14, %s6976_s9 }
 0x70a   : > { %6889 = vtanh.f32 %v9765_v19  ;;  %5411 = vrot.lane.b32.xlu2 %v5322_v17, %s6976_s9 }
 0x70b   : > { %5419 = vrot.lane.b32.xlu0 %v5326_v44, %s6976_s9 }
 0x70f   : > { %v5376_v58 = vpop.permute.xlu2 %5375  ;;  %v5258_v61 = vpop.permute.xlu0 %5257 }
 0x710   : > { %v6890_v0 = vpop.eup %6889  ;;  %v5362_v5 = vpop.permute.xlu1 %5361  ;;  %v9777_v42 = vadd.f32 %v5376_v58, %v5144_v24  ;;  %v5325_v16 = vmul.f32 %v5258_v61, %v9685_v36 }
 0x711   : > { %v9780_v14 = vadd.f32 %v5362_v5, %v5137_v1  ;;  %5561 = vrot.lane.b32.xlu1 %v6890_v0, %s6976_s9  ;;  %v5143_v5 = vmul.f32 %v9514_v29, %v9413_v3  ;;  %v5142_v29 = vmul.f32 %v9498_v55, %v9404_v4  ;;  %v5145_v55 = vmul.f32 %v9516_v52, %v9429_v38 }
 0x712   : > { %6891 = vtanh.f32 %v9777_v42  ;;  %5417 = vrot.lane.b32.xlu2 %v5325_v16, %s6976_s9  ;;  %v5156_v52 = vmul.f32 %v9597_v6, %v9557_v50 }
 0x713   : > { %6893 = vtanh.f32 %v9780_v14 }
 0x717   : > { %v5382_v15 = vpop.permute.xlu2 %5381  ;;  %v5264_v17 = vpop.permute.xlu0 %5263 }
 0x718   : > { %v6892_v44 = vpop.eup %6891  ;;  %v5368_v24 = vpop.permute.xlu1 %5367  ;;  %v9790_v1 = vadd.f32 %v5382_v15, %v5147_v62  ;;  %v5328_v58 = vmul.f32 %v5264_v17, %v9700_v43 }
 0x719   : > { %v6894_v61 = vpop.eup %6893  ;;  %v9793_v0 = vadd.f32 %v5368_v24, %v5140_v53  ;;  %5567 = vrot.lane.b32.xlu1 %v6892_v44, %s6976_s9 }
 0x71a   : > { %6895 = vtanh.f32 %v9790_v1  ;;  %5553 = vrot.lane.b32.xlu0 %v6894_v61, %s6976_s9  ;;  %5423 = vrot.lane.b32.xlu2 %v5328_v58, %s6976_s9 }
 0x71b   : > { %6897 = vtanh.f32 %v9793_v0 }
 0x71f   : > { %v5388_v16 = vpop.permute.xlu2 %5387  ;;  %v5366_v62 = vpop.permute.xlu0 %5365 }
 0x720   : > { %v6896_v53 = vpop.eup %6895  ;;  %v5374_v15 = vpop.permute.xlu1 %5373  ;;  %v9806_v17 = vadd.f32 %v5388_v16, %v5150_v28  ;;  %v9808_v44 = vadd.f32 %v5366_v62, %v5139_v35 }
 0x721   : > { %v6898_v24 = vpop.eup %6897  ;;  %v9810_v58 = vadd.f32 %v5374_v15, %v5143_v5  ;;  %5573 = vrot.lane.b32.xlu1 %v6896_v53, %s6976_s9 }
 0x722   : > { %6899 = vtanh.f32 %v9806_v17  ;;  %5559 = vrot.lane.b32.xlu0 %v6898_v24, %s6976_s9 }
 0x723   : > { %6901 = vtanh.f32 %v9810_v58 }
 0x724   : > { %6903 = vtanh.f32 %v9808_v44 }
 0x727   : > { %v5394_v61 = vpop.permute.xlu2 %5393  ;;  %v5372_v35 = vpop.permute.xlu0 %5371 }
 0x728   : > { %v6900_v28 = vpop.eup %6899  ;;  %v5380_v5 = vpop.permute.xlu1 %5379  ;;  %v9823_v16 = vadd.f32 %v5394_v61, %v5153_v25  ;;  %v9825_v62 = vadd.f32 %v5372_v35, %v5142_v29 }
 0x729   : > { %v6902_v53 = vpop.eup %6901  ;;  %v9827_v15 = vadd.f32 %v5380_v5, %v5146_v51  ;;  %5579 = vrot.lane.b32.xlu1 %v6900_v28, %s6976_s9 }
 0x72a   : > { %10216 = vst [vmem:[#allocation7_spill] sm:$0xff] %v9823_v16  ;;  %v6904_v59 = vpop.eup %6903  ;;  %6905 = vtanh.f32 %v9823_v16  ;;  %5565 = vrot.lane.b32.xlu0 %v6902_v53, %s6976_s9  ;;  %v10218_v53 = vld [vmem:[#allocation10_spill] sm:$0xff] }
 0x72b   : > { %6907 = vtanh.f32 %v9827_v15  ;;  %5557 = vrot.lane.b32.xlu2 %v6904_v59, %s6976_s9  ;;  %v5148_v59 = vmul.f32 %v10218_v53, %v9455_v37  ;;  %v10223_v53 = vld [vmem:[#allocation14_spill] sm:$0xff] }
 0x72c   : > { %6909 = vtanh.f32 %v9825_v62 }
 0x72f   : > { %v5378_v24 = vpop.permute.xlu0 %5377 }
 0x730   : > { %v6906_v25 = vpop.eup %6905  ;;  %v5386_v29 = vpop.permute.xlu1 %5385  ;;  %v9839_v51 = vadd.f32 %v5378_v24, %v5145_v55  ;;  %v10219_v55 = vld [vmem:[#allocation12_spill] sm:$0xff] }
 0x731   : > { %v6908_v61 = vpop.eup %6907  ;;  %v9841_v35 = vadd.f32 %v5386_v29, %v5149_v63  ;;  %5585 = vrot.lane.b32.xlu1 %v6906_v25, %s6976_s9  ;;  %v5152_v63 = vmul.f32 %v10219_v55, %v9503_v9 }
 0x732   : > { %v6910_v28 = vpop.eup %6909  ;;  %6911 = vtanh.f32 %v9839_v51  ;;  %5571 = vrot.lane.b32.xlu0 %v6908_v61, %s6976_s9 }
 0x733   : > { %6913 = vtanh.f32 %v9841_v35  ;;  %5563 = vrot.lane.b32.xlu2 %v6910_v28, %s6976_s9 }
 0x734   : > { %v5400_v39 = vpop.permute.xlu2 %5399 }
 0x735   : > { %v9850_v5 = vadd.f32 %v5400_v39, %v5156_v52  ;;  %v10222_v52 = vld [vmem:[#allocation11_spill] sm:$0xff] }
 0x736   : > { %v5151_v39 = vmul.f32 %v10222_v52, %v9487_v41  ;;  %v10225_v52 = vld [vmem:[#allocation3_spill] sm:$0xff] }
 0x737   : > { %10217 = vst [vmem:[#allocation16_spill] sm:$0xff] %v9850_v5  ;;  %6915 = vtanh.f32 %v9850_v5  ;;  %v5384_v24 = vpop.permute.xlu0 %5383 }
 0x738   : > { %v6912_v25 = vpop.eup %6911  ;;  %v5392_v29 = vpop.permute.xlu1 %5391  ;;  %v9857_v61 = vadd.f32 %v5384_v24, %v5148_v59  ;;  %v5155_v59 = vmul.f32 %v10223_v53, %v9543_v20  ;;  %v5158_v53 = vmul.f32 %v10225_v52, %v9587_v46  ;;  %v10227_v52 = vld [vmem:[#allocation15_spill] sm:$0xff] }
 0x739   : > { %v6914_v28 = vpop.eup %6913  ;;  %v9859_v16 = vadd.f32 %v5392_v29, %v5152_v63 }
 0x73a   : > { %10220 = vst [vmem:[#allocation10_spill] sm:$0xff] %v9857_v61  ;;  %6917 = vtanh.f32 %v9857_v61  ;;  %5577 = vrot.lane.b32.xlu0 %v6914_v28, %s6976_s9 }
 0x73b   : > { %10221 = vst [vmem:[#allocation12_spill] sm:$0xff] %v9859_v16  ;;  %6919 = vtanh.f32 %v9859_v16  ;;  %5569 = vrot.lane.b32.xlu2 %v6912_v25, %s6976_s9  ;;  %v10224_v25 = vld [vmem:[#allocation13_spill] sm:$0xff] }
 0x73d   : > { %v6916_v6 = vpop.eup %6915 }
 0x73e   : > { %5591 = vrot.lane.b32.xlu1 %v6916_v6, %s6976_s9  ;;  %v5154_v6 = vmul.f32 %v10224_v25, %v9531_v31 }
 0x73f   : > { %v5390_v55 = vpop.permute.xlu0 %5389 }
 0x740   : > { %v6918_v63 = vpop.eup %6917  ;;  %v5398_v24 = vpop.permute.xlu1 %5397  ;;  %v9870_v29 = vadd.f32 %v5390_v55, %v5151_v39 }
 0x741   : > { %v6920_v5 = vpop.eup %6919  ;;  %v9872_v28 = vadd.f32 %v5398_v24, %v5155_v59 }
 0x742   : > { %6921 = vtanh.f32 %v9870_v29  ;;  %5583 = vrot.lane.b32.xlu0 %v6920_v5, %s6976_s9  ;;  %v5159_v5 = vmul.f32 %v9626_v33, %v9602_v40  ;;  %v5161_v33 = vmul.f32 %v9630_v23, %v9646_v10 }
 0x743   : > { %6923 = vtanh.f32 %v9872_v28  ;;  %5575 = vrot.lane.b32.xlu2 %v6918_v63, %s6976_s9 }
 0x747   : > { %v5396_v16 = vpop.permute.xlu0 %5395 }
 0x748   : > { %v6922_v39 = vpop.eup %6921  ;;  %v5404_v55 = vpop.permute.xlu1 %5403  ;;  %v9882_v61 = vadd.f32 %v5396_v16, %v5154_v6 }
 0x749   : > { %v6924_v59 = vpop.eup %6923  ;;  %v9884_v24 = vadd.f32 %v5404_v55, %v5158_v53  ;;  %v5157_v53 = vmul.f32 %v10227_v52, %v9571_v26 }
 0x74a   : > { %6925 = vtanh.f32 %v9882_v61  ;;  %5589 = vrot.lane.b32.xlu0 %v6924_v59, %s6976_s9 }
 0x74b   : > { %6927 = vtanh.f32 %v9884_v24  ;;  %5581 = vrot.lane.b32.xlu2 %v6922_v39, %s6976_s9 }
 0x74c   : > { %v5406_v63 = vpop.permute.xlu2 %5405 }
 0x74d   : > { %v9892_v25 = vadd.f32 %v5406_v63, %v5159_v5 }
 0x74f   : > { %10226 = vst [vmem:[#allocation11_spill] sm:$0xff] %v9892_v25  ;;  %6929 = vtanh.f32 %v9892_v25 }
 0x750   : > { %v6926_v16 = vpop.eup %6925 }
 0x751   : > { %v6928_v6 = vpop.eup %6927 }
 0x752   : > { %5595 = vrot.lane.b32.xlu0 %v6928_v6, %s6976_s9  ;;  %v5162_v6 = vmul.f32 %v9653_v32, %v9667_v48 }
 0x753   : > { %5587 = vrot.lane.b32.xlu2 %v6926_v16, %s6976_s9  ;;  %v5164_v16 = vmul.f32 %v9658_v57, %v9664_v12  ;;  %v10232_v57 = vld [vmem:[#allocation6_spill] sm:$0xff] }
 0x754   : > { %v5402_v55 = vpop.permute.xlu0 %5401 }
 0x755   : > { %v6930_v59 = vpop.eup %6929  ;;  %v9899_v39 = vadd.f32 %v5402_v55, %v5157_v53 }
 0x756   : > { %5597 = vrot.lane.b32.xlu1 %v6930_v59, %s6976_s9 }
 0x757   : > { %10228 = vst [vmem:[#allocation14_spill] sm:$0xff] %v9899_v39  ;;  %6931 = vtanh.f32 %v9899_v39 }
 0x75c   : > { %v5410_v5 = vpop.permute.xlu1 %5409 }
 0x75d   : > { %v6932_v63 = vpop.eup %6931  ;;  %v9905_v25 = vadd.f32 %v5410_v5, %v5161_v33  ;;  %v5165_v33 = vmul.f32 %v9680_v47, %v9685_v36  ;;  %v5167_v5 = vmul.f32 %v10232_v57, %v9688_v30  ;;  %v10235_v47 = vld [vmem:[#allocation9_spill] sm:$0xff] }
 0x75e   : > { %5593 = vrot.lane.b32.xlu2 %v6932_v63, %s6976_s9 }
 0x75f   : > { %10229 = vst [vmem:[#allocation13_spill] sm:$0xff] %v9905_v25  ;;  %6933 = vtanh.f32 %v9905_v25  ;;  %v10233_v25 = vld [vmem:[#allocation5_spill] sm:$0xff] }
 0x764   : > { %v5416_v52 = vpop.permute.xlu1 %5415  ;;  %v5412_v53 = vpop.permute.xlu2 %5411 }
 0x765   : > { %v6934_v55 = vpop.eup %6933  ;;  %v9913_v59 = vadd.f32 %v5416_v52, %v5164_v16  ;;  %v9915_v23 = vadd.f32 %v5412_v53, %v5162_v6  ;;  %v5160_v16 = vmul.f32 %v10233_v25, %v9623_v7  ;;  %v5168_v25 = vmul.f32 %v10235_v47, %v9700_v43 }
 0x766   : > { %5601 = vrot.lane.b32.xlu0 %v6934_v55, %s6976_s9 }
 0x767   : > { %10230 = vst [vmem:[#allocation3_spill] sm:$0xff] %v9913_v59  ;;  %6935 = vtanh.f32 %v9913_v59 }
 0x768   : > { %10231 = vst [vmem:[#allocation15_spill] sm:$0xff] %v9915_v23  ;;  %6937 = vtanh.f32 %v9915_v23 }
 0x76c   : > { %v5422_v32 = vpop.permute.xlu1 %5421  ;;  %v5418_v63 = vpop.permute.xlu2 %5417 }
 0x76d   : > { %v6936_v52 = vpop.eup %6935  ;;  %v9926_v6 = vadd.f32 %v5422_v32, %v5167_v5  ;;  %v9928_v53 = vadd.f32 %v5418_v63, %v5165_v33  ;;  %v5408_v55 = vpop.permute.xlu0 %5407  ;;  %v10236_v33 = vld [vmem:[#allocation8_spill] sm:$0xff] }
 0x76e   : > { %v6938_v59 = vpop.eup %6937  ;;  %v9930_v39 = vadd.f32 %v5408_v55, %v5160_v16  ;;  %5607 = vrot.lane.b32.xlu0 %v6936_v52, %s6976_s9  ;;  %v5163_v57 = vmul.f32 %v10236_v33, %v9643_v18  ;;  %v10237_v33 = vld [vmem:[#allocation4_spill] sm:$0xff] }
 0x76f   : > { %10234 = vst [vmem:[#allocation6_spill] sm:$0xff] %v9928_v53  ;;  %6939 = vtanh.f32 %v9926_v6  ;;  %5603 = vrot.lane.b32.xlu1 %v6938_v59, %s6976_s9 }
 0x770   : > { %6941 = vtanh.f32 %v9928_v53 }
 0x771   : > { %6943 = vtanh.f32 %v9930_v39 }
 0x774   : > { %v5424_v5 = vpop.permute.xlu2 %5423 }
 0x775   : > { %v6940_v32 = vpop.eup %6939  ;;  %v9941_v63 = vadd.f32 %v5424_v5, %v5168_v25  ;;  %v5414_v16 = vpop.permute.xlu0 %5413  ;;  %v5166_v25 = vmul.f32 %v10237_v33, %v9670_v60 }
 0x776   : > { %v6942_v52 = vpop.eup %6941  ;;  %v9943_v55 = vadd.f32 %v5414_v16, %v5163_v57  ;;  %5613 = vrot.lane.b32.xlu0 %v6940_v32, %s6976_s9 }
 0x777   : > { %v6944_v59 = vpop.eup %6943  ;;  %6945 = vtanh.f32 %v9941_v63  ;;  %5609 = vrot.lane.b32.xlu1 %v6942_v52, %s6976_s9 }
 0x778   : > { %6947 = vtanh.f32 %v9943_v55  ;;  %5599 = vrot.lane.b32.xlu2 %v6944_v59, %s6976_s9 }
 0x77b   : > { %v5556_v47 = vpop.permute.xlu1 %5555 }
 0x77c   : > { %v5650_v5 = vmul.f32 %v5556_v47, %v9368_v54 }
 0x77d   : > { %v6946_v53 = vpop.eup %6945  ;;  %v5420_v57 = vpop.permute.xlu0 %5419 }
 0x77e   : > { %v6948_v16 = vpop.eup %6947  ;;  %v9953_v23 = vadd.f32 %v5420_v57, %v5166_v25  ;;  %5715 = vrot.lane.b32.xlu0 %v5650_v5, %s6977_s10 }
 0x77f   : > { %5615 = vrot.lane.b32.xlu1 %v6946_v53, %s6976_s9 }
 0x780   : > { %6949 = vtanh.f32 %v9953_v23  ;;  %5605 = vrot.lane.b32.xlu2 %v6948_v16, %s6976_s9 }
 0x783   : > { %v5562_v32 = vpop.permute.xlu1 %5561 }
 0x784   : > { %v5653_v52 = vmul.f32 %v5562_v32, %v9395_v45 }
 0x785   : > { %v5558_v59 = vpop.permute.xlu2 %5557 }
 0x786   : > { %v6950_v33 = vpop.eup %6949  ;;  %v5651_v54 = vmul.f32 %v5558_v59, %v9377_v27  ;;  %5721 = vrot.lane.b32.xlu0 %v5653_v52, %s6977_s10 }
 0x788   : > { %5717 = vrot.lane.b32.xlu1 %v5651_v54, %s6977_s10  ;;  %5611 = vrot.lane.b32.xlu2 %v6950_v33, %s6976_s9 }
 0x78b   : > { %v5568_v47 = vpop.permute.xlu1 %5567 }
 0x78c   : > { %v5656_v53 = vmul.f32 %v5568_v47, %v9421_v56  ;;  %v5554_v25 = vpop.permute.xlu0 %5553 }
 0x78d   : > { %v5564_v5 = vpop.permute.xlu2 %5563  ;;  %v5649_v57 = vmul.f32 %v5554_v25, %v9360_v2 }
 0x78e   : > { %v5654_v16 = vmul.f32 %v5564_v5, %v9404_v4  ;;  %5727 = vrot.lane.b32.xlu0 %v5656_v53, %s6977_s10 }
 0x790   : > { %5723 = vrot.lane.b32.xlu1 %v5654_v16, %s6977_s10  ;;  %5713 = vrot.lane.b32.xlu2 %v5649_v57, %s6977_s10 }
 0x793   : > { %v5574_v27 = vpop.permute.xlu1 %5573 }
 0x794   : > { %v5659_v45 = vmul.f32 %v5574_v27, %v9445_v11  ;;  %v5560_v32 = vpop.permute.xlu0 %5559 }
 0x795   : > { %v5570_v52 = vpop.permute.xlu2 %5569  ;;  %v5652_v59 = vmul.f32 %v5560_v32, %v9385_v34 }
 0x796   : > { %v5657_v56 = vmul.f32 %v5570_v52, %v9429_v38  ;;  %5733 = vrot.lane.b32.xlu0 %v5659_v45, %s6977_s10 }
 0x798   : > { %5729 = vrot.lane.b32.xlu1 %v5657_v56, %s6977_s10  ;;  %5719 = vrot.lane.b32.xlu2 %v5652_v59, %s6977_s10 }
 0x79b   : > { %v5580_v2 = vpop.permute.xlu1 %5579 }
 0x79c   : > { %v5662_v4 = vmul.f32 %v5580_v2, %v9475_v8  ;;  %v5566_v33 = vpop.permute.xlu0 %5565 }
 0x79d   : > { %v5576_v54 = vpop.permute.xlu2 %5575  ;;  %v5655_v47 = vmul.f32 %v5566_v33, %v9413_v3 }
 0x79e   : > { %v5660_v11 = vmul.f32 %v5576_v54, %v9455_v37  ;;  %5739 = vrot.lane.b32.xlu0 %v5662_v4, %s6977_s10 }
 0x7a0   : > { %5735 = vrot.lane.b32.xlu1 %v5660_v11, %s6977_s10  ;;  %5725 = vrot.lane.b32.xlu2 %v5655_v47, %s6977_s10 }
 0x7a3   : > { %v5586_v34 = vpop.permute.xlu1 %5585 }
 0x7a4   : > { %v5665_v38 = vmul.f32 %v5586_v34, %v9519_v22  ;;  %v5572_v53 = vpop.permute.xlu0 %5571 }
 0x7a5   : > { %v5582_v25 = vpop.permute.xlu2 %5581  ;;  %v5658_v5 = vmul.f32 %v5572_v53, %v9437_v13 }
 0x7a6   : > { %v5663_v8 = vmul.f32 %v5582_v25, %v9487_v41  ;;  %5745 = vrot.lane.b32.xlu0 %v5665_v38, %s6977_s10 }
 0x7a8   : > { %5741 = vrot.lane.b32.xlu1 %v5663_v8, %s6977_s10  ;;  %5731 = vrot.lane.b32.xlu2 %v5658_v5, %s6977_s10 }
 0x7ac   : > { %v5578_v3 = vpop.permute.xlu0 %5577 }
 0x7ad   : > { %v5588_v37 = vpop.permute.xlu2 %5587  ;;  %v5661_v57 = vmul.f32 %v5578_v3, %v9465_v21 }
 0x7ae   : > { %v5666_v16 = vmul.f32 %v5588_v37, %v9531_v31 }
 0x7b0   : > { %5747 = vrot.lane.b32.xlu1 %v5666_v16, %s6977_s10  ;;  %5737 = vrot.lane.b32.xlu2 %v5661_v57, %s6977_s10  ;;  %v5592_v22 = vpop.permute.xlu1 %5591 }
 0x7b1   : > { %v5668_v13 = vmul.f32 %v5592_v22, %v9557_v50 }
 0x7b3   : > { %5751 = vrot.lane.b32.xlu0 %v5668_v13, %s6977_s10 }
 0x7b4   : > { %v5584_v41 = vpop.permute.xlu0 %5583 }
 0x7b5   : > { %v5664_v27 = vmul.f32 %v5584_v41, %v9503_v9 }
 0x7b8   : > { %5743 = vrot.lane.b32.xlu2 %v5664_v27, %s6977_s10  ;;  %v5594_v45 = vpop.permute.xlu2 %5593 }
 0x7b9   : > { %v5669_v32 = vmul.f32 %v5594_v45, %v9571_v26 }
 0x7bb   : > { %5753 = vrot.lane.b32.xlu1 %v5669_v32, %s6977_s10 }
 0x7bc   : > { %v5590_v21 = vpop.permute.xlu0 %5589 }
 0x7bd   : > { %v5667_v31 = vmul.f32 %v5590_v21, %v9543_v20  ;;  %v10238_v21 = vld [vmem:[#allocation10_spill] sm:$0xff] }
 0x7c0   : > { %5749 = vrot.lane.b32.xlu2 %v5667_v31, %s6977_s10  ;;  %v10239_v31 = vld [vmem:[#allocation12_spill] sm:$0xff] }
 0x7c4   : > { %v5596_v52 = vpop.permute.xlu0 %5595 }
 0x7c5   : > { %v5670_v50 = vmul.f32 %v5596_v52, %v9587_v46 }
 0x7c8   : > { %5755 = vrot.lane.b32.xlu2 %v5670_v50, %s6977_s10  ;;  %v5598_v59 = vpop.permute.xlu1 %5597  ;;  %v10240_v50 = vld [vmem:[#allocation7_spill] sm:$0xff] }
 0x7c9   : > { %v5671_v9 = vmul.f32 %v5598_v59, %v9602_v40 }
 0x7cb   : > { %5757 = vrot.lane.b32.xlu0 %v5671_v9, %s6977_s10 }
 0x7d2   : > { %v5600_v56 = vpop.permute.xlu2 %5599 }
 0x7d3   : > { %v5672_v26 = vmul.f32 %v5600_v56, %v9623_v7 }
 0x7d5   : > { %5759 = vrot.lane.b32.xlu1 %v5672_v26, %s6977_s10 }
 0x7d8   : > { %v5602_v2 = vpop.permute.xlu0 %5601 }
 0x7d9   : > { %v5673_v20 = vmul.f32 %v5602_v2, %v9646_v10 }
 0x7da   : > { %v5606_v4 = vpop.permute.xlu2 %5605 }
 0x7db   : > { %v5675_v33 = vmul.f32 %v5606_v4, %v9643_v18  ;;  %5761 = vrot.lane.b32.xlu2 %v5673_v20, %s6977_s10 }
 0x7dd   : > { %5765 = vrot.lane.b32.xlu1 %v5675_v33, %s6977_s10 }
 0x7e0   : > { %v5608_v46 = vpop.permute.xlu0 %5607 }
 0x7e1   : > { %v5604_v40 = vpop.permute.xlu1 %5603  ;;  %v5676_v54 = vmul.f32 %v5608_v46, %v9664_v12 }
 0x7e2   : > { %v5674_v47 = vmul.f32 %v5604_v40, %v9667_v48  ;;  %v5612_v7 = vpop.permute.xlu2 %5611 }
 0x7e3   : > { %v5678_v11 = vmul.f32 %v5612_v7, %v9670_v60  ;;  %5767 = vrot.lane.b32.xlu2 %v5676_v54, %s6977_s10  ;;  %v10242_v54 = vld [vmem:[#allocation14_spill] sm:$0xff] }
 0x7e4   : > { %5763 = vrot.lane.b32.xlu0 %v5674_v47, %s6977_s10  ;;  %v10243_v47 = vld [vmem:[#allocation13_spill] sm:$0xff] }
 0x7e5   : > { %5771 = vrot.lane.b32.xlu1 %v5678_v11, %s6977_s10 }
 0x7e8   : > { %v5614_v18 = vpop.permute.xlu0 %5613 }
 0x7e9   : > { %v5610_v10 = vpop.permute.xlu1 %5609  ;;  %v5679_v12 = vmul.f32 %v5614_v18, %v9688_v30 }
 0x7ea   : > { %v5677_v48 = vmul.f32 %v5610_v10, %v9685_v36  ;;  %v5714_v60 = vpop.permute.xlu2 %5713  ;;  %v10244_v10 = vld [vmem:[#allocation3_spill] sm:$0xff] }
 0x7eb   : > { %v5810_v34 = vsel %vm5809_vm15, %v5714_v60, %v9780_v14  ;;  %5773 = vrot.lane.b32.xlu2 %v5679_v12, %s6977_s10 }
 0x7ec   : > { %5843 = vst.msk [vmem:[%s10021_s15] sm:$0xff] %vm5842_vm0, %v5810_v34  ;;  %5769 = vrot.lane.b32.xlu0 %v5677_v48, %s6977_s10  ;;  %v10245_v48 = vld [vmem:[#allocation11_spill] sm:$0xff] }
 0x7f0   : > { %v5716_v38 = vpop.permute.xlu0 %5715 }
 0x7f1   : > { %v5616_v53 = vpop.permute.xlu1 %5615  ;;  %v5811_v30 = vsel %vm5809_vm15, %v5716_v38, %v9759_v49 }
 0x7f2   : > { %v5680_v36 = vmul.f32 %v5616_v53, %v9700_v43  ;;  %v5720_v25 = vpop.permute.xlu2 %5719  ;;  %5844 = vst.msk [vmem:[%s10021_s15 + $0x8] sm:$0xff] %vm5842_vm0, %v5811_v30 }
 0x7f3   : > { %v5813_v14 = vsel %vm5809_vm15, %v5720_v25, %v9793_v0 }
 0x7f4   : > { %5846 = vst.msk [vmem:[%s10021_s15 + $0x18] sm:$0xff] %vm5842_vm0, %v5813_v14  ;;  %5775 = vrot.lane.b32.xlu0 %v5680_v36, %s6977_s10 }
 0x7f8   : > { %v5722_v5 = vpop.permute.xlu0 %5721 }
 0x7f9   : > { %v5814_v8 = vsel %vm5809_vm15, %v5722_v5, %v9765_v19 }
 0x7fa   : > { %v5718_v49 = vpop.permute.xlu1 %5717  ;;  %v5726_v3 = vpop.permute.xlu2 %5725  ;;  %5847 = vst.msk [vmem:[%s10021_s15 + $0x20] sm:$0xff] %vm5842_vm0, %v5814_v8  ;;  %v10246_v8 = vld [vmem:[#allocation15_spill] sm:$0xff] }
 0x7fb   : > { %v5812_v43 = vsel %vm5809_vm15, %v5718_v49, %v9808_v44  ;;  %v5816_v0 = vsel %vm5809_vm15, %v5726_v3, %v9810_v58  ;;  %v10247_v3 = vld [vmem:[#allocation6_spill] sm:$0xff] }
 0x7fc   : > { %5845 = vst.msk [vmem:[%s10021_s15 + $0x10] sm:$0xff] %vm5842_vm0, %v5812_v43 }
 0x7fd   : > { %5849 = vst.msk [vmem:[%s10021_s15 + $0x30] sm:$0xff] %vm5842_vm0, %v5816_v0 }
 0x800   : > { %v5728_v37 = vpop.permute.xlu0 %5727 }
 0x801   : > { %v5817_v19 = vsel %vm5809_vm15, %v5728_v37, %v9777_v42 }
 0x802   : > { %v5724_v57 = vpop.permute.xlu1 %5723  ;;  %v5732_v16 = vpop.permute.xlu2 %5731  ;;  %5850 = vst.msk [vmem:[%s10021_s15 + $0x38] sm:$0xff] %vm5842_vm0, %v5817_v19 }
 0x803   : > { %v5815_v44 = vsel %vm5809_vm15, %v5724_v57, %v9825_v62  ;;  %v5819_v58 = vsel %vm5809_vm15, %v5732_v16, %v9827_v15 }
 0x804   : > { %5848 = vst.msk [vmem:[%s10021_s15 + $0x28] sm:$0xff] %vm5842_vm0, %v5815_v44 }
 0x805   : > { %5852 = vst.msk [vmem:[%s10021_s15 + $0x48] sm:$0xff] %vm5842_vm0, %v5819_v58 }
 0x808   : > { %v5734_v22 = vpop.permute.xlu0 %5733 }
 0x809   : > { %v5820_v42 = vsel %vm5809_vm15, %v5734_v22, %v9790_v1 }
 0x80a   : > { %v5730_v13 = vpop.permute.xlu1 %5729  ;;  %v5738_v41 = vpop.permute.xlu2 %5737  ;;  %5853 = vst.msk [vmem:[%s10021_s15 + $0x50] sm:$0xff] %vm5842_vm0, %v5820_v42 }
 0x80b   : > { %v5818_v62 = vsel %vm5809_vm15, %v5730_v13, %v9839_v51  ;;  %v5822_v15 = vsel %vm5809_vm15, %v5738_v41, %v9841_v35 }
 0x80c   : > { %5851 = vst.msk [vmem:[%s10021_s15 + $0x40] sm:$0xff] %vm5842_vm0, %v5818_v62 }
 0x80d   : > { %5855 = vst.msk [vmem:[%s10021_s15 + $0x60] sm:$0xff] %vm5842_vm0, %v5822_v15 }
 0x810   : > { %v5740_v27 = vpop.permute.xlu0 %5739 }
 0x811   : > { %v5823_v1 = vsel %vm5809_vm15, %v5740_v27, %v9806_v17 }
 0x812   : > { %v5736_v45 = vpop.permute.xlu1 %5735  ;;  %v5744_v32 = vpop.permute.xlu2 %5743  ;;  %5856 = vst.msk [vmem:[%s10021_s15 + $0x68] sm:$0xff] %vm5842_vm0, %v5823_v1 }
 0x813   : > { %v5821_v51 = vsel %vm5809_vm15, %v5736_v45, %v10238_v21  ;;  %v5825_v35 = vsel %vm5809_vm15, %v5744_v32, %v10239_v31 }
 0x814   : > { %5854 = vst.msk [vmem:[%s10021_s15 + $0x58] sm:$0xff] %vm5842_vm0, %v5821_v51 }
 0x815   : > { %5858 = vst.msk [vmem:[%s10021_s15 + $0x78] sm:$0xff] %vm5842_vm0, %v5825_v35 }
 0x818   : > { %v5746_v52 = vpop.permute.xlu0 %5745 }
 0x819   : > { %v5826_v17 = vsel %vm5809_vm15, %v5746_v52, %v10240_v50 }
 0x81a   : > { %v5742_v59 = vpop.permute.xlu1 %5741  ;;  %v5750_v9 = vpop.permute.xlu2 %5749  ;;  %5859 = vst.msk [vmem:[%s10021_s15 + $0x80] sm:$0xff] %vm5842_vm0, %v5826_v17 }
 0x81b   : > { %v5824_v56 = vsel %vm5809_vm15, %v5742_v59, %v9870_v29  ;;  %v5828_v26 = vsel %vm5809_vm15, %v5750_v9, %v9872_v28  ;;  %v10241_v28 = vld [vmem:[#allocation16_spill] sm:$0xff] }
 0x81c   : > { %5857 = vst.msk [vmem:[%s10021_s15 + $0x70] sm:$0xff] %vm5842_vm0, %v5824_v56 }
 0x81d   : > { %5861 = vst.msk [vmem:[%s10021_s15 + $0x90] sm:$0xff] %vm5842_vm0, %v5828_v26 }
 0x822   : > { %v5748_v2 = vpop.permute.xlu1 %5747  ;;  %v5756_v20 = vpop.permute.xlu2 %5755 }
 0x823   : > { %v5827_v4 = vsel %vm5809_vm15, %v5748_v2, %v9882_v61  ;;  %v5831_v33 = vsel %vm5809_vm15, %v5756_v20, %v9884_v24 }
 0x824   : > { %5860 = vst.msk [vmem:[%s10021_s15 + $0x88] sm:$0xff] %vm5842_vm0, %v5827_v4 }
 0x825   : > { %5864 = vst.msk [vmem:[%s10021_s15 + $0xa8] sm:$0xff] %vm5842_vm0, %v5831_v33  ;;  %v5752_v29 = vpop.permute.xlu0 %5751 }
 0x826   : > { %v5829_v46 = vsel %vm5809_vm15, %v5752_v29, %v10241_v28 }
 0x827   : > { %5862 = vst.msk [vmem:[%s10021_s15 + $0x98] sm:$0xff] %vm5842_vm0, %v5829_v46 }
 0x82d   : > { %v5754_v40 = vpop.permute.xlu1 %5753 }
 0x82e   : > { %v5830_v61 = vsel %vm5809_vm15, %v5754_v40, %v10242_v54 }
 0x82f   : > { %5863 = vst.msk [vmem:[%s10021_s15 + $0xa0] sm:$0xff] %vm5842_vm0, %v5830_v61 }
 0x835   : > { %v5762_v24 = vpop.permute.xlu2 %5761 }
 0x836   : > { %v5834_v7 = vsel %vm5809_vm15, %v5762_v24, %v10243_v47 }
 0x837   : > { %5867 = vst.msk [vmem:[%s10021_s15 + $0xc0] sm:$0xff] %vm5842_vm0, %v5834_v7 }
 0x83d   : > { %v5768_v11 = vpop.permute.xlu2 %5767  ;;  %v5758_v18 = vpop.permute.xlu0 %5757 }
 0x83e   : > { %v5837_v12 = vsel %vm5809_vm15, %v5768_v11, %v10244_v10  ;;  %v5832_v60 = vsel %vm5809_vm15, %v5758_v18, %v10245_v48 }
 0x83f   : > { %5870 = vst.msk [vmem:[%s10021_s15 + $0xd8] sm:$0xff] %vm5842_vm0, %v5837_v12 }
 0x840   : > { %5865 = vst.msk [vmem:[%s10021_s15 + $0xb0] sm:$0xff] %vm5842_vm0, %v5832_v60 }
 0x845   : > { %v5774_v34 = vpop.permute.xlu2 %5773 }
 0x846   : > { %v5840_v38 = vsel %vm5809_vm15, %v5774_v34, %v9926_v6 }
 0x847   : > { %v5760_v53 = vpop.permute.xlu1 %5759  ;;  %5873 = vst.msk [vmem:[%s10021_s15 + $0xf0] sm:$0xff] %vm5842_vm0, %v5840_v38 }
 0x848   : > { %v5833_v30 = vsel %vm5809_vm15, %v5760_v53, %v9930_v39 }
 0x849   : > { %5866 = vst.msk [vmem:[%s10021_s15 + $0xb8] sm:$0xff] %vm5842_vm0, %v5833_v30 }
 0x84f   : > { %v5766_v36 = vpop.permute.xlu1 %5765 }
 0x850   : > { %v5836_v25 = vsel %vm5809_vm15, %v5766_v36, %v9943_v55 }
 0x851   : > { %5869 = vst.msk [vmem:[%s10021_s15 + $0xd0] sm:$0xff] %vm5842_vm0, %v5836_v25 }
 0x856   : > { %v5764_v14 = vpop.permute.xlu0 %5763 }
 0x857   : > { %v5772_v5 = vpop.permute.xlu1 %5771  ;;  %v5835_v6 = vsel %vm5809_vm15, %v5764_v14, %v10246_v8 }
 0x858   : > { %v5839_v49 = vsel %vm5809_vm15, %v5772_v5, %v9953_v23  ;;  %5868 = vst.msk [vmem:[%s10021_s15 + $0xc8] sm:$0xff] %vm5842_vm0, %v5835_v6 }
 0x859   : > { %5872 = vst.msk [vmem:[%s10021_s15 + $0xe8] sm:$0xff] %vm5842_vm0, %v5839_v49 }
 0x85e   : > { %v5770_v39 = vpop.permute.xlu0 %5769 }
 0x85f   : > { %v5838_v43 = vsel %vm5809_vm15, %v5770_v39, %v10247_v3 }
 0x860   : > { %5871 = vst.msk [vmem:[%s10021_s15 + $0xe0] sm:$0xff] %vm5842_vm0, %v5838_v43 }
 0x866   : > { %v5776_v55 = vpop.permute.xlu0 %5775 }
 0x867   : > { %v5841_v0 = vsel %vm5809_vm15, %v5776_v55, %v9941_v63 }
 0x868   : > { %5874 = vst.msk [vmem:[%s10021_s15 + $0xf8] sm:$0xff] %vm5842_vm0, %v5841_v0 }
 0x869 PF: > { %s17_s26 = sadd.s32 1, %s6974_s26   ;;  %s10248_s24 = smov %s6970_s25 }
 0x86a   : > { %p14_p5 = scmp.ge.s32.totalorder %s17_s26, 4   ;;  %s10249_s25 = smov %s10251_s27 }
 0x86c   :  { %16 = sbr.rel (!%p14_p5) target bundleno = 2 (0x2), region = 88 }

</bundles_post_ra>
